<compile_context>
chip_gen: v7x
topology: tpu7x:2x2x1
jax: 0.10.0
libtpu: 0.0.40
codegen_flags: <defaults>
</compile_context>

<pallas_src>
import math

import jax
import jax.numpy as jnp
from jax.experimental import pallas as pl
from jax.experimental.pallas import tpu as pltpu


_CHUNK = 128  # lane-chunk of packed rows processed per inner (unrolled) step


def _round_up(x, m):
    return ((x + m - 1) // m) * m


def _make_kernel(p_pack, d_pad, scale, n_chunks):
    scale = float(scale)

    def kernel(t_ref, f_ref, ph_ref, out_ref):
        # t_ref:   (p_pack, TILE_R)  raw timesteps; t_ref[p, r] = p-th timestep of row r
        # f_ref:   (d_pad, 128)      [inv_freq, inv_freq, 0-pad], lane-replicated
        # ph_ref:  (d_pad, 128)      [0..0, pi/2..pi/2, 0-pad],   lane-replicated
        # out_ref: (TILE_R, p_pack * d_pad)
        f = f_ref[...]                                     # hoisted: loaded once per tile
        ph = ph_ref[...]
        for c in range(n_chunks):                          # static unroll, n_chunks <= 32
            col = c * _CHUNK
            t = t_ref[:, col:col + _CHUNK]                 # (p_pack, CHUNK)
            u = t * scale + 1.0                            # affine in f32, same order as torch
            blocks = []
            for p in range(p_pack):
                up = u[p:p + 1, :]                         # (1, CHUNK): sublane-broadcast
                blocks.append(jnp.sin(up * f + ph))        # (d_pad, CHUNK), all 128 lanes busy
            slab = blocks[0] if p_pack == 1 else jnp.concatenate(blocks, axis=0)
            # XLU transpose -> lane-dense (CHUNK, row_width) store (unmasked vst).
            out_ref[col:col + _CHUNK, :] = jnp.transpose(slab).astype(out_ref.dtype)

    return kernel


def time_embedding(x, inv_freq, *, dim, scale, tile_rows=4096, out_dtype=jnp.float32):
    """Pallas equivalent of TimeEmbedding.forward. Returns (*x.shape, dim)."""
    assert dim % 2 == 0, "dim must be even (required by the torch module as well)"
    shape = x.shape
    half = dim // 2
    n = math.prod(shape) if shape else 1

    # Pack P timesteps per 128-lane output row when dim divides 128; otherwise
    # pad each per-timestep row up to the next multiple of 128 lanes so the
    # output store is always full-lane (junk lanes sliced off in the wrapper).
    if dim <= 128 and 128 % dim == 0:
        p_pack, d_pad = 128 // dim, dim
    else:
        p_pack, d_pad = 1, _round_up(dim, 128)
    row_width = p_pack * d_pad

    r = -(-n // p_pack)                                    # packed rows needed

    # Row tile: large enough to amortize the ~0.35 us per-grid-step overhead,
    # capped at ~2 MiB per output tile (4 MiB double-buffered -> safe on the
    # v5e 16 MiB / v6e 32 MiB / v7x 32 MiB scoped-VMEM defaults), and a
    # multiple of the 128-row inner chunk.
    out_itemsize = jnp.dtype(out_dtype).itemsize
    cap = max(_CHUNK, ((2 * 1024 * 1024) // (row_width * out_itemsize)) // _CHUNK * _CHUNK)
    tile = max(_CHUNK, (min(int(tile_rows), cap) // _CHUNK) * _CHUNK)
    if r <= tile:
        tile = _round_up(max(r, 1), _CHUNK)
    r_pad = _round_up(r, tile)
    n_pad = r_pad * p_pack

    x_flat = x.reshape(-1).astype(jnp.float32)
    if n_pad != n:
        x_flat = jnp.pad(x_flat, (0, n_pad - n))
    # t2[p, r] = x_flat[r * p_pack + p]: timesteps land on the lane axis in-kernel.
    t2 = x_flat.reshape(r_pad, p_pack).T

    # cos(x) = sin(x + pi/2). Tables are lane-replicated to (d_pad, 128) in the
    # wrapper (no per-step in-kernel lane broadcast); lanes beyond dim are zero.
    inv_f = jnp.asarray(inv_freq, jnp.float32).reshape(-1)
    freq = jnp.concatenate([inv_f, inv_f])
    phase = jnp.concatenate([jnp.zeros((half,), jnp.float32),
                             jnp.full((half,), jnp.pi / 2.0, jnp.float32)])
    if d_pad != dim:
        pad = jnp.zeros((d_pad - dim,), jnp.float32)
        freq = jnp.concatenate([freq, pad])
        phase = jnp.concatenate([phase, pad])
    f_tab = jnp.broadcast_to(freq[:, None], (d_pad, 128))
    ph_tab = jnp.broadcast_to(phase[:, None], (d_pad, 128))

    kernel = _make_kernel(p_pack, d_pad, scale, tile // _CHUNK)

    out = pl.pallas_call(
        kernel,
        out_shape=jax.ShapeDtypeStruct((r_pad, row_width), out_dtype),
        grid=(r_pad // tile,),
        in_specs=[
            pl.BlockSpec((p_pack, tile), lambda i: (0, i)),
            pl.BlockSpec((d_pad, 128), lambda i: (0, 0)),
            pl.BlockSpec((d_pad, 128), lambda i: (0, 0)),
        ],
        out_specs=pl.BlockSpec((tile, row_width), lambda i: (i, 0)),
        compiler_params=pltpu.CompilerParams(
            dimension_semantics=("parallel",)),
    )(t2, f_tab, ph_tab)

    # (r_pad, p_pack*d_pad) row-major is bit-identical to (n_pad, d_pad):
    # reshape is a view; slice off padded rows and padded lanes.
    out = out.reshape(n_pad, d_pad)[:n, :dim]
    return out.reshape(*shape, dim)


def _reference(x, inv_freq, *, dim, scale):
    shape = x.shape
    t = (x * scale + 1.0).reshape(-1).astype(jnp.float32)
    sinusoid = t[:, None] * inv_freq[None, :]
    pos_emb = jnp.concatenate([jnp.sin(sinusoid), jnp.cos(sinusoid)], axis=-1)
    return pos_emb.reshape(*shape, dim)


if __name__ == "__main__":
    dim = 32
    scale = 100.0

    # Deterministic buffer, exactly as in __init__:
    #   inv_freq = exp(arange(0, dim, 2) * (-log(10000) / dim))
    inv_freq = jnp.exp(
        jnp.arange(0, dim, 2, dtype=jnp.float32) * (-jnp.log(10000.0) / dim)
    )

    # Small deterministic timestep tensor, shape (2, 4, 16, 16) -> output (..., dim)
    key = jax.random.PRNGKey(0)
    x = jax.random.uniform(key, (2, 4, 16, 16), dtype=jnp.float32)

    out = time_embedding(x, inv_freq, dim=dim, scale=scale)
    out = jax.block_until_ready(out)

    ref = _reference(x, inv_freq, dim=dim, scale=scale)
    assert out.shape == (2, 4, 16, 16, dim), out.shape
    # Affine is computed in-kernel (same op order as torch); the only deviation
    # is cos(x) vs sin(x + pi/2), a few-ulp argument rounding at |x| ~ 1e2 rad.
    assert jnp.allclose(out, ref, atol=1e-4, rtol=1e-4), "mismatch vs reference"

    print("KERNEL_OK")
</pallas_src>

<mosaic_0001>
module attributes {stable_mosaic.version = 11 : i64} {
  func.func @kernel(%arg0: i32, %arg1: memref<4x512xf32, #tpu.memory_space<vmem>>, %arg2: memref<32x128xf32, #tpu.memory_space<vmem>>, %arg3: memref<32x128xf32, #tpu.memory_space<vmem>>, %arg4: memref<512x128xf32, #tpu.memory_space<vmem>>) attributes {dimension_semantics = [#tpu.dimension_semantics<parallel>], iteration_bounds = array<i64: 1>, scalar_prefetch = 0 : i64, scratch_operands = 0 : i64, tpu.core_type = #tpu.core_type<tc>, window_params = [{transform_indices = @transform_0, window_bounds = array<i64: 4, 512>}, {pipeline_mode = #tpu.pipeline_mode<synchronous>, transform_indices = @transform_1, window_bounds = array<i64: 32, 128>}, {pipeline_mode = #tpu.pipeline_mode<synchronous>, transform_indices = @transform_2, window_bounds = array<i64: 32, 128>}, {transform_indices = @transform_3, window_bounds = array<i64: 512, 128>}]} {
    %c0 = arith.constant 0 : index
    %c0_0 = arith.constant 0 : index
    %0 = vector.load %arg2[%c0, %c0_0] : memref<32x128xf32, #tpu.memory_space<vmem>>, vector<32x128xf32>
    %c0_1 = arith.constant 0 : index
    %c0_2 = arith.constant 0 : index
    %1 = vector.load %arg3[%c0_1, %c0_2] : memref<32x128xf32, #tpu.memory_space<vmem>>, vector<32x128xf32>
    %c0_3 = arith.constant 0 : index
    %c0_4 = arith.constant 0 : index
    %2 = vector.load %arg1[%c0_3, %c0_4] : memref<4x512xf32, #tpu.memory_space<vmem>>, vector<4x128xf32>
    %cst = arith.constant 1.000000e+02 : f32
    %3 = vector.broadcast %cst : f32 to vector<4x128xf32>
    %4 = arith.mulf %2, %3 : vector<4x128xf32>
    %cst_5 = arith.constant 1.000000e+00 : f32
    %5 = vector.broadcast %cst_5 : f32 to vector<4x128xf32>
    %6 = arith.addf %4, %5 : vector<4x128xf32>
    %7 = vector.extract_strided_slice %6 {offsets = [0, 0], sizes = [1, 128], strides = [1, 1]} : vector<4x128xf32> to vector<1x128xf32>
    %8 = vector.broadcast %7 : vector<1x128xf32> to vector<32x128xf32>
    %9 = arith.mulf %8, %0 : vector<32x128xf32>
    %10 = arith.addf %9, %1 : vector<32x128xf32>
    %11 = math.sin %10 : vector<32x128xf32>
    %12 = vector.extract_strided_slice %6 {offsets = [1, 0], sizes = [1, 128], strides = [1, 1]} : vector<4x128xf32> to vector<1x128xf32>
    %13 = vector.broadcast %12 : vector<1x128xf32> to vector<32x128xf32>
    %14 = arith.mulf %13, %0 : vector<32x128xf32>
    %15 = arith.addf %14, %1 : vector<32x128xf32>
    %16 = math.sin %15 : vector<32x128xf32>
    %17 = vector.extract_strided_slice %6 {offsets = [2, 0], sizes = [1, 128], strides = [1, 1]} : vector<4x128xf32> to vector<1x128xf32>
    %18 = vector.broadcast %17 : vector<1x128xf32> to vector<32x128xf32>
    %19 = arith.mulf %18, %0 : vector<32x128xf32>
    %20 = arith.addf %19, %1 : vector<32x128xf32>
    %21 = math.sin %20 : vector<32x128xf32>
    %22 = vector.extract_strided_slice %6 {offsets = [3, 0], sizes = [1, 128], strides = [1, 1]} : vector<4x128xf32> to vector<1x128xf32>
    %23 = vector.broadcast %22 : vector<1x128xf32> to vector<32x128xf32>
    %24 = arith.mulf %23, %0 : vector<32x128xf32>
    %25 = arith.addf %24, %1 : vector<32x128xf32>
    %26 = math.sin %25 : vector<32x128xf32>
    %27 = tpu.concatenate %11, %16, %21, %26 in 0 : vector<32x128xf32>, vector<32x128xf32>, vector<32x128xf32>, vector<32x128xf32> -> vector<128x128xf32>
    %28 = tpu.transpose %27, [1, 0] : vector<128x128xf32> -> vector<128x128xf32>
    %c0_6 = arith.constant 0 : index
    %c0_7 = arith.constant 0 : index
    %29 = vector.load %arg4[%c0_6, %c0_7] : memref<512x128xf32, #tpu.memory_space<vmem>>, vector<128x128xf32>
    tpu.vector_store %arg4[%c0_6, %c0_7], %28 {strides = array<i32>} : memref<512x128xf32, #tpu.memory_space<vmem>>, vector<128x128xf32>,
    %c0_8 = arith.constant 0 : index
    %c128 = arith.constant 128 : index
    %30 = vector.load %arg1[%c0_8, %c128] : memref<4x512xf32, #tpu.memory_space<vmem>>, vector<4x128xf32>
    %cst_9 = arith.constant 1.000000e+02 : f32
    %31 = vector.broadcast %cst_9 : f32 to vector<4x128xf32>
    %32 = arith.mulf %30, %31 : vector<4x128xf32>
    %cst_10 = arith.constant 1.000000e+00 : f32
    %33 = vector.broadcast %cst_10 : f32 to vector<4x128xf32>
    %34 = arith.addf %32, %33 : vector<4x128xf32>
    %35 = vector.extract_strided_slice %34 {offsets = [0, 0], sizes = [1, 128], strides = [1, 1]} : vector<4x128xf32> to vector<1x128xf32>
    %36 = vector.broadcast %35 : vector<1x128xf32> to vector<32x128xf32>
    %37 = arith.mulf %36, %0 : vector<32x128xf32>
    %38 = arith.addf %37, %1 : vector<32x128xf32>
    %39 = math.sin %38 : vector<32x128xf32>
    %40 = vector.extract_strided_slice %34 {offsets = [1, 0], sizes = [1, 128], strides = [1, 1]} : vector<4x128xf32> to vector<1x128xf32>
    %41 = vector.broadcast %40 : vector<1x128xf32> to vector<32x128xf32>
    %42 = arith.mulf %41, %0 : vector<32x128xf32>
    %43 = arith.addf %42, %1 : vector<32x128xf32>
    %44 = math.sin %43 : vector<32x128xf32>
    %45 = vector.extract_strided_slice %34 {offsets = [2, 0], sizes = [1, 128], strides = [1, 1]} : vector<4x128xf32> to vector<1x128xf32>
    %46 = vector.broadcast %45 : vector<1x128xf32> to vector<32x128xf32>
    %47 = arith.mulf %46, %0 : vector<32x128xf32>
    %48 = arith.addf %47, %1 : vector<32x128xf32>
    %49 = math.sin %48 : vector<32x128xf32>
    %50 = vector.extract_strided_slice %34 {offsets = [3, 0], sizes = [1, 128], strides = [1, 1]} : vector<4x128xf32> to vector<1x128xf32>
    %51 = vector.broadcast %50 : vector<1x128xf32> to vector<32x128xf32>
    %52 = arith.mulf %51, %0 : vector<32x128xf32>
    %53 = arith.addf %52, %1 : vector<32x128xf32>
    %54 = math.sin %53 : vector<32x128xf32>
    %55 = tpu.concatenate %39, %44, %49, %54 in 0 : vector<32x128xf32>, vector<32x128xf32>, vector<32x128xf32>, vector<32x128xf32> -> vector<128x128xf32>
    %56 = tpu.transpose %55, [1, 0] : vector<128x128xf32> -> vector<128x128xf32>
    %c128_11 = arith.constant 128 : index
    %c0_12 = arith.constant 0 : index
    %57 = vector.load %arg4[%c128_11, %c0_12] : memref<512x128xf32, #tpu.memory_space<vmem>>, vector<128x128xf32>
    tpu.vector_store %arg4[%c128_11, %c0_12], %56 {strides = array<i32>} : memref<512x128xf32, #tpu.memory_space<vmem>>, vector<128x128xf32>,
    %c0_13 = arith.constant 0 : index
    %c256 = arith.constant 256 : index
    %58 = vector.load %arg1[%c0_13, %c256] : memref<4x512xf32, #tpu.memory_space<vmem>>, vector<4x128xf32>
    %cst_14 = arith.constant 1.000000e+02 : f32
    %59 = vector.broadcast %cst_14 : f32 to vector<4x128xf32>
    %60 = arith.mulf %58, %59 : vector<4x128xf32>
    %cst_15 = arith.constant 1.000000e+00 : f32
    %61 = vector.broadcast %cst_15 : f32 to vector<4x128xf32>
    %62 = arith.addf %60, %61 : vector<4x128xf32>
    %63 = vector.extract_strided_slice %62 {offsets = [0, 0], sizes = [1, 128], strides = [1, 1]} : vector<4x128xf32> to vector<1x128xf32>
    %64 = vector.broadcast %63 : vector<1x128xf32> to vector<32x128xf32>
    %65 = arith.mulf %64, %0 : vector<32x128xf32>
    %66 = arith.addf %65, %1 : vector<32x128xf32>
    %67 = math.sin %66 : vector<32x128xf32>
    %68 = vector.extract_strided_slice %62 {offsets = [1, 0], sizes = [1, 128], strides = [1, 1]} : vector<4x128xf32> to vector<1x128xf32>
    %69 = vector.broadcast %68 : vector<1x128xf32> to vector<32x128xf32>
    %70 = arith.mulf %69, %0 : vector<32x128xf32>
    %71 = arith.addf %70, %1 : vector<32x128xf32>
    %72 = math.sin %71 : vector<32x128xf32>
    %73 = vector.extract_strided_slice %62 {offsets = [2, 0], sizes = [1, 128], strides = [1, 1]} : vector<4x128xf32> to vector<1x128xf32>
    %74 = vector.broadcast %73 : vector<1x128xf32> to vector<32x128xf32>
    %75 = arith.mulf %74, %0 : vector<32x128xf32>
    %76 = arith.addf %75, %1 : vector<32x128xf32>
    %77 = math.sin %76 : vector<32x128xf32>
    %78 = vector.extract_strided_slice %62 {offsets = [3, 0], sizes = [1, 128], strides = [1, 1]} : vector<4x128xf32> to vector<1x128xf32>
    %79 = vector.broadcast %78 : vector<1x128xf32> to vector<32x128xf32>
    %80 = arith.mulf %79, %0 : vector<32x128xf32>
    %81 = arith.addf %80, %1 : vector<32x128xf32>
    %82 = math.sin %81 : vector<32x128xf32>
    %83 = tpu.concatenate %67, %72, %77, %82 in 0 : vector<32x128xf32>, vector<32x128xf32>, vector<32x128xf32>, vector<32x128xf32> -> vector<128x128xf32>
    %84 = tpu.transpose %83, [1, 0] : vector<128x128xf32> -> vector<128x128xf32>
    %c256_16 = arith.constant 256 : index
    %c0_17 = arith.constant 0 : index
    %85 = vector.load %arg4[%c256_16, %c0_17] : memref<512x128xf32, #tpu.memory_space<vmem>>, vector<128x128xf32>
    tpu.vector_store %arg4[%c256_16, %c0_17], %84 {strides = array<i32>} : memref<512x128xf32, #tpu.memory_space<vmem>>, vector<128x128xf32>,
    %c0_18 = arith.constant 0 : index
    %c384 = arith.constant 384 : index
    %86 = vector.load %arg1[%c0_18, %c384] : memref<4x512xf32, #tpu.memory_space<vmem>>, vector<4x128xf32>
    %cst_19 = arith.constant 1.000000e+02 : f32
    %87 = vector.broadcast %cst_19 : f32 to vector<4x128xf32>
    %88 = arith.mulf %86, %87 : vector<4x128xf32>
    %cst_20 = arith.constant 1.000000e+00 : f32
    %89 = vector.broadcast %cst_20 : f32 to vector<4x128xf32>
    %90 = arith.addf %88, %89 : vector<4x128xf32>
    %91 = vector.extract_strided_slice %90 {offsets = [0, 0], sizes = [1, 128], strides = [1, 1]} : vector<4x128xf32> to vector<1x128xf32>
    %92 = vector.broadcast %91 : vector<1x128xf32> to vector<32x128xf32>
    %93 = arith.mulf %92, %0 : vector<32x128xf32>
    %94 = arith.addf %93, %1 : vector<32x128xf32>
    %95 = math.sin %94 : vector<32x128xf32>
    %96 = vector.extract_strided_slice %90 {offsets = [1, 0], sizes = [1, 128], strides = [1, 1]} : vector<4x128xf32> to vector<1x128xf32>
    %97 = vector.broadcast %96 : vector<1x128xf32> to vector<32x128xf32>
    %98 = arith.mulf %97, %0 : vector<32x128xf32>
    %99 = arith.addf %98, %1 : vector<32x128xf32>
    %100 = math.sin %99 : vector<32x128xf32>
    %101 = vector.extract_strided_slice %90 {offsets = [2, 0], sizes = [1, 128], strides = [1, 1]} : vector<4x128xf32> to vector<1x128xf32>
    %102 = vector.broadcast %101 : vector<1x128xf32> to vector<32x128xf32>
    %103 = arith.mulf %102, %0 : vector<32x128xf32>
    %104 = arith.addf %103, %1 : vector<32x128xf32>
    %105 = math.sin %104 : vector<32x128xf32>
    %106 = vector.extract_strided_slice %90 {offsets = [3, 0], sizes = [1, 128], strides = [1, 1]} : vector<4x128xf32> to vector<1x128xf32>
    %107 = vector.broadcast %106 : vector<1x128xf32> to vector<32x128xf32>
    %108 = arith.mulf %107, %0 : vector<32x128xf32>
    %109 = arith.addf %108, %1 : vector<32x128xf32>
    %110 = math.sin %109 : vector<32x128xf32>
    %111 = tpu.concatenate %95, %100, %105, %110 in 0 : vector<32x128xf32>, vector<32x128xf32>, vector<32x128xf32>, vector<32x128xf32> -> vector<128x128xf32>
    %112 = tpu.transpose %111, [1, 0] : vector<128x128xf32> -> vector<128x128xf32>
    %c384_21 = arith.constant 384 : index
    %c0_22 = arith.constant 0 : index
    %113 = vector.load %arg4[%c384_21, %c0_22] : memref<512x128xf32, #tpu.memory_space<vmem>>, vector<128x128xf32>
    tpu.vector_store %arg4[%c384_21, %c0_22], %112 {strides = array<i32>} : memref<512x128xf32, #tpu.memory_space<vmem>>, vector<128x128xf32>,
    return
  }
  func.func @transform_0(%arg0: i32) -> (i32, i32) {
    %c0_i32 = arith.constant 0 : i32
    %c0_i32_0 = arith.constant 0 : i32
    return %c0_i32, %arg0 : i32, i32
  }
  func.func @transform_1(%arg0: i32) -> (i32, i32) {
    %c0_i32 = arith.constant 0 : i32
    %c0_i32_0 = arith.constant 0 : i32
    %c0_i32_1 = arith.constant 0 : i32
    return %c0_i32, %c0_i32_0 : i32, i32
  }
  func.func @transform_2(%arg0: i32) -> (i32, i32) {
    %c0_i32 = arith.constant 0 : i32
    %c0_i32_0 = arith.constant 0 : i32
    %c0_i32_1 = arith.constant 0 : i32
    return %c0_i32, %c0_i32_0 : i32, i32
  }
  func.func @transform_3(%arg0: i32) -> (i32, i32) {
    %c0_i32 = arith.constant 0 : i32
    %c0_i32_0 = arith.constant 0 : i32
    return %arg0, %c0_i32 : i32, i32
  }
}

</mosaic_0001>

<bundles_post_ra>
// kernel: tpu_custom_call.1
= control target key start
LH: loop header
LB: loop body
LE: loop exit
PB: predicated region body
PF: predicated region fallthrough
CT: control target
= control target key end

     0   :  { %8 = vsyncpa [#allocation3], 0  ;;  %s13698_s0 = inlined_call_operand.hbm [shape: f32[4,512], index: 0, kind: input, shape index: {}]   ;;  %s13699_s1 = inlined_call_operand.hbm [shape: f32[32,128], index: 1, kind: input, shape index: {}]   ;;  %s13700_s2 = inlined_call_operand.hbm [shape: f32[32,128], index: 2, kind: input, shape index: {}]   ;;  %s13701_s3 = inlined_call_operand.hbm [shape: f32[512,128], index: 3, kind: output, shape index: {}]  }
   0x1   :  { %9 = vsyncpa [#allocation6], 0 }
   0x2   :  { %10 = vsyncpa [#allocation4], 0  ;;  %s8062_s12 = smov [#allocation5]   ;;  %s7968_s16 = scalar_lea.hbm %s13699_s1, 512 }
   0x3   :  { %s26_s13 = sshll.u32 %s8062_s12, 4  ;;  %p7969_p0 = scmp.ne.s32.totalorder %s13699_s1, %s7968_s16  ;;  %s27_s13 = int_to_ptr.vmem [resolvable:$true] %s26_s13 }
   0x4   :  { %p7972_p1 = scmp.lt.u32.totalorder %s7968_s16, %s13699_s1 }
   0x6   :  { %p7974_p2 = pnand %p7972_p1, %p7969_p0 }
   0x8   :  { %7977 = shalt.err (!%p7974_p2)
}
   0x9   :  { %s7978_s21 = scalar_lea.vmem %s27_s13, 512  ;;  %p7983_p4 = scmp.lt.s32.totalorder %s27_s13, %s27_s13 }
   0xa   :  { %p7979_p3 = scmp.ne.s32.totalorder %s27_s13, %s7978_s21  ;;  %p7984_p5 = scmp.lt.s32.totalorder %s7978_s21, %s7978_s21 }
   0xc   :  { %p7985_p6 = por %p7984_p5, %p7983_p4 }
   0xe   :  { %p7986_p7 = pnand %p7985_p6, %p7979_p3 }
  0x10   :  { %7989 = shalt.err (!%p7986_p7)
}
  0x11   :  { %s8063_s22 = smov 128   ;;  %s8064_s23 = smov 8  }
  0x12   :  { %32 = dma.hbm_to_vmem [thread:$0]  %s13699_s1, 512, %s27_s13, [#allocation6], %s8063_s22, %s8063_s22, %s8064_s23  }
  0x13   :  { %s8065_s26 = smov [#allocation2]   ;;  %s8066_s28 = smov [#allocation7]  }
  0x14   :  { %s17_s27 = sshll.u32 %s8065_s26, 4  ;;  %s38_s29 = sshll.u32 %s8066_s28, 4  ;;  %s18_s27 = int_to_ptr.vmem [resolvable:$true] %s17_s27  ;;  %s39_s29 = int_to_ptr.vmem [resolvable:$true] %s38_s29 }
  0x15   :  { %s7990_s5 = scalar_lea.hbm %s13698_s0, 256 }
  0x16   :  { %p7991_p8 = scmp.ne.s32.totalorder %s13698_s0, %s7990_s5  ;;  %p7994_p9 = scmp.lt.u32.totalorder %s7990_s5, %s13698_s0 }
  0x18   :  { %p7996_p10 = pnand %p7994_p9, %p7991_p8 }
  0x1a   :  { %7999 = shalt.err (!%p7996_p10)
}
  0x1b   :  { %s8000_s1 = scalar_lea.vmem %s18_s27, 256  ;;  %p8005_p12 = scmp.lt.s32.totalorder %s18_s27, %s18_s27 }
  0x1c   :  { %p8001_p11 = scmp.ne.s32.totalorder %s18_s27, %s8000_s1  ;;  %p8006_p13 = scmp.lt.s32.totalorder %s8000_s1, %s8000_s1 }
  0x1e   :  { %p8007_p0 = por %p8006_p13, %p8005_p12 }
  0x20   :  { %p8008_p1 = pnand %p8007_p0, %p8001_p11 }
  0x22   :  { %8011 = shalt.err (!%p8008_p1)
}
  0x23   :  { %20 = dma.hbm_to_vmem [thread:$0]  %s13698_s0, 256, %s18_s27, [#allocation3]  }
  0x24   :  { %s8012_s14 = scalar_lea.hbm %s13700_s2, 512 }
  0x25   :  { %p8013_p2 = scmp.ne.s32.totalorder %s13700_s2, %s8012_s14  ;;  %p8016_p3 = scmp.lt.u32.totalorder %s8012_s14, %s13700_s2 }
  0x27   :  { %p8018_p4 = pnand %p8016_p3, %p8013_p2 }
  0x29   :  { %8021 = shalt.err (!%p8018_p4)
}
  0x2a   :  { %s8022_s19 = scalar_lea.vmem %s39_s29, 512  ;;  %p8027_p6 = scmp.lt.s32.totalorder %s39_s29, %s39_s29 }
  0x2b   :  { %p8023_p5 = scmp.ne.s32.totalorder %s39_s29, %s8022_s19  ;;  %p8028_p7 = scmp.lt.s32.totalorder %s8022_s19, %s8022_s19 }
  0x2d   :  { %p8029_p8 = por %p8028_p7, %p8027_p6 }
  0x2f   :  { %p8030_p9 = pnand %p8029_p8, %p8023_p5 }
  0x31   :  { %8033 = shalt.err (!%p8030_p9)
}
  0x32   :  { %44 = dma.hbm_to_vmem [thread:$0]  %s13700_s2, 512, %s39_s29, [#allocation6], %s8063_s22, %s8063_s22, %s8064_s23  }
  0x33   :  { %8056 = dma.done.wait [#allocation3], 256  }
  0x34   :  { %8057 = vsyncadd [#allocation3], 4294967040 }
  0x35   :  { %8058 = dma.done.wait [#allocation6], 1024  }
  0x36   :  { %8059 = vsyncadd [#allocation6], 4294966272  ;;  %v65_v0 = vlaneseq  ;;  %v1825_v2 = vld [vmem:[#allocation2 + $0x4] sm:$0xf]  ;;  %v62_v5 = vld [vmem:[#allocation2] sm:$0xf] }
  0x37   :  { %v1826_v4 = vmul.f32 100.0, %v1825_v2  ;;  %v63_v6 = vmul.f32 100.0, %v62_v5  ;;  %v54_v8 = vld [vmem:[#allocation5] sm:$0xff]  ;;  %v55_v10 = vld [vmem:[#allocation5 + $0x8] sm:$0xff]  ;;  %v56_v34 = vld [vmem:[#allocation5 + $0x10] sm:$0xff]  ;;  %s8073_s2 = smov [#allocation8]  }
  0x38   :  { %v8136_v1 = vshrl.u32 %v65_v0, 7  ;;  %v58_v12 = vld [vmem:[#allocation7] sm:$0xff]  ;;  %v59_v15 = vld [vmem:[#allocation7 + $0x8] sm:$0xff]  ;;  %v8067_v54 = vmov 683565275   ;;  %s7119_s21 = sshll.u32 %s8073_s2, 4  ;;  %s7120_s21 = int_to_ptr.vmem [resolvable:$true] %s7119_s21 }
  0x39   :  { %v8141_v7 = vadd.f32 1.0, %v1826_v4  ;;  %v8143_v9 = vadd.f32 1.0, %v63_v6  ;;  %v8068_v56 = vmov 2475754826   ;;  %v8069_v58 = vmov 2131351028   ;;  %p8039_p11 = scmp.lt.s32.totalorder %s7120_s21, %s7120_s21 }
  0x3a   :  { %v8139_v3 = vsub.s32 0, %v8136_v1  ;;  %v8070_v60 = vmov 2102212464   ;;  %v8071_v62 = vmov 920167782   ;;  %s8034_s24 = scalar_lea.vmem %s7120_s21, 8192 }
  0x3b   :  { %p8035_p10 = scmp.ne.s32.totalorder %s7120_s21, %s8034_s24  ;;  %p8040_p12 = scmp.lt.s32.totalorder %s8034_s24, %s8034_s24 }
  0x3c   :  { %v8147_v11 = vrot.slane %v8141_v7, %v8139_v3  ;;  %v8151_v13 = vrot.slane %v8143_v9, %v8139_v3 }
  0x3d   :  { %p8041_p13 = por %p8040_p12, %p8039_p11 }
  0x3e   :  { %v1832_v14 = vmul.f32 %v8147_v11, %v54_v8  ;;  %v1833_v16 = vmul.f32 %v8147_v11, %v55_v10  ;;  %v69_v17 = vmul.f32 %v8151_v13, %v54_v8  ;;  %v70_v33 = vmul.f32 %v8151_v13, %v55_v10 }
  0x3f   :  { %v8174_v41 = vmul.f32 %v8147_v11, %v56_v34  ;;  %v8179_v44 = vmul.f32 %v8151_v13, %v56_v34  ;;  %v8072_v10 = vmov 1326507024   ;;  %p8042_p0 = pnand %p8041_p13, %p8035_p10 }
  0x40   :  { %v8156_v18 = vadd.f32 %v1832_v14, %v58_v12  ;;  %v8158_v19 = vadd.f32 %v69_v17, %v58_v12  ;;  %v8160_v20 = vadd.f32 %v1833_v16, %v59_v15  ;;  %v8176_v43 = vadd.f32 %v70_v33, %v59_v15 }
  0x42   :  { %v1840_v21 = vand.u32 2147483647, %v8156_v18  ;;  %v1843_v22 = vand.u32 2139095040, %v8156_v18  ;;  %v77_v23 = vand.u32 2147483647, %v8158_v19  ;;  %v80_v24 = vand.u32 2139095040, %v8158_v19 }
  0x43   :  { %v1947_v29 = vand.u32 2139095040, %v8160_v20  ;;  %v1944_v39 = vand.u32 2147483647, %v8160_v20  ;;  %vm1842_vm12 = vcmp.lt.s32.totalorder %v8156_v18, 0 }
  0x44   :  { %v1844_v25 = vshrl.u32 %v1843_v22, 23  ;;  %v1847_v26 = vand.u32 8388607, %v1840_v21  ;;  %v81_v27 = vshrl.u32 %v80_v24, 23  ;;  %v84_v28 = vand.u32 8388607, %v77_v23 }
  0x45   :  { %v1948_v32 = vshrl.u32 %v1947_v29, 23  ;;  %v8187_v51 = vand.u32 8388607, %v1944_v39  ;;  %vm8280_vm14 = vcmp.le.f32.partialorder %v1840_v21, 0.7853982 }
  0x46   :  { %v7196_v30 = vadd.s32 4294967169, %v1844_v25  ;;  %v7132_v31 = vadd.s32 4294967169, %v81_v27  ;;  %v1848_v35 = vor.u32 8388608, %v1847_v26  ;;  %v85_v37 = vor.u32 8388608, %v84_v28 }
  0x47   :  { %v7200_v40 = vadd.s32 4294967169, %v1948_v32 }
  0x48   :  { %v1850_v36 = vadd.s32 1, %v7196_v30  ;;  %v87_v38 = vadd.s32 1, %v7132_v31  ;;  %v8181_v47 = vshll.u32 %v1848_v35, 8  ;;  %v8183_v50 = vshll.u32 %v85_v37, 8 }
  0x49   :  { %v8189_v52 = vadd.s32 1, %v7200_v40 }
  0x4a   :  { %vm1851_vm0 = vcmp.gt.s32.totalorder %v1850_v36, 0  ;;  %vm88_vm1 = vcmp.gt.s32.totalorder %v87_v38, 0 }
  0x4b   :  { %v1852_v42 = vsel %vm1851_vm0, %v1850_v36, 0  ;;  %v89_v48 = vsel %vm88_vm1, %v87_v38, 0  ;;  %vm1955_vm6 = vcmp.gt.s32.totalorder %v8189_v52, 0 }
  0x4c   :  { %v1853_v45 = vshrl.u32 %v1852_v42, 5  ;;  %v1854_v46 = vand.u32 31, %v1852_v42  ;;  %v91_v49 = vand.u32 31, %v89_v48  ;;  %v8196_v0 = vshrl.u32 %v89_v48, 5 }
  0x4e   :  { %v1855_v53 = vsub.s32 32, %v1854_v46  ;;  %v1857_v55 = vshll.u32 %v8067_v54, %v1854_v46  ;;  %v1860_v57 = vshll.u32 %v8068_v56, %v1854_v46  ;;  %v1863_v59 = vshll.u32 %v8069_v58, %v1854_v46 }
  0x4f   :  { %v1866_v61 = vshll.u32 %v8070_v60, %v1854_v46  ;;  %v1869_v63 = vshll.u32 %v8071_v62, %v1854_v46  ;;  %vm1872_vm2 = vcmp.lt.s32.totalorder %v1853_v45, 1  ;;  %vm1873_vm3 = vcmp.lt.s32.totalorder %v1853_v45, 2 }
  0x50   :  { %v1856_v2 = vshrl.u32 %v8067_v54, %v1855_v53  ;;  %v1858_v4 = vshrl.u32 %v8068_v56, %v1855_v53  ;;  %v1861_v5 = vshrl.u32 %v8069_v58, %v1855_v53  ;;  %v1864_v6 = vshrl.u32 %v8070_v60, %v1855_v53 }
  0x51   :  { %v1867_v8 = vshrl.u32 %v8071_v62, %v1855_v53  ;;  %v1870_v12 = vshrl.u32 %v8072_v10, %v1855_v53  ;;  %vm1875_vm4 = vcmp.lt.s32.totalorder %v1853_v45, 4  ;;  %v92_v17 = vsub.s32 32, %v91_v49 }
  0x52   :  { %v1859_v14 = vor.u32 %v1858_v4, %v1857_v55  ;;  %v1862_v15 = vor.u32 %v1861_v5, %v1860_v57  ;;  %v1865_v16 = vor.u32 %v1864_v6, %v1863_v59  ;;  %vm1874_vm5 = vcmp.lt.s32.totalorder %v1853_v45, 3 }
  0x53   :  { %v1868_v22 = vor.u32 %v1867_v8, %v1866_v61  ;;  %v1871_v24 = vor.u32 %v1870_v12, %v1869_v63  ;;  %v94_v25 = vshll.u32 %v8067_v54, %v91_v49  ;;  %v97_v33 = vshll.u32 %v8068_v56, %v91_v49 }
  0x54   :  { %v1876_v26 = vsel %vm1872_vm2, %v1856_v2, %v1859_v14  ;;  %v1877_v27 = vsel %vm1875_vm4, %v1865_v16, 2102212464  ;;  %v1880_v28 = vsel %vm1872_vm2, %v1859_v14, %v1862_v15  ;;  %v1884_v29 = vsel %vm1872_vm2, %v1862_v15, %v1865_v16 }
  0x55   :  { %v1878_v30 = vsel %vm1874_vm5, %v1862_v15, %v1877_v27  ;;  %v1881_v31 = vsel %vm1875_vm4, %v1868_v22, 920167782  ;;  %v1885_v32 = vsel %vm1875_vm4, %v1871_v24, 1326507024  ;;  %v93_v36 = vshrl.u32 %v8067_v54, %v92_v17 }
  0x56   :  { %v1882_v34 = vsel %vm1874_vm5, %v1865_v16, %v1881_v31  ;;  %v1886_v35 = vsel %vm1874_vm5, %v1868_v22, %v1885_v32  ;;  %v95_v37 = vshrl.u32 %v8068_v56, %v92_v17  ;;  %v1879_v38 = vsel %vm1873_vm3, %v1876_v26, %v1878_v30 }
  0x57   :  { %v1883_v40 = vsel %vm1873_vm3, %v1880_v28, %v1882_v34  ;;  %v1887_v42 = vsel %vm1873_vm3, %v1884_v29, %v1886_v35  ;;  %v98_v46 = vshrl.u32 %v8069_v58, %v92_v17  ;;  %v100_v63 = vshll.u32 %v8069_v58, %v91_v49 }
  0x58   :  { %v8217_v48 = vmul.u32.u64.low %v8181_v47, %v1887_v42  ;;  %v8218_v53 = vmul.u32.u64.high %v8181_v47, %v1887_v42, %v8217_v48  ;;  %v8221_v55 = vmul.u32.u64.low %v8181_v47, %v1883_v40  ;;  %v8222_v57 = vmul.u32.u64.high %v8181_v47, %v1883_v40, %v8221_v55 }
  0x59   :  { %v96_v59 = vor.u32 %v95_v37, %v94_v25  ;;  %v99_v61 = vor.u32 %v98_v46, %v97_v33  ;;  %v101_v2 = vshrl.u32 %v8070_v60, %v92_v17  ;;  %v103_v45 = vshll.u32 %v8070_v60, %v91_v49 }
  0x5a   :  { %v104_v4 = vshrl.u32 %v8071_v62, %v92_v17  ;;  %v106_v5 = vshll.u32 %v8071_v62, %v91_v49  ;;  %v107_v6 = vshrl.u32 %v8072_v10, %v92_v17  ;;  %v1895_v8 = vmul.u32 %v8181_v47, %v1879_v38  ;;  %v60_v38 = vld [vmem:[#allocation7 + $0x10] sm:$0xff] }
  0x5b   :  { %v102_v12 = vor.u32 %v101_v2, %v100_v63  ;;  %vm109_vm7 = vcmp.lt.s32.totalorder %v8196_v0, 1  ;;  %vm110_vm8 = vcmp.lt.s32.totalorder %v8196_v0, 2  ;;  %vm1897_vm9 = vc.u32 %v8218_v53, %v8221_v55 }
  0x5c   :  { %v1898_v14 = vadd.s32 1, %v8222_v57  ;;  %v105_v15 = vor.u32 %v104_v4, %v103_v45  ;;  %vm111_vm10 = vcmp.lt.s32.totalorder %v8196_v0, 3  ;;  %v108_v16 = vor.u32 %v107_v6, %v106_v5 }
  0x5d   :  { %vm112_vm11 = vcmp.lt.s32.totalorder %v8196_v0, 4  ;;  %v113_v49 = vsel %vm109_vm7, %v93_v36, %v96_v59  ;;  %v117_v17 = vsel %vm109_vm7, %v96_v59, %v99_v61  ;;  %v121_v25 = vsel %vm109_vm7, %v99_v61, %v102_v12 }
  0x5e   :  { %v1899_v47 = vsel %vm1897_vm9, %v1898_v14, %v8222_v57  ;;  %v114_v22 = vsel %vm112_vm11, %v102_v12, 2102212464  ;;  %v118_v24 = vsel %vm112_vm11, %v105_v15, 920167782  ;;  %v122_v29 = vsel %vm112_vm11, %v108_v16, 1326507024 }
  0x5f   :  { %v1900_v26 = vadd.s32 %v1899_v47, %v1895_v8  ;;  %v115_v27 = vsel %vm111_vm10, %v99_v61, %v114_v22  ;;  %v119_v28 = vsel %vm111_vm10, %v102_v12, %v118_v24  ;;  %v123_v32 = vsel %vm111_vm10, %v105_v15, %v122_v29 }
  0x60   :  { %v116_v30 = vsel %vm110_vm8, %v113_v49, %v115_v27  ;;  %v120_v31 = vsel %vm110_vm8, %v117_v17, %v119_v28  ;;  %v1956_v33 = vsel %vm1955_vm6, %v8189_v52, 0  ;;  %v124_v35 = vsel %vm110_vm8, %v121_v25, %v123_v32 }
  0x61   :  { %v1901_v34 = vadd.s32 536870912, %v1900_v26  ;;  %v8250_v36 = vmul.u32.u64.low %v8183_v50, %v120_v31  ;;  %v8251_v37 = vmul.u32.u64.high %v8183_v50, %v120_v31, %v8250_v36  ;;  %v1952_v46 = vor.u32 8388608, %v8187_v51 }
  0x62   :  { %v8255_v40 = vmul.u32.u64.low %v8183_v50, %v124_v35  ;;  %v8256_v42 = vmul.u32.u64.high %v8183_v50, %v124_v35, %v8255_v40  ;;  %v181_v48 = vand.u32 2147483647, %v8176_v43  ;;  %v1958_v52 = vand.u32 31, %v1956_v33 }
  0x63   :  { %v1902_v57 = vshrl.u32 %v1901_v34, 30  ;;  %v132_v59 = vmul.u32 %v8183_v50, %v116_v30  ;;  %v8262_v0 = vadd.f32 %v8174_v41, %v60_v38  ;;  %v8265_v61 = vadd.f32 %v8179_v44, %v60_v38 }
  0x64   :  { %v135_v2 = vadd.s32 1, %v8251_v37  ;;  %v1959_v45 = vsub.s32 32, %v1958_v52  ;;  %vm134_vm13 = vc.u32 %v8256_v42, %v8250_v36  ;;  %v8271_v51 = vshll.u32 %v1952_v46, 8 }
  0x65   :  { %v1903_v63 = vshll.u32 %v1902_v57, 30  ;;  %v184_v4 = vand.u32 2139095040, %v8176_v43  ;;  %v8276_v41 = vand.u32 8388607, %v181_v48  ;;  %v1926_v5 = vsub.s32 4, %v1902_v57 }
  0x66   :  { %v136_v6 = vsel %vm134_vm13, %v135_v2, %v8251_v37  ;;  %v1957_v8 = vshrl.u32 %v1956_v33, 5  ;;  %v1961_v14 = vshll.u32 %v8067_v54, %v1958_v52  ;;  %v1962_v15 = vshrl.u32 %v8068_v56, %v1959_v45 }
  0x67   :  { %v8284_v50 = vsub.s32 %v1900_v26, %v1903_v63  ;;  %v137_v12 = vadd.s32 %v136_v6, %v132_v59  ;;  %v1964_v16 = vshll.u32 %v8068_v56, %v1958_v52  ;;  %v1965_v21 = vshrl.u32 %v8069_v58, %v1959_v45 }
  0x68   :  { %v1967_v17 = vshll.u32 %v8069_v58, %v1958_v52  ;;  %v1968_v47 = vshrl.u32 %v8070_v60, %v1959_v45  ;;  %v1896_v22 = vadd.s32 %v8221_v55, %v8218_v53  ;;  %v1970_v25 = vshll.u32 %v8070_v60, %v1958_v52 }
  0x69   :  { %v1906_v49 = vsub.s32 0, %v8284_v50  ;;  %v138_v24 = vadd.s32 536870912, %v137_v12  ;;  %v185_v26 = vshrl.u32 %v184_v4, 23  ;;  %v1927_v28 = vsel %vm1842_vm12, %v1926_v5, %v1902_v57 }
  0x6a   :  { %v1971_v29 = vshrl.u32 %v8071_v62, %v1959_v45  ;;  %vm1979_vm15 = vcmp.lt.s32.totalorder %v1957_v8, 4  ;;  %v1960_v31 = vshrl.u32 %v8067_v54, %v1959_v45  ;;  %v1973_v32 = vshll.u32 %v8071_v62, %v1958_v52 }
  0x6b   :  { %v7197_v27 = vmin.u32 %v1906_v49, %v8284_v50  ;;  %v8301_v30 = vshrl.u32 %v138_v24, 30  ;;  %v1974_v53 = vshrl.u32 %v8072_v10, %v1959_v45  ;;  %v1963_v33 = vor.u32 %v1962_v15, %v1961_v14 }
  0x6c   :  { %v1966_v34 = vor.u32 %v1965_v21, %v1964_v16  ;;  %v1969_v35 = vor.u32 %v1968_v47, %v1967_v17  ;;  %v1972_v38 = vor.u32 %v1971_v29, %v1970_v25  ;;  %vm1976_vm0 = vcmp.lt.s32.totalorder %v1957_v8, 1 }
  0x6d   :  { %v1908_v55 = vclz %v7197_v27  ;;  %v140_v37 = vshll.u32 %v8301_v30, 30  ;;  %vm1978_vm1 = vcmp.lt.s32.totalorder %v1957_v8, 3  ;;  %v1975_v46 = vor.u32 %v1974_v53, %v1973_v32 }
  0x6e   :  { %v1981_v57 = vsel %vm1979_vm15, %v1969_v35, 2102212464  ;;  %v7136_v59 = vadd.s32 4294967169, %v185_v26  ;;  %v1929_v63 = vsel %vm8280_vm14, 0, %v1927_v28  ;;  %vm1977_vm2 = vcmp.lt.s32.totalorder %v1957_v8, 2 }
  0x6f   :  { %v7198_v40 = vadd.s32 4294967294, %v1908_v55  ;;  %v8310_v52 = vsub.s32 %v137_v12, %v140_v37  ;;  %v1985_v2 = vsel %vm1979_vm15, %v1972_v38, 920167782  ;;  %v1980_v45 = vsel %vm1976_vm0, %v1960_v31, %v1963_v33 }
  0x70   :  { %v1984_v4 = vsel %vm1976_vm0, %v1963_v33, %v1966_v34  ;;  %v1986_v5 = vsel %vm1978_vm1, %v1969_v35, %v1985_v2  ;;  %v1982_v15 = vsel %vm1978_vm1, %v1966_v34, %v1981_v57  ;;  %v1988_v16 = vsel %vm1976_vm0, %v1966_v34, %v1969_v35 }
  0x71   :  { %vm7199_vm3 = vcmp.lt.s32.totalorder %v7198_v40, 0  ;;  %v143_v14 = vsub.s32 0, %v8310_v52  ;;  %v1989_v17 = vsel %vm1979_vm15, %v1975_v46, 1326507024  ;;  %vm79_vm4 = vcmp.lt.s32.totalorder %v8158_v19, 0 }
  0x72   :  { %v1911_v6 = vsel %vm7199_vm3, 0, %v7198_v40  ;;  %v1987_v24 = vsel %vm1977_vm2, %v1984_v4, %v1986_v5  ;;  %v1990_v25 = vsel %vm1978_vm1, %v1972_v38, %v1989_v17  ;;  %v191_v29 = vadd.s32 1, %v7136_v59 }
  0x73   :  { %v1912_v49 = vsub.s32 32, %v1911_v6  ;;  %v1913_v12 = vshll.u32 %v8284_v50, %v1911_v6  ;;  %v1916_v21 = vsub.s32 4294967266, %v1911_v6  ;;  %v7133_v47 = vmin.u32 %v143_v14, %v8310_v52 }
  0x74   :  { %v1991_v28 = vsel %vm1977_vm2, %v1988_v16, %v1990_v25  ;;  %v1933_v31 = vadd.s32 3, %v1929_v63  ;;  %v1983_v50 = vsel %vm1977_vm2, %v1980_v45, %v1982_v15  ;;  %v189_v53 = vor.u32 8388608, %v8276_v41 }
  0x75   :  { %v1914_v26 = vshrl.u32 %v1896_v22, %v1912_v49  ;;  %v1917_v27 = vadd.s32 127, %v1916_v21  ;;  %v145_v32 = vclz %v7133_v47  ;;  %vm192_vm5 = vcmp.gt.s32.totalorder %v191_v29, 0 }
  0x76   :  { %v8329_v34 = vmul.u32.u64.low %v8271_v51, %v1991_v28  ;;  %v8330_v35 = vmul.u32.u64.high %v8271_v51, %v1991_v28, %v8329_v34  ;;  %v8333_v38 = vmul.u32.u64.low %v8271_v51, %v1987_v24  ;;  %v8334_v22 = vmul.u32.u64.high %v8271_v51, %v1987_v24, %v8333_v38 }
  0x77   :  { %v1915_v55 = vor.u32 %v1914_v26, %v1913_v12  ;;  %v1918_v33 = vshll.u32 %v1917_v27, 23  ;;  %v7134_v37 = vadd.s32 4294967294, %v145_v32  ;;  %v163_v8 = vsub.s32 4, %v8301_v30 }
  0x78   :  { %v193_v57 = vsel %vm192_vm5, %v191_v29, 0  ;;  %v8338_v59 = vand.u32 3, %v1933_v31  ;;  %v133_v63 = vadd.s32 %v8250_v36, %v8256_v42  ;;  %v1999_v5 = vmul.u32 %v8271_v51, %v1983_v50 }
  0x79   :  { %v1919_v40 = vor.u32 4788187, %v1918_v33  ;;  %v1922_v46 = vcvt.s32.f32 %v1915_v55  ;;  %vm7135_vm6 = vcmp.lt.s32.totalorder %v7134_v37, 0  ;;  %v195_v2 = vand.u32 31, %v193_v57 }
  0x7a   :  { %v148_v4 = vsel %vm7135_vm6, 0, %v7134_v37  ;;  %vm2001_vm7 = vc.u32 %v8330_v35, %v8333_v38  ;;  %vm8347_vm8 = vcmp.le.f32.partialorder %v77_v23, 0.7853982  ;;  %v2002_v36 = vadd.s32 1, %v8334_v22 }
  0x7b   :  { %v1920_v45 = vand.u32 2147483647, %v1919_v40  ;;  %v149_v14 = vsub.s32 32, %v148_v4  ;;  %v150_v15 = vshll.u32 %v8310_v52, %v148_v4  ;;  %v153_v16 = vsub.s32 4294967266, %v148_v4 }
  0x7c   :  { %v164_v51 = vsel %vm79_vm4, %v163_v8, %v8301_v30  ;;  %v8356_v49 = vshrl.u32 %v193_v57, 5  ;;  %v196_v12 = vsub.s32 32, %v195_v2  ;;  %v2003_v23 = vsel %vm2001_vm7, %v2002_v36, %v8334_v22 }
  0x7d   :  { %v1923_v42 = vmul.f32 %v1922_v46, %v1920_v45  ;;  %v151_v21 = vshrl.u32 %v133_v63, %v149_v14  ;;  %v154_v17 = vadd.s32 127, %v153_v16  ;;  %v198_v47 = vshll.u32 %v8067_v54, %v195_v2 }
  0x7e   :  { %v2004_v25 = vadd.s32 %v2003_v23, %v1999_v5  ;;  %v199_v52 = vshrl.u32 %v8068_v56, %v196_v12  ;;  %v201_v26 = vshll.u32 %v8068_v56, %v195_v2  ;;  %v202_v29 = vshrl.u32 %v8069_v58, %v196_v12 }
  0x7f   :  { %v1924_v24 = vxor.u32 2147483648, %v1923_v42  ;;  %v152_v27 = vor.u32 %v151_v21, %v150_v15  ;;  %v155_v28 = vshll.u32 %v154_v17, 23  ;;  %v204_v30 = vshll.u32 %v8069_v58, %v195_v2 }
  0x80   :  { %v2005_v32 = vadd.s32 536870912, %v2004_v25  ;;  %v205_v50 = vshrl.u32 %v8070_v60, %v196_v12  ;;  %v207_v55 = vshll.u32 %v8070_v60, %v195_v2  ;;  %v200_v22 = vor.u32 %v199_v52, %v198_v47 }
  0x81   :  { %v1925_v31 = vsel %vm1842_vm12, %v1924_v24, %v1923_v42  ;;  %v156_v34 = vor.u32 4788187, %v155_v28  ;;  %v159_v37 = vcvt.s32.f32 %v152_v27  ;;  %v203_v46 = vor.u32 %v202_v29, %v201_v26 }
  0x82   :  { %v1928_v33 = vsel %vm8280_vm14, %v8156_v18, %v1925_v31  ;;  %v8371_v40 = vshrl.u32 %v2005_v32, 30  ;;  %v208_v8 = vshrl.u32 %v8071_v62, %v196_v12  ;;  %v210_v63 = vshll.u32 %v8071_v62, %v195_v2 }
  0x83   :  { %7656 = vcosq.f32 %v1928_v33  ;;  %v157_v57 = vand.u32 2147483647, %v156_v34  ;;  %v211_v45 = vshrl.u32 %v8072_v10, %v196_v12  ;;  %v166_v4 = vsel %vm8347_vm8, 0, %v164_v51 }
  0x84   :  { %7658 = vsinq.f32 %v1928_v33  ;;  %v2007_v44 = vshll.u32 %v8371_v40, 30  ;;  %v209_v5 = vor.u32 %v208_v8, %v207_v55  ;;  %vm213_vm9 = vcmp.lt.s32.totalorder %v8356_v49, 1 }
  0x85   :  { %v160_v14 = vmul.f32 %v159_v37, %v157_v57  ;;  %v197_v15 = vshrl.u32 %v8067_v54, %v196_v12  ;;  %v206_v16 = vor.u32 %v205_v50, %v204_v30  ;;  %v8383_v36 = vshll.u32 %v189_v53, 8 }
  0x86   :  { %vm1935_vm10 = vcmp.lt.s32.totalorder %v8338_v59, 2  ;;  %v8386_v2 = vsub.s32 %v2004_v25, %v2007_v44  ;;  %v212_v42 = vor.u32 %v211_v45, %v210_v63  ;;  %vm215_vm11 = vcmp.lt.s32.totalorder %v8356_v49, 3 }
  0x87   :  { %vm216_vm12 = vcmp.lt.s32.totalorder %v8356_v49, 4  ;;  %vm1932_vm13 = vweird.f32 %v8156_v18  ;;  %v161_v51 = vxor.u32 2147483648, %v160_v14  ;;  %vm1946_vm14 = vcmp.lt.s32.totalorder %v8160_v20, 0 }
  0x88   :  { %vm214_vm15 = vcmp.lt.s32.totalorder %v8356_v49, 2  ;;  %v218_v41 = vsel %vm216_vm12, %v206_v16, 2102212464  ;;  %v221_v53 = vsel %vm213_vm9, %v200_v22, %v203_v46  ;;  %vm1936_vm0 = vcmp.eq.s32.totalorder %v8338_v59, 0 }
  0x89   :  { %v170_v12 = vadd.s32 3, %v166_v4  ;;  %v2010_v21 = vsub.s32 0, %v8386_v2  ;;  %v222_v17 = vsel %vm216_vm12, %v209_v5, 920167782  ;;  %v162_v23 = vsel %vm79_vm4, %v161_v51, %v160_v14 }
  0x8a   :  { %v217_v47 = vsel %vm213_vm9, %v197_v15, %v200_v22  ;;  %v219_v24 = vsel %vm215_vm11, %v203_v46, %v218_v41  ;;  %v223_v25 = vsel %vm215_vm11, %v206_v16, %v222_v17  ;;  %v165_v52 = vsel %vm8347_vm8, %v8158_v19, %v162_v23 }
  0x8b   :  { %vm8414_vm1 = vcmp.le.f32.partialorder %v1944_v39, 0.7853982  ;;  %v7201_v27 = vmin.u32 %v2010_v21, %v8386_v2  ;;  %v224_v28 = vsel %vm214_vm15, %v221_v53, %v223_v25  ;;  %v225_v29 = vsel %vm213_vm9, %v203_v46, %v206_v16 }
  0x8c   :  { %7660 = vcosq.f32 %v165_v52  ;;  %v226_v30 = vsel %vm216_vm12, %v212_v42, 1326507024  ;;  %v8426_v6 = vmul.u32.u64.low %v8383_v36, %v224_v28  ;;  %v8427_v31 = vmul.u32.u64.high %v8383_v36, %v224_v28, %v8426_v6 }
  0x8d   :  { %v7657_v39 = vpop.eup %7656  ;;  %vm1939_vm2 = vcmp.eq.s32.totalorder %v8338_v59, 2  ;;  %7662 = vsinq.f32 %v165_v52  ;;  %v2012_v32 = vclz %v7201_v27  ;;  %v2030_v50 = vsub.s32 4, %v8371_v40 }
  0x8e   :  { %v7659_v55 = vpop.eup %7658  ;;  %v1940_v33 = vxor.u32 2147483648, %v7657_v39  ;;  %v171_v34 = vand.u32 3, %v170_v12  ;;  %v2000_v37 = vadd.s32 %v8333_v38, %v8330_v35  ;;  %v227_v22 = vsel %vm215_vm11, %v209_v5, %v226_v30 }
  0x8f   :  { %v1937_v46 = vxor.u32 2147483648, %v7659_v55  ;;  %v7202_v8 = vadd.s32 4294967294, %v2012_v32  ;;  %v220_v57 = vsel %vm214_vm15, %v217_v47, %v219_v24  ;;  %v228_v63 = vsel %vm214_vm15, %v225_v29, %v227_v22 }
  0x90   :  { %v1941_v45 = vsel %vm1939_vm2, %v1940_v33, %v7659_v55  ;;  %v8441_v4 = vmul.u32.u64.low %v8383_v36, %v228_v63  ;;  %v8442_v44 = vmul.u32.u64.high %v8383_v36, %v228_v63, %v8441_v4  ;;  %v2048_v14 = vand.u32 2147483647, %v8262_v0 }
  0x91   :  { %v1938_v35 = vsel %vm1936_vm0, %v7657_v39, %v1937_v46  ;;  %vm169_vm3 = vweird.f32 %v8158_v19  ;;  %vm7203_vm4 = vcmp.lt.s32.totalorder %v7202_v8, 0  ;;  %v2031_v38 = vsel %vm1946_vm14, %v2030_v50, %v8371_v40 }
  0x92   :  { %v239_v49 = vadd.s32 1, %v8427_v31  ;;  %v1942_v5 = vsel %vm1935_vm10, %v1938_v35, %v1941_v45  ;;  %v2015_v15 = vsel %vm7203_vm4, 0, %v7202_v8  ;;  %v236_v16 = vmul.u32 %v8383_v36, %v220_v57 }
  0x93   :  { %v2051_v42 = vand.u32 2139095040, %v8262_v0  ;;  %v1943_v51 = vsel %vm1932_vm13, nan, %v1942_v5  ;;  %v2016_v41 = vsub.s32 32, %v2015_v15  ;;  %v2017_v53 = vshll.u32 %v8386_v2, %v2015_v15 }
  0x94   :  { %v2020_v12 = vsub.s32 4294967266, %v2015_v15  ;;  %3540 = vxpose.xlu1.b32.start [1/16] %v1943_v51, 128  ;;  %v2033_v40 = vsel %vm8414_vm1, 0, %v2031_v38  ;;  %vm238_vm5 = vc.u32 %v8442_v44, %v8426_v6  ;;  %v2055_v36 = vand.u32 8388607, %v2048_v14 }
  0x95   :  { %v2052_v59 = vshrl.u32 %v2051_v42, 23  ;;  %vm172_vm6 = vcmp.lt.s32.totalorder %v171_v34, 2  ;;  %v2018_v21 = vshrl.u32 %v2000_v37, %v2016_v41  ;;  %v240_v18 = vsel %vm238_vm5, %v239_v49, %v8427_v31  ;;  %v8467_v31 = vld [vmem:[#allocation5 + $0x18] sm:$0xff] }
  0x96   :  { %v2021_v17 = vadd.s32 127, %v2020_v12  ;;  %v7661_v23 = vpop.eup %7660  ;;  %vm173_vm7 = vcmp.eq.s32.totalorder %v171_v34, 0  ;;  %vm176_vm8 = vcmp.eq.s32.totalorder %v171_v34, 2  ;;  %v241_v2 = vadd.s32 %v240_v18, %v236_v16 }
  0x97   :  { %v7204_v47 = vadd.s32 4294967169, %v2052_v59  ;;  %v7663_v24 = vpop.eup %7662  ;;  %v177_v25 = vxor.u32 2147483648, %v7661_v23  ;;  %v2019_v52 = vor.u32 %v2018_v21, %v2017_v53  ;;  %v2037_v28 = vadd.s32 3, %v2033_v40 }
  0x98   :  { %v2022_v27 = vshll.u32 %v2021_v17, 23  ;;  %v174_v29 = vxor.u32 2147483648, %v7663_v24  ;;  %v242_v30 = vadd.s32 536870912, %v241_v2  ;;  %v2056_v39 = vor.u32 8388608, %v2055_v36 }
  0x99   :  { %v2058_v32 = vadd.s32 1, %v7204_v47  ;;  %v178_v50 = vsel %vm176_vm8, %v177_v25, %v7663_v24  ;;  %v2026_v33 = vcvt.s32.f32 %v2019_v52  ;;  %v288_v37 = vand.u32 2139095040, %v8265_v61 }
  0x9a   :  { %v2023_v55 = vor.u32 4788187, %v2022_v27  ;;  %v175_v22 = vsel %vm173_vm7, %v7661_v23, %v174_v29  ;;  %v243_v46 = vshrl.u32 %v242_v30, 30  ;;  %v285_v8 = vand.u32 2147483647, %v8265_v61 }
  0x9b   :  { %vm2059_vm9 = vcmp.gt.s32.totalorder %v2058_v32, 0  ;;  %v179_v57 = vsel %vm172_vm6, %v175_v22, %v178_v50  ;;  %v289_v38 = vshrl.u32 %v288_v37, 23  ;;  %v8476_v49 = vmul.f32 %v8147_v11, %v8467_v31 }
  0x9c   :  { %v2024_v63 = vand.u32 2147483647, %v2023_v55  ;;  %v2060_v45 = vsel %vm2059_vm9, %v2058_v32, 0  ;;  %v180_v4 = vsel %vm169_vm3, nan, %v179_v57  ;;  %v244_v35 = vshll.u32 %v243_v46, 30 }
  0x9d   :  { %1777 = vxpose.xlu0.b32.start [1/16] %v180_v4, 128  ;;  %v8478_v15 = vand.u32 3, %v2037_v28  ;;  %vm183_vm10 = vcmp.lt.s32.totalorder %v8176_v43, 0  ;;  %v2062_v16 = vand.u32 31, %v2060_v45  ;;  %v237_v34 = vadd.s32 %v8426_v6, %v8442_v44 }
  0x9e   :  { %v2027_v5 = vmul.f32 %v2026_v33, %v2024_v63  ;;  %v8483_v42 = vsub.s32 %v241_v2, %v244_v35  ;;  %v8485_v19 = vshll.u32 %v2056_v39, 8  ;;  %v8489_v51 = vand.u32 8388607, %v285_v8 }
  0x9f   :  { %v267_v41 = vsub.s32 4, %v243_v46  ;;  %v8491_v53 = vshrl.u32 %v2060_v45, 5  ;;  %v2063_v12 = vsub.s32 32, %v2062_v16  ;;  %v2065_v59 = vshll.u32 %v8067_v54, %v2062_v16 }
  0xa0   :  { %v2028_v11 = vxor.u32 2147483648, %v2027_v5  ;;  %v247_v40 = vsub.s32 0, %v8483_v42  ;;  %v2068_v36 = vshll.u32 %v8068_v56, %v2062_v16  ;;  %v7140_v6 = vadd.s32 4294967169, %v289_v38 }
  0xa1   :  { %v2066_v21 = vshrl.u32 %v8068_v56, %v2063_v12  ;;  %v2069_v17 = vshrl.u32 %v8069_v58, %v2063_v12  ;;  %v2071_v18 = vshll.u32 %v8069_v58, %v2062_v16  ;;  %v2072_v47 = vshrl.u32 %v8070_v60, %v2063_v12 }
  0xa2   :  { %v2029_v44 = vsel %vm1946_vm14, %v2028_v11, %v2027_v5  ;;  %v7137_v2 = vmin.u32 %v247_v40, %v8483_v42  ;;  %v293_v24 = vor.u32 8388608, %v8489_v51  ;;  %v8509_v25 = vsel %vm183_vm10, %v267_v41, %v243_v46 }
  0xa3   :  { %v2032_v23 = vsel %vm8414_vm1, %v8160_v20, %v2029_v44  ;;  %v2064_v52 = vshrl.u32 %v8067_v54, %v2063_v12  ;;  %v2074_v27 = vshll.u32 %v8070_v60, %v2062_v16  ;;  %vm8515_vm11 = vcmp.le.f32.partialorder %v181_v48, 0.7853982 }
  0xa4   :  { %7664 = vcosq.f32 %v2032_v23  ;;  %v249_v28 = vclz %v7137_v2  ;;  %v2067_v29 = vor.u32 %v2066_v21, %v2065_v59  ;;  %v2070_v30 = vor.u32 %v2069_v17, %v2068_v36 }
  0xa5   :  { %7666 = vsinq.f32 %v2032_v23  ;;  %vm2043_vm12 = vcmp.eq.s32.totalorder %v8478_v15, 2  ;;  %v2073_v39 = vor.u32 %v2072_v47, %v2071_v18  ;;  %v2075_v32 = vshrl.u32 %v8071_v62, %v2063_v12 }
  0xa6   :  { %v2077_v50 = vshll.u32 %v8071_v62, %v2062_v16  ;;  %vm2080_vm13 = vcmp.lt.s32.totalorder %v8491_v53, 1  ;;  %vm2040_vm14 = vcmp.eq.s32.totalorder %v8478_v15, 0  ;;  %v7138_v55 = vadd.s32 4294967294, %v249_v28 }
  0xa7   :  { %v2078_v48 = vshrl.u32 %v8072_v10, %v2063_v12  ;;  %vm2081_vm15 = vcmp.lt.s32.totalorder %v8491_v53, 2  ;;  %vm2083_vm0 = vcmp.lt.s32.totalorder %v8491_v53, 4  ;;  %vm2039_vm1 = vcmp.lt.s32.totalorder %v8478_v15, 2 }
  0xa8   :  { %v2076_v33 = vor.u32 %v2075_v32, %v2074_v27  ;;  %vm2082_vm2 = vcmp.lt.s32.totalorder %v8491_v53, 3  ;;  %v2084_v37 = vsel %vm2080_vm13, %v2064_v52, %v2067_v29  ;;  %v2085_v22 = vsel %vm2083_vm0, %v2073_v39, 2102212464 }
  0xa9   :  { %vm2036_vm3 = vweird.f32 %v8160_v20  ;;  %vm7139_vm4 = vcmp.lt.s32.totalorder %v7138_v55, 0  ;;  %v2079_v46 = vor.u32 %v2078_v48, %v2077_v50  ;;  %v2086_v57 = vsel %vm2082_vm2, %v2070_v30, %v2085_v22 }
  0xaa   :  { %v2088_v63 = vsel %vm2080_vm13, %v2067_v29, %v2070_v30  ;;  %v252_v45 = vsel %vm7139_vm4, 0, %v7138_v55  ;;  %v2089_v4 = vsel %vm2083_vm0, %v2076_v33, 920167782  ;;  %v2092_v35 = vsel %vm2080_vm13, %v2070_v30, %v2073_v39 }
  0xab   :  { %v295_v38 = vadd.s32 1, %v7140_v6  ;;  %v253_v5 = vsub.s32 32, %v252_v45  ;;  %v254_v16 = vshll.u32 %v8483_v42, %v252_v45  ;;  %v257_v11 = vsub.s32 4294967266, %v252_v45 }
  0xac   :  { %v2090_v41 = vsel %vm2082_vm2, %v2073_v39, %v2089_v4  ;;  %v2087_v12 = vsel %vm2081_vm15, %v2084_v37, %v2086_v57  ;;  %v2093_v59 = vsel %vm2083_vm0, %v2079_v46, 1326507024  ;;  %v270_v17 = vsel %vm8515_vm11, 0, %v8509_v25 }
  0xad   :  { %v2091_v40 = vsel %vm2081_vm15, %v2088_v63, %v2090_v41  ;;  %vm296_vm5 = vcmp.gt.s32.totalorder %v295_v38, 0  ;;  %v255_v36 = vshrl.u32 %v237_v34, %v253_v5  ;;  %v258_v44 = vadd.s32 127, %v257_v11 }
  0xae   :  { %v2094_v6 = vsel %vm2082_vm2, %v2076_v33, %v2093_v59  ;;  %v297_v42 = vsel %vm296_vm5, %v295_v38, 0  ;;  %v7665_v21 = vpop.eup %7664  ;;  %v8559_v23 = vmul.u32.u64.low %v8485_v19, %v2091_v40  ;;  %v8560_v2 = vmul.u32.u64.high %v8485_v19, %v2091_v40, %v8559_v23 }
  0xaf   :  { %v2095_v18 = vsel %vm2081_vm15, %v2092_v35, %v2094_v6  ;;  %v7667_v47 = vpop.eup %7666  ;;  %v2044_v34 = vxor.u32 2147483648, %v7665_v21  ;;  %v256_v52 = vor.u32 %v255_v36, %v254_v16  ;;  %v259_v27 = vshll.u32 %v258_v44, 23 }
  0xb0   :  { %v299_v28 = vand.u32 31, %v297_v42  ;;  %v2041_v29 = vxor.u32 2147483648, %v7667_v47  ;;  %v8564_v30 = vmul.u32.u64.low %v8485_v19, %v2095_v18  ;;  %v8565_v39 = vmul.u32.u64.high %v8485_v19, %v2095_v18, %v8564_v30 }
  0xb1   :  { %v2103_v25 = vmul.u32 %v8485_v19, %v2087_v12  ;;  %v2045_v53 = vsel %vm2043_vm12, %v2044_v34, %v7667_v47  ;;  %v260_v32 = vor.u32 4788187, %v259_v27  ;;  %v263_v50 = vcvt.s32.f32 %v256_v52 }
  0xb2   :  { %v300_v55 = vsub.s32 32, %v299_v28  ;;  %v2042_v48 = vsel %vm2040_vm14, %v7665_v21, %v2041_v29  ;;  %v2106_v33 = vadd.s32 1, %v8560_v2  ;;  %v302_v37 = vshll.u32 %v8067_v54, %v299_v28  ;;  %v8599_v29 = vld [vmem:[#allocation7 + $0x18] sm:$0xff] }
  0xb3   :  { %v305_v22 = vshll.u32 %v8068_v56, %v299_v28  ;;  %v2046_v46 = vsel %vm2039_vm1, %v2042_v48, %v2045_v53  ;;  %v261_v57 = vand.u32 2147483647, %v260_v32  ;;  %v274_v19 = vadd.s32 3, %v270_v17 }
  0xb4   :  { %v303_v63 = vshrl.u32 %v8068_v56, %v300_v55  ;;  %v2047_v45 = vsel %vm2036_vm3, nan, %v2046_v46  ;;  %vm2105_vm6 = vc.u32 %v8565_v39, %v8559_v23  ;;  %v298_v4 = vshrl.u32 %v297_v42, 5 }
  0xb5   :  { %v306_v35 = vshrl.u32 %v8069_v58, %v300_v55  ;;  %3541 = vxpose.xlu1.b32.cont [2/16] %v2047_v45, 128  ;;  %v264_v38 = vmul.f32 %v263_v50, %v261_v57  ;;  %v2107_v5 = vsel %vm2105_vm6, %v2106_v33, %v8560_v2  ;;  %v308_v15 = vshll.u32 %v8069_v58, %v299_v28 }
  0xb6   :  { %v304_v16 = vor.u32 %v303_v63, %v302_v37  ;;  %v2108_v11 = vadd.s32 %v2107_v5, %v2103_v25  ;;  %v309_v12 = vshrl.u32 %v8070_v60, %v300_v55  ;;  %v311_v20 = vshll.u32 %v8070_v60, %v299_v28 }
  0xb7   :  { %v307_v41 = vor.u32 %v306_v35, %v305_v22  ;;  %v265_v40 = vxor.u32 2147483648, %v264_v38  ;;  %v312_v59 = vshrl.u32 %v8071_v62, %v300_v55  ;;  %v314_v36 = vshll.u32 %v8071_v62, %v299_v28 }
  0xb8   :  { %v315_v44 = vshrl.u32 %v8072_v10, %v300_v55  ;;  %v2109_v6 = vadd.s32 536870912, %v2108_v11  ;;  %v301_v42 = vshrl.u32 %v8067_v54, %v300_v55  ;;  %v310_v21 = vor.u32 %v309_v12, %v308_v15 }
  0xb9   :  { %vm317_vm7 = vcmp.lt.s32.totalorder %v298_v4, 1  ;;  %v266_v17 = vsel %vm183_vm10, %v265_v40, %v264_v38  ;;  %v313_v18 = vor.u32 %v312_v59, %v311_v20  ;;  %vm320_vm8 = vcmp.lt.s32.totalorder %v298_v4, 4 }
  0xba   :  { %v316_v2 = vor.u32 %v315_v44, %v314_v36  ;;  %v269_v47 = vsel %vm8515_vm11, %v8176_v43, %v266_v17  ;;  %v2110_v34 = vshrl.u32 %v2109_v6, 30  ;;  %vm319_vm9 = vcmp.lt.s32.totalorder %v298_v4, 3 }
  0xbb   :  { %v322_v52 = vsel %vm320_vm8, %v310_v21, 2102212464  ;;  %7668 = vcosq.f32 %v269_v47  ;;  %vm318_vm12 = vcmp.lt.s32.totalorder %v298_v4, 2  ;;  %v325_v27 = vsel %vm317_vm7, %v304_v16, %v307_v41 }
  0xbc   :  { %v326_v28 = vsel %vm320_vm8, %v313_v18, 920167782  ;;  %7670 = vsinq.f32 %v269_v47  ;;  %v2111_v30 = vshll.u32 %v2110_v34, 30  ;;  %v321_v25 = vsel %vm317_vm7, %v301_v42, %v304_v16 }
  0xbd   :  { %v323_v53 = vsel %vm319_vm9, %v307_v41, %v322_v52  ;;  %v327_v26 = vsel %vm319_vm9, %v310_v21, %v326_v28  ;;  %v329_v32 = vsel %vm317_vm7, %v307_v41, %v310_v21  ;;  %v330_v50 = vsel %vm320_vm8, %v316_v2, 1326507024 }
  0xbe   :  { %v333_v55 = vshll.u32 %v293_v24, 8  ;;  %v8608_v48 = vsub.s32 %v2108_v11, %v2111_v30  ;;  %v328_v33 = vsel %vm318_vm12, %v325_v27, %v327_v26  ;;  %v331_v37 = vsel %vm319_vm9, %v313_v18, %v330_v50 }
  0xbf   :  { %v8614_v22 = vadd.f32 %v8476_v49, %v8599_v29  ;;  %v275_v46 = vand.u32 3, %v274_v19  ;;  %v332_v57 = vsel %vm318_vm12, %v329_v32, %v331_v37  ;;  %v324_v51 = vsel %vm318_vm12, %v321_v25, %v323_v53 }
  0xc0   :  { %v8617_v63 = vmul.u32.u64.low %v333_v55, %v328_v33  ;;  %v8618_v45 = vmul.u32.u64.high %v333_v55, %v328_v33, %v8617_v63  ;;  %v2114_v35 = vsub.s32 0, %v8608_v48  ;;  %v2134_v5 = vsub.s32 4, %v2110_v34 }
  0xc1   :  { %v8622_v24 = vmul.u32.u64.low %v333_v55, %v332_v57  ;;  %v8623_v38 = vmul.u32.u64.high %v333_v55, %v332_v57, %v8622_v24  ;;  %v2152_v16 = vand.u32 2147483647, %v8614_v22  ;;  %vm273_vm10 = vweird.f32 %v8176_v43 }
  0xc2   :  { %v7205_v49 = vmin.u32 %v2114_v35, %v8608_v48  ;;  %v2155_v19 = vand.u32 2139095040, %v8614_v22  ;;  %vm8631_vm11 = vcmp.le.f32.partialorder %v2048_v14, 0.7853982  ;;  %vm2050_vm13 = vcmp.lt.s32.totalorder %v8262_v0, 0 }
  0xc3   :  { %v340_v4 = vmul.u32 %v333_v55, %v324_v51  ;;  %v343_v11 = vadd.s32 1, %v8618_v45  ;;  %vm276_vm14 = vcmp.lt.s32.totalorder %v275_v46, 2  ;;  %vm277_vm15 = vcmp.eq.s32.totalorder %v275_v46, 0 }
  0xc4   :  { %v2116_v41 = vclz %v7205_v49  ;;  %v2159_v12 = vand.u32 8388607, %v2152_v16  ;;  %vm280_vm0 = vcmp.eq.s32.totalorder %v275_v46, 2  ;;  %v2135_v40 = vsel %vm2050_vm13, %v2134_v5, %v2110_v34 }
  0xc5   :  { %v7669_v20 = vpop.eup %7668  ;;  %vm342_vm1 = vc.u32 %v8623_v38, %v8617_v63  ;;  %v2156_v14 = vshrl.u32 %v2155_v19, 23  ;;  %v2104_v44 = vadd.s32 %v8559_v23, %v8565_v39  ;;  %v72_v2 = vmul.f32 %v8151_v13, %v8467_v31 }
  0xc6   :  { %v7671_v59 = vpop.eup %7670  ;;  %v281_v36 = vxor.u32 2147483648, %v7669_v20  ;;  %v7206_v6 = vadd.s32 4294967294, %v2116_v41  ;;  %v344_v42 = vsel %vm342_vm1, %v343_v11, %v8618_v45  ;;  %v2137_v34 = vsel %vm8631_vm11, 0, %v2135_v40 }
  0xc7   :  { %v278_v21 = vxor.u32 2147483648, %v7671_v59  ;;  %v345_v17 = vadd.s32 %v344_v42, %v340_v4  ;;  %v7208_v18 = vadd.s32 4294967169, %v2156_v14  ;;  %v2160_v52 = vor.u32 8388608, %v2159_v12 }
  0xc8   :  { %v282_v47 = vsel %vm280_vm0, %v281_v36, %v7671_v59  ;;  %vm7207_vm2 = vcmp.lt.s32.totalorder %v7206_v6, 0  ;;  %v8655_v32 = vadd.f32 %v72_v2, %v8599_v29  ;;  %vm287_vm4 = vcmp.lt.s32.totalorder %v8265_v61, 0 }
  0xc9   :  { %v279_v27 = vsel %vm277_vm15, %v7669_v20, %v278_v21  ;;  %v2119_v28 = vsel %vm7207_vm2, 0, %v7206_v6  ;;  %v346_v30 = vadd.s32 536870912, %v345_v17  ;;  %v2162_v23 = vadd.s32 1, %v7208_v18 }
  0xca   :  { %v283_v39 = vsel %vm276_vm14, %v279_v27, %v282_v47  ;;  %v2120_v25 = vsub.s32 32, %v2119_v28  ;;  %v2121_v53 = vshll.u32 %v8608_v48, %v2119_v28  ;;  %v2124_v26 = vsub.s32 4294967266, %v2119_v28 }
  0xcb   :  { %v284_v13 = vsel %vm273_vm10, nan, %v283_v39  ;;  %v347_v31 = vshrl.u32 %v346_v30, 30  ;;  %vm2163_vm3 = vcmp.gt.s32.totalorder %v2162_v23, 0  ;;  %v8658_v48 = vadd.s32 3, %v2137_v34 }
  0xcc   :  { %1778 = vxpose.xlu0.b32.cont [2/16] %v284_v13, 128  ;;  %v2122_v50 = vshrl.u32 %v2104_v44, %v2120_v25  ;;  %v2125_v55 = vadd.s32 127, %v2124_v26  ;;  %v2164_v33 = vsel %vm2163_vm3, %v2162_v23, 0  ;;  %v341_v43 = vadd.s32 %v8617_v63, %v8623_v38 }
  0xcd   :  { %v348_v37 = vshll.u32 %v347_v31, 30  ;;  %v2166_v46 = vand.u32 31, %v2164_v33  ;;  %v8663_v24 = vshll.u32 %v2160_v52, 8  ;;  %v392_v29 = vand.u32 2139095040, %v8655_v32 }
  0xce   :  { %v2123_v57 = vor.u32 %v2122_v50, %v2121_v53  ;;  %v2126_v45 = vshll.u32 %v2125_v55, 23  ;;  %v371_v19 = vsub.s32 4, %v347_v31  ;;  %v389_v4 = vand.u32 2147483647, %v8655_v32 }
  0xcf   :  { %v8661_v35 = vsub.s32 %v345_v17, %v348_v37  ;;  %v2167_v51 = vsub.s32 32, %v2166_v46  ;;  %v2169_v41 = vshll.u32 %v8067_v54, %v2166_v46  ;;  %v2172_v63 = vshll.u32 %v8068_v56, %v2166_v46 }
  0xd0   :  { %v2127_v5 = vor.u32 4788187, %v2126_v45  ;;  %v2130_v49 = vcvt.s32.f32 %v2123_v57  ;;  %v2175_v40 = vshll.u32 %v8069_v58, %v2166_v46  ;;  %vm8676_vm5 = vcmp.le.f32.partialorder %v285_v8, 0.7853982 }
  0xd1   :  { %v351_v11 = vsub.s32 0, %v8661_v35  ;;  %v2170_v12 = vshrl.u32 %v8068_v56, %v2167_v51  ;;  %v2173_v20 = vshrl.u32 %v8069_v58, %v2167_v51  ;;  %v2176_v14 = vshrl.u32 %v8070_v60, %v2167_v51 }
  0xd2   :  { %v2128_v38 = vand.u32 2147483647, %v2127_v5  ;;  %v2165_v44 = vshrl.u32 %v2164_v33, 5  ;;  %v2178_v6 = vshll.u32 %v8070_v60, %v2166_v46  ;;  %v393_v42 = vshrl.u32 %v392_v29, 23 }
  0xd3   :  { %v7141_v36 = vmin.u32 %v351_v11, %v8661_v35  ;;  %v372_v17 = vsel %vm287_vm4, %v371_v19, %v347_v31  ;;  %v2168_v18 = vshrl.u32 %v8067_v54, %v2167_v51  ;;  %v2179_v2 = vshrl.u32 %v8071_v62, %v2167_v51 }
  0xd4   :  { %v2131_v21 = vmul.f32 %v2130_v49, %v2128_v38  ;;  %v2171_v34 = vor.u32 %v2170_v12, %v2169_v41  ;;  %v2174_v8 = vor.u32 %v2173_v20, %v2172_v63  ;;  %v2177_v52 = vor.u32 %v2176_v14, %v2175_v40 }
  0xd5   :  { %v353_v47 = vclz %v7141_v36  ;;  %v2180_v28 = vor.u32 %v2179_v2, %v2178_v6  ;;  %v2181_v30 = vshll.u32 %v8071_v62, %v2166_v46  ;;  %v2182_v23 = vshrl.u32 %v8072_v10, %v2167_v51 }
  0xd6   :  { %v2132_v27 = vxor.u32 2147483648, %v2131_v21  ;;  %vm2184_vm6 = vcmp.lt.s32.totalorder %v2165_v44, 1  ;;  %vm2185_vm7 = vcmp.lt.s32.totalorder %v2165_v44, 2  ;;  %vm2186_vm8 = vcmp.lt.s32.totalorder %v2165_v44, 3 }
  0xd7   :  { %v7142_v39 = vadd.s32 4294967294, %v353_v47  ;;  %v2183_v53 = vor.u32 %v2182_v23, %v2181_v30  ;;  %vm2187_vm9 = vcmp.lt.s32.totalorder %v2165_v44, 4  ;;  %v2188_v26 = vsel %vm2184_vm6, %v2168_v18, %v2171_v34 }
  0xd8   :  { %v2133_v25 = vsel %vm2050_vm13, %v2132_v27, %v2131_v21  ;;  %v2189_v31 = vsel %vm2187_vm9, %v2177_v52, 2102212464  ;;  %v2192_v50 = vsel %vm2184_vm6, %v2171_v34, %v2174_v8  ;;  %v2193_v37 = vsel %vm2187_vm9, %v2180_v28, 920167782 }
  0xd9   :  { %v2136_v13 = vsel %vm8631_vm11, %v8262_v0, %v2133_v25  ;;  %vm7143_vm12 = vcmp.lt.s32.totalorder %v7142_v39, 0  ;;  %v2190_v33 = vsel %vm2186_vm8, %v2174_v8, %v2189_v31  ;;  %v374_v15 = vsel %vm8676_vm5, 0, %v372_v17 }
  0xda   :  { %7672 = vcosq.f32 %v2136_v13  ;;  %v356_v55 = vsel %vm7143_vm12, 0, %v7142_v39  ;;  %v2194_v51 = vsel %vm2186_vm8, %v2177_v52, %v2193_v37  ;;  %v2196_v29 = vsel %vm2184_vm6, %v2174_v8, %v2177_v52 }
  0xdb   :  { %7674 = vsinq.f32 %v2136_v13  ;;  %v357_v46 = vsub.s32 32, %v356_v55  ;;  %v358_v57 = vshll.u32 %v8661_v35, %v356_v55  ;;  %v361_v45 = vsub.s32 4294967266, %v356_v55 }
  0xdc   :  { %v2197_v5 = vsel %vm2187_vm9, %v2183_v53, 1326507024  ;;  %v2195_v11 = vsel %vm2185_vm7, %v2192_v50, %v2194_v51  ;;  %v2191_v12 = vsel %vm2185_vm7, %v2188_v26, %v2190_v33  ;;  %v7144_v6 = vadd.s32 4294967169, %v393_v42 }
  0xdd   :  { %v359_v49 = vshrl.u32 %v341_v43, %v357_v46  ;;  %v362_v19 = vadd.s32 127, %v361_v45  ;;  %v2198_v41 = vsel %vm2186_vm8, %v2180_v28, %v2197_v5  ;;  %v2142_v43 = vand.u32 3, %v8658_v48 }
  0xde   :  { %v2199_v35 = vsel %vm2185_vm7, %v2196_v29, %v2198_v41  ;;  %v8709_v63 = vmul.u32.u64.low %v8663_v24, %v2195_v11  ;;  %v8710_v38 = vmul.u32.u64.high %v8663_v24, %v2195_v11, %v8709_v63  ;;  %v2207_v18 = vmul.u32 %v8663_v24, %v2191_v12 }
  0xdf   :  { %v360_v20 = vor.u32 %v359_v49, %v358_v57  ;;  %v363_v40 = vshll.u32 %v362_v19, 23  ;;  %v8714_v14 = vmul.u32.u64.low %v8663_v24, %v2199_v35  ;;  %v8715_v36 = vmul.u32.u64.high %v8663_v24, %v2199_v35, %v8714_v14 }
  0xe0   :  { %v378_v44 = vadd.s32 3, %v374_v15  ;;  %v2210_v2 = vadd.s32 1, %v8710_v38  ;;  %v399_v47 = vadd.s32 1, %v7144_v6  ;;  %vm2140_vm10 = vweird.f32 %v8262_v0 }
  0xe1   :  { %v364_v21 = vor.u32 4788187, %v363_v40  ;;  %v367_v17 = vcvt.s32.f32 %v360_v20  ;;  %vm2209_vm11 = vc.u32 %v8715_v36, %v8709_v63  ;;  %v396_v8 = vand.u32 8388607, %v389_v4 }
  0xe2   :  { %vm2144_vm13 = vcmp.eq.s32.totalorder %v2142_v43, 0  ;;  %vm2147_vm14 = vcmp.eq.s32.totalorder %v2142_v43, 2  ;;  %v2211_v48 = vsel %vm2209_vm11, %v2210_v2, %v8710_v38  ;;  %vm400_vm15 = vcmp.gt.s32.totalorder %v399_v47, 0 }
  0xe3   :  { %v365_v34 = vand.u32 2147483647, %v364_v21  ;;  %v2212_v28 = vadd.s32 %v2211_v48, %v2207_v18  ;;  %v401_v30 = vsel %vm400_vm15, %v399_v47, 0  ;;  %vm2143_vm0 = vcmp.lt.s32.totalorder %v2142_v43, 2  ;;  %v7912_v47 = vld [vmem:[#allocation5] sm:$0xff] }
  0xe4   :  { %v7673_v52 = vpop.eup %7672  ;;  %v8726_v39 = vand.u32 3, %v378_v44  ;;  %v403_v25 = vand.u32 31, %v401_v30  ;;  %v397_v31 = vor.u32 8388608, %v396_v8  ;;  %v8729_v55 = vshrl.u32 %v401_v30, 5 }
  0xe5   :  { %v7675_v24 = vpop.eup %7674  ;;  %v2148_v42 = vxor.u32 2147483648, %v7673_v52  ;;  %v368_v27 = vmul.f32 %v367_v17, %v365_v34  ;;  %v2213_v13 = vadd.s32 536870912, %v2212_v28  ;;  %v8732_v37 = vsub.s32 1, %v8136_v1 }
  0xe6   :  { %v2145_v23 = vxor.u32 2147483648, %v7675_v24  ;;  %v404_v33 = vsub.s32 32, %v403_v25  ;;  %v406_v15 = vshll.u32 %v8067_v54, %v403_v25  ;;  %v409_v49 = vshll.u32 %v8068_v56, %v403_v25 }
  0xe7   :  { %v2149_v53 = vsel %vm2147_vm14, %v2148_v42, %v7675_v24  ;;  %v369_v26 = vxor.u32 2147483648, %v368_v27  ;;  %v8736_v45 = vshrl.u32 %v2213_v13, 30  ;;  %v412_v41 = vshll.u32 %v8069_v58, %v403_v25 }
  0xe8   :  { %v2146_v50 = vsel %vm2144_vm13, %v7673_v52, %v2145_v23  ;;  %v407_v5 = vshrl.u32 %v8068_v56, %v404_v33  ;;  %v410_v11 = vshrl.u32 %v8069_v58, %v404_v33  ;;  %v413_v0 = vshrl.u32 %v8070_v60, %v404_v33 }
  0xe9   :  { %v2150_v46 = vsel %vm2143_vm0, %v2146_v50, %v2149_v53  ;;  %v370_v57 = vsel %vm287_vm4, %v369_v26, %v368_v27  ;;  %v2215_v19 = vshll.u32 %v8736_v45, 30  ;;  %v415_v12 = vshll.u32 %v8070_v60, %v403_v25 }
  0xea   :  { %v2151_v51 = vsel %vm2140_vm10, nan, %v2150_v46  ;;  %v373_v29 = vsel %vm8676_vm5, %v8265_v61, %v370_v57  ;;  %v8753_v59 = vrot.slane %v8141_v7, %v8732_v37  ;;  %vm384_vm1 = vcmp.eq.s32.totalorder %v8726_v39, 2 }
  0xeb   :  { %3542 = vxpose.xlu1.b32.cont [3/16] %v2151_v51, 128  ;;  %7676 = vcosq.f32 %v373_v29  ;;  %v8756_v35 = vsub.s32 %v2212_v28, %v2215_v19  ;;  %v405_v38 = vshrl.u32 %v8067_v54, %v404_v33  ;;  %v416_v20 = vshrl.u32 %v8071_v62, %v404_v33 }
  0xec   :  { %7678 = vsinq.f32 %v373_v29  ;;  %vm381_vm2 = vcmp.eq.s32.totalorder %v8726_v39, 0  ;;  %v408_v40 = vor.u32 %v407_v5, %v406_v15  ;;  %v411_v14 = vor.u32 %v410_v11, %v409_v49 }
  0xed   :  { %v418_v43 = vshll.u32 %v8071_v62, %v403_v25  ;;  %v419_v6 = vshrl.u32 %v8072_v10, %v404_v33  ;;  %vm380_vm3 = vcmp.lt.s32.totalorder %v8726_v39, 2  ;;  %v2218_v21 = vsub.s32 0, %v8756_v35 }
  0xee   :  { %v414_v17 = vor.u32 %v413_v0, %v412_v41  ;;  %v417_v18 = vor.u32 %v416_v20, %v415_v12  ;;  %vm421_vm4 = vcmp.lt.s32.totalorder %v8729_v55, 1  ;;  %vm377_vm5 = vweird.f32 %v8265_v61 }
  0xef   :  { %v420_v44 = vor.u32 %v419_v6, %v418_v43  ;;  %vm424_vm6 = vcmp.lt.s32.totalorder %v8729_v55, 4  ;;  %v437_v2 = vshll.u32 %v397_v31, 8  ;;  %v2260_v34 = vmul.f32 %v7912_v47, %v8753_v59  ;;  %v7913_v31 = vld [vmem:[#allocation7] sm:$0xff] }
  0xf0   :  { %v7209_v8 = vmin.u32 %v2218_v21, %v8756_v35  ;;  %vm422_vm7 = vcmp.lt.s32.totalorder %v8729_v55, 2  ;;  %vm423_vm8 = vcmp.lt.s32.totalorder %v8729_v55, 3  ;;  %v426_v52 = vsel %vm424_vm6, %v414_v17, 2102212464 }
  0xf1   :  { %vm2154_vm9 = vcmp.lt.s32.totalorder %v8614_v22, 0  ;;  %v425_v48 = vsel %vm421_vm4, %v405_v38, %v408_v40  ;;  %v427_v24 = vsel %vm423_vm8, %v411_v14, %v426_v52  ;;  %v429_v42 = vsel %vm421_vm4, %v408_v40, %v411_v14 }
  0xf2   :  { %v430_v27 = vsel %vm424_vm6, %v417_v18, 920167782  ;;  %v2208_v28 = vadd.s32 %v8709_v63, %v8715_v36  ;;  %v2220_v30 = vclz %v7209_v8  ;;  %v433_v23 = vsel %vm421_vm4, %v411_v14, %v414_v17 }
  0xf3   :  { %v8789_v25 = vrot.slane %v8143_v9, %v8732_v37  ;;  %v2238_v53 = vsub.s32 4, %v8736_v45  ;;  %v431_v26 = vsel %vm423_vm8, %v414_v17, %v430_v27  ;;  %v434_v13 = vsel %vm424_vm6, %v420_v44, 1326507024 }
  0xf4   :  { %v8796_v50 = vadd.f32 %v7913_v31, %v2260_v34  ;;  %v7210_v36 = vadd.s32 4294967294, %v2220_v30  ;;  %v428_v33 = vsel %vm422_vm7, %v425_v48, %v427_v24  ;;  %v432_v46 = vsel %vm422_vm7, %v429_v42, %v431_v26 }
  0xf5   :  { %v7677_v63 = vpop.eup %7676  ;;  %v435_v57 = vsel %vm423_vm8, %v417_v18, %v434_v13  ;;  %v8806_v5 = vmul.u32.u64.low %v437_v2, %v432_v46  ;;  %v8807_v49 = vmul.u32.u64.high %v437_v2, %v432_v46, %v8806_v5  ;;  %v497_v20 = vmul.f32 %v7912_v47, %v8789_v25 }
  0xf6   :  { %v7679_v15 = vpop.eup %7678  ;;  %v385_v51 = vxor.u32 2147483648, %v7677_v63  ;;  %v436_v29 = vsel %vm422_vm7, %v433_v23, %v435_v57  ;;  %vm7211_vm12 = vcmp.lt.s32.totalorder %v7210_v36, 0  ;;  %v2268_v38 = vand.u32 2147483647, %v8796_v50 }
  0xf7   :  { %v382_v19 = vxor.u32 2147483648, %v7679_v15  ;;  %v8809_v11 = vmul.u32.u64.low %v437_v2, %v436_v29  ;;  %v8810_v41 = vmul.u32.u64.high %v437_v2, %v436_v29, %v8809_v11  ;;  %v2223_v12 = vsel %vm7211_vm12, 0, %v7210_v36  ;;  %v8842_v36 = vld [vmem:[#allocation5 + $0x8] sm:$0xff] }
  0xf8   :  { %v386_v0 = vsel %vm384_vm1, %v385_v51, %v7679_v15  ;;  %v2224_v40 = vsub.s32 32, %v2223_v12  ;;  %v2225_v14 = vshll.u32 %v8756_v35, %v2223_v12  ;;  %v2228_v43 = vsub.s32 4294967266, %v2223_v12 }
  0xf9   :  { %v383_v55 = vsel %vm381_vm2, %v7677_v63, %v382_v19  ;;  %v444_v21 = vmul.u32 %v437_v2, %v428_v33  ;;  %v447_v17 = vadd.s32 1, %v8807_v49  ;;  %v2271_v18 = vand.u32 2139095040, %v8796_v50 }
  0xfa   :  { %v387_v6 = vsel %vm380_vm3, %v383_v55, %v386_v0  ;;  %v2226_v34 = vshrl.u32 %v2208_v28, %v2224_v40  ;;  %v2229_v47 = vadd.s32 127, %v2228_v43  ;;  %v2239_v8 = vsel %vm2154_vm9, %v2238_v53, %v8736_v45  ;;  %v8858_v55 = vld [vmem:[#allocation7 + $0x8] sm:$0xff] }
  0xfb   :  { %v388_v44 = vsel %vm377_vm5, nan, %v387_v6  ;;  %vm8830_vm10 = vcmp.le.f32.partialorder %v2152_v16, 0.7853982  ;;  %vm446_vm11 = vc.u32 %v8810_v41, %v8806_v5  ;;  %v2272_v35 = vshrl.u32 %v2271_v18, 23 }
  0xfc   :  { %1779 = vxpose.xlu0.b32.cont [3/16] %v388_v44, 128  ;;  %v2227_v2 = vor.u32 %v2226_v34, %v2225_v14  ;;  %v2230_v52 = vshll.u32 %v2229_v47, 23  ;;  %v448_v61 = vsel %vm446_vm11, %v447_v17, %v8807_v49  ;;  %v2275_v48 = vand.u32 8388607, %v2268_v38 }
  0xfd   :  { %v2241_v45 = vsel %vm8830_vm10, 0, %v2239_v8  ;;  %v449_v24 = vadd.s32 %v448_v61, %v444_v21  ;;  %v7212_v42 = vadd.s32 4294967169, %v2272_v35  ;;  %v8840_v28 = vadd.f32 %v7913_v31, %v497_v20 }
  0xfe   :  { %v2231_v27 = vor.u32 4788187, %v2230_v52  ;;  %v2234_v16 = vcvt.s32.f32 %v2227_v2  ;;  %v2245_v26 = vadd.s32 3, %v2241_v45  ;;  %v2276_v13 = vor.u32 8388608, %v2275_v48 }
  0xff   :  { %v450_v30 = vadd.s32 536870912, %v449_v24  ;;  %v2278_v23 = vadd.s32 1, %v7212_v42  ;;  %v2261_v33 = vmul.f32 %v8842_v36, %v8753_v59  ;;  %v508_v15 = vand.u32 2139095040, %v8840_v28 }
 0x100   :  { %v2232_v53 = vand.u32 2147483647, %v2231_v27  ;;  %v8847_v49 = vand.u32 3, %v2245_v26  ;;  %vm391_vm14 = vcmp.lt.s32.totalorder %v8655_v32, 0  ;;  %v8851_v19 = vadd.s32 %v8806_v5, %v8810_v41 }
 0x101   :  { %v451_v63 = vshrl.u32 %v450_v30, 30  ;;  %vm2279_vm13 = vcmp.gt.s32.totalorder %v2278_v23, 0  ;;  %v8853_v11 = vshll.u32 %v2276_v13, 8  ;;  %v505_v20 = vand.u32 2147483647, %v8840_v28 }
 0x102   :  { %v2235_v46 = vmul.f32 %v2234_v16, %v2232_v53  ;;  %v2280_v57 = vsel %vm2279_vm13, %v2278_v23, 0  ;;  %v8861_v40 = vadd.f32 %v8858_v55, %v2261_v33  ;;  %v509_v41 = vshrl.u32 %v508_v15, 23 }
 0x103   :  { %v452_v51 = vshll.u32 %v451_v63, 30  ;;  %v2282_v29 = vand.u32 31, %v2280_v57  ;;  %v2281_v17 = vshrl.u32 %v2280_v57, 5  ;;  %v475_v35 = vsub.s32 4, %v451_v63 }
 0x104   :  { %v2236_v31 = vxor.u32 2147483648, %v2235_v46  ;;  %vm2251_vm15 = vcmp.eq.s32.totalorder %v8847_v49, 2  ;;  %v8881_v48 = vand.u32 8388607, %v505_v20  ;;  %vm2248_vm0 = vcmp.eq.s32.totalorder %v8847_v49, 0 }
 0x105   :  { %v8855_v0 = vsub.s32 %v449_v24, %v452_v51  ;;  %v2283_v12 = vsub.s32 32, %v2282_v29  ;;  %v2285_v43 = vshll.u32 %v8067_v54, %v2282_v29  ;;  %v2288_v5 = vshll.u32 %v8068_v56, %v2282_v29 }
 0x106   :  { %v2237_v14 = vsel %vm2154_vm9, %v2236_v31, %v2235_v46  ;;  %v2291_v18 = vshll.u32 %v8069_v58, %v2282_v29  ;;  %v2294_v2 = vshll.u32 %v8070_v60, %v2282_v29  ;;  %v7148_v27 = vadd.s32 4294967169, %v509_v41 }
 0x107   :  { %v2240_v6 = vsel %vm8830_vm10, %v8614_v22, %v2237_v14  ;;  %v455_v21 = vsub.s32 0, %v8855_v0  ;;  %v2286_v44 = vshrl.u32 %v8068_v56, %v2283_v12  ;;  %v2289_v34 = vshrl.u32 %v8069_v58, %v2283_v12 }
 0x108   :  { %7680 = vcosq.f32 %v2240_v6  ;;  %v2292_v47 = vshrl.u32 %v8070_v60, %v2283_v12  ;;  %v2295_v61 = vshrl.u32 %v8071_v62, %v2283_v12  ;;  %v2284_v24 = vshrl.u32 %v8067_v54, %v2283_v12 }
 0x109   :  { %7682 = vsinq.f32 %v2240_v6  ;;  %v7145_v8 = vmin.u32 %v455_v21, %v8855_v0  ;;  %v2287_v39 = vor.u32 %v2286_v44, %v2285_v43  ;;  %v2290_v52 = vor.u32 %v2289_v34, %v2288_v5 }
 0x10a   :  { %v2293_v42 = vor.u32 %v2292_v47, %v2291_v18  ;;  %vm2247_vm1 = vcmp.lt.s32.totalorder %v8847_v49, 2  ;;  %vm8888_vm2 = vcmp.le.f32.partialorder %v389_v4, 0.7853982  ;;  %v2296_v30 = vor.u32 %v2295_v61, %v2294_v2 }
 0x10b   :  { %v457_v45 = vclz %v7145_v8  ;;  %v2297_v23 = vshll.u32 %v8071_v62, %v2282_v29  ;;  %v2298_v53 = vshrl.u32 %v8072_v10, %v2283_v12  ;;  %vm2300_vm3 = vcmp.lt.s32.totalorder %v2281_v17, 1 }
 0x10c   :  { %vm2244_vm4 = vweird.f32 %v8614_v22  ;;  %v476_v13 = vsel %vm391_vm14, %v475_v35, %v451_v63  ;;  %vm2302_vm5 = vcmp.lt.s32.totalorder %v2281_v17, 3  ;;  %vm2303_vm6 = vcmp.lt.s32.totalorder %v2281_v17, 4 }
 0x10d   :  { %v7146_v26 = vadd.s32 4294967294, %v457_v45  ;;  %v2299_v33 = vor.u32 %v2298_v53, %v2297_v23  ;;  %vm2301_vm7 = vcmp.lt.s32.totalorder %v2281_v17, 2  ;;  %v2305_v4 = vsel %vm2303_vm6, %v2293_v42, 2102212464 }
 0x10e   :  { %v2308_v46 = vsel %vm2300_vm3, %v2287_v39, %v2290_v52  ;;  %v2304_v57 = vsel %vm2300_vm3, %v2284_v24, %v2287_v39  ;;  %v2306_v15 = vsel %vm2302_vm5, %v2290_v52, %v2305_v4  ;;  %v2309_v51 = vsel %vm2303_vm6, %v2296_v30, 920167782 }
 0x10f   :  { %vm7147_vm8 = vcmp.lt.s32.totalorder %v7146_v26, 0  ;;  %v2310_v31 = vsel %vm2302_vm5, %v2293_v42, %v2309_v51  ;;  %v2312_v12 = vsel %vm2300_vm3, %v2290_v52, %v2293_v42  ;;  %v2313_v14 = vsel %vm2303_vm6, %v2299_v33, 1326507024 }
 0x110   :  { %v460_v29 = vsel %vm7147_vm8, 0, %v7146_v26  ;;  %v2311_v41 = vsel %vm2301_vm7, %v2308_v46, %v2310_v31  ;;  %v2307_v21 = vsel %vm2301_vm7, %v2304_v57, %v2306_v15  ;;  %v2314_v18 = vsel %vm2302_vm5, %v2296_v30, %v2313_v14 }
 0x111   :  { %v461_v63 = vsub.s32 32, %v460_v29  ;;  %v462_v43 = vshll.u32 %v8855_v0, %v460_v29  ;;  %v465_v5 = vsub.s32 4294967266, %v460_v29  ;;  %v2315_v0 = vsel %vm2301_vm7, %v2312_v12, %v2314_v18 }
 0x112   :  { %v7681_v6 = vpop.eup %7680  ;;  %v8907_v44 = vmul.u32.u64.low %v8853_v11, %v2311_v41  ;;  %v8908_v34 = vmul.u32.u64.high %v8853_v11, %v2311_v41, %v8907_v44  ;;  %v8914_v52 = vmul.u32.u64.low %v8853_v11, %v2315_v0  ;;  %v8915_v61 = vmul.u32.u64.high %v8853_v11, %v2315_v0, %v8914_v52 }
 0x113   :  { %v7683_v47 = vpop.eup %7682  ;;  %v2252_v8 = vxor.u32 2147483648, %v7681_v6  ;;  %v463_v35 = vshrl.u32 %v8851_v19, %v461_v63  ;;  %v466_v2 = vadd.s32 127, %v465_v5  ;;  %v515_v45 = vadd.s32 1, %v7148_v27 }
 0x114   :  { %v2249_v39 = vxor.u32 2147483648, %v7683_v47  ;;  %v478_v23 = vsel %vm8888_vm2, 0, %v476_v13  ;;  %v2323_v17 = vmul.u32 %v8853_v11, %v2307_v21  ;;  %v2326_v53 = vadd.s32 1, %v8908_v34 }
 0x115   :  { %v2253_v24 = vsel %vm2251_vm15, %v2252_v8, %v7683_v47  ;;  %v464_v42 = vor.u32 %v463_v35, %v462_v43  ;;  %v467_v30 = vshll.u32 %v466_v2, 23  ;;  %vm516_vm9 = vcmp.gt.s32.totalorder %v515_v45, 0 }
 0x116   :  { %v2250_v19 = vsel %vm2248_vm0, %v7681_v6, %v2249_v39  ;;  %v517_v4 = vsel %vm516_vm9, %v515_v45, 0  ;;  %vm2325_vm12 = vc.u32 %v8915_v61, %v8907_v44  ;;  %v482_v51 = vadd.s32 3, %v478_v23 }
 0x117   :  { %v2254_v26 = vsel %vm2247_vm1, %v2250_v19, %v2253_v24  ;;  %v468_v27 = vor.u32 4788187, %v467_v30  ;;  %v471_v33 = vcvt.s32.f32 %v464_v42  ;;  %v8931_v13 = vshrl.u32 %v517_v4, 5 }
 0x118   :  { %v2255_v46 = vsel %vm2244_vm4, nan, %v2254_v26  ;;  %v2327_v11 = vsel %vm2325_vm12, %v2326_v53, %v8908_v34  ;;  %v519_v15 = vand.u32 31, %v517_v4  ;;  %v513_v49 = vor.u32 8388608, %v8881_v48 }
 0x119   :  { %3543 = vxpose.xlu1.b32.cont [4/16] %v2255_v46, 128  ;;  %v469_v57 = vand.u32 2147483647, %v468_v27  ;;  %v2328_v29 = vadd.s32 %v2327_v11, %v2323_v17  ;;  %v2375_v31 = vand.u32 2139095040, %v8861_v40  ;;  %vm537_vm10 = vcmp.lt.s32.totalorder %v8931_v13, 1 }
 0x11a   :  { %v520_v14 = vsub.s32 32, %v519_v15  ;;  %v522_v22 = vshll.u32 %v8067_v54, %v519_v15  ;;  %v525_v63 = vshll.u32 %v8068_v56, %v519_v15  ;;  %v528_v5 = vshll.u32 %v8069_v58, %v519_v15 }
 0x11b   :  { %v472_v12 = vmul.f32 %v471_v33, %v469_v57  ;;  %v2329_v43 = vadd.s32 536870912, %v2328_v29  ;;  %v531_v41 = vshll.u32 %v8070_v60, %v519_v15  ;;  %v534_v18 = vshll.u32 %v8071_v62, %v519_v15 }
 0x11c   :  { %v523_v21 = vshrl.u32 %v8068_v56, %v520_v14  ;;  %v526_v48 = vshrl.u32 %v8069_v58, %v520_v14  ;;  %v529_v47 = vshrl.u32 %v8070_v60, %v520_v14  ;;  %v532_v8 = vshrl.u32 %v8071_v62, %v520_v14 }
 0x11d   :  { %v473_v6 = vxor.u32 2147483648, %v472_v12  ;;  %v2330_v34 = vshrl.u32 %v2329_v43, 30  ;;  %v535_v35 = vshrl.u32 %v8072_v10, %v520_v14  ;;  %vm539_vm11 = vcmp.lt.s32.totalorder %v8931_v13, 3 }
 0x11e   :  { %v524_v0 = vor.u32 %v523_v21, %v522_v22  ;;  %v527_v39 = vor.u32 %v526_v48, %v525_v63  ;;  %v530_v24 = vor.u32 %v529_v47, %v528_v5  ;;  %vm540_vm13 = vcmp.lt.s32.totalorder %v8931_v13, 4 }
 0x11f   :  { %v474_v2 = vsel %vm391_vm14, %v473_v6, %v472_v12  ;;  %v2331_v45 = vshll.u32 %v2330_v34, 30  ;;  %v521_v42 = vshrl.u32 %v8067_v54, %v520_v14  ;;  %v533_v30 = vor.u32 %v532_v8, %v531_v41 }
 0x120   :  { %v477_v52 = vsel %vm8888_vm2, %v8655_v32, %v474_v2  ;;  %v536_v23 = vor.u32 %v535_v35, %v534_v18  ;;  %vm538_vm14 = vcmp.lt.s32.totalorder %v8931_v13, 2  ;;  %v2376_v17 = vshrl.u32 %v2375_v31, 23 }
 0x121   :  { %7684 = vcosq.f32 %v477_v52  ;;  %v8955_v19 = vsub.s32 %v2328_v29, %v2331_v45  ;;  %v542_v53 = vsel %vm540_vm13, %v530_v24, 2102212464  ;;  %v545_v16 = vsel %vm537_vm10, %v524_v0, %v527_v39 }
 0x122   :  { %7686 = vsinq.f32 %v477_v52  ;;  %v546_v26 = vsel %vm540_vm13, %v533_v30, 920167782  ;;  %v553_v27 = vshll.u32 %v513_v49, 8  ;;  %v483_v33 = vand.u32 3, %v482_v51 }
 0x123   :  { %v2334_v4 = vsub.s32 0, %v8955_v19  ;;  %v2354_v46 = vsub.s32 4, %v2330_v34  ;;  %v547_v57 = vsel %vm539_vm11, %v530_v24, %v546_v26  ;;  %v541_v11 = vsel %vm537_vm10, %v521_v42, %v524_v0 }
 0x124   :  { %v548_v15 = vsel %vm538_vm14, %v545_v16, %v547_v57  ;;  %v549_v29 = vsel %vm537_vm10, %v527_v39, %v530_v24  ;;  %v550_v31 = vsel %vm540_vm13, %v536_v23, 1326507024  ;;  %vm481_vm15 = vweird.f32 %v8655_v32 }
 0x125   :  { %v7213_v51 = vmin.u32 %v2334_v4, %v8955_v19  ;;  %v543_v49 = vsel %vm539_vm11, %v527_v39, %v542_v53  ;;  %v551_v12 = vsel %vm539_vm11, %v533_v30, %v550_v31  ;;  %v7216_v14 = vadd.s32 4294967169, %v2376_v17 }
 0x126   :  { %vm2270_vm0 = vcmp.lt.s32.totalorder %v8796_v50, 0  ;;  %v552_v22 = vsel %vm538_vm14, %v549_v29, %v551_v12  ;;  %v8984_v63 = vmul.u32.u64.low %v553_v27, %v548_v15  ;;  %v8985_v43 = vmul.u32.u64.high %v553_v27, %v548_v15, %v8984_v63 }
 0x127   :  { %vm8990_vm1 = vcmp.le.f32.partialorder %v2268_v38, 0.7853982  ;;  %v2336_v41 = vclz %v7213_v51  ;;  %v2355_v6 = vsel %vm2270_vm0, %v2354_v46, %v2330_v34  ;;  %v2372_v21 = vand.u32 2147483647, %v8861_v40 }
 0x128   :  { %v544_v48 = vsel %vm538_vm14, %v541_v11, %v543_v49  ;;  %v8999_v18 = vmul.u32.u64.low %v553_v27, %v552_v22  ;;  %v9000_v47 = vmul.u32.u64.high %v553_v27, %v552_v22, %v8999_v18  ;;  %v2382_v8 = vadd.s32 1, %v7216_v14 }
 0x129   :  { %vm484_vm2 = vcmp.lt.s32.totalorder %v483_v33, 2  ;;  %vm485_vm3 = vcmp.eq.s32.totalorder %v483_v33, 0  ;;  %vm488_vm4 = vcmp.eq.s32.totalorder %v483_v33, 2  ;;  %v7214_v38 = vadd.s32 4294967294, %v2336_v41 }
 0x12a   :  { %v2324_v2 = vadd.s32 %v8907_v44, %v8915_v61  ;;  %v2357_v34 = vsel %vm8990_vm1, 0, %v2355_v6  ;;  %v563_v0 = vadd.s32 1, %v8985_v43  ;;  %vm2383_vm5 = vcmp.gt.s32.totalorder %v2382_v8, 0 }
 0x12b   :  { %v7685_v35 = vpop.eup %7684  ;;  %vm7215_vm6 = vcmp.lt.s32.totalorder %v7214_v38, 0  ;;  %v560_v52 = vmul.u32 %v553_v27, %v544_v48  ;;  %v2384_v45 = vsel %vm2383_vm5, %v2382_v8, 0  ;;  %vm562_vm7 = vc.u32 %v9000_v47, %v8984_v63 }
 0x12c   :  { %v7687_v13 = vpop.eup %7686  ;;  %v489_v39 = vxor.u32 2147483648, %v7685_v35  ;;  %v2339_v42 = vsel %vm7215_vm6, 0, %v7214_v38  ;;  %v2379_v30 = vand.u32 8388607, %v2372_v21  ;;  %v2361_v16 = vadd.s32 3, %v2357_v34 }
 0x12d   :  { %v486_v24 = vxor.u32 2147483648, %v7687_v13  ;;  %v2340_v61 = vsub.s32 32, %v2339_v42  ;;  %v2341_v23 = vshll.u32 %v8955_v19, %v2339_v42  ;;  %v2344_v17 = vsub.s32 4294967266, %v2339_v42 }
 0x12e   :  { %v490_v44 = vsel %vm488_vm4, %v489_v39, %v7687_v13  ;;  %v564_v26 = vsel %vm562_vm7, %v563_v0, %v8985_v43  ;;  %v2386_v27 = vand.u32 31, %v2384_v45  ;;  %v2380_v29 = vor.u32 8388608, %v2379_v30 }
 0x12f   :  { %v487_v53 = vsel %vm485_vm3, %v7685_v35, %v486_v24  ;;  %v2342_v46 = vshrl.u32 %v2324_v2, %v2340_v61  ;;  %v2345_v57 = vadd.s32 127, %v2344_v17  ;;  %v565_v11 = vadd.s32 %v564_v26, %v560_v52 }
 0x130   :  { %v491_v4 = vsel %vm484_vm2, %v487_v53, %v490_v44  ;;  %v2387_v31 = vsub.s32 32, %v2386_v27  ;;  %v2389_v51 = vshll.u32 %v8067_v54, %v2386_v27  ;;  %v2392_v14 = vshll.u32 %v8068_v56, %v2386_v27 }
 0x131   :  { %v492_v15 = vsel %vm481_vm15, nan, %v491_v4  ;;  %v2343_v19 = vor.u32 %v2342_v46, %v2341_v23  ;;  %v2346_v49 = vshll.u32 %v2345_v57, 23  ;;  %v566_v12 = vadd.s32 536870912, %v565_v11  ;;  %v7916_v46 = vld [vmem:[#allocation5 + $0x10] sm:$0xff] }
 0x132   :  { %1780 = vxpose.xlu0.b32.cont [4/16] %v492_v15, 128  ;;  %v2390_v22 = vshrl.u32 %v8068_v56, %v2387_v31  ;;  %v2393_v33 = vshrl.u32 %v8069_v58, %v2387_v31  ;;  %v2395_v43 = vshll.u32 %v8069_v58, %v2386_v27  ;;  %v2396_v41 = vshrl.u32 %v8070_v60, %v2387_v31 }
 0x133   :  { %v2347_v32 = vor.u32 4788187, %v2346_v49  ;;  %v2350_v6 = vcvt.s32.f32 %v2343_v19  ;;  %v567_v48 = vshrl.u32 %v566_v12, 30  ;;  %v2398_v18 = vshll.u32 %v8070_v60, %v2386_v27 }
 0x134   :  { %v9025_v8 = vand.u32 3, %v2361_v16  ;;  %v2385_v38 = vshrl.u32 %v2384_v45, 5  ;;  %v2399_v35 = vshrl.u32 %v8071_v62, %v2387_v31  ;;  %v2401_v0 = vshll.u32 %v8071_v62, %v2386_v27 }
 0x135   :  { %v2348_v2 = vand.u32 2147483647, %v2347_v32  ;;  %v568_v34 = vshll.u32 %v567_v48, 30  ;;  %v9029_v13 = vshll.u32 %v2380_v29, 8  ;;  %v2388_v39 = vshrl.u32 %v8067_v54, %v2387_v31 }
 0x136   :  { %v2391_v52 = vor.u32 %v2390_v22, %v2389_v51  ;;  %v2400_v24 = vor.u32 %v2399_v35, %v2398_v18  ;;  %v2402_v42 = vshrl.u32 %v8072_v10, %v2387_v31  ;;  %v2394_v61 = vor.u32 %v2393_v33, %v2392_v14 }
 0x137   :  { %v2351_v30 = vmul.f32 %v2350_v6, %v2348_v2  ;;  %v9033_v44 = vsub.s32 %v565_v11, %v568_v34  ;;  %v2397_v23 = vor.u32 %v2396_v41, %v2395_v43  ;;  %vm507_vm8 = vcmp.lt.s32.totalorder %v8840_v28, 0 }
 0x138   :  { %v2403_v45 = vor.u32 %v2402_v42, %v2401_v0  ;;  %vm2404_vm9 = vcmp.lt.s32.totalorder %v2385_v38, 1  ;;  %vm2407_vm12 = vcmp.lt.s32.totalorder %v2385_v38, 4  ;;  %v498_v17 = vmul.f32 %v8842_v36, %v8789_v25 }
 0x139   :  { %v2352_v53 = vxor.u32 2147483648, %v2351_v30  ;;  %v571_v16 = vsub.s32 0, %v9033_v44  ;;  %vm2406_vm10 = vcmp.lt.s32.totalorder %v2385_v38, 3  ;;  %v2409_v26 = vsel %vm2407_vm12, %v2397_v23, 2102212464 }
 0x13a   :  { %vm2405_vm11 = vcmp.lt.s32.totalorder %v2385_v38, 2  ;;  %v2408_v27 = vsel %vm2404_vm9, %v2388_v39, %v2391_v52  ;;  %v2413_v4 = vsel %vm2407_vm12, %v2400_v24, 920167782  ;;  %v2262_v57 = vmul.f32 %v7916_v46, %v8753_v59 }
 0x13b   :  { %v2353_v11 = vsel %vm2270_vm0, %v2352_v53, %v2351_v30  ;;  %v7149_v15 = vmin.u32 %v571_v16, %v9033_v44  ;;  %v2410_v36 = vsel %vm2406_vm10, %v2394_v61, %v2409_v26  ;;  %v2412_v29 = vsel %vm2404_vm9, %v2391_v52, %v2394_v61 }
 0x13c   :  { %v2356_v31 = vsel %vm8990_vm1, %v8796_v50, %v2353_v11  ;;  %v2414_v51 = vsel %vm2406_vm10, %v2397_v23, %v2413_v4  ;;  %v2416_v19 = vsel %vm2404_vm9, %v2394_v61, %v2397_v23  ;;  %v2417_v49 = vsel %vm2407_vm12, %v2403_v45, 1326507024 }
 0x13d   :  { %7688 = vcosq.f32 %v2356_v31  ;;  %v573_v12 = vclz %v7149_v15  ;;  %v591_v14 = vsub.s32 4, %v567_v48  ;;  %v9055_v22 = vadd.f32 %v8858_v55, %v498_v17 }
 0x13e   :  { %7690 = vsinq.f32 %v2356_v31  ;;  %v2411_v33 = vsel %vm2405_vm11, %v2408_v27, %v2410_v36  ;;  %v2415_v43 = vsel %vm2405_vm11, %v2412_v29, %v2414_v51  ;;  %v2418_v5 = vsel %vm2406_vm10, %v2400_v24, %v2417_v49 }
 0x13f   :  { %v7150_v41 = vadd.s32 4294967294, %v573_v12  ;;  %v2419_v32 = vsel %vm2405_vm11, %v2416_v19, %v2418_v5  ;;  %v9062_v6 = vmul.u32.u64.low %v9029_v13, %v2415_v43  ;;  %v9063_v18 = vmul.u32.u64.high %v9029_v13, %v2415_v43, %v9062_v6 }
 0x140   :  { %vm9067_vm13 = vcmp.le.f32.partialorder %v505_v20, 0.7853982  ;;  %v561_v55 = vadd.s32 %v8984_v63, %v9000_v47  ;;  %v9074_v2 = vmul.u32.u64.low %v9029_v13, %v2419_v32  ;;  %v9075_v34 = vmul.u32.u64.high %v9029_v13, %v2419_v32, %v9074_v2  ;;  %v7917_v63 = vld [vmem:[#allocation7 + $0x10] sm:$0xff] }
 0x141   :  { %vm7151_vm14 = vcmp.lt.s32.totalorder %v7150_v41, 0  ;;  %v592_v38 = vsel %vm507_vm8, %v591_v14, %v567_v48  ;;  %v609_v0 = vand.u32 2147483647, %v9055_v22  ;;  %v612_v39 = vand.u32 2139095040, %v9055_v22 }
 0x142   :  { %vm2360_vm15 = vweird.f32 %v8796_v50  ;;  %vm2363_vm0 = vcmp.lt.s32.totalorder %v9025_v8, 2  ;;  %v576_v20 = vsel %vm7151_vm14, 0, %v7150_v41  ;;  %v2427_v52 = vmul.u32 %v9029_v13, %v2411_v33 }
 0x143   :  { %v9084_v47 = vadd.f32 %v7917_v63, %v2262_v57  ;;  %v577_v24 = vsub.s32 32, %v576_v20  ;;  %v578_v42 = vshll.u32 %v9033_v44, %v576_v20  ;;  %v581_v30 = vsub.s32 4294967266, %v576_v20 }
 0x144   :  { %v2430_v48 = vadd.s32 1, %v9063_v18  ;;  %vm2364_vm1 = vcmp.eq.s32.totalorder %v9025_v8, 0  ;;  %v594_v61 = vsel %vm9067_vm13, 0, %v592_v38  ;;  %vm2429_vm2 = vc.u32 %v9075_v34, %v9062_v6 }
 0x145   :  { %v613_v23 = vshrl.u32 %v612_v39, 23  ;;  %v579_v45 = vshrl.u32 %v561_v55, %v577_v24  ;;  %v582_v17 = vadd.s32 127, %v581_v30  ;;  %v616_v53 = vand.u32 8388607, %v609_v0 }
 0x146   :  { %v2431_v13 = vsel %vm2429_vm2, %v2430_v48, %v9063_v18  ;;  %vm2367_vm3 = vcmp.eq.s32.totalorder %v9025_v8, 2  ;;  %v2476_v26 = vand.u32 2147483647, %v9084_v47  ;;  %v2479_v11 = vand.u32 2139095040, %v9084_v47 }
 0x147   :  { %v2432_v44 = vadd.s32 %v2431_v13, %v2427_v52  ;;  %v7152_v16 = vadd.s32 4294967169, %v613_v23  ;;  %v7689_v27 = vpop.eup %7688  ;;  %v580_v4 = vor.u32 %v579_v45, %v578_v42  ;;  %v583_v57 = vshll.u32 %v582_v17, 23 }
 0x148   :  { %v499_v15 = vmul.f32 %v7916_v46, %v8789_v25  ;;  %v7691_v36 = vpop.eup %7690  ;;  %v2368_v29 = vxor.u32 2147483648, %v7689_v27  ;;  %v598_v31 = vadd.s32 3, %v594_v61  ;;  %v617_v33 = vor.u32 8388608, %v616_v53 }
 0x149   :  { %v2433_v51 = vadd.s32 536870912, %v2432_v44  ;;  %v619_v19 = vadd.s32 1, %v7152_v16  ;;  %v2365_v49 = vxor.u32 2147483648, %v7691_v36  ;;  %v584_v12 = vor.u32 4788187, %v583_v57 }
 0x14a   :  { %v587_v14 = vcvt.s32.f32 %v580_v4  ;;  %v2369_v43 = vsel %vm2367_vm3, %v2368_v29, %v7691_v36  ;;  %v9105_v41 = vand.u32 8388607, %v2476_v26  ;;  %v2480_v55 = vshrl.u32 %v2479_v11, 23 }
 0x14b   :  { %v9101_v5 = vshrl.u32 %v2433_v51, 30  ;;  %vm620_vm4 = vcmp.gt.s32.totalorder %v619_v19, 0  ;;  %v2366_v46 = vsel %vm2364_vm1, %v7689_v27, %v2365_v49  ;;  %v585_v32 = vand.u32 2147483647, %v584_v12 }
 0x14c   :  { %v621_v18 = vsel %vm620_vm4, %v619_v19, 0  ;;  %v2370_v2 = vsel %vm2363_vm0, %v2366_v46, %v2369_v43  ;;  %v9114_v52 = vand.u32 3, %v598_v31  ;;  %v2428_v42 = vadd.s32 %v9062_v6, %v9075_v34 }
 0x14d   :  { %v2435_v38 = vshll.u32 %v9101_v5, 30  ;;  %v2371_v39 = vsel %vm2360_vm15, nan, %v2370_v2  ;;  %v588_v20 = vmul.f32 %v587_v14, %v585_v32  ;;  %v623_v24 = vand.u32 31, %v621_v18 }
 0x14e   :  { %3544 = vxpose.xlu1.b32.cont [5/16] %v2371_v39, 128  ;;  %v9119_v48 = vshll.u32 %v617_v33, 8  ;;  %v9121_v61 = vadd.f32 %v7917_v63, %v499_v15  ;;  %v7220_v45 = vadd.s32 4294967169, %v2480_v55  ;;  %v2484_v17 = vor.u32 8388608, %v9105_v41 }
 0x14f   :  { %v9117_v30 = vsub.s32 %v2432_v44, %v2435_v38  ;;  %v589_v8 = vxor.u32 2147483648, %v588_v20  ;;  %v624_v23 = vsub.s32 32, %v623_v24  ;;  %v622_v13 = vshrl.u32 %v621_v18, 5 }
 0x150   :  { %v626_v53 = vshll.u32 %v8067_v54, %v623_v24  ;;  %v629_v16 = vshll.u32 %v8068_v56, %v623_v24  ;;  %v632_v44 = vshll.u32 %v8069_v58, %v623_v24  ;;  %vm2374_vm5 = vcmp.lt.s32.totalorder %v8861_v40, 0 }
 0x151   :  { %v2438_v50 = vsub.s32 0, %v9117_v30  ;;  %v590_v6 = vsel %vm507_vm8, %v589_v8, %v588_v20  ;;  %v627_v34 = vshrl.u32 %v8068_v56, %v624_v23  ;;  %v630_v63 = vshrl.u32 %v8069_v58, %v624_v23 }
 0x152   :  { %v593_v27 = vsel %vm9067_vm13, %v8840_v28, %v590_v6  ;;  %v2458_v57 = vsub.s32 4, %v9101_v5  ;;  %v633_v11 = vshrl.u32 %v8070_v60, %v624_v23  ;;  %v625_v15 = vshrl.u32 %v8067_v54, %v624_v23 }
 0x153   :  { %v7217_v4 = vmin.u32 %v2438_v50, %v9117_v30  ;;  %7692 = vcosq.f32 %v593_v27  ;;  %v635_v36 = vshll.u32 %v8070_v60, %v623_v24  ;;  %v2486_v29 = vadd.s32 1, %v7220_v45 }
 0x154   :  { %7694 = vsinq.f32 %v593_v27  ;;  %v628_v51 = vor.u32 %v627_v34, %v626_v53  ;;  %v631_v19 = vor.u32 %v630_v63, %v629_v16  ;;  %vm604_vm6 = vcmp.eq.s32.totalorder %v9114_v52, 2 }
 0x155   :  { %v2440_v31 = vclz %v7217_v4  ;;  %v634_v35 = vor.u32 %v633_v11, %v632_v44  ;;  %v636_v49 = vshrl.u32 %v8071_v62, %v624_v23  ;;  %v638_v12 = vshll.u32 %v8071_v62, %v623_v24 }
 0x156   :  { %vm641_vm7 = vcmp.lt.s32.totalorder %v622_v13, 1  ;;  %vm601_vm8 = vcmp.eq.s32.totalorder %v9114_v52, 0  ;;  %v639_v33 = vshrl.u32 %v8072_v10, %v624_v23  ;;  %vm642_vm9 = vcmp.lt.s32.totalorder %v622_v13, 2 }
 0x157   :  { %v7218_v14 = vadd.s32 4294967294, %v2440_v31  ;;  %vm644_vm12 = vcmp.lt.s32.totalorder %v622_v13, 4  ;;  %vm600_vm10 = vcmp.lt.s32.totalorder %v9114_v52, 2  ;;  %v637_v43 = vor.u32 %v636_v49, %v635_v36 }
 0x158   :  { %vm643_vm11 = vcmp.lt.s32.totalorder %v622_v13, 3  ;;  %v645_v46 = vsel %vm641_vm7, %v625_v15, %v628_v51  ;;  %v646_v32 = vsel %vm644_vm12, %v634_v35, 2102212464  ;;  %vm597_vm13 = vweird.f32 %v8840_v28 }
 0x159   :  { %vm7219_vm14 = vcmp.lt.s32.totalorder %v7218_v14, 0  ;;  %v640_v18 = vor.u32 %v639_v33, %v638_v12  ;;  %v647_v55 = vsel %vm643_vm11, %v631_v19, %v646_v32  ;;  %v649_v2 = vsel %vm641_vm7, %v628_v51, %v631_v19 }
 0x15a   :  { %v2443_v38 = vsel %vm7219_vm14, 0, %v7218_v14  ;;  %v650_v39 = vsel %vm644_vm12, %v637_v43, 920167782  ;;  %v653_v20 = vsel %vm641_vm7, %v631_v19, %v634_v35  ;;  %vm2487_vm15 = vcmp.gt.s32.totalorder %v2486_v29, 0 }
 0x15b   :  { %vm9156_vm0 = vcmp.le.f32.partialorder %v2372_v21, 0.7853982  ;;  %v2444_v8 = vsub.s32 32, %v2443_v38  ;;  %v2445_v23 = vshll.u32 %v9117_v30, %v2443_v38  ;;  %v2448_v45 = vsub.s32 4294967266, %v2443_v38 }
 0x15c   :  { %v651_v50 = vsel %vm643_vm11, %v634_v35, %v650_v39  ;;  %v2459_v53 = vsel %vm2374_vm5, %v2458_v57, %v9101_v5  ;;  %v654_v6 = vsel %vm644_vm12, %v640_v18, 1326507024  ;;  %v2488_v34 = vsel %vm2487_vm15, %v2486_v29, 0 }
 0x15d   :  { %v652_v16 = vsel %vm642_vm9, %v649_v2, %v651_v50  ;;  %v2446_v63 = vshrl.u32 %v2428_v42, %v2444_v8  ;;  %v2449_v21 = vadd.s32 127, %v2448_v45  ;;  %v648_v44 = vsel %vm642_vm9, %v645_v46, %v647_v55  ;;  %v7693_v4 = vpop.eup %7692 }
 0x15e   :  { %v655_v27 = vsel %vm643_vm11, %v637_v43, %v654_v6  ;;  %v9171_v11 = vmul.u32.u64.low %v9119_v48, %v652_v16  ;;  %v9172_v15 = vmul.u32.u64.high %v9119_v48, %v652_v16, %v9171_v11  ;;  %v2490_v5 = vand.u32 31, %v2488_v34  ;;  %v7695_v57 = vpop.eup %7694 }
 0x15f   :  { %v656_v30 = vsel %vm642_vm9, %v653_v20, %v655_v27  ;;  %v605_v36 = vxor.u32 2147483648, %v7693_v4  ;;  %v2447_v31 = vor.u32 %v2446_v63, %v2445_v23  ;;  %v2450_v51 = vshll.u32 %v2449_v21, 23 }
 0x160   :  { %v9175_v29 = vshrl.u32 %v2488_v34, 5  ;;  %v602_v42 = vxor.u32 2147483648, %v7695_v57  ;;  %v9178_v19 = vmul.u32.u64.low %v9119_v48, %v656_v30  ;;  %v9179_v35 = vmul.u32.u64.high %v9119_v48, %v656_v30, %v9178_v19 }
 0x161   :  { %v2491_v49 = vsub.s32 32, %v2490_v5  ;;  %v606_v13 = vsel %vm604_vm6, %v605_v36, %v7695_v57  ;;  %v2451_v12 = vor.u32 4788187, %v2450_v51  ;;  %v2454_v14 = vcvt.s32.f32 %v2447_v31 }
 0x162   :  { %v2493_v33 = vshll.u32 %v8067_v54, %v2490_v5  ;;  %v603_v43 = vsel %vm601_vm8, %v7693_v4, %v602_v42  ;;  %v664_v46 = vmul.u32 %v9119_v48, %v648_v44  ;;  %v667_v32 = vadd.s32 1, %v9172_v15 }
 0x163   :  { %v2494_v18 = vshrl.u32 %v8068_v56, %v2491_v49  ;;  %v607_v55 = vsel %vm600_vm10, %v603_v43, %v606_v13  ;;  %v2452_v2 = vand.u32 2147483647, %v2451_v12  ;;  %v2496_v38 = vshll.u32 %v8068_v56, %v2490_v5 }
 0x164   :  { %v2497_v39 = vshrl.u32 %v8069_v58, %v2491_v49  ;;  %v608_v20 = vsel %vm597_vm13, nan, %v607_v55  ;;  %v2461_v8 = vsel %vm9156_vm0, 0, %v2459_v53  ;;  %vm666_vm1 = vc.u32 %v9179_v35, %v9171_v11 }
 0x165   :  { %vm2508_vm2 = vcmp.lt.s32.totalorder %v9175_v29, 1  ;;  %1781 = vxpose.xlu0.b32.cont [5/16] %v608_v20, 128  ;;  %v2455_v48 = vmul.f32 %v2454_v14, %v2452_v2  ;;  %v668_v52 = vsel %vm666_vm1, %v667_v32, %v9172_v15  ;;  %v2495_v23 = vor.u32 %v2494_v18, %v2493_v33 }
 0x166   :  { %v2499_v45 = vshll.u32 %v8069_v58, %v2490_v5  ;;  %v669_v50 = vadd.s32 %v668_v52, %v664_v46  ;;  %v2500_v16 = vshrl.u32 %v8070_v60, %v2491_v49  ;;  %v2502_v28 = vshll.u32 %v8070_v60, %v2490_v5 }
 0x167   :  { %v2503_v6 = vshrl.u32 %v8071_v62, %v2491_v49  ;;  %v2456_v53 = vxor.u32 2147483648, %v2455_v48  ;;  %v2498_v34 = vor.u32 %v2497_v39, %v2496_v38  ;;  %v2505_v63 = vshll.u32 %v8071_v62, %v2490_v5 }
 0x168   :  { %v2506_v21 = vshrl.u32 %v8072_v10, %v2491_v49  ;;  %v670_v44 = vadd.s32 536870912, %v669_v50  ;;  %v2492_v27 = vshrl.u32 %v8067_v54, %v2491_v49  ;;  %v2501_v4 = vor.u32 %v2500_v16, %v2499_v45 }
 0x169   :  { %v2504_v30 = vor.u32 %v2503_v6, %v2502_v28  ;;  %v2457_v15 = vsel %vm2374_vm5, %v2456_v53, %v2455_v48  ;;  %v2465_v57 = vadd.s32 3, %v2461_v8  ;;  %vm2511_vm3 = vcmp.lt.s32.totalorder %v9175_v29, 4 }
 0x16a   :  { %v2507_v36 = vor.u32 %v2506_v21, %v2505_v63  ;;  %v2460_v31 = vsel %vm9156_vm0, %v8861_v40, %v2457_v15  ;;  %v671_v51 = vshrl.u32 %v670_v44, 30  ;;  %vm2510_vm4 = vcmp.lt.s32.totalorder %v9175_v29, 3 }
 0x16b   :  { %v2513_v5 = vsel %vm2511_vm3, %v2501_v4, 2102212464  ;;  %7696 = vcosq.f32 %v2460_v31  ;;  %vm2509_vm6 = vcmp.lt.s32.totalorder %v9175_v29, 2  ;;  %v2516_v42 = vsel %vm2508_vm2, %v2495_v23, %v2498_v34  ;;  %v9252_v29 = vld [vmem:[#allocation5 + $0x18] sm:$0xff] }
 0x16c   :  { %v2517_v19 = vsel %vm2511_vm3, %v2504_v30, 920167782  ;;  %7698 = vsinq.f32 %v2460_v31  ;;  %v672_v49 = vshll.u32 %v671_v51, 30  ;;  %v2512_v13 = vsel %vm2508_vm2, %v2492_v27, %v2495_v23 }
 0x16d   :  { %v2520_v24 = vsel %vm2508_vm2, %v2498_v34, %v2501_v4  ;;  %v2514_v12 = vsel %vm2510_vm4, %v2498_v34, %v2513_v5  ;;  %v2518_v14 = vsel %vm2510_vm4, %v2501_v4, %v2517_v19  ;;  %v2521_v33 = vsel %vm2511_vm3, %v2507_v36, 1326507024 }
 0x16e   :  { %v2524_v43 = vshll.u32 %v2484_v17, 8  ;;  %v9228_v46 = vsub.s32 %v669_v50, %v672_v49  ;;  %v695_v32 = vsub.s32 4, %v671_v51  ;;  %v2519_v18 = vsel %vm2509_vm6, %v2516_v42, %v2518_v14 }
 0x16f   :  { %v2522_v55 = vsel %vm2510_vm4, %v2504_v30, %v2521_v33  ;;  %v2466_v2 = vand.u32 3, %v2465_v57  ;;  %v2515_v41 = vsel %vm2509_vm6, %v2512_v13, %v2514_v12  ;;  %vm611_vm5 = vcmp.lt.s32.totalorder %v9055_v22, 0 }
 0x170   :  { %v2523_v38 = vsel %vm2509_vm6, %v2520_v24, %v2522_v55  ;;  %v9236_v39 = vmul.u32.u64.low %v2524_v43, %v2519_v18  ;;  %v9237_v20 = vmul.u32.u64.high %v2524_v43, %v2519_v18, %v9236_v39  ;;  %v675_v8 = vsub.s32 0, %v9228_v46 }
 0x171   :  { %v9242_v17 = vmul.u32.u64.low %v2524_v43, %v2523_v38  ;;  %v9243_v48 = vmul.u32.u64.high %v2524_v43, %v2523_v38, %v9242_v17  ;;  %v716_v52 = vand.u32 2139095040, %v9121_v61  ;;  %vm2464_vm7 = vweird.f32 %v8861_v40 }
 0x172   :  { %v7153_v23 = vmin.u32 %v675_v8, %v9228_v46  ;;  %v696_v45 = vsel %vm611_vm5, %v695_v32, %v671_v51  ;;  %v2531_v50 = vmul.u32 %v2524_v43, %v2515_v41  ;;  %v2534_v16 = vadd.s32 1, %v9237_v20  ;;  %v9275_v32 = vld [vmem:[#allocation7 + $0x18] sm:$0xff] }
 0x173   :  { %v717_v28 = vshrl.u32 %v716_v52, 23  ;;  %v2263_v6 = vmul.f32 %v9252_v29, %v8753_v59  ;;  %vm2467_vm8 = vcmp.lt.s32.totalorder %v2466_v2, 2  ;;  %vm9258_vm9 = vcmp.le.f32.partialorder %v609_v0, 0.7853982 }
 0x174   :  { %v677_v34 = vclz %v7153_v23  ;;  %v713_v63 = vand.u32 2147483647, %v9121_v61  ;;  %vm2471_vm12 = vcmp.eq.s32.totalorder %v2466_v2, 2  ;;  %v698_v44 = vsel %vm9258_vm9, 0, %v696_v45 }
 0x175   :  { %v7697_v21 = vpop.eup %7696  ;;  %vm2533_vm10 = vc.u32 %v9243_v48, %v9236_v39  ;;  %v7156_v27 = vadd.s32 4294967169, %v717_v28  ;;  %vm2468_vm11 = vcmp.eq.s32.totalorder %v2466_v2, 0  ;;  %v665_v57 = vadd.s32 %v9171_v11, %v9179_v35 }
 0x176   :  { %v7699_v4 = vpop.eup %7698  ;;  %v2472_v59 = vxor.u32 2147483648, %v7697_v21  ;;  %v7154_v30 = vadd.s32 4294967294, %v677_v34  ;;  %v2535_v0 = vsel %vm2533_vm10, %v2534_v16, %v9237_v20  ;;  %v702_v5 = vadd.s32 3, %v698_v44 }
 0x177   :  { %v2469_v15 = vxor.u32 2147483648, %v7699_v4  ;;  %v2536_v36 = vadd.s32 %v2535_v0, %v2531_v50  ;;  %v723_v31 = vadd.s32 1, %v7156_v27  ;;  %v720_v42 = vand.u32 8388607, %v713_v63 }
 0x178   :  { %v2473_v51 = vsel %vm2471_vm12, %v2472_v59, %v7699_v4  ;;  %vm7155_vm13 = vcmp.lt.s32.totalorder %v7154_v30, 0  ;;  %v9278_v18 = vadd.f32 %v9275_v32, %v2263_v6  ;;  %v9280_v2 = vand.u32 3, %v702_v5 }
 0x179   :  { %v2470_v19 = vsel %vm2468_vm11, %v7697_v21, %v2469_v15  ;;  %v680_v49 = vsel %vm7155_vm13, 0, %v7154_v30  ;;  %v2537_v13 = vadd.s32 536870912, %v2536_v36  ;;  %vm724_vm14 = vcmp.gt.s32.totalorder %v723_v31, 0 }
 0x17a   :  { %v2474_v24 = vsel %vm2467_vm8, %v2470_v19, %v2473_v51  ;;  %v681_v12 = vsub.s32 32, %v680_v49  ;;  %v682_v14 = vshll.u32 %v9228_v46, %v680_v49  ;;  %v685_v33 = vsub.s32 4294967266, %v680_v49 }
 0x17b   :  { %v2475_v11 = vsel %vm2464_vm7, nan, %v2474_v24  ;;  %v2538_v35 = vshrl.u32 %v2537_v13, 30  ;;  %v725_v43 = vsel %vm724_vm14, %v723_v31, 0  ;;  %vm2478_vm15 = vcmp.lt.s32.totalorder %v9084_v47, 0 }
 0x17c   :  { %3545 = vxpose.xlu1.b32.cont [6/16] %v2475_v11, 128  ;;  %v683_v55 = vshrl.u32 %v665_v57, %v681_v12  ;;  %v686_v38 = vadd.s32 127, %v685_v33  ;;  %v727_v20 = vand.u32 31, %v725_v43  ;;  %v9284_v46 = vadd.s32 %v9236_v39, %v9243_v48 }
 0x17d   :  { %v2539_v40 = vshll.u32 %v2538_v35, 30  ;;  %v721_v17 = vor.u32 8388608, %v720_v42  ;;  %v2562_v45 = vsub.s32 4, %v2538_v35  ;;  %v726_v50 = vshrl.u32 %v725_v43, 5 }
 0x17e   :  { %v684_v8 = vor.u32 %v683_v55, %v682_v14  ;;  %v687_v41 = vshll.u32 %v686_v38, 23  ;;  %v728_v52 = vsub.s32 32, %v727_v20  ;;  %v2583_v16 = vand.u32 2139095040, %v9278_v18 }
 0x17f   :  { %v9286_v23 = vsub.s32 %v2536_v36, %v2539_v40  ;;  %v730_v34 = vshll.u32 %v8067_v54, %v727_v20  ;;  %v733_v21 = vshll.u32 %v8068_v56, %v727_v20  ;;  %v736_v27 = vshll.u32 %v8069_v58, %v727_v20 }
 0x180   :  { %v688_v28 = vor.u32 4788187, %v687_v41  ;;  %v691_v6 = vcvt.s32.f32 %v684_v8  ;;  %v731_v48 = vshrl.u32 %v8068_v56, %v728_v52  ;;  %v734_v44 = vshrl.u32 %v8069_v58, %v728_v52 }
 0x181   :  { %v2542_v39 = vsub.s32 0, %v9286_v23  ;;  %v737_v59 = vshrl.u32 %v8070_v60, %v728_v52  ;;  %v739_v30 = vshll.u32 %v8070_v60, %v727_v20  ;;  %v740_v0 = vshrl.u32 %v8071_v62, %v728_v52 }
 0x182   :  { %v689_v4 = vand.u32 2147483647, %v688_v28  ;;  %vm9300_vm0 = vcmp.le.f32.partialorder %v2476_v26, 0.7853982  ;;  %v9305_v36 = vshll.u32 %v721_v17, 8  ;;  %v2584_v51 = vshrl.u32 %v2583_v16, 23 }
 0x183   :  { %v7221_v57 = vmin.u32 %v2542_v39, %v9286_v23  ;;  %v2580_v31 = vand.u32 2147483647, %v9278_v18  ;;  %v2563_v42 = vsel %vm2478_vm15, %v2562_v45, %v2538_v35  ;;  %v729_v19 = vshrl.u32 %v8067_v54, %v728_v52 }
 0x184   :  { %v692_v5 = vmul.f32 %v691_v6, %v689_v4  ;;  %v742_v49 = vshll.u32 %v8071_v62, %v727_v20  ;;  %v732_v26 = vor.u32 %v731_v48, %v730_v34  ;;  %v735_v24 = vor.u32 %v734_v44, %v733_v21 }
 0x185   :  { %v2544_v13 = vclz %v7221_v57  ;;  %v741_v12 = vor.u32 %v740_v0, %v739_v30  ;;  %v738_v33 = vor.u32 %v737_v59, %v736_v27  ;;  %v743_v11 = vshrl.u32 %v8072_v10, %v728_v52 }
 0x186   :  { %v693_v14 = vxor.u32 2147483648, %v692_v5  ;;  %vm745_vm1 = vcmp.lt.s32.totalorder %v726_v50, 1  ;;  %vm746_vm2 = vcmp.lt.s32.totalorder %v726_v50, 2  ;;  %vm747_vm3 = vcmp.lt.s32.totalorder %v726_v50, 3 }
 0x187   :  { %v7222_v43 = vadd.s32 4294967294, %v2544_v13  ;;  %vm748_vm4 = vcmp.lt.s32.totalorder %v726_v50, 4  ;;  %v744_v55 = vor.u32 %v743_v11, %v742_v49  ;;  %v749_v38 = vsel %vm745_vm1, %v729_v19, %v732_v26 }
 0x188   :  { %v694_v35 = vsel %vm611_vm5, %v693_v14, %v692_v5  ;;  %v750_v20 = vsel %vm748_vm4, %v738_v33, 2102212464  ;;  %v753_v8 = vsel %vm745_vm1, %v732_v26, %v735_v24  ;;  %v754_v41 = vsel %vm748_vm4, %v741_v12, 920167782 }
 0x189   :  { %v697_v40 = vsel %vm9258_vm9, %v9055_v22, %v694_v35  ;;  %vm7223_vm6 = vcmp.lt.s32.totalorder %v7222_v43, 0  ;;  %v751_v52 = vsel %vm747_vm3, %v735_v24, %v750_v20  ;;  %v755_v45 = vsel %vm747_vm3, %v738_v33, %v754_v41 }
 0x18a   :  { %7700 = vcosq.f32 %v697_v40  ;;  %v2547_v17 = vsel %vm7223_vm6, 0, %v7222_v43  ;;  %v2565_v53 = vsel %vm9300_vm0, 0, %v2563_v42  ;;  %v756_v34 = vsel %vm746_vm2, %v753_v8, %v755_v45 }
 0x18b   :  { %7702 = vsinq.f32 %v697_v40  ;;  %v2548_v16 = vsub.s32 32, %v2547_v17  ;;  %v2549_v28 = vshll.u32 %v9286_v23, %v2547_v17  ;;  %v2552_v6 = vsub.s32 4294967266, %v2547_v17 }
 0x18c   :  { %v757_v21 = vsel %vm745_vm1, %v735_v24, %v738_v33  ;;  %v758_v39 = vsel %vm748_vm4, %v744_v55, 1326507024  ;;  %v7224_v4 = vadd.s32 4294967169, %v2584_v51  ;;  %v752_v59 = vsel %vm746_vm2, %v749_v38, %v751_v52 }
 0x18d   :  { %v2550_v48 = vshrl.u32 %v9284_v46, %v2548_v16  ;;  %v2553_v44 = vadd.s32 127, %v2552_v6  ;;  %v759_v27 = vsel %vm747_vm3, %v741_v12, %v758_v39  ;;  %v2569_v46 = vadd.s32 3, %v2565_v53 }
 0x18e   :  { %v760_v23 = vsel %vm746_vm2, %v757_v21, %v759_v27  ;;  %v9335_v30 = vmul.u32.u64.low %v9305_v36, %v756_v34  ;;  %v9336_v0 = vmul.u32.u64.high %v9305_v36, %v756_v34, %v9335_v30  ;;  %v2590_v49 = vadd.s32 1, %v7224_v4 }
 0x18f   :  { %v2551_v57 = vor.u32 %v2550_v48, %v2549_v28  ;;  %v2554_v5 = vshll.u32 %v2553_v44, 23  ;;  %v9340_v42 = vmul.u32.u64.low %v9305_v36, %v760_v23  ;;  %v9341_v19 = vmul.u32.u64.high %v9305_v36, %v760_v23, %v9340_v42 }
 0x190   :  { %v500_v51 = vmul.f32 %v9252_v29, %v8789_v25  ;;  %v768_v50 = vmul.u32 %v9305_v36, %v752_v59  ;;  %v9348_v24 = vand.u32 8388607, %v2580_v31  ;;  %vm701_vm5 = vweird.f32 %v9055_v22 }
 0x191   :  { %v2555_v13 = vor.u32 4788187, %v2554_v5  ;;  %v2558_v26 = vcvt.s32.f32 %v2551_v57  ;;  %vm704_vm7 = vcmp.lt.s32.totalorder %v9280_v2, 2  ;;  %v771_v12 = vadd.s32 1, %v9336_v0 }
 0x192   :  { %vm2591_vm8 = vcmp.gt.s32.totalorder %v2590_v49, 0  ;;  %vm705_vm9 = vcmp.eq.s32.totalorder %v9280_v2, 0  ;;  %vm770_vm12 = vc.u32 %v9341_v19, %v9335_v30  ;;  %vm708_vm10 = vcmp.eq.s32.totalorder %v9280_v2, 2 }
 0x193   :  { %v2556_v14 = vand.u32 2147483647, %v2555_v13  ;;  %v2592_v25 = vsel %vm2591_vm8, %v2590_v49, 0  ;;  %v9357_v36 = vand.u32 3, %v2569_v46  ;;  %v772_v33 = vsel %vm770_vm12, %v771_v12, %v9336_v0 }
 0x194   :  { %v7701_v29 = vpop.eup %7700  ;;  %v2594_v11 = vand.u32 31, %v2592_v25  ;;  %v773_v38 = vadd.s32 %v772_v33, %v768_v50  ;;  %v2588_v20 = vor.u32 8388608, %v9348_v24  ;;  %v9361_v8 = vshrl.u32 %v2592_v25, 5 }
 0x195   :  { %v7703_v43 = vpop.eup %7702  ;;  %v709_v35 = vxor.u32 2147483648, %v7701_v29  ;;  %v2559_v55 = vmul.f32 %v2558_v26, %v2556_v14  ;;  %v9382_v0 = vadd.f32 %v9275_v32, %v500_v51  ;;  %vm715_vm13 = vcmp.lt.s32.totalorder %v9121_v61, 0 }
 0x196   :  { %v706_v40 = vxor.u32 2147483648, %v7703_v43  ;;  %v2595_v41 = vsub.s32 32, %v2594_v11  ;;  %v2597_v17 = vshll.u32 %v8067_v54, %v2594_v11  ;;  %v774_v16 = vadd.s32 536870912, %v773_v38 }
 0x197   :  { %v710_v52 = vsel %vm708_vm10, %v709_v35, %v7703_v43  ;;  %v2560_v45 = vxor.u32 2147483648, %v2559_v55  ;;  %v2600_v28 = vshll.u32 %v8068_v56, %v2594_v11  ;;  %v2603_v21 = vshll.u32 %v8069_v58, %v2594_v11 }
 0x198   :  { %v707_v6 = vsel %vm705_vm9, %v7701_v29, %v706_v40  ;;  %v2598_v53 = vshrl.u32 %v8068_v56, %v2595_v41  ;;  %v2601_v34 = vshrl.u32 %v8069_v58, %v2595_v41  ;;  %v775_v44 = vshrl.u32 %v774_v16, 30 }
 0x199   :  { %v711_v39 = vsel %vm704_vm7, %v707_v6, %v710_v52  ;;  %v2561_v48 = vsel %vm2478_vm15, %v2560_v45, %v2559_v55  ;;  %v2604_v27 = vshrl.u32 %v8070_v60, %v2595_v41  ;;  %v2596_v23 = vshrl.u32 %v8067_v54, %v2595_v41 }
 0x19a   :  { %v712_v4 = vsel %vm701_vm5, nan, %v711_v39  ;;  %v2564_v59 = vsel %vm9300_vm0, %v9084_v47, %v2561_v48  ;;  %v776_v2 = vshll.u32 %v775_v44, 30  ;;  %v2599_v57 = vor.u32 %v2598_v53, %v2597_v17 }
 0x19b   :  { %1782 = vxpose.xlu0.b32.cont [6/16] %v712_v4, 128  ;;  %7704 = vcosq.f32 %v2564_v59  ;;  %v2602_v5 = vor.u32 %v2601_v34, %v2600_v28  ;;  %v2606_v42 = vshll.u32 %v8070_v60, %v2594_v11  ;;  %v2607_v22 = vshrl.u32 %v8071_v62, %v2595_v41 }
 0x19c   :  { %7706 = vsinq.f32 %v2564_v59  ;;  %v2609_v46 = vshll.u32 %v8071_v62, %v2594_v11  ;;  %v9387_v49 = vsub.s32 %v773_v38, %v776_v2  ;;  %v2605_v15 = vor.u32 %v2604_v27, %v2603_v21 }
 0x19d   :  { %v2610_v13 = vshrl.u32 %v8072_v10, %v2595_v41  ;;  %vm2612_vm11 = vcmp.lt.s32.totalorder %v9361_v8, 1  ;;  %v2608_v32 = vor.u32 %v2607_v22, %v2606_v42  ;;  %vm2614_vm14 = vcmp.lt.s32.totalorder %v9361_v8, 3 }
 0x19e   :  { %vm2571_vm15 = vcmp.lt.s32.totalorder %v9357_v36, 2  ;;  %v779_v51 = vsub.s32 0, %v9387_v49  ;;  %vm2613_vm0 = vcmp.lt.s32.totalorder %v9361_v8, 2  ;;  %vm2615_vm1 = vcmp.lt.s32.totalorder %v9361_v8, 4 }
 0x19f   :  { %v2611_v26 = vor.u32 %v2610_v13, %v2609_v46  ;;  %vm2568_vm2 = vweird.f32 %v9084_v47  ;;  %v2617_v50 = vsel %vm2615_vm1, %v2605_v15, 2102212464  ;;  %v2620_v24 = vsel %vm2612_vm11, %v2599_v57, %v2602_v5 }
 0x1a0   :  { %v2621_v12 = vsel %vm2615_vm1, %v2608_v32, 920167782  ;;  %v2628_v14 = vshll.u32 %v2588_v20, 8  ;;  %v7157_v25 = vmin.u32 %v779_v51, %v9387_v49  ;;  %v2616_v29 = vsel %vm2612_vm11, %v2596_v23, %v2599_v57 }
 0x1a1   :  { %v2622_v33 = vsel %vm2614_vm14, %v2605_v15, %v2621_v12  ;;  %v820_v11 = vand.u32 2139095040, %v9382_v0  ;;  %v2618_v43 = vsel %vm2614_vm14, %v2602_v5, %v2617_v50  ;;  %v2624_v55 = vsel %vm2612_vm11, %v2602_v5, %v2605_v15 }
 0x1a2   :  { %v2623_v35 = vsel %vm2613_vm0, %v2620_v24, %v2622_v33  ;;  %v2625_v38 = vsel %vm2615_vm1, %v2611_v26, 1326507024  ;;  %vm2572_vm3 = vcmp.eq.s32.totalorder %v9357_v36, 0  ;;  %vm2575_vm4 = vcmp.eq.s32.totalorder %v9357_v36, 2 }
 0x1a3   :  { %vm9416_vm6 = vcmp.le.f32.partialorder %v713_v63, 0.7853982  ;;  %v781_v40 = vclz %v7157_v25  ;;  %v799_v41 = vsub.s32 4, %v775_v44  ;;  %v2626_v17 = vsel %vm2614_vm14, %v2608_v32, %v2625_v38 }
 0x1a4   :  { %v9422_v52 = vmul.u32.u64.low %v2628_v14, %v2623_v35  ;;  %v9423_v45 = vmul.u32.u64.high %v2628_v14, %v2623_v35, %v9422_v52  ;;  %v817_v16 = vand.u32 2147483647, %v9382_v0  ;;  %v2619_v53 = vsel %vm2613_vm0, %v2616_v29, %v2618_v43 }
 0x1a5   :  { %v7705_v28 = vpop.eup %7704  ;;  %v7158_v6 = vadd.s32 4294967294, %v781_v40  ;;  %v2627_v63 = vsel %vm2613_vm0, %v2624_v55, %v2626_v17  ;;  %v821_v34 = vshrl.u32 %v820_v11, 23  ;;  %v769_v48 = vadd.s32 %v9335_v30, %v9341_v19 }
 0x1a6   :  { %v7707_v21 = vpop.eup %7706  ;;  %v2576_v39 = vxor.u32 2147483648, %v7705_v28  ;;  %v9433_v27 = vmul.u32.u64.low %v2628_v14, %v2627_v63  ;;  %v9434_v4 = vmul.u32.u64.high %v2628_v14, %v2627_v63, %v9433_v27  ;;  %v800_v23 = vsel %vm715_vm13, %v799_v41, %v775_v44 }
 0x1a7   :  { %v2573_v59 = vxor.u32 2147483648, %v7707_v21  ;;  %vm7159_vm5 = vcmp.lt.s32.totalorder %v7158_v6, 0  ;;  %v7160_v2 = vadd.s32 4294967169, %v821_v34  ;;  %v2635_v5 = vmul.u32 %v2628_v14, %v2619_v53 }
 0x1a8   :  { %v2577_v57 = vsel %vm2575_vm4, %v2576_v39, %v7707_v21  ;;  %v784_v8 = vsel %vm7159_vm5, 0, %v7158_v6  ;;  %v2638_v42 = vadd.s32 1, %v9423_v45  ;;  %vm2637_vm7 = vc.u32 %v9434_v4, %v9422_v52 }
 0x1a9   :  { %v2574_v22 = vsel %vm2572_vm3, %v7705_v28, %v2573_v59  ;;  %v785_v30 = vsub.s32 32, %v784_v8  ;;  %v786_v19 = vshll.u32 %v9387_v49, %v784_v8  ;;  %v789_v46 = vsub.s32 4294967266, %v784_v8 }
 0x1aa   :  { %v2578_v15 = vsel %vm2571_vm15, %v2574_v22, %v2577_v57  ;;  %v827_v44 = vadd.s32 1, %v7160_v2  ;;  %v9449_v13 = vsub.s32 2, %v8136_v1  ;;  %v2639_v50 = vsel %vm2637_vm7, %v2638_v42, %v9423_v45  ;;  %v7920_v22 = vld [vmem:[#allocation5] sm:$0xff] }
 0x1ab   :  { %v2579_v32 = vsel %vm2568_vm2, nan, %v2578_v15  ;;  %v787_v51 = vshrl.u32 %v769_v48, %v785_v30  ;;  %v790_v26 = vadd.s32 127, %v789_v46  ;;  %v802_v49 = vsel %vm9416_vm6, 0, %v800_v23 }
 0x1ac   :  { %3546 = vxpose.xlu1.b32.cont [7/16] %v2579_v32, 128  ;;  %v2640_v36 = vadd.s32 %v2639_v50, %v2635_v5  ;;  %v824_v24 = vand.u32 8388607, %v817_v16  ;;  %vm828_vm8 = vcmp.gt.s32.totalorder %v827_v44, 0  ;;  %v806_v43 = vadd.s32 3, %v802_v49 }
 0x1ad   :  { %v788_v12 = vor.u32 %v787_v51, %v786_v19  ;;  %v791_v14 = vshll.u32 %v790_v26, 23  ;;  %v829_v25 = vsel %vm828_vm8, %v827_v44, 0  ;;  %v9462_v40 = vrot.slane %v8141_v7, %v9449_v13 }
 0x1ae   :  { %v2641_v29 = vadd.s32 536870912, %v2640_v36  ;;  %v831_v33 = vand.u32 31, %v829_v25  ;;  %v825_v55 = vor.u32 8388608, %v824_v24  ;;  %v830_v17 = vshrl.u32 %v829_v25, 5 }
 0x1af   :  { %v792_v47 = vor.u32 4788187, %v791_v14  ;;  %v795_v11 = vcvt.s32.f32 %v788_v12  ;;  %v9473_v59 = vand.u32 3, %v806_v43  ;;  %v2636_v5 = vadd.s32 %v9422_v52, %v9434_v4 }
 0x1b0   :  { %v9458_v35 = vshrl.u32 %v2641_v29, 30  ;;  %v832_v38 = vsub.s32 32, %v831_v33  ;;  %v834_v45 = vshll.u32 %v8067_v54, %v831_v33  ;;  %v837_v28 = vshll.u32 %v8068_v56, %v831_v33 }
 0x1b1   :  { %v793_v41 = vand.u32 2147483647, %v792_v47  ;;  %v840_v63 = vshll.u32 %v8069_v58, %v831_v33  ;;  %v843_v34 = vshll.u32 %v8070_v60, %v831_v33  ;;  %v846_v2 = vshll.u32 %v8071_v62, %v831_v33 }
 0x1b2   :  { %v2643_v6 = vshll.u32 %v9458_v35, 30  ;;  %v835_v53 = vshrl.u32 %v8068_v56, %v832_v38  ;;  %v838_v39 = vshrl.u32 %v8069_v58, %v832_v38  ;;  %v841_v48 = vshrl.u32 %v8070_v60, %v832_v38 }
 0x1b3   :  { %v796_v21 = vmul.f32 %v795_v11, %v793_v41  ;;  %v844_v27 = vshrl.u32 %v8071_v62, %v832_v38  ;;  %v847_v57 = vshrl.u32 %v8072_v10, %v832_v38  ;;  %v9481_v42 = vshll.u32 %v825_v55, 8 }
 0x1b4   :  { %v9475_v23 = vsub.s32 %v2640_v36, %v2643_v6  ;;  %v2688_v30 = vmul.f32 %v7920_v22, %v9462_v40  ;;  %v833_v46 = vshrl.u32 %v8067_v54, %v832_v38  ;;  %v836_v15 = vor.u32 %v835_v53, %v834_v45  ;;  %v7921_v45 = vld [vmem:[#allocation7] sm:$0xff] }
 0x1b5   :  { %v797_v8 = vxor.u32 2147483648, %v796_v21  ;;  %v839_v44 = vor.u32 %v838_v39, %v837_v28  ;;  %vm2582_vm9 = vcmp.lt.s32.totalorder %v9278_v18, 0  ;;  %v842_v51 = vor.u32 %v841_v48, %v840_v63 }
 0x1b6   :  { %v2646_v19 = vsub.s32 0, %v9475_v23  ;;  %v845_v26 = vor.u32 %v844_v27, %v843_v34  ;;  %vm849_vm12 = vcmp.lt.s32.totalorder %v830_v17, 1  ;;  %v848_v50 = vor.u32 %v847_v57, %v846_v2 }
 0x1b7   :  { %v798_v32 = vsel %vm715_vm13, %v797_v8, %v796_v21  ;;  %vm852_vm10 = vcmp.lt.s32.totalorder %v830_v17, 4  ;;  %vm850_vm11 = vcmp.lt.s32.totalorder %v830_v17, 2  ;;  %vm851_vm14 = vcmp.lt.s32.totalorder %v830_v17, 3 }
 0x1b8   :  { %v801_v52 = vsel %vm9416_vm6, %v9121_v61, %v798_v32  ;;  %v7225_v4 = vmin.u32 %v2646_v19, %v9475_v23  ;;  %v854_v49 = vsel %vm852_vm10, %v842_v51, 2102212464  ;;  %vm9496_vm13 = vcmp.le.f32.partialorder %v2580_v31, 0.7853982 }
 0x1b9   :  { %7708 = vcosq.f32 %v801_v52  ;;  %v853_v20 = vsel %vm849_vm12, %v833_v46, %v836_v15  ;;  %v857_v12 = vsel %vm849_vm12, %v836_v15, %v839_v44  ;;  %v855_v14 = vsel %vm851_vm14, %v839_v44, %v854_v49 }
 0x1ba   :  { %7710 = vsinq.f32 %v801_v52  ;;  %v2648_v24 = vclz %v7225_v4  ;;  %v858_v25 = vsel %vm852_vm10, %v845_v26, 920167782  ;;  %v861_v29 = vsel %vm849_vm12, %v839_v44, %v842_v51 }
 0x1bb   :  { %v9507_v33 = vrot.slane %v8143_v9, %v9449_v13  ;;  %v2666_v31 = vsub.s32 4, %v9458_v35  ;;  %v859_v11 = vsel %vm851_vm14, %v842_v51, %v858_v25  ;;  %v862_v43 = vsel %vm852_vm10, %v848_v50, 1326507024 }
 0x1bc   :  { %v7226_v47 = vadd.s32 4294967294, %v2648_v24  ;;  %v856_v55 = vsel %vm850_vm11, %v853_v20, %v855_v14  ;;  %v860_v38 = vsel %vm850_vm11, %v857_v12, %v859_v11  ;;  %v863_v41 = vsel %vm851_vm14, %v845_v26, %v862_v43 }
 0x1bd   :  { %v9515_v28 = vadd.f32 %v7921_v45, %v2688_v30  ;;  %vm805_vm15 = vweird.f32 %v9121_v61  ;;  %v864_v6 = vsel %vm850_vm11, %v861_v29, %v863_v41  ;;  %vm808_vm1 = vcmp.lt.s32.totalorder %v9473_v59, 2 }
 0x1be   :  { %vm7227_vm0 = vcmp.lt.s32.totalorder %v7226_v47, 0  ;;  %v9520_v53 = vmul.u32.u64.low %v9481_v42, %v860_v38  ;;  %v9521_v63 = vmul.u32.u64.high %v9481_v42, %v860_v38, %v9520_v53  ;;  %v2667_v17 = vsel %vm2582_vm9, %v2666_v31, %v9458_v35 }
 0x1bf   :  { %v2651_v34 = vsel %vm7227_vm0, 0, %v7226_v47  ;;  %v9525_v21 = vmul.u32.u64.low %v9481_v42, %v864_v6  ;;  %v9526_v39 = vmul.u32.u64.high %v9481_v42, %v864_v6, %v9525_v21  ;;  %vm809_vm2 = vcmp.eq.s32.totalorder %v9473_v59, 0 }
 0x1c0   :  { %v2652_v48 = vsub.s32 32, %v2651_v34  ;;  %v2653_v27 = vshll.u32 %v9475_v23, %v2651_v34  ;;  %v2656_v2 = vsub.s32 4294967266, %v2651_v34  ;;  %v872_v57 = vmul.u32 %v9481_v42, %v856_v55 }
 0x1c1   :  { %v2696_v8 = vand.u32 2147483647, %v9515_v28  ;;  %v2699_v30 = vand.u32 2139095040, %v9515_v28  ;;  %v875_v15 = vadd.s32 1, %v9521_v63  ;;  %v925_v44 = vmul.f32 %v7920_v22, %v9507_v33 }
 0x1c2   :  { %v2654_v19 = vshrl.u32 %v2636_v5, %v2652_v48  ;;  %v2657_v46 = vadd.s32 127, %v2656_v2  ;;  %vm812_vm3 = vcmp.eq.s32.totalorder %v9473_v59, 2  ;;  %v2669_v35 = vsel %vm9496_vm13, 0, %v2667_v17 }
 0x1c3   :  { %v7709_v23 = vpop.eup %7708  ;;  %vm874_vm4 = vc.u32 %v9526_v39, %v9520_v53  ;;  %v2700_v32 = vshrl.u32 %v2699_v30, 23  ;;  %v2703_v22 = vand.u32 8388607, %v2696_v8  ;;  %v9545_v14 = vadd.f32 %v7921_v45, %v925_v44 }
 0x1c4   :  { %v7711_v42 = vpop.eup %7710  ;;  %v813_v51 = vxor.u32 2147483648, %v7709_v23  ;;  %v2655_v26 = vor.u32 %v2654_v19, %v2653_v27  ;;  %v2658_v52 = vshll.u32 %v2657_v46, 23  ;;  %v876_v5 = vsel %vm874_vm4, %v875_v15, %v9521_v63 }
 0x1c5   :  { %v810_v4 = vxor.u32 2147483648, %v7711_v42  ;;  %v877_v50 = vadd.s32 %v876_v5, %v872_v57  ;;  %v7228_v49 = vadd.s32 4294967169, %v2700_v32  ;;  %v2673_v43 = vadd.s32 3, %v2669_v35 }
 0x1c6   :  { %v814_v24 = vsel %vm812_vm3, %v813_v51, %v7711_v42  ;;  %v2659_v20 = vor.u32 4788187, %v2658_v52  ;;  %v2662_v12 = vcvt.s32.f32 %v2655_v26  ;;  %v2704_v41 = vor.u32 8388608, %v2703_v22 }
 0x1c7   :  { %v811_v25 = vsel %vm809_vm2, %v7709_v23, %v810_v4  ;;  %v878_v29 = vadd.s32 536870912, %v877_v50  ;;  %v2706_v47 = vadd.s32 1, %v7228_v49  ;;  %v936_v63 = vand.u32 2139095040, %v9545_v14 }
 0x1c8   :  { %v815_v31 = vsel %vm808_vm1, %v811_v25, %v814_v24  ;;  %v2660_v11 = vand.u32 2147483647, %v2659_v20  ;;  %v9554_v27 = vand.u32 3, %v2673_v43  ;;  %vm819_vm5 = vcmp.lt.s32.totalorder %v9382_v0, 0 }
 0x1c9   :  { %v816_v55 = vsel %vm805_vm15, nan, %v815_v31  ;;  %v879_v38 = vshrl.u32 %v878_v29, 30  ;;  %vm2707_vm6 = vcmp.gt.s32.totalorder %v2706_v47, 0  ;;  %v9558_v59 = vadd.s32 %v9520_v53, %v9526_v39 }
 0x1ca   :  { %1783 = vxpose.xlu0.b32.cont [7/16] %v816_v55, 128  ;;  %v2663_v6 = vmul.f32 %v2662_v12, %v2660_v11  ;;  %v2708_v45 = vsel %vm2707_vm6, %v2706_v47, 0  ;;  %v9562_v17 = vshll.u32 %v2704_v41, 8  ;;  %v933_v57 = vand.u32 2147483647, %v9545_v14 }
 0x1cb   :  { %v880_v34 = vshll.u32 %v879_v38, 30  ;;  %v2710_v21 = vand.u32 31, %v2708_v45  ;;  %v937_v15 = vshrl.u32 %v936_v63, 23  ;;  %v2709_v44 = vshrl.u32 %v2708_v45, 5 }
 0x1cc   :  { %v2664_v48 = vxor.u32 2147483648, %v2663_v6  ;;  %v903_v26 = vsub.s32 4, %v879_v38  ;;  %vm2679_vm7 = vcmp.eq.s32.totalorder %v9554_v27, 2  ;;  %vm2676_vm8 = vcmp.eq.s32.totalorder %v9554_v27, 0 }
 0x1cd   :  { %v9560_v61 = vsub.s32 %v877_v50, %v880_v34  ;;  %v2711_v2 = vsub.s32 32, %v2710_v21  ;;  %v2713_v19 = vshll.u32 %v8067_v54, %v2710_v21  ;;  %v2716_v46 = vshll.u32 %v8068_v56, %v2710_v21 }
 0x1ce   :  { %v2665_v30 = vsel %vm2582_vm9, %v2664_v48, %v2663_v6  ;;  %v2719_v23 = vshll.u32 %v8069_v58, %v2710_v21  ;;  %v2722_v52 = vshll.u32 %v8070_v60, %v2710_v21  ;;  %v9583_v50 = vand.u32 8388607, %v933_v57 }
 0x1cf   :  { %v2668_v53 = vsel %vm9496_vm13, %v9278_v18, %v2665_v30  ;;  %v883_v39 = vsub.s32 0, %v9560_v61  ;;  %v2714_v35 = vshrl.u32 %v8068_v56, %v2711_v2  ;;  %v2717_v32 = vshrl.u32 %v8069_v58, %v2711_v2 }
 0x1d0   :  { %7712 = vcosq.f32 %v2668_v53  ;;  %v2720_v42 = vshrl.u32 %v8070_v60, %v2711_v2  ;;  %v2723_v4 = vshrl.u32 %v8071_v62, %v2711_v2  ;;  %v2712_v22 = vshrl.u32 %v8067_v54, %v2711_v2 }
 0x1d1   :  { %7714 = vsinq.f32 %v2668_v53  ;;  %v7161_v51 = vmin.u32 %v883_v39, %v9560_v61  ;;  %v2715_v36 = vor.u32 %v2714_v35, %v2713_v19  ;;  %v2718_v5 = vor.u32 %v2717_v32, %v2716_v46 }
 0x1d2   :  { %v2721_v24 = vor.u32 %v2720_v42, %v2719_v23  ;;  %v7164_v20 = vadd.s32 4294967169, %v937_v15  ;;  %vm2675_vm9 = vcmp.lt.s32.totalorder %v9554_v27, 2  ;;  %vm9590_vm12 = vcmp.le.f32.partialorder %v817_v16, 0.7853982 }
 0x1d3   :  { %v885_v49 = vclz %v7161_v51  ;;  %v2724_v25 = vor.u32 %v2723_v4, %v2722_v52  ;;  %v2725_v29 = vshll.u32 %v8071_v62, %v2710_v21  ;;  %v2726_v47 = vshrl.u32 %v8072_v10, %v2711_v2 }
 0x1d4   :  { %vm2728_vm10 = vcmp.lt.s32.totalorder %v2709_v44, 1  ;;  %vm2672_vm11 = vweird.f32 %v9278_v18  ;;  %v904_v11 = vsel %vm819_vm5, %v903_v26, %v879_v38  ;;  %vm2730_vm14 = vcmp.lt.s32.totalorder %v2709_v44, 3 }
 0x1d5   :  { %v7162_v31 = vadd.s32 4294967294, %v885_v49  ;;  %vm2731_vm13 = vcmp.lt.s32.totalorder %v2709_v44, 4  ;;  %v2727_v43 = vor.u32 %v2726_v47, %v2725_v29  ;;  %vm2729_vm15 = vcmp.lt.s32.totalorder %v2709_v44, 2 }
 0x1d6   :  { %v2733_v16 = vsel %vm2731_vm13, %v2721_v24, 2102212464  ;;  %v2736_v55 = vsel %vm2728_vm10, %v2715_v36, %v2718_v5  ;;  %v2732_v41 = vsel %vm2728_vm10, %v2712_v22, %v2715_v36  ;;  %v2737_v45 = vsel %vm2731_vm13, %v2724_v25, 920167782 }
 0x1d7   :  { %vm7163_vm0 = vcmp.lt.s32.totalorder %v7162_v31, 0  ;;  %v2734_v6 = vsel %vm2730_vm14, %v2718_v5, %v2733_v16  ;;  %v2738_v34 = vsel %vm2730_vm14, %v2721_v24, %v2737_v45  ;;  %v2740_v21 = vsel %vm2728_vm10, %v2718_v5, %v2721_v24  ;;  %v9637_v45 = vld [vmem:[#allocation5 + $0x8] sm:$0xff] }
 0x1d8   :  { %v888_v63 = vsel %vm7163_vm0, 0, %v7162_v31  ;;  %v2741_v48 = vsel %vm2731_vm13, %v2727_v43, 1326507024  ;;  %v2739_v19 = vsel %vm2729_vm15, %v2736_v55, %v2738_v34  ;;  %v2735_v15 = vsel %vm2729_vm15, %v2732_v41, %v2734_v6 }
 0x1d9   :  { %v889_v38 = vsub.s32 32, %v888_v63  ;;  %v890_v2 = vshll.u32 %v9560_v61, %v888_v63  ;;  %v893_v30 = vsub.s32 4294967266, %v888_v63  ;;  %v2742_v53 = vsel %vm2730_vm14, %v2724_v25, %v2741_v48 }
 0x1da   :  { %v7713_v46 = vpop.eup %7712  ;;  %v9609_v39 = vmul.u32.u64.low %v9562_v17, %v2739_v19  ;;  %v9610_v23 = vmul.u32.u64.high %v9562_v17, %v2739_v19, %v9609_v39  ;;  %v2743_v61 = vsel %vm2729_vm15, %v2740_v21, %v2742_v53  ;;  %v943_v5 = vadd.s32 1, %v7164_v20 }
 0x1db   :  { %v7715_v35 = vpop.eup %7714  ;;  %v2680_v32 = vxor.u32 2147483648, %v7713_v46  ;;  %v891_v42 = vshrl.u32 %v9558_v59, %v889_v38  ;;  %v894_v51 = vadd.s32 127, %v893_v30  ;;  %v906_v24 = vsel %vm9590_vm12, 0, %v904_v11 }
 0x1dc   :  { %v2677_v26 = vxor.u32 2147483648, %v7715_v35  ;;  %v9616_v52 = vmul.u32.u64.low %v9562_v17, %v2743_v61  ;;  %v9617_v36 = vmul.u32.u64.high %v9562_v17, %v2743_v61, %v9616_v52  ;;  %v2751_v44 = vmul.u32 %v9562_v17, %v2735_v15 }
 0x1dd   :  { %v2681_v4 = vsel %vm2679_vm7, %v2680_v32, %v7715_v35  ;;  %v892_v49 = vor.u32 %v891_v42, %v890_v2  ;;  %v895_v22 = vshll.u32 %v894_v51, 23  ;;  %v2754_v25 = vadd.s32 1, %v9610_v23 }
 0x1de   :  { %v2678_v59 = vsel %vm2676_vm8, %v7713_v46, %v2677_v26  ;;  %vm944_vm1 = vcmp.gt.s32.totalorder %v943_v5, 0  ;;  %vm2753_vm2 = vc.u32 %v9617_v36, %v9609_v39  ;;  %v910_v41 = vadd.s32 3, %v906_v24 }
 0x1df   :  { %v2682_v29 = vsel %vm2675_vm9, %v2678_v59, %v2681_v4  ;;  %v896_v20 = vor.u32 4788187, %v895_v22  ;;  %v899_v47 = vcvt.s32.f32 %v892_v49  ;;  %v945_v31 = vsel %vm944_vm1, %v943_v5, 0  ;;  %v9663_v59 = vld [vmem:[#allocation7 + $0x8] sm:$0xff] }
 0x1e0   :  { %v2683_v43 = vsel %vm2672_vm11, nan, %v2682_v29  ;;  %v9633_v11 = vshrl.u32 %v945_v31, 5  ;;  %v2755_v17 = vsel %vm2753_vm2, %v2754_v25, %v9610_v23  ;;  %v947_v55 = vand.u32 31, %v945_v31 }
 0x1e1   :  { %3547 = vxpose.xlu1.b32.cont [8/16] %v2683_v43, 128  ;;  %v897_v16 = vand.u32 2147483647, %v896_v20  ;;  %v2756_v6 = vadd.s32 %v2755_v17, %v2751_v44  ;;  %v941_v27 = vor.u32 8388608, %v9583_v50  ;;  %v2689_v18 = vmul.f32 %v9637_v45, %v9462_v40 }
 0x1e2   :  { %v948_v34 = vsub.s32 32, %v947_v55  ;;  %v950_v21 = vshll.u32 %v8067_v54, %v947_v55  ;;  %v953_v48 = vshll.u32 %v8068_v56, %v947_v55  ;;  %v956_v2 = vshll.u32 %v8069_v58, %v947_v55 }
 0x1e3   :  { %v900_v63 = vmul.f32 %v899_v47, %v897_v16  ;;  %v2757_v38 = vadd.s32 536870912, %v2756_v6  ;;  %v959_v30 = vshll.u32 %v8070_v60, %v947_v55  ;;  %vm965_vm3 = vcmp.lt.s32.totalorder %v9633_v11, 1 }
 0x1e4   :  { %v951_v50 = vshrl.u32 %v8068_v56, %v948_v34  ;;  %v954_v46 = vshrl.u32 %v8069_v58, %v948_v34  ;;  %v962_v15 = vshll.u32 %v8071_v62, %v947_v55  ;;  %v957_v23 = vshrl.u32 %v8070_v60, %v948_v34 }
 0x1e5   :  { %v901_v19 = vxor.u32 2147483648, %v900_v63  ;;  %v2758_v53 = vshrl.u32 %v2757_v38, 30  ;;  %v960_v35 = vshrl.u32 %v8071_v62, %v948_v34  ;;  %v963_v32 = vshrl.u32 %v8072_v10, %v948_v34 }
 0x1e6   :  { %v952_v51 = vor.u32 %v951_v50, %v950_v21  ;;  %v955_v61 = vor.u32 %v954_v46, %v953_v48  ;;  %vm967_vm4 = vcmp.lt.s32.totalorder %v9633_v11, 3  ;;  %v958_v5 = vor.u32 %v957_v23, %v956_v2 }
 0x1e7   :  { %v902_v42 = vsel %vm819_vm5, %v901_v19, %v900_v63  ;;  %v2759_v52 = vshll.u32 %v2758_v53, 30  ;;  %vm968_vm6 = vcmp.lt.s32.totalorder %v9633_v11, 4  ;;  %v949_v4 = vshrl.u32 %v8067_v54, %v948_v34 }
 0x1e8   :  { %v905_v26 = vsel %vm9590_vm12, %v9382_v0, %v902_v42  ;;  %v961_v49 = vor.u32 %v960_v35, %v959_v30  ;;  %v964_v22 = vor.u32 %v963_v32, %v962_v15  ;;  %vm966_vm5 = vcmp.lt.s32.totalorder %v9633_v11, 2 }
 0x1e9   :  { %7716 = vcosq.f32 %v905_v26  ;;  %v9660_v24 = vsub.s32 %v2756_v6, %v2759_v52  ;;  %v9666_v44 = vadd.f32 %v9663_v59, %v2689_v18  ;;  %v970_v12 = vsel %vm968_vm6, %v958_v5, 2102212464 }
 0x1ea   :  { %7718 = vsinq.f32 %v905_v26  ;;  %v973_v25 = vsel %vm965_vm3, %v952_v51, %v955_v61  ;;  %v974_v29 = vsel %vm968_vm6, %v961_v49, 920167782  ;;  %v981_v20 = vshll.u32 %v941_v27, 8 }
 0x1eb   :  { %v911_v47 = vand.u32 3, %v910_v41  ;;  %v2762_v31 = vsub.s32 0, %v9660_v24  ;;  %v975_v43 = vsel %vm967_vm4, %v958_v5, %v974_v29  ;;  %v969_v16 = vsel %vm965_vm3, %v949_v4, %v952_v51 }
 0x1ec   :  { %v976_v17 = vsel %vm966_vm5, %v973_v25, %v975_v43  ;;  %v977_v55 = vsel %vm965_vm3, %v955_v61, %v958_v5  ;;  %v978_v6 = vsel %vm968_vm6, %v964_v22, 1326507024  ;;  %v971_v41 = vsel %vm967_vm4, %v955_v61, %v970_v12 }
 0x1ed   :  { %v7229_v27 = vmin.u32 %v2762_v31, %v9660_v24  ;;  %v979_v18 = vsel %vm967_vm4, %v961_v49, %v978_v6  ;;  %v2803_v63 = vand.u32 2139095040, %v9666_v44  ;;  %vm909_vm7 = vweird.f32 %v9382_v0 }
 0x1ee   :  { %v980_v34 = vsel %vm966_vm5, %v977_v55, %v979_v18  ;;  %v9693_v21 = vmul.u32.u64.low %v981_v20, %v976_v17  ;;  %v9694_v48 = vmul.u32.u64.high %v981_v20, %v976_v17, %v9693_v21  ;;  %vm9700_vm8 = vcmp.le.f32.partialorder %v2696_v8, 0.7853982 }
 0x1ef   :  { %v2764_v2 = vclz %v7229_v27  ;;  %v2782_v30 = vsub.s32 4, %v2758_v53  ;;  %v972_v19 = vsel %vm966_vm5, %v969_v16, %v971_v41  ;;  %v2804_v15 = vshrl.u32 %v2803_v63, 23 }
 0x1f0   :  { %v9706_v50 = vmul.u32.u64.low %v981_v20, %v980_v34  ;;  %v9707_v46 = vmul.u32.u64.high %v981_v20, %v980_v34, %v9706_v50  ;;  %vm913_vm9 = vcmp.eq.s32.totalorder %v911_v47, 0  ;;  %vm2698_vm12 = vcmp.lt.s32.totalorder %v9515_v28, 0 }
 0x1f1   :  { %v7230_v23 = vadd.s32 4294967294, %v2764_v2  ;;  %v2800_v35 = vand.u32 2147483647, %v9666_v44  ;;  %vm916_vm10 = vcmp.eq.s32.totalorder %v911_v47, 2  ;;  %v2752_v8 = vadd.s32 %v9609_v39, %v9617_v36 }
 0x1f2   :  { %v991_v42 = vadd.s32 1, %v9694_v48  ;;  %v7232_v51 = vadd.s32 4294967169, %v2804_v15  ;;  %v2783_v26 = vsel %vm2698_vm12, %v2782_v30, %v2758_v53  ;;  %v988_v52 = vmul.u32 %v981_v20, %v972_v19 }
 0x1f3   :  { %v7717_v32 = vpop.eup %7716  ;;  %vm7231_vm11 = vcmp.lt.s32.totalorder %v7230_v23, 0  ;;  %vm912_vm14 = vcmp.lt.s32.totalorder %v911_v47, 2  ;;  %vm990_vm13 = vc.u32 %v9707_v46, %v9693_v21  ;;  %v2785_v25 = vsel %vm9700_vm8, 0, %v2783_v26 }
 0x1f4   :  { %v7719_v11 = vpop.eup %7718  ;;  %v917_v61 = vxor.u32 2147483648, %v7717_v32  ;;  %v2767_v4 = vsel %vm7231_vm11, 0, %v7230_v23  ;;  %v992_v29 = vsel %vm990_vm13, %v991_v42, %v9694_v48  ;;  %v2810_v53 = vadd.s32 1, %v7232_v51 }
 0x1f5   :  { %v914_v5 = vxor.u32 2147483648, %v7719_v11  ;;  %v2768_v22 = vsub.s32 32, %v2767_v4  ;;  %v2769_v39 = vshll.u32 %v9660_v24, %v2767_v4  ;;  %v2772_v36 = vsub.s32 4294967266, %v2767_v4 }
 0x1f6   :  { %v918_v49 = vsel %vm916_vm10, %v917_v61, %v7719_v11  ;;  %v993_v16 = vadd.s32 %v992_v29, %v988_v52  ;;  %v2807_v55 = vand.u32 8388607, %v2800_v35  ;;  %vm2811_vm15 = vcmp.gt.s32.totalorder %v2810_v53, 0 }
 0x1f7   :  { %v915_v12 = vsel %vm913_vm9, %v7717_v32, %v914_v5  ;;  %v2770_v31 = vshrl.u32 %v2752_v8, %v2768_v22  ;;  %v2773_v43 = vadd.s32 127, %v2772_v36  ;;  %v926_v24 = vmul.f32 %v9637_v45, %v9507_v33 }
 0x1f8   :  { %v919_v20 = vsel %vm912_vm14, %v915_v12, %v918_v49  ;;  %v994_v27 = vadd.s32 536870912, %v993_v16  ;;  %v2812_v41 = vsel %vm2811_vm15, %v2810_v53, 0  ;;  %v2789_v48 = vadd.s32 3, %v2785_v25 }
 0x1f9   :  { %v920_v17 = vsel %vm909_vm7, nan, %v919_v20  ;;  %v2771_v47 = vor.u32 %v2770_v31, %v2769_v39  ;;  %v2774_v6 = vshll.u32 %v2773_v43, 23  ;;  %v2814_v18 = vand.u32 31, %v2812_v41 }
 0x1fa   :  { %1784 = vxpose.xlu0.b32.cont [8/16] %v920_v17, 128  ;;  %v9729_v2 = vshrl.u32 %v994_v27, 30  ;;  %v2808_v0 = vor.u32 8388608, %v2807_v55  ;;  %v2813_v30 = vshrl.u32 %v2812_v41, 5  ;;  %v9732_v50 = vadd.f32 %v9663_v59, %v926_v24 }
 0x1fb   :  { %v2775_v63 = vor.u32 4788187, %v2774_v6  ;;  %v2778_v34 = vcvt.s32.f32 %v2771_v47  ;;  %v2815_v19 = vsub.s32 32, %v2814_v18  ;;  %v2817_v23 = vshll.u32 %v8067_v54, %v2814_v18 }
 0x1fc   :  { %v996_v45 = vshll.u32 %v9729_v2, 30  ;;  %v2820_v32 = vshll.u32 %v8068_v56, %v2814_v18  ;;  %v2823_v51 = vshll.u32 %v8069_v58, %v2814_v18  ;;  %v2826_v59 = vshll.u32 %v8070_v60, %v2814_v18 }
 0x1fd   :  { %v2776_v15 = vand.u32 2147483647, %v2775_v63  ;;  %v2818_v8 = vshrl.u32 %v8068_v56, %v2815_v19  ;;  %v2821_v42 = vshrl.u32 %v8069_v58, %v2815_v19  ;;  %v2824_v11 = vshrl.u32 %v8070_v60, %v2815_v19 }
 0x1fe   :  { %v9741_v26 = vsub.s32 %v993_v16, %v996_v45  ;;  %v2827_v52 = vshrl.u32 %v8071_v62, %v2815_v19  ;;  %v9745_v5 = vand.u32 3, %v2789_v48  ;;  %v989_v4 = vadd.s32 %v9693_v21, %v9707_v46 }
 0x1ff   :  { %v2779_v61 = vmul.f32 %v2778_v34, %v2776_v15  ;;  %v9749_v49 = vshll.u32 %v2808_v0, 8  ;;  %v1037_v22 = vand.u32 2147483647, %v9732_v50  ;;  %v2816_v12 = vshrl.u32 %v8067_v54, %v2815_v19 }
 0x200   :  { %v999_v36 = vsub.s32 0, %v9741_v26  ;;  %v2819_v25 = vor.u32 %v2818_v8, %v2817_v23  ;;  %v2822_v29 = vor.u32 %v2821_v42, %v2820_v32  ;;  %v2825_v53 = vor.u32 %v2824_v11, %v2823_v51 }
 0x201   :  { %v2780_v39 = vxor.u32 2147483648, %v2779_v61  ;;  %v2829_v20 = vshll.u32 %v8071_v62, %v2814_v18  ;;  %v2830_v31 = vshrl.u32 %v8072_v10, %v2815_v19  ;;  %v2828_v46 = vor.u32 %v2827_v52, %v2826_v59 }
 0x202   :  { %v7165_v21 = vmin.u32 %v999_v36, %v9741_v26  ;;  %vm2832_vm0 = vcmp.lt.s32.totalorder %v2813_v30, 1  ;;  %vm935_vm1 = vcmp.lt.s32.totalorder %v9545_v14, 0  ;;  %vm2835_vm2 = vcmp.lt.s32.totalorder %v2813_v30, 4 }
 0x203   :  { %v2781_v43 = vsel %vm2698_vm12, %v2780_v39, %v2779_v61  ;;  %v2831_v17 = vor.u32 %v2830_v31, %v2829_v20  ;;  %v1040_v55 = vand.u32 2139095040, %v9732_v50  ;;  %vm2833_vm3 = vcmp.lt.s32.totalorder %v2813_v30, 2  ;;  %v9802_v20 = vld [vmem:[#allocation5 + $0x10] sm:$0xff] }
 0x204   :  { %v2784_v16 = vsel %vm9700_vm8, %v9515_v28, %v2781_v43  ;;  %v1001_v24 = vclz %v7165_v21  ;;  %vm2834_vm4 = vcmp.lt.s32.totalorder %v2813_v30, 3  ;;  %v2836_v47 = vsel %vm2832_vm0, %v2816_v12, %v2819_v25 }
 0x205   :  { %7720 = vcosq.f32 %v2784_v16  ;;  %v2837_v6 = vsel %vm2835_vm2, %v2825_v53, 2102212464  ;;  %v2840_v27 = vsel %vm2832_vm0, %v2819_v25, %v2822_v29  ;;  %vm9769_vm6 = vcmp.le.f32.partialorder %v933_v57, 0.7853982 }
 0x206   :  { %7722 = vsinq.f32 %v2784_v16  ;;  %v7166_v41 = vadd.s32 4294967294, %v1001_v24  ;;  %v2838_v18 = vsel %vm2834_vm4, %v2822_v29, %v2837_v6  ;;  %v2841_v63 = vsel %vm2835_vm2, %v2828_v46, 920167782 }
 0x207   :  { %v2844_v34 = vsel %vm2832_vm0, %v2822_v29, %v2825_v53  ;;  %v1019_v48 = vsub.s32 4, %v9729_v2  ;;  %v2842_v0 = vsel %vm2834_vm4, %v2825_v53, %v2841_v63  ;;  %v2845_v19 = vsel %vm2835_vm2, %v2831_v17, 1326507024  ;;  %v9815_v63 = vld [vmem:[#allocation7 + $0x10] sm:$0xff] }
 0x208   :  { %v1041_v15 = vshrl.u32 %v1040_v55, 23  ;;  %vm7167_vm5 = vcmp.lt.s32.totalorder %v7166_v41, 0  ;;  %v2839_v57 = vsel %vm2833_vm3, %v2836_v47, %v2838_v18  ;;  %v2843_v45 = vsel %vm2833_vm3, %v2840_v27, %v2842_v0 }
 0x209   :  { %v2846_v23 = vsel %vm2834_vm4, %v2828_v46, %v2845_v19  ;;  %vm2788_vm7 = vweird.f32 %v9515_v28  ;;  %v1004_v32 = vsel %vm7167_vm5, 0, %v7166_v41  ;;  %vm2791_vm8 = vcmp.lt.s32.totalorder %v9745_v5, 2 }
 0x20a   :  { %v2847_v8 = vsel %vm2833_vm3, %v2844_v34, %v2846_v23  ;;  %v9785_v42 = vmul.u32.u64.low %v9749_v49, %v2843_v45  ;;  %v9786_v51 = vmul.u32.u64.high %v9749_v49, %v2843_v45, %v9785_v42  ;;  %v1005_v11 = vsub.s32 32, %v1004_v32 }
 0x20b   :  { %v1006_v61 = vshll.u32 %v9741_v26, %v1004_v32  ;;  %v1009_v59 = vsub.s32 4294967266, %v1004_v32  ;;  %v7168_v52 = vadd.s32 4294967169, %v1041_v15  ;;  %vm2792_vm9 = vcmp.eq.s32.totalorder %v9745_v5, 0 }
 0x20c   :  { %v9793_v39 = vmul.u32.u64.low %v9749_v49, %v2847_v8  ;;  %v9794_v36 = vmul.u32.u64.high %v9749_v49, %v2847_v8, %v9793_v39  ;;  %v1007_v30 = vshrl.u32 %v989_v4, %v1005_v11  ;;  %v1020_v25 = vsel %vm935_vm1, %v1019_v48, %v9729_v2 }
 0x20d   :  { %v1010_v12 = vadd.s32 127, %v1009_v59  ;;  %v1047_v29 = vadd.s32 1, %v7168_v52  ;;  %vm2795_vm12 = vcmp.eq.s32.totalorder %v9745_v5, 2  ;;  %v2855_v26 = vmul.u32 %v9749_v49, %v2839_v57 }
 0x20e   :  { %v2858_v53 = vadd.s32 1, %v9786_v51  ;;  %v2690_v31 = vmul.f32 %v9802_v20, %v9462_v40  ;;  %v1008_v21 = vor.u32 %v1007_v30, %v1006_v61  ;;  %v1044_v46 = vand.u32 8388607, %v1037_v22 }
 0x20f   :  { %v7721_v43 = vpop.eup %7720  ;;  %v1011_v4 = vshll.u32 %v1010_v12, 23  ;;  %vm1048_vm10 = vcmp.gt.s32.totalorder %v1047_v29, 0  ;;  %v1022_v17 = vsel %vm9769_vm6, 0, %v1020_v25  ;;  %vm2857_vm11 = vc.u32 %v9794_v36, %v9785_v42 }
 0x210   :  { %v7723_v2 = vpop.eup %7722  ;;  %v2796_v16 = vxor.u32 2147483648, %v7721_v43  ;;  %v1049_v49 = vsel %vm1048_vm10, %v1047_v29, 0  ;;  %v1015_v47 = vcvt.s32.f32 %v1008_v21  ;;  %v2859_v6 = vsel %vm2857_vm11, %v2858_v53, %v9786_v51 }
 0x211   :  { %v2793_v55 = vxor.u32 2147483648, %v7723_v2  ;;  %v1012_v24 = vor.u32 4788187, %v1011_v4  ;;  %v2860_v41 = vadd.s32 %v2859_v6, %v2855_v26  ;;  %v1051_v18 = vand.u32 31, %v1049_v49 }
 0x212   :  { %v2797_v27 = vsel %vm2795_vm12, %v2796_v16, %v7723_v2  ;;  %v9818_v34 = vadd.f32 %v9815_v63, %v2690_v31  ;;  %v1026_v19 = vadd.s32 3, %v1022_v17  ;;  %v1045_v15 = vor.u32 8388608, %v1044_v46 }
 0x213   :  { %v2794_v48 = vsel %vm2792_vm9, %v7721_v43, %v2793_v55  ;;  %v1013_v0 = vand.u32 2147483647, %v1012_v24  ;;  %v2861_v45 = vadd.s32 536870912, %v2860_v41  ;;  %v1050_v23 = vshrl.u32 %v1049_v49, 5 }
 0x214   :  { %v2798_v57 = vsel %vm2791_vm8, %v2794_v48, %v2797_v27  ;;  %v1052_v32 = vsub.s32 32, %v1051_v18  ;;  %v1054_v11 = vshll.u32 %v8067_v54, %v1051_v18  ;;  %v1057_v61 = vshll.u32 %v8068_v56, %v1051_v18 }
 0x215   :  { %v2799_v8 = vsel %vm2788_vm7, nan, %v2798_v57  ;;  %v1016_v51 = vmul.f32 %v1015_v47, %v1013_v0  ;;  %v9828_v59 = vshrl.u32 %v2861_v45, 30  ;;  %v1060_v5 = vshll.u32 %v8069_v58, %v1051_v18 }
 0x216   :  { %3548 = vxpose.xlu1.b32.cont [9/16] %v2799_v8, 128  ;;  %v1055_v52 = vshrl.u32 %v8068_v56, %v1052_v32  ;;  %v1058_v39 = vshrl.u32 %v8069_v58, %v1052_v32  ;;  %v1061_v12 = vshrl.u32 %v8070_v60, %v1052_v32  ;;  %v1063_v28 = vshll.u32 %v8070_v60, %v1051_v18 }
 0x217   :  { %v1017_v30 = vxor.u32 2147483648, %v1016_v51  ;;  %v1064_v25 = vshrl.u32 %v8071_v62, %v1052_v32  ;;  %v9836_v29 = vand.u32 3, %v1026_v19  ;;  %v2863_v26 = vshll.u32 %v9828_v59, 30 }
 0x218   :  { %v1053_v53 = vshrl.u32 %v8067_v54, %v1052_v32  ;;  %v2907_v31 = vand.u32 2139095040, %v9818_v34  ;;  %v1056_v21 = vor.u32 %v1055_v52, %v1054_v11  ;;  %v1059_v4 = vor.u32 %v1058_v39, %v1057_v61 }
 0x219   :  { %v1018_v43 = vsel %vm935_vm1, %v1017_v30, %v1016_v51  ;;  %v1066_v46 = vshll.u32 %v8071_v62, %v1051_v18  ;;  %v9847_v16 = vsub.s32 %v2860_v41, %v2863_v26  ;;  %v1065_v17 = vor.u32 %v1064_v25, %v1063_v28 }
 0x21a   :  { %v1021_v2 = vsel %vm9769_vm6, %v9545_v14, %v1018_v43  ;;  %v1067_v49 = vshrl.u32 %v8072_v10, %v1052_v32  ;;  %v1062_v55 = vor.u32 %v1061_v12, %v1060_v5  ;;  %vm1069_vm14 = vcmp.lt.s32.totalorder %v1050_v23, 1 }
 0x21b   :  { %7724 = vcosq.f32 %v1021_v2  ;;  %v9850_v24 = vshll.u32 %v1045_v15, 8  ;;  %v2866_v47 = vsub.s32 0, %v9847_v16  ;;  %v2908_v27 = vshrl.u32 %v2907_v31, 23 }
 0x21c   :  { %7726 = vsinq.f32 %v1021_v2  ;;  %v1068_v6 = vor.u32 %v1067_v49, %v1066_v46  ;;  %vm1070_vm13 = vcmp.lt.s32.totalorder %v1050_v23, 2  ;;  %vm1071_vm15 = vcmp.lt.s32.totalorder %v1050_v23, 3 }
 0x21d   :  { %vm1072_vm0 = vcmp.lt.s32.totalorder %v1050_v23, 4  ;;  %v1073_v38 = vsel %vm1069_vm14, %v1053_v53, %v1056_v21  ;;  %v7233_v41 = vmin.u32 %v2866_v47, %v9847_v16  ;;  %v1077_v48 = vsel %vm1069_vm14, %v1056_v21, %v1059_v4 }
 0x21e   :  { %v1074_v18 = vsel %vm1072_vm0, %v1062_v55, 2102212464  ;;  %v1078_v0 = vsel %vm1072_vm0, %v1065_v17, 920167782  ;;  %v1081_v57 = vsel %vm1069_vm14, %v1059_v4, %v1062_v55  ;;  %v1082_v45 = vsel %vm1072_vm0, %v1068_v6, 1326507024 }
 0x21f   :  { %v1075_v19 = vsel %vm1071_vm15, %v1059_v4, %v1074_v18  ;;  %v1079_v15 = vsel %vm1071_vm15, %v1062_v55, %v1078_v0  ;;  %vm1025_vm1 = vweird.f32 %v9545_v14  ;;  %vm1028_vm2 = vcmp.lt.s32.totalorder %v9836_v29, 2 }
 0x220   :  { %vm9863_vm3 = vcmp.le.f32.partialorder %v2800_v35, 0.7853982  ;;  %vm2802_vm4 = vcmp.lt.s32.totalorder %v9666_v44, 0  ;;  %v2868_v8 = vclz %v7233_v41  ;;  %v2886_v51 = vsub.s32 4, %v9828_v59 }
 0x221   :  { %v1076_v11 = vsel %vm1070_vm13, %v1073_v38, %v1075_v19  ;;  %v1080_v61 = vsel %vm1070_vm13, %v1077_v48, %v1079_v15  ;;  %v1083_v52 = vsel %vm1071_vm15, %v1065_v17, %v1082_v45  ;;  %v7236_v39 = vadd.s32 4294967169, %v2908_v27 }
 0x222   :  { %v7234_v5 = vadd.s32 4294967294, %v2868_v8  ;;  %v1084_v30 = vsel %vm1070_vm13, %v1081_v57, %v1083_v52  ;;  %v9874_v35 = vmul.u32.u64.low %v9850_v24, %v1080_v61  ;;  %v9875_v12 = vmul.u32.u64.high %v9850_v24, %v1080_v61, %v9874_v35 }
 0x223   :  { %v9879_v28 = vmul.u32.u64.low %v9850_v24, %v1084_v30  ;;  %v9880_v25 = vmul.u32.u64.high %v9850_v24, %v1084_v30, %v9879_v28  ;;  %v2904_v26 = vand.u32 2147483647, %v9818_v34  ;;  %v2914_v53 = vadd.s32 1, %v7236_v39 }
 0x224   :  { %vm1029_vm6 = vcmp.eq.s32.totalorder %v9836_v29, 0  ;;  %vm1032_vm5 = vcmp.eq.s32.totalorder %v9836_v29, 2  ;;  %v2856_v23 = vadd.s32 %v9785_v42, %v9794_v36  ;;  %vm7235_vm7 = vcmp.lt.s32.totalorder %v7234_v5, 0 }
 0x225   :  { %v7725_v31 = vpop.eup %7724  ;;  %v2871_v43 = vsel %vm7235_vm7, 0, %v7234_v5  ;;  %v2887_v21 = vsel %vm2802_vm4, %v2886_v51, %v9828_v59  ;;  %v1092_v4 = vmul.u32 %v9850_v24, %v1076_v11  ;;  %vm2915_vm8 = vcmp.gt.s32.totalorder %v2914_v53, 0 }
 0x226   :  { %v7727_v46 = vpop.eup %7726  ;;  %v1033_v2 = vxor.u32 2147483648, %v7725_v31  ;;  %v2872_v17 = vsub.s32 32, %v2871_v43  ;;  %v2873_v49 = vshll.u32 %v9847_v16, %v2871_v43  ;;  %v2876_v55 = vsub.s32 4294967266, %v2871_v43 }
 0x227   :  { %v1030_v47 = vxor.u32 2147483648, %v7727_v46  ;;  %vm1094_vm9 = vc.u32 %v9880_v25, %v9874_v35  ;;  %v1095_v42 = vadd.s32 1, %v9875_v12  ;;  %v2911_v36 = vand.u32 8388607, %v2904_v26 }
 0x228   :  { %v1034_v59 = vsel %vm1032_vm5, %v1033_v2, %v7727_v46  ;;  %v2874_v24 = vshrl.u32 %v2856_v23, %v2872_v17  ;;  %v2877_v6 = vadd.s32 127, %v2876_v55  ;;  %v2916_v27 = vsel %vm2915_vm8, %v2914_v53, 0 }
 0x229   :  { %v1031_v38 = vsel %vm1029_vm6, %v7725_v31, %v1030_v47  ;;  %v2889_v16 = vsel %vm9863_vm3, 0, %v2887_v21  ;;  %v1096_v41 = vsel %vm1094_vm9, %v1095_v42, %v9875_v12  ;;  %v2918_v18 = vand.u32 31, %v2916_v27 }
 0x22a   :  { %v1035_v48 = vsel %vm1028_vm2, %v1031_v38, %v1034_v59  ;;  %v2875_v0 = vor.u32 %v2874_v24, %v2873_v49  ;;  %v2878_v19 = vshll.u32 %v2877_v6, 23  ;;  %v1097_v15 = vadd.s32 %v1096_v41, %v1092_v4 }
 0x22b   :  { %v1036_v57 = vsel %vm1025_vm1, nan, %v1035_v48  ;;  %v2917_v45 = vshrl.u32 %v2916_v27, 5  ;;  %v2919_v8 = vsub.s32 32, %v2918_v18  ;;  %v2921_v51 = vshll.u32 %v8067_v54, %v2918_v18 }
 0x22c   :  { %1785 = vxpose.xlu0.b32.cont [9/16] %v1036_v57, 128  ;;  %v2879_v11 = vor.u32 4788187, %v2878_v19  ;;  %v2882_v61 = vcvt.s32.f32 %v2875_v0  ;;  %v1098_v52 = vadd.s32 536870912, %v1097_v15  ;;  %v2924_v39 = vshll.u32 %v8068_v56, %v2918_v18 }
 0x22d   :  { %v2922_v5 = vshrl.u32 %v8068_v56, %v2919_v8  ;;  %v2925_v29 = vshrl.u32 %v8069_v58, %v2919_v8  ;;  %v2927_v30 = vshll.u32 %v8069_v58, %v2918_v18  ;;  %v2928_v12 = vshrl.u32 %v8070_v60, %v2919_v8 }
 0x22e   :  { %v2880_v14 = vand.u32 2147483647, %v2879_v11  ;;  %v1099_v28 = vshrl.u32 %v1098_v52, 30  ;;  %v2930_v53 = vshll.u32 %v8070_v60, %v2918_v18  ;;  %v2931_v23 = vshrl.u32 %v8071_v62, %v2919_v8 }
 0x22f   :  { %v2893_v31 = vadd.s32 3, %v2889_v16  ;;  %v2912_v43 = vor.u32 8388608, %v2911_v36  ;;  %v2933_v21 = vshll.u32 %v8071_v62, %v2918_v18  ;;  %v927_v4 = vmul.f32 %v9802_v20, %v9507_v33 }
 0x230   :  { %v2883_v46 = vmul.f32 %v2882_v61, %v2880_v14  ;;  %v1100_v2 = vshll.u32 %v1099_v28, 30  ;;  %v2920_v17 = vshrl.u32 %v8067_v54, %v2919_v8  ;;  %v2923_v49 = vor.u32 %v2922_v5, %v2921_v51 }
 0x231   :  { %v2926_v55 = vor.u32 %v2925_v29, %v2924_v39  ;;  %v2929_v47 = vor.u32 %v2928_v12, %v2927_v30  ;;  %v2932_v42 = vor.u32 %v2931_v23, %v2930_v53  ;;  %v2934_v59 = vshrl.u32 %v8072_v10, %v2919_v8 }
 0x232   :  { %v2884_v24 = vxor.u32 2147483648, %v2883_v46  ;;  %v9921_v6 = vsub.s32 %v1097_v15, %v1100_v2  ;;  %vm2936_vm12 = vcmp.lt.s32.totalorder %v2917_v45, 1  ;;  %vm2939_vm10 = vcmp.lt.s32.totalorder %v2917_v45, 4 }
 0x233   :  { %v2935_v36 = vor.u32 %v2934_v59, %v2933_v21  ;;  %vm2938_vm11 = vcmp.lt.s32.totalorder %v2917_v45, 3  ;;  %v2941_v27 = vsel %vm2939_vm10, %v2929_v47, 2102212464  ;;  %v2952_v20 = vshll.u32 %v2912_v43, 8 }
 0x234   :  { %v2885_v38 = vsel %vm2802_vm4, %v2884_v24, %v2883_v46  ;;  %v1103_v16 = vsub.s32 0, %v9921_v6  ;;  %vm2937_vm14 = vcmp.lt.s32.totalorder %v2917_v45, 2  ;;  %v9928_v41 = vadd.f32 %v9815_v63, %v927_v4 }
 0x235   :  { %v2888_v18 = vsel %vm9863_vm3, %v9666_v44, %v2885_v38  ;;  %v2940_v48 = vsel %vm2936_vm12, %v2920_v17, %v2923_v49  ;;  %v2944_v0 = vsel %vm2936_vm12, %v2923_v49, %v2926_v55  ;;  %v2945_v19 = vsel %vm2939_vm10, %v2932_v42, 920167782  ;;  %v7926_v38 = vld [vmem:[#allocation5 + $0x18] sm:$0xff] }
 0x236   :  { %7728 = vcosq.f32 %v2888_v18  ;;  %v7169_v15 = vmin.u32 %v1103_v16, %v9921_v6  ;;  %v2942_v57 = vsel %vm2938_vm11, %v2926_v55, %v2941_v27  ;;  %v2946_v8 = vsel %vm2938_vm11, %v2929_v47, %v2945_v19 }
 0x237   :  { %7730 = vsinq.f32 %v2888_v18  ;;  %v2947_v63 = vsel %vm2937_vm14, %v2944_v0, %v2946_v8  ;;  %v2948_v51 = vsel %vm2936_vm12, %v2926_v55, %v2929_v47  ;;  %v2949_v32 = vsel %vm2939_vm10, %v2935_v36, 1326507024 }
 0x238   :  { %v2894_v11 = vand.u32 3, %v2893_v31  ;;  %v1105_v61 = vclz %v7169_v15  ;;  %v1123_v52 = vsub.s32 4, %v1099_v28  ;;  %v2950_v39 = vsel %vm2938_vm11, %v2932_v42, %v2949_v32 }
 0x239   :  { %v9943_v5 = vmul.u32.u64.low %v2952_v20, %v2947_v63  ;;  %v9944_v29 = vmul.u32.u64.high %v2952_v20, %v2947_v63, %v9943_v5  ;;  %vm9949_vm13 = vcmp.le.f32.partialorder %v1037_v22, 0.7853982  ;;  %v2943_v14 = vsel %vm2937_vm14, %v2940_v48, %v2942_v57 }
 0x23a   :  { %v7170_v12 = vadd.s32 4294967294, %v1105_v61  ;;  %v2951_v53 = vsel %vm2937_vm14, %v2948_v51, %v2950_v39  ;;  %vm2892_vm15 = vweird.f32 %v9666_v44  ;;  %vm1039_vm0 = vcmp.lt.s32.totalorder %v9732_v50, 0 }
 0x23b   :  { %v9957_v23 = vmul.u32.u64.low %v2952_v20, %v2951_v53  ;;  %v9958_v31 = vmul.u32.u64.high %v2952_v20, %v2951_v53, %v9957_v23  ;;  %v1144_v43 = vand.u32 2139095040, %v9928_v41  ;;  %vm2895_vm1 = vcmp.lt.s32.totalorder %v2894_v11, 2 }
 0x23c   :  { %v1093_v22 = vadd.s32 %v9874_v35, %v9880_v25  ;;  %vm7171_vm2 = vcmp.lt.s32.totalorder %v7170_v12, 0  ;;  %v1124_v21 = vsel %vm1039_vm0, %v1123_v52, %v1099_v28  ;;  %v2959_v45 = vmul.u32 %v2952_v20, %v2943_v14 }
 0x23d   :  { %v1108_v4 = vsel %vm7171_vm2, 0, %v7170_v12  ;;  %v2962_v46 = vadd.s32 1, %v9944_v29  ;;  %v1145_v2 = vshrl.u32 %v1144_v43, 23  ;;  %vm2896_vm3 = vcmp.eq.s32.totalorder %v2894_v11, 0 }
 0x23e   :  { %v1109_v17 = vsub.s32 32, %v1108_v4  ;;  %v1110_v49 = vshll.u32 %v9921_v6, %v1108_v4  ;;  %v1113_v55 = vsub.s32 4294967266, %v1108_v4  ;;  %v1126_v47 = vsel %vm9949_vm13, 0, %v1124_v21 }
 0x23f   :  { %vm2961_vm4 = vc.u32 %v9958_v31, %v9943_v5  ;;  %v1141_v35 = vand.u32 2147483647, %v9928_v41  ;;  %v7172_v25 = vadd.s32 4294967169, %v1145_v2  ;;  %vm2899_vm6 = vcmp.eq.s32.totalorder %v2894_v11, 2 }
 0x240   :  { %v7729_v28 = vpop.eup %7728  ;;  %v1111_v42 = vshrl.u32 %v1093_v22, %v1109_v17  ;;  %v1114_v59 = vadd.s32 127, %v1113_v55  ;;  %v2963_v24 = vsel %vm2961_vm4, %v2962_v46, %v9944_v29  ;;  %v2691_v16 = vmul.f32 %v7926_v38, %v9462_v40  ;;  %v9988_v22 = vld [vmem:[#allocation7 + $0x18] sm:$0xff] }
 0x241   :  { %v7731_v36 = vpop.eup %7730  ;;  %v2900_v27 = vxor.u32 2147483648, %v7729_v28  ;;  %v2964_v20 = vadd.s32 %v2963_v24, %v2959_v45  ;;  %v1151_v6 = vadd.s32 1, %v7172_v25  ;;  %v1130_v19 = vadd.s32 3, %v1126_v47 }
 0x242   :  { %v2897_v18 = vxor.u32 2147483648, %v7731_v36  ;;  %v1112_v48 = vor.u32 %v1111_v42, %v1110_v49  ;;  %v1115_v0 = vshll.u32 %v1114_v59, 23  ;;  %v1148_v8 = vand.u32 8388607, %v1141_v35 }
 0x243   :  { %v2901_v15 = vsel %vm2899_vm6, %v2900_v27, %v7731_v36  ;;  %v2965_v57 = vadd.s32 536870912, %v2964_v20  ;;  %vm1152_vm5 = vcmp.gt.s32.totalorder %v1151_v6, 0  ;;  %v9983_v14 = vmul.f32 %v7926_v38, %v9507_v33 }
 0x244   :  { %v2898_v63 = vsel %vm2896_vm3, %v7729_v28, %v2897_v18  ;;  %v1116_v51 = vor.u32 4788187, %v1115_v0  ;;  %v1119_v32 = vcvt.s32.f32 %v1112_v48  ;;  %v1153_v61 = vsel %vm1152_vm5, %v1151_v6, 0 }
 0x245   :  { %v2902_v52 = vsel %vm2895_vm1, %v2898_v63, %v2901_v15  ;;  %v9978_v39 = vshrl.u32 %v2965_v57, 30  ;;  %v1155_v40 = vand.u32 31, %v1153_v61  ;;  %v9985_v53 = vand.u32 3, %v1130_v19 }
 0x246   :  { %v2903_v29 = vsel %vm2892_vm15, nan, %v2902_v52  ;;  %v1117_v12 = vand.u32 2147483647, %v1116_v51  ;;  %v9991_v11 = vadd.f32 %v9988_v22, %v2691_v16  ;;  %v1149_v4 = vor.u32 8388608, %v1148_v8 }
 0x247   :  { %3549 = vxpose.xlu1.b32.cont [10/16] %v2903_v29, 128  ;;  %v2967_v23 = vshll.u32 %v9978_v39, 30  ;;  %v1156_v43 = vsub.s32 32, %v1155_v40  ;;  %v1154_v45 = vshrl.u32 %v1153_v61, 5  ;;  %v1158_v44 = vshll.u32 %v8067_v54, %v1155_v40 }
 0x248   :  { %v1120_v21 = vmul.f32 %v1119_v32, %v1117_v12  ;;  %v1161_v2 = vshll.u32 %v8068_v56, %v1155_v40  ;;  %v1164_v17 = vshll.u32 %v8069_v58, %v1155_v40  ;;  %v1167_v25 = vshll.u32 %v8070_v60, %v1155_v40 }
 0x249   :  { %v9994_v46 = vsub.s32 %v2964_v20, %v2967_v23  ;;  %v1159_v33 = vshrl.u32 %v8068_v56, %v1156_v43  ;;  %v1162_v55 = vshrl.u32 %v8069_v58, %v1156_v43  ;;  %v1165_v47 = vshrl.u32 %v8070_v60, %v1156_v43 }
 0x24a   :  { %v1121_v49 = vxor.u32 2147483648, %v1120_v21  ;;  %v2960_v28 = vadd.s32 %v9943_v5, %v9958_v31  ;;  %v1168_v59 = vshrl.u32 %v8071_v62, %v1156_v43  ;;  %v3011_v24 = vand.u32 2139095040, %v9991_v11 }
 0x24b   :  { %v2970_v42 = vsub.s32 0, %v9994_v46  ;;  %v1157_v27 = vshrl.u32 %v8067_v54, %v1156_v43  ;;  %v1160_v20 = vor.u32 %v1159_v33, %v1158_v44  ;;  %v1170_v6 = vshll.u32 %v8071_v62, %v1155_v40 }
 0x24c   :  { %v1122_v36 = vsel %vm1039_vm0, %v1121_v49, %v1120_v21  ;;  %v1163_v31 = vor.u32 %v1162_v55, %v1161_v2  ;;  %v1166_v16 = vor.u32 %v1165_v47, %v1164_v17  ;;  %v1169_v18 = vor.u32 %v1168_v59, %v1167_v25 }
 0x24d   :  { %v1125_v38 = vsel %vm9949_vm13, %v9732_v50, %v1122_v36  ;;  %v7237_v5 = vmin.u32 %v2970_v42, %v9994_v46  ;;  %v1171_v48 = vshrl.u32 %v8072_v10, %v1156_v43  ;;  %vm1173_vm7 = vcmp.lt.s32.totalorder %v1154_v45, 1 }
 0x24e   :  { %7732 = vcosq.f32 %v1125_v38  ;;  %v10016_v19 = vshll.u32 %v1149_v4, 8  ;;  %v3012_v15 = vshrl.u32 %v3011_v24, 23  ;;  %vm1174_vm8 = vcmp.lt.s32.totalorder %v1154_v45, 2 }
 0x24f   :  { %7734 = vsinq.f32 %v1125_v38  ;;  %v2972_v0 = vclz %v7237_v5  ;;  %v1172_v57 = vor.u32 %v1171_v48, %v1170_v6  ;;  %vm1175_vm9 = vcmp.lt.s32.totalorder %v1154_v45, 3 }
 0x250   :  { %vm1176_vm12 = vcmp.lt.s32.totalorder %v1154_v45, 4  ;;  %vm2906_vm10 = vcmp.lt.s32.totalorder %v9818_v34, 0  ;;  %v1177_v8 = vsel %vm1173_vm7, %v1157_v27, %v1160_v20  ;;  %v1181_v51 = vsel %vm1173_vm7, %v1160_v20, %v1163_v31 }
 0x251   :  { %v7238_v30 = vadd.s32 4294967294, %v2972_v0  ;;  %v1178_v63 = vsel %vm1176_vm12, %v1166_v16, 2102212464  ;;  %vm1132_vm11 = vcmp.lt.s32.totalorder %v9985_v53, 2  ;;  %v1182_v61 = vsel %vm1176_vm12, %v1169_v18, 920167782 }
 0x252   :  { %v1179_v32 = vsel %vm1175_vm9, %v1163_v31, %v1178_v63  ;;  %v1185_v52 = vsel %vm1173_vm7, %v1163_v31, %v1166_v16  ;;  %v1186_v40 = vsel %vm1176_vm12, %v1172_v57, 1326507024  ;;  %vm1129_vm14 = vweird.f32 %v9732_v50 }
 0x253   :  { %vm7239_vm13 = vcmp.lt.s32.totalorder %v7238_v30, 0  ;;  %v2990_v29 = vsub.s32 4, %v9978_v39  ;;  %v1183_v12 = vsel %vm1175_vm9, %v1166_v16, %v1182_v61  ;;  %v1187_v23 = vsel %vm1175_vm9, %v1169_v18, %v1186_v40 }
 0x254   :  { %vm10030_vm15 = vcmp.le.f32.partialorder %v2904_v26, 0.7853982  ;;  %v2975_v21 = vsel %vm7239_vm13, 0, %v7238_v30  ;;  %v1180_v4 = vsel %vm1174_vm8, %v1177_v8, %v1179_v32  ;;  %v1184_v44 = vsel %vm1174_vm8, %v1181_v51, %v1183_v12 }
 0x255   :  { %v1188_v33 = vsel %vm1174_vm8, %v1185_v52, %v1187_v23  ;;  %v2976_v2 = vsub.s32 32, %v2975_v21  ;;  %v2977_v17 = vshll.u32 %v9994_v46, %v2975_v21  ;;  %v2980_v49 = vsub.s32 4294967266, %v2975_v21 }
 0x256   :  { %v7240_v55 = vadd.s32 4294967169, %v3012_v15  ;;  %v10039_v47 = vmul.u32.u64.low %v10016_v19, %v1188_v33  ;;  %v10040_v25 = vmul.u32.u64.high %v10016_v19, %v1188_v33, %v10039_v47  ;;  %vm1133_vm0 = vcmp.eq.s32.totalorder %v9985_v53, 0 }
 0x257   :  { %v10043_v26 = vmul.u32.u64.low %v10016_v19, %v1184_v44  ;;  %v10044_v42 = vmul.u32.u64.high %v10016_v19, %v1184_v44, %v10043_v26  ;;  %v2978_v59 = vshrl.u32 %v2960_v28, %v2976_v2  ;;  %v2981_v24 = vadd.s32 127, %v2980_v49 }
 0x258   :  { %v3018_v45 = vadd.s32 1, %v7240_v55  ;;  %v7733_v36 = vpop.eup %7732  ;;  %vm1136_vm1 = vcmp.eq.s32.totalorder %v9985_v53, 2  ;;  %v1196_v46 = vmul.u32 %v10016_v19, %v1180_v4  ;;  %v3008_v27 = vand.u32 2147483647, %v9991_v11 }
 0x259   :  { %v10053_v20 = vadd.f32 %v9988_v22, %v9983_v14  ;;  %v7735_v6 = vpop.eup %7734  ;;  %v1137_v38 = vxor.u32 2147483648, %v7733_v36  ;;  %v2979_v5 = vor.u32 %v2978_v59, %v2977_v17  ;;  %v2982_v31 = vshll.u32 %v2981_v24, 23 }
 0x25a   :  { %vm3019_vm2 = vcmp.gt.s32.totalorder %v3018_v45, 0  ;;  %v1134_v16 = vxor.u32 2147483648, %v7735_v6  ;;  %v2991_v28 = vsel %vm2906_vm10, %v2990_v29, %v9978_v39  ;;  %vm1198_vm3 = vc.u32 %v10040_v25, %v10043_v26 }
 0x25b   :  { %v1199_v18 = vadd.s32 1, %v10044_v42  ;;  %v1138_v48 = vsel %vm1136_vm1, %v1137_v38, %v7735_v6  ;;  %v2983_v0 = vor.u32 4788187, %v2982_v31  ;;  %v2986_v19 = vcvt.s32.f32 %v2979_v5 }
 0x25c   :  { %v3020_v14 = vsel %vm3019_vm2, %v3018_v45, 0  ;;  %v1135_v22 = vsel %vm1133_vm0, %v7733_v36, %v1134_v16  ;;  %v3015_v57 = vand.u32 8388607, %v3008_v27  ;;  %v2993_v63 = vsel %vm10030_vm15, 0, %v2991_v28 }
 0x25d   :  { %v1200_v15 = vsel %vm1198_vm3, %v1199_v18, %v10044_v42  ;;  %v3022_v30 = vand.u32 31, %v3020_v14  ;;  %v1139_v39 = vsel %vm1132_vm11, %v1135_v22, %v1138_v48  ;;  %v2984_v8 = vand.u32 2147483647, %v2983_v0 }
 0x25e   :  { %v1201_v51 = vadd.s32 %v1200_v15, %v1196_v46  ;;  %v1140_v32 = vsel %vm1129_vm14, nan, %v1139_v39  ;;  %v3021_v61 = vshrl.u32 %v3020_v14, 5  ;;  %v2997_v55 = vadd.s32 3, %v2993_v63 }
 0x25f   :  { %v3023_v52 = vsub.s32 32, %v3022_v30  ;;  %v3025_v40 = vshll.u32 %v8067_v54, %v3022_v30  ;;  %1786 = vxpose.xlu0.b32.cont [10/16] %v1140_v32, 128  ;;  %v2987_v29 = vmul.f32 %v2986_v19, %v2984_v8  ;;  %v3028_v23 = vshll.u32 %v8068_v56, %v3022_v30 }
 0x260   :  { %v1202_v12 = vadd.s32 536870912, %v1201_v51  ;;  %v3031_v53 = vshll.u32 %v8069_v58, %v3022_v30  ;;  %v3034_v50 = vshll.u32 %v8070_v60, %v3022_v30  ;;  %v3037_v49 = vshll.u32 %v8071_v62, %v3022_v30 }
 0x261   :  { %v3026_v21 = vshrl.u32 %v8068_v56, %v3023_v52  ;;  %v3029_v4 = vshrl.u32 %v8069_v58, %v3023_v52  ;;  %v3032_v44 = vshrl.u32 %v8070_v60, %v3023_v52  ;;  %v2988_v33 = vxor.u32 2147483648, %v2987_v29 }
 0x262   :  { %v1203_v2 = vshrl.u32 %v1202_v12, 30  ;;  %v3035_v17 = vshrl.u32 %v8071_v62, %v3023_v52  ;;  %v3016_v47 = vor.u32 8388608, %v3015_v57  ;;  %v3024_v42 = vshrl.u32 %v8067_v54, %v3023_v52 }
 0x263   :  { %v3038_v59 = vshrl.u32 %v8072_v10, %v3023_v52  ;;  %v2989_v24 = vsel %vm2906_vm10, %v2988_v33, %v2987_v29  ;;  %v3027_v36 = vor.u32 %v3026_v21, %v3025_v40  ;;  %v3030_v46 = vor.u32 %v3029_v4, %v3028_v23 }
 0x264   :  { %v1204_v45 = vshll.u32 %v1203_v2, 30  ;;  %v2992_v6 = vsel %vm10030_vm15, %v9818_v34, %v2989_v24  ;;  %v3036_v38 = vor.u32 %v3035_v17, %v3034_v50  ;;  %vm3040_vm4 = vcmp.lt.s32.totalorder %v3021_v61, 1 }
 0x265   :  { %v3039_v5 = vor.u32 %v3038_v59, %v3037_v49  ;;  %7736 = vcosq.f32 %v2992_v6  ;;  %v3033_v16 = vor.u32 %v3032_v44, %v3031_v53  ;;  %v1248_v28 = vand.u32 2139095040, %v10053_v20 }
 0x266   :  { %v10088_v31 = vsub.s32 %v1201_v51, %v1204_v45  ;;  %7738 = vsinq.f32 %v2992_v6  ;;  %vm3042_vm6 = vcmp.lt.s32.totalorder %v3021_v61, 3  ;;  %vm3043_vm5 = vcmp.lt.s32.totalorder %v3021_v61, 4 }
 0x267   :  { %v3056_v18 = vshll.u32 %v3016_v47, 8  ;;  %vm3041_vm7 = vcmp.lt.s32.totalorder %v3021_v61, 2  ;;  %v3045_v0 = vsel %vm3043_vm5, %v3033_v16, 2102212464  ;;  %v3048_v43 = vsel %vm3040_vm4, %v3027_v36, %v3030_v46 }
 0x268   :  { %v1207_v48 = vsub.s32 0, %v10088_v31  ;;  %v3044_v19 = vsel %vm3040_vm4, %v3024_v42, %v3027_v36  ;;  %v3046_v14 = vsel %vm3042_vm6, %v3030_v46, %v3045_v0  ;;  %v3049_v22 = vsel %vm3043_vm5, %v3036_v38, 920167782 }
 0x269   :  { %v3053_v15 = vsel %vm3043_vm5, %v3039_v5, 1326507024  ;;  %v2998_v57 = vand.u32 3, %v2997_v55  ;;  %v3050_v39 = vsel %vm3042_vm6, %v3033_v16, %v3049_v22  ;;  %v3052_v8 = vsel %vm3040_vm4, %v3030_v46, %v3033_v16 }
 0x26a   :  { %v7173_v30 = vmin.u32 %v1207_v48, %v10088_v31  ;;  %vm2996_vm8 = vweird.f32 %v9818_v34  ;;  %vm1143_vm9 = vcmp.lt.s32.totalorder %v9928_v41, 0  ;;  %v3051_v63 = vsel %vm3041_vm7, %v3048_v43, %v3050_v39 }
 0x26b   :  { %v3054_v51 = vsel %vm3042_vm6, %v3036_v38, %v3053_v15  ;;  %vm10104_vm12 = vcmp.le.f32.partialorder %v1141_v35, 0.7853982  ;;  %v1227_v40 = vsub.s32 4, %v1203_v2  ;;  %v3047_v29 = vsel %vm3041_vm7, %v3044_v19, %v3046_v14 }
 0x26c   :  { %v1209_v52 = vclz %v7173_v30  ;;  %v3055_v12 = vsel %vm3041_vm7, %v3052_v8, %v3054_v51  ;;  %v10110_v23 = vmul.u32.u64.low %v3056_v18, %v3051_v63  ;;  %v10111_v53 = vmul.u32.u64.high %v3056_v18, %v3051_v63, %v10110_v23 }
 0x26d   :  { %v1249_v21 = vshrl.u32 %v1248_v28, 23  ;;  %vm2999_vm10 = vcmp.lt.s32.totalorder %v2998_v57, 2  ;;  %v10114_v44 = vmul.u32.u64.low %v3056_v18, %v3055_v12  ;;  %v10115_v50 = vmul.u32.u64.high %v3056_v18, %v3055_v12, %v10114_v44 }
 0x26e   :  { %v7174_v4 = vadd.s32 4294967294, %v1209_v52  ;;  %vm3000_vm11 = vcmp.eq.s32.totalorder %v2998_v57, 0  ;;  %vm3003_vm14 = vcmp.eq.s32.totalorder %v2998_v57, 2  ;;  %v1245_v35 = vand.u32 2147483647, %v10053_v20 }
 0x26f   :  { %v7176_v33 = vadd.s32 4294967169, %v1249_v21  ;;  %v7737_v17 = vpop.eup %7736  ;;  %v1197_v61 = vadd.s32 %v10043_v26, %v10040_v25  ;;  %v1228_v49 = vsel %vm1143_vm9, %v1227_v40, %v1203_v2  ;;  %v3063_v55 = vmul.u32 %v3056_v18, %v3047_v29 }
 0x270   :  { %vm7175_vm13 = vcmp.lt.s32.totalorder %v7174_v4, 0  ;;  %v7739_v47 = vpop.eup %7738  ;;  %v3004_v42 = vxor.u32 2147483648, %v7737_v17  ;;  %v3066_v24 = vadd.s32 1, %v10111_v53  ;;  %v1230_v25 = vsel %vm10104_vm12, 0, %v1228_v49 }
 0x271   :  { %v1212_v59 = vsel %vm7175_vm13, 0, %v7174_v4  ;;  %v1255_v45 = vadd.s32 1, %v7176_v33  ;;  %v3001_v36 = vxor.u32 2147483648, %v7739_v47  ;;  %vm3065_vm15 = vc.u32 %v10115_v50, %v10110_v23 }
 0x272   :  { %v1213_v46 = vsub.s32 32, %v1212_v59  ;;  %v1214_v6 = vshll.u32 %v10088_v31, %v1212_v59  ;;  %v1217_v38 = vsub.s32 4294967266, %v1212_v59  ;;  %v3005_v5 = vsel %vm3003_vm14, %v3004_v42, %v7739_v47 }
 0x273   :  { %vm1256_vm0 = vcmp.gt.s32.totalorder %v1255_v45, 0  ;;  %v3002_v26 = vsel %vm3000_vm11, %v7737_v17, %v3001_v36  ;;  %v3067_v28 = vsel %vm3065_vm15, %v3066_v24, %v10111_v53  ;;  %v1252_v31 = vand.u32 8388607, %v1245_v35 }
 0x274   :  { %v1215_v2 = vshrl.u32 %v1197_v61, %v1213_v46  ;;  %v1218_v16 = vadd.s32 127, %v1217_v38  ;;  %v3006_v18 = vsel %vm2999_vm10, %v3002_v26, %v3005_v5  ;;  %v3068_v48 = vadd.s32 %v3067_v28, %v3063_v55 }
 0x275   :  { %v1257_v0 = vsel %vm1256_vm0, %v1255_v45, 0  ;;  %v3007_v43 = vsel %vm2996_vm8, nan, %v3006_v18  ;;  %v1234_v8 = vadd.s32 3, %v1230_v25  ;;  %v10137_v63 = vsub.s32 3, %v8136_v1 }
 0x276   :  { %v1216_v19 = vor.u32 %v1215_v2, %v1214_v6  ;;  %v1219_v14 = vshll.u32 %v1218_v16, 23  ;;  %3550 = vxpose.xlu1.b32.cont [11/16] %v3007_v43, 128  ;;  %v3069_v22 = vadd.s32 536870912, %v3068_v48  ;;  %v1259_v15 = vand.u32 31, %v1257_v0 }
 0x277   :  { %v1253_v51 = vor.u32 8388608, %v1252_v31  ;;  %v1258_v52 = vshrl.u32 %v1257_v0, 5  ;;  %v10151_v55 = vand.u32 3, %v1234_v8  ;;  %v10160_v46 = vrot.slane %v8141_v7, %v10137_v63 }
 0x278   :  { %v1220_v30 = vor.u32 4788187, %v1219_v14  ;;  %v1223_v39 = vcvt.s32.f32 %v1216_v19  ;;  %v10139_v57 = vshrl.u32 %v3069_v22, 30  ;;  %v1260_v40 = vsub.s32 32, %v1259_v15 }
 0x279   :  { %v1262_v34 = vshll.u32 %v8067_v54, %v1259_v15  ;;  %v1265_v12 = vshll.u32 %v8068_v56, %v1259_v15  ;;  %v1268_v53 = vshll.u32 %v8069_v58, %v1259_v15  ;;  %v1271_v44 = vshll.u32 %v8070_v60, %v1259_v15 }
 0x27a   :  { %v1221_v29 = vand.u32 2147483647, %v1220_v30  ;;  %v3071_v21 = vshll.u32 %v10139_v57, 30  ;;  %v1263_v4 = vshrl.u32 %v8068_v56, %v1260_v40  ;;  %v1274_v1 = vshll.u32 %v8071_v62, %v1259_v15 }
 0x27b   :  { %v1266_v17 = vshrl.u32 %v8069_v58, %v1260_v40  ;;  %v1269_v61 = vshrl.u32 %v8070_v60, %v1260_v40  ;;  %v1272_v49 = vshrl.u32 %v8071_v62, %v1260_v40  ;;  %v1275_v42 = vshrl.u32 %v8072_v10, %v1260_v40 }
 0x27c   :  { %v1224_v33 = vmul.f32 %v1223_v39, %v1221_v29  ;;  %v10153_v47 = vsub.s32 %v3068_v48, %v3071_v21  ;;  %v10156_v59 = vshll.u32 %v1253_v51, 8  ;;  %v1264_v45 = vor.u32 %v1263_v4, %v1262_v34 }
 0x27d   :  { %v1267_v36 = vor.u32 %v1266_v17, %v1265_v12  ;;  %v1270_v38 = vor.u32 %v1269_v61, %v1268_v53  ;;  %v1273_v5 = vor.u32 %v1272_v49, %v1271_v44  ;;  %vm1277_vm1 = vcmp.lt.s32.totalorder %v1258_v52, 1 }
 0x27e   :  { %v1225_v24 = vxor.u32 2147483648, %v1224_v33  ;;  %v3074_v6 = vsub.s32 0, %v10153_v47  ;;  %v1261_v26 = vshrl.u32 %v8067_v54, %v1260_v40  ;;  %v1276_v2 = vor.u32 %v1275_v42, %v1274_v1  ;;  %v7928_v40 = vld [vmem:[#allocation5] sm:$0xff] }
 0x27f   :  { %vm1280_vm2 = vcmp.lt.s32.totalorder %v1258_v52, 4  ;;  %vm1279_vm3 = vcmp.lt.s32.totalorder %v1258_v52, 3  ;;  %vm1278_vm4 = vcmp.lt.s32.totalorder %v1258_v52, 2  ;;  %v1285_v18 = vsel %vm1277_vm1, %v1264_v45, %v1267_v36  ;;  %v7929_v1 = vld [vmem:[#allocation7] sm:$0xff] }
 0x280   :  { %v1226_v25 = vsel %vm1143_vm9, %v1225_v24, %v1224_v33  ;;  %v7241_v28 = vmin.u32 %v3074_v6, %v10153_v47  ;;  %v1282_v7 = vsel %vm1280_vm2, %v1270_v38, 2102212464  ;;  %v1286_v48 = vsel %vm1280_vm2, %v1273_v5, 920167782 }
 0x281   :  { %v1229_v16 = vsel %vm10104_vm12, %v9928_v41, %v1226_v25  ;;  %vm10175_vm6 = vcmp.le.f32.partialorder %v3008_v27, 0.7853982  ;;  %vm3010_vm5 = vcmp.lt.s32.totalorder %v9991_v11, 0  ;;  %v1281_v0 = vsel %vm1277_vm1, %v1261_v26, %v1264_v45 }
 0x282   :  { %7740 = vcosq.f32 %v1229_v16  ;;  %v3076_v32 = vclz %v7241_v28  ;;  %v1283_v43 = vsel %vm1279_vm3, %v1267_v36, %v1282_v7  ;;  %v1287_v19 = vsel %vm1279_vm3, %v1270_v38, %v1286_v48 }
 0x283   :  { %7742 = vsinq.f32 %v1229_v16  ;;  %v1289_v14 = vsel %vm1277_vm1, %v1267_v36, %v1270_v38  ;;  %v3094_v15 = vsub.s32 4, %v10139_v57  ;;  %v1288_v30 = vsel %vm1278_vm4, %v1285_v18, %v1287_v19 }
 0x284   :  { %v7242_v22 = vadd.s32 4294967294, %v3076_v32  ;;  %v1290_v27 = vsel %vm1280_vm2, %v1276_v2, 1326507024  ;;  %vm1236_vm7 = vcmp.lt.s32.totalorder %v10151_v55, 2  ;;  %v3116_v29 = vmul.f32 %v7928_v40, %v10160_v46 }
 0x285   :  { %v1291_v39 = vsel %vm1279_vm3, %v1273_v5, %v1290_v27  ;;  %v10190_v8 = vmul.u32.u64.low %v10156_v59, %v1288_v30  ;;  %v10191_v51 = vmul.u32.u64.high %v10156_v59, %v1288_v30, %v10190_v8  ;;  %vm1233_vm8 = vweird.f32 %v9928_v41 }
 0x286   :  { %v3064_v34 = vadd.s32 %v10110_v23, %v10115_v50  ;;  %vm7243_vm9 = vcmp.lt.s32.totalorder %v7242_v22, 0  ;;  %v1284_v12 = vsel %vm1278_vm4, %v1281_v0, %v1283_v43  ;;  %v1292_v53 = vsel %vm1278_vm4, %v1289_v14, %v1291_v39 }
 0x287   :  { %v3079_v21 = vsel %vm7243_vm9, 0, %v7242_v22  ;;  %v10201_v4 = vmul.u32.u64.low %v10156_v59, %v1292_v53  ;;  %v10202_v44 = vmul.u32.u64.high %v10156_v59, %v1292_v53, %v10201_v4  ;;  %v10204_v33 = vadd.f32 %v7929_v1, %v3116_v29 }
 0x288   :  { %v3080_v17 = vsub.s32 32, %v3079_v21  ;;  %v3081_v61 = vshll.u32 %v10153_v47, %v3079_v21  ;;  %v3084_v49 = vsub.s32 4294967266, %v3079_v21  ;;  %v3095_v23 = vsel %vm3010_vm5, %v3094_v15, %v10139_v57 }
 0x289   :  { %v1300_v50 = vmul.u32 %v10156_v59, %v1284_v12  ;;  %v1303_v52 = vadd.s32 1, %v10191_v51  ;;  %v3127_v42 = vand.u32 2139095040, %v10204_v33  ;;  %v10215_v24 = vrot.slane %v8143_v9, %v10137_v63 }
 0x28a   :  { %vm1237_vm12 = vcmp.eq.s32.totalorder %v10151_v55, 0  ;;  %v3082_v45 = vshrl.u32 %v3064_v34, %v3080_v17  ;;  %v3085_v36 = vadd.s32 127, %v3084_v49  ;;  %v3124_v47 = vand.u32 2147483647, %v10204_v33 }
 0x28b   :  { %vm1240_vm10 = vcmp.eq.s32.totalorder %v10151_v55, 2  ;;  %v3097_v57 = vsel %vm10175_vm6, 0, %v3095_v23  ;;  %vm1302_vm11 = vc.u32 %v10202_v44, %v10190_v8  ;;  %v3128_v59 = vshrl.u32 %v3127_v42, 23 }
 0x28c   :  { %v7741_v6 = vpop.eup %7740  ;;  %v3083_v9 = vor.u32 %v3082_v45, %v3081_v61  ;;  %v3086_v25 = vshll.u32 %v3085_v36, 23  ;;  %v1304_v26 = vsel %vm1302_vm11, %v1303_v52, %v10191_v51  ;;  %v1353_v7 = vmul.f32 %v7928_v40, %v10215_v24 }
 0x28d   :  { %v7743_v38 = vpop.eup %7742  ;;  %v1241_v5 = vxor.u32 2147483648, %v7741_v6  ;;  %v1305_v16 = vadd.s32 %v1304_v26, %v1300_v50  ;;  %v7244_v28 = vadd.s32 4294967169, %v3128_v59  ;;  %v3131_v0 = vand.u32 8388607, %v3124_v47 }
 0x28e   :  { %v1238_v2 = vxor.u32 2147483648, %v7743_v38  ;;  %v3087_v48 = vor.u32 4788187, %v3086_v25  ;;  %v3090_v32 = vcvt.s32.f32 %v3083_v9  ;;  %v3101_v30 = vadd.s32 3, %v3097_v57 }
 0x28f   :  { %v1242_v18 = vsel %vm1240_vm10, %v1241_v5, %v7743_v38  ;;  %v1306_v19 = vadd.s32 536870912, %v1305_v16  ;;  %v3134_v14 = vadd.s32 1, %v7244_v28  ;;  %v10236_v51 = vadd.f32 %v7929_v1, %v1353_v7 }
 0x290   :  { %v1239_v43 = vsel %vm1237_vm12, %v7741_v6, %v1238_v2  ;;  %v3088_v15 = vand.u32 2147483647, %v3087_v48  ;;  %v3132_v29 = vor.u32 8388608, %v3131_v0  ;;  %v10239_v55 = vand.u32 3, %v3101_v30 }
 0x291   :  { %v1243_v22 = vsel %vm1236_vm7, %v1239_v43, %v1242_v18  ;;  %v10234_v39 = vshrl.u32 %v1306_v19, 30  ;;  %vm3135_vm14 = vcmp.gt.s32.totalorder %v3134_v14, 0  ;;  %v1361_v4 = vand.u32 2147483647, %v10236_v51 }
 0x292   :  { %v1244_v27 = vsel %vm1233_vm8, nan, %v1243_v22  ;;  %v3091_v40 = vmul.f32 %v3090_v32, %v3088_v15  ;;  %v3136_v34 = vsel %vm3135_vm14, %v3134_v14, 0  ;;  %v10244_v41 = vadd.s32 %v10190_v8, %v10202_v44 }
 0x293   :  { %1787 = vxpose.xlu0.b32.cont [11/16] %v1244_v27, 128  ;;  %v1308_v12 = vshll.u32 %v10234_v39, 30  ;;  %v3138_v53 = vand.u32 31, %v3136_v34  ;;  %v1364_v61 = vand.u32 2139095040, %v10236_v51  ;;  %v10253_v52 = vshll.u32 %v3132_v29, 8 }
 0x294   :  { %v3092_v21 = vxor.u32 2147483648, %v3091_v40  ;;  %v3137_v44 = vshrl.u32 %v3136_v34, 5  ;;  %vm3107_vm13 = vcmp.eq.s32.totalorder %v10239_v55, 2  ;;  %v10269_v26 = vand.u32 8388607, %v1361_v4 }
 0x295   :  { %v10246_v17 = vsub.s32 %v1305_v16, %v1308_v12  ;;  %v3139_v1 = vsub.s32 32, %v3138_v53  ;;  %v3141_v23 = vshll.u32 %v8067_v54, %v3138_v53  ;;  %v3144_v50 = vshll.u32 %v8068_v56, %v3138_v53 }
 0x296   :  { %v3093_v49 = vsel %vm3010_vm5, %v3092_v21, %v3091_v40  ;;  %v3147_v45 = vshll.u32 %v8069_v58, %v3138_v53  ;;  %v3150_v38 = vshll.u32 %v8070_v60, %v3138_v53  ;;  %v1365_v5 = vshrl.u32 %v1364_v61, 23 }
 0x297   :  { %v3096_v42 = vsel %vm10175_vm6, %v9991_v11, %v3093_v49  ;;  %v1311_v8 = vsub.s32 0, %v10246_v17  ;;  %v3142_v36 = vshrl.u32 %v8068_v56, %v3139_v1  ;;  %v3145_v6 = vshrl.u32 %v8069_v58, %v3139_v1 }
 0x298   :  { %7744 = vcosq.f32 %v3096_v42  ;;  %v3148_v57 = vshrl.u32 %v8070_v60, %v3139_v1  ;;  %v3151_v25 = vshrl.u32 %v8071_v62, %v3139_v1  ;;  %vm3104_vm15 = vcmp.eq.s32.totalorder %v10239_v55, 0 }
 0x299   :  { %7746 = vsinq.f32 %v3096_v42  ;;  %v7177_v59 = vmin.u32 %v1311_v8, %v10246_v17  ;;  %v3143_v31 = vor.u32 %v3142_v36, %v3141_v23  ;;  %v3146_v9 = vor.u32 %v3145_v6, %v3144_v50 }
 0x29a   :  { %v1331_v16 = vsub.s32 4, %v10234_v39  ;;  %v3140_v28 = vshrl.u32 %v8067_v54, %v3139_v1  ;;  %v3149_v7 = vor.u32 %v3148_v57, %v3147_v45  ;;  %vm3103_vm0 = vcmp.lt.s32.totalorder %v10239_v55, 2 }
 0x29b   :  { %v1313_v2 = vclz %v7177_v59  ;;  %vm1247_vm1 = vcmp.lt.s32.totalorder %v10053_v20, 0  ;;  %v3152_v18 = vor.u32 %v3151_v25, %v3150_v38  ;;  %v3153_v48 = vshll.u32 %v8071_v62, %v3138_v53 }
 0x29c   :  { %v3154_v32 = vshrl.u32 %v8072_v10, %v3139_v1  ;;  %vm3156_vm2 = vcmp.lt.s32.totalorder %v3137_v44, 1  ;;  %vm3100_vm3 = vweird.f32 %v9991_v11  ;;  %vm3158_vm4 = vcmp.lt.s32.totalorder %v3137_v44, 3 }
 0x29d   :  { %v7178_v0 = vadd.s32 4294967294, %v1313_v2  ;;  %vm3159_vm6 = vcmp.lt.s32.totalorder %v3137_v44, 4  ;;  %v7180_v43 = vadd.s32 4294967169, %v1365_v5  ;;  %vm3157_vm5 = vcmp.lt.s32.totalorder %v3137_v44, 2 }
 0x29e   :  { %v3155_v19 = vor.u32 %v3154_v32, %v3153_v48  ;;  %v3161_v14 = vsel %vm3159_vm6, %v3149_v7, 2102212464  ;;  %v3164_v22 = vsel %vm3156_vm2, %v3143_v31, %v3146_v9  ;;  %v3160_v15 = vsel %vm3156_vm2, %v3140_v28, %v3143_v31 }
 0x29f   :  { %vm7179_vm7 = vcmp.lt.s32.totalorder %v7178_v0, 0  ;;  %v3162_v30 = vsel %vm3158_vm4, %v3146_v9, %v3161_v14  ;;  %v3165_v27 = vsel %vm3159_vm6, %v3152_v18, 920167782  ;;  %v3168_v34 = vsel %vm3156_vm2, %v3146_v9, %v3149_v7 }
 0x2a0   :  { %v1316_v40 = vsel %vm7179_vm7, 0, %v7178_v0  ;;  %v3166_v29 = vsel %vm3158_vm4, %v3149_v7, %v3165_v27  ;;  %v3169_v12 = vsel %vm3159_vm6, %v3155_v19, 1326507024  ;;  %v3163_v23 = vsel %vm3157_vm5, %v3160_v15, %v3162_v30  ;;  %v10324_v15 = vld [vmem:[#allocation5 + $0x8] sm:$0xff] }
 0x2a1   :  { %v1317_v53 = vsub.s32 32, %v1316_v40  ;;  %v1318_v21 = vshll.u32 %v10246_v17, %v1316_v40  ;;  %v1321_v1 = vsub.s32 4294967266, %v1316_v40  ;;  %v3167_v61 = vsel %vm3157_vm5, %v3164_v22, %v3166_v29 }
 0x2a2   :  { %v7745_v49 = vpop.eup %7744  ;;  %v3170_v50 = vsel %vm3158_vm4, %v3152_v18, %v3169_v12  ;;  %v10289_v42 = vmul.u32.u64.low %v10253_v52, %v3167_v61  ;;  %v10290_v8 = vmul.u32.u64.high %v10253_v52, %v3167_v61, %v10289_v42  ;;  %v1371_v31 = vadd.s32 1, %v7180_v43 }
 0x2a3   :  { %v7747_v45 = vpop.eup %7746  ;;  %v3108_v36 = vxor.u32 2147483648, %v7745_v49  ;;  %v1319_v6 = vshrl.u32 %v10244_v41, %v1317_v53  ;;  %v1322_v57 = vadd.s32 127, %v1321_v1  ;;  %v3171_v17 = vsel %vm3157_vm5, %v3168_v34, %v3170_v50 }
 0x2a4   :  { %v3105_v59 = vxor.u32 2147483648, %v7747_v45  ;;  %v10296_v38 = vmul.u32.u64.low %v10253_v52, %v3171_v17  ;;  %v10297_v5 = vmul.u32.u64.high %v10253_v52, %v3171_v17, %v10296_v38  ;;  %v1332_v28 = vsel %vm1247_vm1, %v1331_v16, %v10234_v39 }
 0x2a5   :  { %v3109_v9 = vsel %vm3107_vm13, %v3108_v36, %v7747_v45  ;;  %v1320_v25 = vor.u32 %v1319_v6, %v1318_v21  ;;  %v1323_v2 = vshll.u32 %v1322_v57, 23  ;;  %v3179_v44 = vmul.u32 %v10253_v52, %v3163_v23 }
 0x2a6   :  { %v3106_v41 = vsel %vm3104_vm15, %v7745_v49, %v3105_v59  ;;  %v3182_v7 = vadd.s32 1, %v10290_v8  ;;  %vm1372_vm8 = vcmp.gt.s32.totalorder %v1371_v31, 0  ;;  %vm10314_vm9 = vcmp.le.f32.partialorder %v1245_v35, 0.7853982 }
 0x2a7   :  { %v3110_v18 = vsel %vm3103_vm0, %v3106_v41, %v3109_v9  ;;  %v1324_v48 = vor.u32 4788187, %v1323_v2  ;;  %v1327_v32 = vcvt.s32.f32 %v1320_v25  ;;  %v1373_v0 = vsel %vm1372_vm8, %v1371_v31, 0 }
 0x2a8   :  { %v3111_v43 = vsel %vm3100_vm3, nan, %v3110_v18  ;;  %vm3181_vm12 = vc.u32 %v10297_v5, %v10289_v42  ;;  %v1334_v55 = vsel %vm10314_vm9, 0, %v1332_v28  ;;  %v1375_v19 = vand.u32 31, %v1373_v0 }
 0x2a9   :  { %3551 = vxpose.xlu1.b32.cont [12/16] %v3111_v43, 128  ;;  %v1325_v52 = vand.u32 2147483647, %v1324_v48  ;;  %v3183_v16 = vsel %vm3181_vm12, %v3182_v7, %v10290_v8  ;;  %v1369_v11 = vor.u32 8388608, %v10269_v26  ;;  %v1374_v22 = vshrl.u32 %v1373_v0, 5 }
 0x2aa   :  { %v3184_v14 = vadd.s32 %v3183_v16, %v3179_v44  ;;  %v3117_v35 = vmul.f32 %v10324_v15, %v10160_v46  ;;  %v1376_v27 = vsub.s32 32, %v1375_v19  ;;  %v1378_v40 = vshll.u32 %v8067_v54, %v1375_v19 }
 0x2ab   :  { %v1328_v30 = vmul.f32 %v1327_v32, %v1325_v52  ;;  %v1381_v29 = vshll.u32 %v8068_v56, %v1375_v19  ;;  %v1338_v34 = vadd.s32 3, %v1334_v55  ;;  %v1384_v53 = vshll.u32 %v8069_v58, %v1375_v19  ;;  %v7931_v55 = vld [vmem:[#allocation7 + $0x8] sm:$0xff] }
 0x2ac   :  { %v3185_v12 = vadd.s32 536870912, %v3184_v14  ;;  %v1387_v21 = vshll.u32 %v8070_v60, %v1375_v19  ;;  %v1379_v26 = vshrl.u32 %v8068_v56, %v1376_v27  ;;  %v1382_v61 = vshrl.u32 %v8069_v58, %v1376_v27 }
 0x2ad   :  { %v1329_v1 = vxor.u32 2147483648, %v1328_v30  ;;  %v1390_v49 = vshll.u32 %v8071_v62, %v1375_v19  ;;  %v1385_v50 = vshrl.u32 %v8070_v60, %v1376_v27  ;;  %v1388_v8 = vshrl.u32 %v8071_v62, %v1376_v27 }
 0x2ae   :  { %v3186_v23 = vshrl.u32 %v3185_v12, 30  ;;  %v1391_v45 = vshrl.u32 %v8072_v10, %v1376_v27  ;;  %v1380_v6 = vor.u32 %v1379_v26, %v1378_v40  ;;  %v1383_v57 = vor.u32 %v1382_v61, %v1381_v29 }
 0x2af   :  { %v1330_v36 = vsel %vm1247_vm1, %v1329_v1, %v1328_v30  ;;  %vm1393_vm10 = vcmp.lt.s32.totalorder %v1374_v22, 1  ;;  %v1386_v38 = vor.u32 %v1385_v50, %v1384_v53  ;;  %vm1396_vm11 = vcmp.lt.s32.totalorder %v1374_v22, 4 }
 0x2b0   :  { %v1333_v17 = vsel %vm10314_vm9, %v10053_v20, %v1330_v36  ;;  %v3187_v59 = vshll.u32 %v3186_v23, 30  ;;  %v1389_v31 = vor.u32 %v1388_v8, %v1387_v21  ;;  %v1392_v9 = vor.u32 %v1391_v45, %v1390_v49 }
 0x2b1   :  { %7748 = vcosq.f32 %v1333_v17  ;;  %vm1395_vm14 = vcmp.lt.s32.totalorder %v1374_v22, 3  ;;  %v1377_v2 = vshrl.u32 %v8067_v54, %v1376_v27  ;;  %vm1394_vm13 = vcmp.lt.s32.totalorder %v1374_v22, 2 }
 0x2b2   :  { %7750 = vsinq.f32 %v1333_v17  ;;  %v10343_v25 = vsub.s32 %v3184_v14, %v3187_v59  ;;  %v1398_v28 = vsel %vm1396_vm11, %v1386_v38, 2102212464  ;;  %v1401_v41 = vsel %vm1393_vm10, %v1380_v6, %v1383_v57 }
 0x2b3   :  { %v1402_v44 = vsel %vm1396_vm11, %v1389_v31, 920167782  ;;  %v1409_v7 = vshll.u32 %v1369_v11, 8  ;;  %v1339_v18 = vand.u32 3, %v1338_v34  ;;  %v3210_v32 = vsub.s32 4, %v3186_v23 }
 0x2b4   :  { %v3190_v48 = vsub.s32 0, %v10343_v25  ;;  %v1403_v0 = vsel %vm1395_vm14, %v1386_v38, %v1402_v44  ;;  %v1405_v39 = vsel %vm1393_vm10, %v1383_v57, %v1386_v38  ;;  %v1406_v52 = vsel %vm1396_vm11, %v1392_v9, 1326507024 }
 0x2b5   :  { %v1404_v43 = vsel %vm1394_vm13, %v1401_v41, %v1403_v0  ;;  %v10354_v16 = vadd.f32 %v7931_v55, %v3117_v35  ;;  %v1397_v14 = vsel %vm1393_vm10, %v1377_v2, %v1380_v6  ;;  %v1399_v11 = vsel %vm1395_vm14, %v1383_v57, %v1398_v28 }
 0x2b6   :  { %v7245_v19 = vmin.u32 %v3190_v48, %v10343_v25  ;;  %v1407_v30 = vsel %vm1395_vm14, %v1389_v31, %v1406_v52  ;;  %vm3126_vm15 = vcmp.lt.s32.totalorder %v10204_v33, 0  ;;  %vm1337_vm0 = vweird.f32 %v10053_v20 }
 0x2b7   :  { %v1408_v27 = vsel %vm1394_vm13, %v1405_v39, %v1407_v30  ;;  %v10362_v40 = vmul.u32.u64.low %v1409_v7, %v1404_v43  ;;  %v10363_v29 = vmul.u32.u64.high %v1409_v7, %v1404_v43, %v10362_v40  ;;  %v3211_v35 = vsel %vm3126_vm15, %v3210_v32, %v3186_v23 }
 0x2b8   :  { %v3192_v34 = vclz %v7245_v19  ;;  %v3228_v12 = vand.u32 2147483647, %v10354_v16  ;;  %v1400_v53 = vsel %vm1394_vm13, %v1397_v14, %v1399_v11  ;;  %v3231_v26 = vand.u32 2139095040, %v10354_v16 }
 0x2b9   :  { %v10370_v21 = vmul.u32.u64.low %v1409_v7, %v1408_v27  ;;  %v10371_v1 = vmul.u32.u64.high %v1409_v7, %v1408_v27, %v10370_v21  ;;  %vm1340_vm1 = vcmp.lt.s32.totalorder %v1339_v18, 2  ;;  %vm1341_vm2 = vcmp.eq.s32.totalorder %v1339_v18, 0 }
 0x2ba   :  { %vm10376_vm3 = vcmp.le.f32.partialorder %v3124_v47, 0.7853982  ;;  %v7246_v49 = vadd.s32 4294967294, %v3192_v34  ;;  %vm1344_vm4 = vcmp.eq.s32.totalorder %v1339_v18, 2  ;;  %v3180_v22 = vadd.s32 %v10289_v42, %v10297_v5  ;;  %v10404_v21 = vld [vmem:[#allocation5 + $0x10] sm:$0xff] }
 0x2bb   :  { %v7749_v50 = vpop.eup %7748  ;;  %v1419_v23 = vadd.s32 1, %v10363_v29  ;;  %v3232_v8 = vshrl.u32 %v3231_v26, 23  ;;  %v3213_v6 = vsel %vm10376_vm3, 0, %v3211_v35  ;;  %v1416_v57 = vmul.u32 %v1409_v7, %v1400_v53 }
 0x2bc   :  { %v7751_v45 = vpop.eup %7750  ;;  %v1345_v36 = vxor.u32 2147483648, %v7749_v50  ;;  %vm7247_vm6 = vcmp.lt.s32.totalorder %v7246_v49, 0  ;;  %vm1418_vm5 = vc.u32 %v10371_v1, %v10362_v40  ;;  %v3235_v59 = vand.u32 8388607, %v3228_v12 }
 0x2bd   :  { %v1342_v47 = vxor.u32 2147483648, %v7751_v45  ;;  %v3195_v17 = vsel %vm7247_vm6, 0, %v7246_v49  ;;  %v1420_v2 = vsel %vm1418_vm5, %v1419_v23, %v10363_v29  ;;  %v7248_v28 = vadd.s32 4294967169, %v3232_v8 }
 0x2be   :  { %v1346_v38 = vsel %vm1344_vm4, %v1345_v36, %v7751_v45  ;;  %v3196_v31 = vsub.s32 32, %v3195_v17  ;;  %v3197_v42 = vshll.u32 %v10343_v25, %v3195_v17  ;;  %v3200_v5 = vsub.s32 4294967266, %v3195_v17 }
 0x2bf   :  { %v1343_v9 = vsel %vm1341_vm2, %v7749_v50, %v1342_v47  ;;  %v1354_v41 = vmul.f32 %v10324_v15, %v10215_v24  ;;  %v1421_v32 = vadd.s32 %v1420_v2, %v1416_v57  ;;  %v3217_v43 = vadd.s32 3, %v3213_v6 }
 0x2c0   :  { %v1347_v44 = vsel %vm1340_vm1, %v1343_v9, %v1346_v38  ;;  %v3198_v7 = vshrl.u32 %v3180_v22, %v3196_v31  ;;  %v3201_v48 = vadd.s32 127, %v3200_v5  ;;  %v3238_v39 = vadd.s32 1, %v7248_v28 }
 0x2c1   :  { %v1348_v0 = vsel %vm1337_vm0, nan, %v1347_v44  ;;  %v1422_v19 = vadd.s32 536870912, %v1421_v32  ;;  %v3236_v14 = vor.u32 8388608, %v3235_v59  ;;  %v10396_v11 = vadd.f32 %v7931_v55, %v1354_v41 }
 0x2c2   :  { %1788 = vxpose.xlu0.b32.cont [12/16] %v1348_v0, 128  ;;  %v3199_v25 = vor.u32 %v3198_v7, %v3197_v42  ;;  %v3202_v52 = vshll.u32 %v3201_v48, 23  ;;  %vm3239_vm7 = vcmp.gt.s32.totalorder %v3238_v39, 0  ;;  %v10398_v29 = vand.u32 3, %v3217_v43 }
 0x2c3   :  { %v1423_v18 = vshrl.u32 %v1422_v19, 30  ;;  %v3240_v27 = vsel %vm3239_vm7, %v3238_v39, 0  ;;  %vm1363_vm8 = vcmp.lt.s32.totalorder %v10236_v51, 0  ;;  %v10402_v20 = vadd.s32 %v10362_v40, %v10371_v1 }
 0x2c4   :  { %v3203_v30 = vor.u32 4788187, %v3202_v52  ;;  %v3206_v15 = vcvt.s32.f32 %v3199_v25  ;;  %v3242_v34 = vand.u32 31, %v3240_v27  ;;  %v10408_v55 = vmul.f32 %v10404_v21, %v10160_v46 }
 0x2c5   :  { %v1424_v53 = vshll.u32 %v1423_v18, 30  ;;  %v10410_v49 = vshll.u32 %v3236_v14, 8  ;;  %v1465_v50 = vand.u32 2147483647, %v10396_v11  ;;  %v1468_v22 = vand.u32 2139095040, %v10396_v11 }
 0x2c6   :  { %v3204_v35 = vand.u32 2147483647, %v3203_v30  ;;  %v3243_v26 = vsub.s32 32, %v3242_v34  ;;  %v3245_v40 = vshll.u32 %v8067_v54, %v3242_v34  ;;  %v3248_v1 = vshll.u32 %v8068_v56, %v3242_v34 }
 0x2c7   :  { %v10414_v8 = vsub.s32 %v1421_v32, %v1424_v53  ;;  %v3251_v6 = vshll.u32 %v8069_v58, %v3242_v34  ;;  %v3254_v57 = vshll.u32 %v8070_v60, %v3242_v34  ;;  %v3241_v59 = vshrl.u32 %v3240_v27, 5 }
 0x2c8   :  { %v3207_v23 = vmul.f32 %v3206_v15, %v3204_v35  ;;  %v3246_v45 = vshrl.u32 %v8068_v56, %v3243_v26  ;;  %v3249_v36 = vshrl.u32 %v8069_v58, %v3243_v26  ;;  %v3252_v38 = vshrl.u32 %v8070_v60, %v3243_v26 }
 0x2c9   :  { %v1427_v17 = vsub.s32 0, %v10414_v8  ;;  %v1447_v31 = vsub.s32 4, %v1423_v18  ;;  %v3244_v42 = vshrl.u32 %v8067_v54, %v3243_v26  ;;  %v3255_v5 = vshrl.u32 %v8071_v62, %v3243_v26 }
 0x2ca   :  { %v3208_v47 = vxor.u32 2147483648, %v3207_v23  ;;  %v3257_v9 = vshll.u32 %v8071_v62, %v3242_v34  ;;  %v3247_v41 = vor.u32 %v3246_v45, %v3245_v40  ;;  %v3250_v44 = vor.u32 %v3249_v36, %v3248_v1 }
 0x2cb   :  { %v7181_v28 = vmin.u32 %v1427_v17, %v10414_v8  ;;  %vm10435_vm9 = vcmp.le.f32.partialorder %v1361_v4, 0.7853982  ;;  %v3253_v32 = vor.u32 %v3252_v38, %v3251_v6  ;;  %v3256_v0 = vor.u32 %v3255_v5, %v3254_v57 }
 0x2cc   :  { %v3209_v2 = vsel %vm3126_vm15, %v3208_v47, %v3207_v23  ;;  %v3258_v43 = vshrl.u32 %v8072_v10, %v3243_v26  ;;  %vm3260_vm12 = vcmp.lt.s32.totalorder %v3241_v59, 1  ;;  %v1469_v25 = vshrl.u32 %v1468_v22, 23 }
 0x2cd   :  { %v3212_v7 = vsel %vm10376_vm3, %v10204_v33, %v3209_v2  ;;  %v1429_v39 = vclz %v7181_v28  ;;  %v1448_v52 = vsel %vm1363_vm8, %v1447_v31, %v1423_v18  ;;  %vm3261_vm10 = vcmp.lt.s32.totalorder %v3241_v59, 2 }
 0x2ce   :  { %7752 = vcosq.f32 %v3212_v7  ;;  %v3259_v61 = vor.u32 %v3258_v43, %v3257_v9  ;;  %vm3262_vm11 = vcmp.lt.s32.totalorder %v3241_v59, 3  ;;  %vm3263_vm14 = vcmp.lt.s32.totalorder %v3241_v59, 4  ;;  %v10467_v59 = vld [vmem:[#allocation7 + $0x10] sm:$0xff] }
 0x2cf   :  { %7754 = vsinq.f32 %v3212_v7  ;;  %v7182_v19 = vadd.s32 4294967294, %v1429_v39  ;;  %v3264_v4 = vsel %vm3260_vm12, %v3244_v42, %v3247_v41  ;;  %v3265_v14 = vsel %vm3263_vm14, %v3253_v32, 2102212464 }
 0x2d0   :  { %v3268_v30 = vsel %vm3260_vm12, %v3247_v41, %v3250_v44  ;;  %v3269_v15 = vsel %vm3263_vm14, %v3256_v0, 920167782  ;;  %v3272_v27 = vsel %vm3260_vm12, %v3250_v44, %v3253_v32  ;;  %vm3219_vm13 = vcmp.lt.s32.totalorder %v10398_v29, 2 }
 0x2d1   :  { %vm7183_vm15 = vcmp.lt.s32.totalorder %v7182_v19, 0  ;;  %v3266_v34 = vsel %vm3262_vm11, %v3250_v44, %v3265_v14  ;;  %v3270_v35 = vsel %vm3262_vm11, %v3253_v32, %v3269_v15  ;;  %v3273_v53 = vsel %vm3263_vm14, %v3259_v61, 1326507024 }
 0x2d2   :  { %vm3216_vm0 = vweird.f32 %v10204_v33  ;;  %v1432_v18 = vsel %vm7183_vm15, 0, %v7182_v19  ;;  %v3267_v26 = vsel %vm3261_vm10, %v3264_v4, %v3266_v34  ;;  %v3271_v22 = vsel %vm3261_vm10, %v3268_v30, %v3270_v35 }
 0x2d3   :  { %v3274_v23 = vsel %vm3262_vm11, %v3256_v0, %v3273_v53  ;;  %v1433_v40 = vsub.s32 32, %v1432_v18  ;;  %v1434_v1 = vshll.u32 %v10414_v8, %v1432_v18  ;;  %v1437_v45 = vsub.s32 4294967266, %v1432_v18 }
 0x2d4   :  { %v3275_v36 = vsel %vm3261_vm10, %v3272_v27, %v3274_v23  ;;  %v10456_v47 = vmul.u32.u64.low %v10410_v49, %v3271_v22  ;;  %v10457_v17 = vmul.u32.u64.high %v10410_v49, %v3271_v22, %v10456_v47  ;;  %v1450_v42 = vsel %vm10435_vm9, 0, %v1448_v52 }
 0x2d5   :  { %v10452_v6 = vmul.u32.u64.low %v10410_v49, %v3275_v36  ;;  %v10453_v57 = vmul.u32.u64.high %v10410_v49, %v3275_v36, %v10452_v6  ;;  %v1435_v38 = vshrl.u32 %v10402_v20, %v1433_v40  ;;  %v1438_v31 = vadd.s32 127, %v1437_v45 }
 0x2d6   :  { %v7184_v5 = vadd.s32 4294967169, %v1469_v25  ;;  %vm3220_vm1 = vcmp.eq.s32.totalorder %v10398_v29, 0  ;;  %vm3223_vm2 = vcmp.eq.s32.totalorder %v10398_v29, 2  ;;  %v1472_v8 = vand.u32 8388607, %v1465_v50 }
 0x2d7   :  { %v10471_v9 = vadd.f32 %v10467_v59, %v10408_v55  ;;  %v1436_v20 = vor.u32 %v1435_v38, %v1434_v1  ;;  %v1439_v28 = vshll.u32 %v1438_v31, 23  ;;  %v3283_v41 = vmul.u32 %v10410_v49, %v3267_v26 }
 0x2d8   :  { %v7753_v2 = vpop.eup %7752  ;;  %v1475_v44 = vadd.s32 1, %v7184_v5  ;;  %v1454_v0 = vadd.s32 3, %v1450_v42  ;;  %vm3285_vm3 = vc.u32 %v10453_v57, %v10456_v47  ;;  %v3286_v43 = vadd.s32 1, %v10457_v17 }
 0x2d9   :  { %v7755_v7 = vpop.eup %7754  ;;  %v3224_v32 = vxor.u32 2147483648, %v7753_v2  ;;  %v1440_v25 = vor.u32 4788187, %v1439_v28  ;;  %v1443_v52 = vcvt.s32.f32 %v1436_v20  ;;  %v1473_v19 = vor.u32 8388608, %v1472_v8 }
 0x2da   :  { %v3221_v39 = vxor.u32 2147483648, %v7755_v7  ;;  %vm1476_vm4 = vcmp.gt.s32.totalorder %v1475_v44, 0  ;;  %v3287_v61 = vsel %vm3285_vm3, %v3286_v43, %v10457_v17  ;;  %v10484_v27 = vand.u32 3, %v1454_v0 }
 0x2db   :  { %v3225_v55 = vsel %vm3223_vm2, %v3224_v32, %v7755_v7  ;;  %v1477_v49 = vsel %vm1476_vm4, %v1475_v44, 0  ;;  %v1441_v14 = vand.u32 2147483647, %v1440_v25  ;;  %v3288_v30 = vadd.s32 %v3287_v61, %v3283_v41 }
 0x2dc   :  { %v3222_v4 = vsel %vm3220_vm1, %v7753_v2, %v3221_v39  ;;  %v1479_v34 = vand.u32 31, %v1477_v49  ;;  %v10488_v35 = vmul.f32 %v10404_v21, %v10215_v24  ;;  %v3335_v22 = vand.u32 2139095040, %v10471_v9 }
 0x2dd   :  { %v3226_v15 = vsel %vm3219_vm13, %v3222_v4, %v3225_v55  ;;  %v1444_v18 = vmul.f32 %v1443_v52, %v1441_v14  ;;  %v3289_v26 = vadd.s32 536870912, %v3288_v30  ;;  %v1478_v23 = vshrl.u32 %v1477_v49, 5 }
 0x2de   :  { %v3227_v53 = vsel %vm3216_vm0, nan, %v3226_v15  ;;  %v1480_v40 = vsub.s32 32, %v1479_v34  ;;  %v1482_v29 = vshll.u32 %v8067_v54, %v1479_v34  ;;  %v10494_v1 = vshll.u32 %v1473_v19, 8 }
 0x2df   :  { %3552 = vxpose.xlu1.b32.cont [13/16] %v3227_v53, 128  ;;  %v1445_v45 = vxor.u32 2147483648, %v1444_v18  ;;  %v10496_v36 = vshrl.u32 %v3289_v26, 30  ;;  %v1485_v21 = vshll.u32 %v8068_v56, %v1479_v34  ;;  %v1491_v6 = vshll.u32 %v8070_v60, %v1479_v34 }
 0x2e0   :  { %v1483_v33 = vshrl.u32 %v8068_v56, %v1480_v40  ;;  %v1486_v17 = vshrl.u32 %v8069_v58, %v1480_v40  ;;  %v1488_v38 = vshll.u32 %v8069_v58, %v1479_v34  ;;  %v1489_v31 = vshrl.u32 %v8070_v60, %v1480_v40 }
 0x2e1   :  { %v1446_v42 = vsel %vm1363_vm8, %v1445_v45, %v1444_v18  ;;  %v3291_v5 = vshll.u32 %v10496_v36, 30  ;;  %v1492_v8 = vshrl.u32 %v8071_v62, %v1480_v40  ;;  %v3336_v2 = vshrl.u32 %v3335_v22, 23 }
 0x2e2   :  { %v1449_v20 = vsel %vm10435_vm9, %v10236_v51, %v1446_v42  ;;  %v1481_v28 = vshrl.u32 %v8067_v54, %v1480_v40  ;;  %v1484_v41 = vor.u32 %v1483_v33, %v1482_v29  ;;  %v1494_v44 = vshll.u32 %v8071_v62, %v1479_v34 }
 0x2e3   :  { %7756 = vcosq.f32 %v1449_v20  ;;  %v10513_v7 = vsub.s32 %v3288_v30, %v3291_v5  ;;  %v1487_v32 = vor.u32 %v1486_v17, %v1485_v21  ;;  %v1493_v0 = vor.u32 %v1492_v8, %v1491_v6 }
 0x2e4   :  { %7758 = vsinq.f32 %v1449_v20  ;;  %v1490_v43 = vor.u32 %v1489_v31, %v1488_v38  ;;  %v1495_v39 = vshrl.u32 %v8072_v10, %v1480_v40  ;;  %vm1497_vm6 = vcmp.lt.s32.totalorder %v1478_v23, 1 }
 0x2e5   :  { %v3294_v25 = vsub.s32 0, %v10513_v7  ;;  %vm1499_vm5 = vcmp.lt.s32.totalorder %v1478_v23, 3  ;;  %vm1500_vm7 = vcmp.lt.s32.totalorder %v1478_v23, 4  ;;  %v7252_v48 = vadd.s32 4294967169, %v3336_v2 }
 0x2e6   :  { %v1496_v52 = vor.u32 %v1495_v39, %v1494_v44  ;;  %vm1498_vm8 = vcmp.lt.s32.totalorder %v1478_v23, 2  ;;  %v1501_v55 = vsel %vm1497_vm6, %v1481_v28, %v1484_v41  ;;  %v1502_v61 = vsel %vm1500_vm7, %v1490_v43, 2102212464 }
 0x2e7   :  { %vm3230_vm9 = vcmp.lt.s32.totalorder %v10354_v16, 0  ;;  %v7249_v19 = vmin.u32 %v3294_v25, %v10513_v7  ;;  %v1503_v49 = vsel %vm1499_vm5, %v1487_v32, %v1502_v61  ;;  %v1505_v4 = vsel %vm1497_vm6, %v1484_v41, %v1487_v32 }
 0x2e8   :  { %v1506_v14 = vsel %vm1500_vm7, %v1493_v0, 920167782  ;;  %vm1453_vm12 = vweird.f32 %v10236_v51  ;;  %v1509_v15 = vsel %vm1497_vm6, %v1487_v32, %v1490_v43  ;;  %v1510_v34 = vsel %vm1500_vm7, %v1496_v52, 1326507024 }
 0x2e9   :  { %v1507_v30 = vsel %vm1499_vm5, %v1490_v43, %v1506_v14  ;;  %v3332_v53 = vand.u32 2147483647, %v10471_v9  ;;  %vm1456_vm10 = vcmp.lt.s32.totalorder %v10484_v27, 2  ;;  %vm1457_vm11 = vcmp.eq.s32.totalorder %v10484_v27, 0 }
 0x2ea   :  { %vm1460_vm14 = vcmp.eq.s32.totalorder %v10484_v27, 2  ;;  %v3296_v18 = vclz %v7249_v19  ;;  %v1504_v26 = vsel %vm1498_vm8, %v1501_v55, %v1503_v49  ;;  %v1508_v22 = vsel %vm1498_vm8, %v1505_v4, %v1507_v30 }
 0x2eb   :  { %v1511_v40 = vsel %vm1499_vm5, %v1493_v0, %v1510_v34  ;;  %v3342_v29 = vadd.s32 1, %v7252_v48  ;;  %v10534_v6 = vmul.u32.u64.low %v10494_v1, %v1508_v22  ;;  %v10535_v33 = vmul.u32.u64.high %v10494_v1, %v1508_v22, %v10534_v6 }
 0x2ec   :  { %v7250_v45 = vadd.s32 4294967294, %v3296_v18  ;;  %v1512_v21 = vsel %vm1498_vm8, %v1509_v15, %v1511_v40  ;;  %v3314_v17 = vsub.s32 4, %v10496_v36  ;;  %vm10545_vm15 = vcmp.le.f32.partialorder %v3228_v12, 0.7853982 }
 0x2ed   :  { %v10540_v38 = vmul.u32.u64.low %v10494_v1, %v1512_v21  ;;  %v10541_v31 = vmul.u32.u64.high %v10494_v1, %v1512_v21, %v10540_v38  ;;  %vm3343_vm13 = vcmp.gt.s32.totalorder %v3342_v29, 0  ;;  %v7757_v42 = vpop.eup %7756  ;;  %v3284_v23 = vadd.s32 %v10456_v47, %v10453_v57 }
 0x2ee   :  { %vm7251_vm0 = vcmp.lt.s32.totalorder %v7250_v45, 0  ;;  %v3339_v8 = vand.u32 8388607, %v3332_v53  ;;  %v3344_v2 = vsel %vm3343_vm13, %v3342_v29, 0  ;;  %v7759_v20 = vpop.eup %7758  ;;  %v1461_v28 = vxor.u32 2147483648, %v7757_v42 }
 0x2ef   :  { %v3299_v41 = vsel %vm7251_vm0, 0, %v7250_v45  ;;  %v1520_v44 = vmul.u32 %v10494_v1, %v1504_v26  ;;  %v3346_v32 = vand.u32 31, %v3344_v2  ;;  %v1458_v0 = vxor.u32 2147483648, %v7759_v20 }
 0x2f0   :  { %v3300_v43 = vsub.s32 32, %v3299_v41  ;;  %v3301_v12 = vshll.u32 %v10513_v7, %v3299_v41  ;;  %v3304_v39 = vsub.s32 4294967266, %v3299_v41  ;;  %v1462_v25 = vsel %vm1460_vm14, %v1461_v28, %v7759_v20 }
 0x2f1   :  { %v3315_v57 = vsel %vm3230_vm9, %v3314_v17, %v10496_v36  ;;  %vm1522_vm1 = vc.u32 %v10541_v31, %v10534_v6  ;;  %v1523_v47 = vadd.s32 1, %v10535_v33  ;;  %v1459_v1 = vsel %vm1457_vm11, %v7757_v42, %v1458_v0 }
 0x2f2   :  { %v3302_v48 = vshrl.u32 %v3284_v23, %v3300_v43  ;;  %v3305_v52 = vadd.s32 127, %v3304_v39  ;;  %v3347_v55 = vsub.s32 32, %v3346_v32  ;;  %v1463_v7 = vsel %vm1456_vm10, %v1459_v1, %v1462_v25 }
 0x2f3   :  { %v1524_v61 = vsel %vm1522_vm1, %v1523_v47, %v10535_v33  ;;  %v10568_v19 = vshrl.u32 %v3344_v2, 5  ;;  %v3349_v36 = vshll.u32 %v8067_v54, %v3346_v32  ;;  %v1464_v49 = vsel %vm1453_vm12, nan, %v1463_v7 }
 0x2f4   :  { %v3303_v4 = vor.u32 %v3302_v48, %v3301_v12  ;;  %v3306_v14 = vshll.u32 %v3305_v52, 23  ;;  %v1525_v30 = vadd.s32 %v1524_v61, %v1520_v44  ;;  %1789 = vxpose.xlu0.b32.cont [13/16] %v1464_v49, 128  ;;  %v3350_v15 = vshrl.u32 %v8068_v56, %v3347_v55 }
 0x2f5   :  { %v3352_v34 = vshll.u32 %v8068_v56, %v3346_v32  ;;  %v3353_v27 = vshrl.u32 %v8069_v58, %v3347_v55  ;;  %v3355_v18 = vshll.u32 %v8069_v58, %v3346_v32  ;;  %v3356_v29 = vshrl.u32 %v8070_v60, %v3347_v55 }
 0x2f6   :  { %v3307_v26 = vor.u32 4788187, %v3306_v14  ;;  %v3310_v22 = vcvt.s32.f32 %v3303_v4  ;;  %v1526_v40 = vadd.s32 536870912, %v1525_v30  ;;  %v3317_v51 = vsel %vm10545_vm15, 0, %v3315_v57 }
 0x2f7   :  { %v3340_v45 = vor.u32 8388608, %v3339_v8  ;;  %v3358_v21 = vshll.u32 %v8070_v60, %v3346_v32  ;;  %v3359_v33 = vshrl.u32 %v8071_v62, %v3347_v55  ;;  %v3348_v42 = vshrl.u32 %v8067_v54, %v3347_v55 }
 0x2f8   :  { %v3308_v17 = vand.u32 2147483647, %v3307_v26  ;;  %v1527_v38 = vshrl.u32 %v1526_v40, 30  ;;  %v3361_v23 = vshll.u32 %v8071_v62, %v3346_v32  ;;  %v3351_v2 = vor.u32 %v3350_v15, %v3349_v36 }
 0x2f9   :  { %v3354_v20 = vor.u32 %v3353_v27, %v3352_v34  ;;  %v3360_v28 = vor.u32 %v3359_v33, %v3358_v21  ;;  %v3362_v41 = vshrl.u32 %v8072_v10, %v3347_v55  ;;  %v3357_v43 = vor.u32 %v3356_v29, %v3355_v18 }
 0x2fa   :  { %v3311_v44 = vmul.f32 %v3310_v22, %v3308_v17  ;;  %v1528_v0 = vshll.u32 %v1527_v38, 30  ;;  %vm3364_vm2 = vcmp.lt.s32.totalorder %v10568_v19, 1  ;;  %v3321_v8 = vadd.s32 3, %v3317_v51 }
 0x2fb   :  { %v3363_v12 = vor.u32 %v3362_v41, %v3361_v23  ;;  %vm3367_vm3 = vcmp.lt.s32.totalorder %v10568_v19, 4  ;;  %v3380_v39 = vshll.u32 %v3340_v45, 8  ;;  %vm3366_vm4 = vcmp.lt.s32.totalorder %v10568_v19, 3 }
 0x2fc   :  { %v3312_v25 = vxor.u32 2147483648, %v3311_v44  ;;  %v10587_v57 = vsub.s32 %v1525_v30, %v1528_v0  ;;  %v3369_v32 = vsel %vm3367_vm3, %v3357_v43, 2102212464  ;;  %vm3365_vm6 = vcmp.lt.s32.totalorder %v10568_v19, 2 }
 0x2fd   :  { %v3372_v47 = vsel %vm3364_vm2, %v3351_v2, %v3354_v20  ;;  %v3373_v1 = vsel %vm3367_vm3, %v3360_v28, 920167782  ;;  %v10599_v48 = vadd.f32 %v10467_v59, %v10488_v35  ;;  %v1551_v7 = vsub.s32 4, %v1527_v38 }
 0x2fe   :  { %v3313_v52 = vsel %vm3230_vm9, %v3312_v25, %v3311_v44  ;;  %v1531_v55 = vsub.s32 0, %v10587_v57  ;;  %v3368_v61 = vsel %vm3364_vm2, %v3348_v42, %v3351_v2  ;;  %v3370_v49 = vsel %vm3366_vm4, %v3354_v20, %v3369_v32 }
 0x2ff   :  { %v3316_v36 = vsel %vm10545_vm15, %v10354_v16, %v3313_v52  ;;  %v3374_v59 = vsel %vm3366_vm4, %v3357_v43, %v3373_v1  ;;  %v3377_v35 = vsel %vm3367_vm3, %v3363_v12, 1326507024  ;;  %v3376_v30 = vsel %vm3364_vm2, %v3354_v20, %v3357_v43 }
 0x300   :  { %7760 = vcosq.f32 %v3316_v36  ;;  %v7185_v4 = vmin.u32 %v1531_v55, %v10587_v57  ;;  %v3375_v14 = vsel %vm3365_vm6, %v3372_v47, %v3374_v59  ;;  %v3378_v5 = vsel %vm3366_vm4, %v3360_v28, %v3377_v35 }
 0x301   :  { %7762 = vsinq.f32 %v3316_v36  ;;  %v10622_v15 = vmul.u32.u64.low %v3380_v39, %v3375_v14  ;;  %v10623_v34 = vmul.u32.u64.high %v3380_v39, %v3375_v14, %v10622_v15  ;;  %vm1467_vm5 = vcmp.lt.s32.totalorder %v10396_v11, 0 }
 0x302   :  { %v1533_v27 = vclz %v7185_v4  ;;  %v3322_v18 = vand.u32 3, %v3321_v8  ;;  %v1552_v26 = vsel %vm1467_vm5, %v1551_v7, %v1527_v38  ;;  %v3379_v22 = vsel %vm3365_vm6, %v3376_v30, %v3378_v5 }
 0x303   :  { %v1572_v40 = vand.u32 2139095040, %v10599_v48  ;;  %v3371_v51 = vsel %vm3365_vm6, %v3368_v61, %v3370_v49  ;;  %v10634_v45 = vmul.u32.u64.low %v3380_v39, %v3379_v22  ;;  %v10635_v21 = vmul.u32.u64.high %v3380_v39, %v3379_v22, %v10634_v45 }
 0x304   :  { %v7186_v29 = vadd.s32 4294967294, %v1533_v27  ;;  %vm10639_vm7 = vcmp.le.f32.partialorder %v1465_v50, 0.7853982  ;;  %v1521_v38 = vadd.s32 %v10534_v6, %v10541_v31  ;;  %v3390_v19 = vadd.s32 1, %v10623_v34 }
 0x305   :  { %v1573_v17 = vshrl.u32 %v1572_v40, 23  ;;  %v1554_v42 = vsel %vm10639_vm7, 0, %v1552_v26  ;;  %v3387_v2 = vmul.u32 %v3380_v39, %v3371_v51  ;;  %v1569_v20 = vand.u32 2147483647, %v10599_v48 }
 0x306   :  { %vm7187_vm8 = vcmp.lt.s32.totalorder %v7186_v29, 0  ;;  %vm3323_vm9 = vcmp.lt.s32.totalorder %v3322_v18, 2  ;;  %vm3324_vm12 = vcmp.eq.s32.totalorder %v3322_v18, 0  ;;  %vm3327_vm10 = vcmp.eq.s32.totalorder %v3322_v18, 2 }
 0x307   :  { %v1536_v23 = vsel %vm7187_vm8, 0, %v7186_v29  ;;  %v7188_v28 = vadd.s32 4294967169, %v1573_v17  ;;  %vm3389_vm11 = vc.u32 %v10635_v21, %v10622_v15  ;;  %v1558_v8 = vadd.s32 3, %v1554_v42 }
 0x308   :  { %v1537_v50 = vsub.s32 32, %v1536_v23  ;;  %v1538_v41 = vshll.u32 %v10587_v57, %v1536_v23  ;;  %v1541_v44 = vsub.s32 4294967266, %v1536_v23  ;;  %v3391_v12 = vsel %vm3389_vm11, %v3390_v19, %v10623_v34 }
 0x309   :  { %v1579_v6 = vadd.s32 1, %v7188_v28  ;;  %v3392_v32 = vadd.s32 %v3391_v12, %v3387_v2  ;;  %v1576_v47 = vand.u32 8388607, %v1569_v20  ;;  %vm3320_vm13 = vweird.f32 %v10354_v16 }
 0x30a   :  { %v7761_v31 = vpop.eup %7760  ;;  %v1539_v0 = vshrl.u32 %v1521_v38, %v1537_v50  ;;  %v1542_v43 = vadd.s32 127, %v1541_v44  ;;  %v10661_v27 = vand.u32 3, %v1558_v8  ;;  %v7934_v50 = vld [vmem:[#allocation5 + $0x18] sm:$0xff]  ;;  %vm3334_vm15 = vcmp.lt.s32.totalorder %v10471_v9, 0 }
 0x30b   :  { %v7763_v39 = vpop.eup %7762  ;;  %v3328_v25 = vxor.u32 2147483648, %v7761_v31  ;;  %vm1580_vm14 = vcmp.gt.s32.totalorder %v1579_v6, 0  ;;  %v3393_v61 = vadd.s32 536870912, %v3392_v32  ;;  %v1577_v26 = vor.u32 8388608, %v1576_v47 }
 0x30c   :  { %v3325_v57 = vxor.u32 2147483648, %v7763_v39  ;;  %v1540_v1 = vor.u32 %v1539_v0, %v1538_v41  ;;  %v1543_v52 = vshll.u32 %v1542_v43, 23  ;;  %v1581_v55 = vsel %vm1580_vm14, %v1579_v6, 0 }
 0x30d   :  { %v3329_v7 = vsel %vm3327_vm10, %v3328_v25, %v7763_v39  ;;  %v1583_v36 = vand.u32 31, %v1581_v55  ;;  %v10659_v14 = vshrl.u32 %v3393_v61, 30  ;;  %v10664_v22 = vshrl.u32 %v1581_v55, 5 }
 0x30e   :  { %v3326_v49 = vsel %vm3324_vm12, %v7761_v31, %v3325_v57  ;;  %v1544_v59 = vor.u32 4788187, %v1543_v52  ;;  %v1547_v35 = vcvt.s32.f32 %v1540_v1  ;;  %v10676_v28 = vshll.u32 %v1577_v26, 8  ;;  %v7935_v1 = vld [vmem:[#allocation7 + $0x18] sm:$0xff] }
 0x30f   :  { %v3330_v4 = vsel %vm3323_vm9, %v3326_v49, %v3329_v7  ;;  %v1584_v30 = vsub.s32 32, %v1583_v36  ;;  %v3395_v16 = vshll.u32 %v10659_v14, 30  ;;  %v1586_v40 = vshll.u32 %v8067_v54, %v1583_v36 }
 0x310   :  { %v3331_v5 = vsel %vm3320_vm13, nan, %v3330_v4  ;;  %v1545_v34 = vand.u32 2147483647, %v1544_v59  ;;  %v1589_v18 = vshll.u32 %v8068_v56, %v1583_v36  ;;  %v1595_v17 = vshll.u32 %v8070_v60, %v1583_v36 }
 0x311   :  { %3553 = vxpose.xlu1.b32.cont [14/16] %v3331_v5, 128  ;;  %v1587_v29 = vshrl.u32 %v8068_v56, %v1584_v30  ;;  %v1590_v45 = vshrl.u32 %v8069_v58, %v1584_v30  ;;  %v10671_v38 = vsub.s32 %v3392_v32, %v3395_v16  ;;  %v1592_v42 = vshll.u32 %v8069_v58, %v1583_v36 }
 0x312   :  { %v1548_v51 = vmul.f32 %v1547_v35, %v1545_v34  ;;  %v1593_v19 = vshrl.u32 %v8070_v60, %v1584_v30  ;;  %v1596_v23 = vshrl.u32 %v8071_v62, %v1584_v30  ;;  %v3119_v41 = vmul.f32 %v7934_v50, %v10160_v46 }
 0x313   :  { %v10680_v44 = vmul.f32 %v7934_v50, %v10215_v24  ;;  %v3398_v6 = vsub.s32 0, %v10671_v38  ;;  %v1585_v31 = vshrl.u32 %v8067_v54, %v1584_v30  ;;  %v1588_v0 = vor.u32 %v1587_v29, %v1586_v40 }
 0x314   :  { %v1549_v2 = vxor.u32 2147483648, %v1548_v51  ;;  %v1598_v43 = vshll.u32 %v8071_v62, %v1583_v36  ;;  %v1591_v12 = vor.u32 %v1590_v45, %v1589_v18  ;;  %v1597_v39 = vor.u32 %v1596_v23, %v1595_v17 }
 0x315   :  { %v1599_v25 = vshrl.u32 %v8072_v10, %v1584_v30  ;;  %v7253_v24 = vmin.u32 %v3398_v6, %v10671_v38  ;;  %v1594_v32 = vor.u32 %v1593_v19, %v1592_v42  ;;  %vm1601_vm0 = vcmp.lt.s32.totalorder %v10664_v22, 1 }
 0x316   :  { %v1550_v8 = vsel %vm1467_vm5, %v1549_v2, %v1548_v51  ;;  %vm10696_vm1 = vcmp.le.f32.partialorder %v3332_v53, 0.7853982  ;;  %vm1603_vm2 = vcmp.lt.s32.totalorder %v10664_v22, 3  ;;  %vm1604_vm3 = vcmp.lt.s32.totalorder %v10664_v22, 4 }
 0x317   :  { %v1553_v46 = vsel %vm10639_vm7, %v10396_v11, %v1550_v8  ;;  %v1600_v57 = vor.u32 %v1599_v25, %v1598_v43  ;;  %v3400_v33 = vclz %v7253_v24  ;;  %vm1602_vm4 = vcmp.lt.s32.totalorder %v10664_v22, 2 }
 0x318   :  { %7764 = vcosq.f32 %v1553_v46  ;;  %v10703_v52 = vadd.f32 %v7935_v1, %v3119_v41  ;;  %v3418_v55 = vsub.s32 4, %v10659_v14  ;;  %v1606_v53 = vsel %vm1604_vm3, %v1594_v32, 2102212464 }
 0x319   :  { %7766 = vsinq.f32 %v1553_v46  ;;  %v1609_v7 = vsel %vm1601_vm0, %v1588_v0, %v1591_v12  ;;  %v1610_v61 = vsel %vm1604_vm3, %v1597_v39, 920167782  ;;  %v3388_v36 = vadd.s32 %v10622_v15, %v10635_v21 }
 0x31a   :  { %v7254_v49 = vadd.s32 4294967294, %v3400_v33  ;;  %v1611_v59 = vsel %vm1603_vm2, %v1594_v32, %v1610_v61  ;;  %v1613_v35 = vsel %vm1601_vm0, %v1591_v12, %v1594_v32  ;;  %vm1560_vm6 = vcmp.lt.s32.totalorder %v10661_v27, 2 }
 0x31b   :  { %v1605_v4 = vsel %vm1601_vm0, %v1585_v31, %v1588_v0  ;;  %v1607_v30 = vsel %vm1603_vm2, %v1591_v12, %v1606_v53  ;;  %v1612_v5 = vsel %vm1602_vm4, %v1609_v7, %v1611_v59  ;;  %v1614_v15 = vsel %vm1604_vm3, %v1600_v57, 1326507024 }
 0x31c   :  { %vm1557_vm5 = vweird.f32 %v10396_v11  ;;  %vm7255_vm7 = vcmp.lt.s32.totalorder %v7254_v49, 0  ;;  %v1615_v21 = vsel %vm1603_vm2, %v1597_v39, %v1614_v15  ;;  %v3419_v40 = vsel %vm3334_vm15, %v3418_v55, %v10659_v14 }
 0x31d   :  { %v10731_v34 = vmul.u32.u64.low %v10676_v28, %v1612_v5  ;;  %v10732_v26 = vmul.u32.u64.high %v10676_v28, %v1612_v5, %v10731_v34  ;;  %v3403_v16 = vsel %vm7255_vm7, 0, %v7254_v49  ;;  %v1616_v29 = vsel %vm1602_vm4, %v1613_v35, %v1615_v21 }
 0x31e   :  { %v3439_v51 = vand.u32 2139095040, %v10703_v52  ;;  %v3404_v18 = vsub.s32 32, %v3403_v16  ;;  %v3405_v45 = vshll.u32 %v10671_v38, %v3403_v16  ;;  %v3408_v17 = vsub.s32 4294967266, %v3403_v16 }
 0x31f   :  { %v1608_v42 = vsel %vm1602_vm4, %v1605_v4, %v1607_v30  ;;  %vm1561_vm8 = vcmp.eq.s32.totalorder %v10661_v27, 0  ;;  %v10746_v19 = vmul.u32.u64.low %v10676_v28, %v1616_v29  ;;  %v10747_v23 = vmul.u32.u64.high %v10676_v28, %v1616_v29, %v10746_v19 }
 0x320   :  { %v3440_v2 = vshrl.u32 %v3439_v51, 23  ;;  %v3406_v14 = vshrl.u32 %v3388_v36, %v3404_v18  ;;  %v3409_v50 = vadd.s32 127, %v3408_v17  ;;  %v3421_v41 = vsel %vm10696_vm1, 0, %v3419_v40 }
 0x321   :  { %v1627_v6 = vadd.s32 1, %v10732_v26  ;;  %vm1564_vm9 = vcmp.eq.s32.totalorder %v10661_v27, 2  ;;  %v1624_v22 = vmul.u32 %v10676_v28, %v1608_v42  ;;  %v3436_v38 = vand.u32 2147483647, %v10703_v52 }
 0x322   :  { %v7765_v31 = vpop.eup %7764  ;;  %v7256_v0 = vadd.s32 4294967169, %v3440_v2  ;;  %v3407_v12 = vor.u32 %v3406_v14, %v3405_v45  ;;  %v3410_v39 = vshll.u32 %v3409_v50, 23  ;;  %v10756_v25 = vadd.f32 %v7935_v1, %v10680_v44  ;;  %v5351_v44 = vld [vmem:[#allocation2 + $0xc] sm:$0xf] }
 0x323   :  { %v7767_v43 = vpop.eup %7766  ;;  %v1565_v8 = vxor.u32 2147483648, %v7765_v31  ;;  %v3425_v24 = vadd.s32 3, %v3421_v41  ;;  %vm1626_vm12 = vc.u32 %v10747_v23, %v10731_v34  ;;  %v3443_v61 = vand.u32 8388607, %v3436_v38 }
 0x324   :  { %v1562_v46 = vxor.u32 2147483648, %v7767_v43  ;;  %v3446_v32 = vadd.s32 1, %v7256_v0  ;;  %v3411_v33 = vor.u32 4788187, %v3410_v39  ;;  %v3414_v55 = vcvt.s32.f32 %v3407_v12 }
 0x325   :  { %v1566_v57 = vsel %vm1564_vm9, %v1565_v8, %v7767_v43  ;;  %v1628_v28 = vsel %vm1626_vm12, %v1627_v6, %v10732_v26  ;;  %v10769_v5 = vand.u32 3, %v3425_v24  ;;  %v10771_v15 = vmul.f32 100.0, %v5351_v44 }
 0x326   :  { %v1563_v53 = vsel %vm1561_vm8, %v7765_v31, %v1562_v46  ;;  %v1629_v7 = vadd.s32 %v1628_v28, %v1624_v22  ;;  %vm3447_vm10 = vcmp.gt.s32.totalorder %v3446_v32, 0  ;;  %v3412_v36 = vand.u32 2147483647, %v3411_v33 }
 0x327   :  { %v1567_v1 = vsel %vm1560_vm6, %v1563_v53, %v1566_v57  ;;  %v3448_v49 = vsel %vm3447_vm10, %v3446_v32, 0  ;;  %v3444_v26 = vor.u32 8388608, %v3443_v61  ;;  %v1676_v27 = vand.u32 2139095040, %v10756_v25 }
 0x328   :  { %v1568_v59 = vsel %vm1557_vm5, nan, %v1567_v1  ;;  %v1630_v35 = vadd.s32 536870912, %v1629_v7  ;;  %v3450_v4 = vand.u32 31, %v3448_v49  ;;  %v3415_v30 = vmul.f32 %v3414_v55, %v3412_v36 }
 0x329   :  { %1790 = vxpose.xlu0.b32.cont [14/16] %v1568_v59, 128  ;;  %v3449_v29 = vshrl.u32 %v3448_v49, 5  ;;  %v1673_v31 = vand.u32 2147483647, %v10756_v25  ;;  %v1677_v22 = vshrl.u32 %v1676_v27, 23  ;;  %vm1571_vm11 = vcmp.lt.s32.totalorder %v10599_v48, 0 }
 0x32a   :  { %v10773_v21 = vshrl.u32 %v1630_v35, 30  ;;  %v3451_v16 = vsub.s32 32, %v3450_v4  ;;  %v3416_v40 = vxor.u32 2147483648, %v3415_v30  ;;  %v3453_v51 = vshll.u32 %v8067_v54, %v3450_v4 }
 0x32b   :  { %v3456_v11 = vshll.u32 %v8068_v56, %v3450_v4  ;;  %v3459_v17 = vshll.u32 %v8069_v58, %v3450_v4  ;;  %v3462_v42 = vshll.u32 %v8070_v60, %v3450_v4  ;;  %v3465_v8 = vshll.u32 %v8071_v62, %v3450_v4 }
 0x32c   :  { %v1632_v18 = vshll.u32 %v10773_v21, 30  ;;  %v3454_v45 = vshrl.u32 %v8068_v56, %v3451_v16  ;;  %v3417_v19 = vsel %vm3334_vm15, %v3416_v40, %v3415_v30  ;;  %v3457_v2 = vshrl.u32 %v8069_v58, %v3451_v16 }
 0x32d   :  { %v3460_v14 = vshrl.u32 %v8070_v60, %v3451_v16  ;;  %v3463_v50 = vshrl.u32 %v8071_v62, %v3451_v16  ;;  %v3420_v41 = vsel %vm10696_vm1, %v10471_v9, %v3417_v19  ;;  %v3452_v39 = vshrl.u32 %v8067_v54, %v3451_v16 }
 0x32e   :  { %v10790_v6 = vsub.s32 %v1629_v7, %v1632_v18  ;;  %7768 = vcosq.f32 %v3420_v41  ;;  %v3455_v0 = vor.u32 %v3454_v45, %v3453_v51  ;;  %v3458_v43 = vor.u32 %v3457_v2, %v3456_v11 }
 0x32f   :  { %7770 = vsinq.f32 %v3420_v41  ;;  %v3464_v46 = vor.u32 %v3463_v50, %v3462_v42  ;;  %v3461_v47 = vor.u32 %v3460_v14, %v3459_v17  ;;  %v3466_v24 = vshrl.u32 %v8072_v10, %v3451_v16 }
 0x330   :  { %v1635_v12 = vsub.s32 0, %v10790_v6  ;;  %vm3468_vm14 = vcmp.lt.s32.totalorder %v3449_v29, 1  ;;  %v3484_v32 = vshll.u32 %v3444_v26, 8  ;;  %vm3428_vm13 = vcmp.eq.s32.totalorder %v10769_v5, 0 }
 0x331   :  { %vm3469_vm15 = vcmp.lt.s32.totalorder %v3449_v29, 2  ;;  %vm3470_vm0 = vcmp.lt.s32.totalorder %v3449_v29, 3  ;;  %vm3471_vm1 = vcmp.lt.s32.totalorder %v3449_v29, 4  ;;  %vm3427_vm2 = vcmp.lt.s32.totalorder %v10769_v5, 2 }
 0x332   :  { %v7189_v57 = vmin.u32 %v1635_v12, %v10790_v6  ;;  %v3467_v33 = vor.u32 %v3466_v24, %v3465_v8  ;;  %v3473_v55 = vsel %vm3471_vm1, %v3461_v47, 2102212464  ;;  %v3476_v28 = vsel %vm3468_vm14, %v3455_v0, %v3458_v43 }
 0x333   :  { %v3477_v53 = vsel %vm3471_vm1, %v3464_v46, 920167782  ;;  %vm3424_vm3 = vweird.f32 %v10471_v9  ;;  %v1655_v61 = vsub.s32 4, %v10773_v21  ;;  %v3472_v44 = vsel %vm3468_vm14, %v3452_v39, %v3455_v0 }
 0x334   :  { %v1637_v7 = vclz %v7189_v57  ;;  %v7192_v1 = vadd.s32 4294967169, %v1677_v22  ;;  %v3474_v36 = vsel %vm3470_vm0, %v3458_v43, %v3473_v55  ;;  %v3478_v49 = vsel %vm3470_vm0, %v3461_v47, %v3477_v53 }
 0x335   :  { %v3480_v59 = vsel %vm3468_vm14, %v3458_v43, %v3461_v47  ;;  %v3481_v35 = vsel %vm3471_vm1, %v3467_v33, 1326507024  ;;  %vm3431_vm4 = vcmp.eq.s32.totalorder %v10769_v5, 2  ;;  %v3479_v30 = vsel %vm3469_vm15, %v3476_v28, %v3478_v49 }
 0x336   :  { %v7190_v4 = vadd.s32 4294967294, %v1637_v7  ;;  %v3482_v26 = vsel %vm3470_vm0, %v3464_v46, %v3481_v35  ;;  %v1625_v16 = vadd.s32 %v10731_v34, %v10747_v23  ;;  %v3475_v11 = vsel %vm3469_vm15, %v3472_v44, %v3474_v36 }
 0x337   :  { %v3483_v27 = vsel %vm3469_vm15, %v3480_v59, %v3482_v26  ;;  %v10814_v40 = vmul.u32.u64.low %v3484_v32, %v3479_v30  ;;  %v10815_v51 = vmul.u32.u64.high %v3484_v32, %v3479_v30, %v10814_v40  ;;  %v1656_v19 = vsel %vm1571_vm11, %v1655_v61, %v10773_v21  ;;  %v3588_v30 = vld [vmem:[#allocation2 + $0x8] sm:$0xf] }
 0x338   :  { %vm7191_vm6 = vcmp.lt.s32.totalorder %v7190_v4, 0  ;;  %v10819_v18 = vmul.u32.u64.low %v3484_v32, %v3483_v27  ;;  %v10820_v45 = vmul.u32.u64.high %v3484_v32, %v3483_v27, %v10819_v18  ;;  %v7769_v17 = vpop.eup %7768  ;;  %v1680_v34 = vand.u32 8388607, %v1673_v31 }
 0x339   :  { %v1640_v42 = vsel %vm7191_vm6, 0, %v7190_v4  ;;  %v1683_v23 = vadd.s32 1, %v7192_v1  ;;  %v7771_v2 = vpop.eup %7770  ;;  %v3432_v14 = vxor.u32 2147483648, %v7769_v17  ;;  %v3491_v0 = vmul.u32 %v3484_v32, %v3475_v11 }
 0x33a   :  { %v1641_v50 = vsub.s32 32, %v1640_v42  ;;  %v1642_v41 = vshll.u32 %v10790_v6, %v1640_v42  ;;  %v1645_v29 = vsub.s32 4294967266, %v1640_v42  ;;  %v3429_v22 = vxor.u32 2147483648, %v7771_v2 }
 0x33b   :  { %v3494_v43 = vadd.s32 1, %v10815_v51  ;;  %vm1684_vm5 = vcmp.gt.s32.totalorder %v1683_v23, 0  ;;  %v3433_v8 = vsel %vm3431_vm4, %v3432_v14, %v7771_v2  ;;  %v10832_v39 = vadd.f32 1.0, %v10771_v15 }
 0x33c   :  { %v1643_v12 = vshrl.u32 %v1625_v16, %v1641_v50  ;;  %v1646_v21 = vadd.s32 127, %v1645_v29  ;;  %v3430_v46 = vsel %vm3428_vm13, %v7769_v17, %v3429_v22  ;;  %vm10838_vm7 = vcmp.le.f32.partialorder %v1569_v20, 0.7853982  ;;  %v10871_v29 = vld [vmem:[#allocation5] sm:$0xff] }
 0x33d   :  { %vm3493_vm8 = vc.u32 %v10820_v45, %v10814_v40  ;;  %v1685_v47 = vsel %vm1684_vm5, %v1683_v23, 0  ;;  %v3434_v24 = vsel %vm3427_vm2, %v3430_v46, %v3433_v8  ;;  %v1658_v20 = vsel %vm10838_vm7, 0, %v1656_v19 }
 0x33e   :  { %v1644_v32 = vor.u32 %v1643_v12, %v1642_v41  ;;  %v1647_v57 = vshll.u32 %v1646_v21, 23  ;;  %v3495_v15 = vsel %vm3493_vm8, %v3494_v43, %v10815_v51  ;;  %v3435_v33 = vsel %vm3424_vm3, nan, %v3434_v24 }
 0x33f   :  { %v3496_v55 = vadd.s32 %v3495_v15, %v3491_v0  ;;  %v1687_v28 = vand.u32 31, %v1685_v47  ;;  %3554 = vxpose.xlu1.b32.cont [15/16] %v3435_v33, 128  ;;  %v1681_v61 = vor.u32 8388608, %v1680_v34  ;;  %v10853_v5 = vrot.slane %v10832_v39, %v8139_v3 }
 0x340   :  { %v1648_v53 = vor.u32 4788187, %v1647_v57  ;;  %v1651_v7 = vcvt.s32.f32 %v1644_v32  ;;  %v1686_v1 = vshrl.u32 %v1685_v47, 5  ;;  %v1662_v19 = vadd.s32 3, %v1658_v20 }
 0x341   :  { %v3497_v44 = vadd.s32 536870912, %v3496_v55  ;;  %v1688_v36 = vsub.s32 32, %v1687_v28  ;;  %v1690_v49 = vshll.u32 %v8067_v54, %v1687_v28  ;;  %v1693_v59 = vshll.u32 %v8068_v56, %v1687_v28 }
 0x342   :  { %v1649_v9 = vand.u32 2147483647, %v1648_v53  ;;  %v1696_v35 = vshll.u32 %v8069_v58, %v1687_v28  ;;  %v1699_v4 = vshll.u32 %v8070_v60, %v1687_v28  ;;  %v1702_v51 = vshll.u32 %v8071_v62, %v1687_v28 }
 0x343   :  { %v10859_v26 = vshrl.u32 %v3497_v44, 30  ;;  %v1691_v16 = vshrl.u32 %v8068_v56, %v1688_v36  ;;  %v1694_v27 = vshrl.u32 %v8069_v58, %v1688_v36  ;;  %v1697_v18 = vshrl.u32 %v8070_v60, %v1688_v36 }
 0x344   :  { %v1652_v11 = vmul.f32 %v1651_v7, %v1649_v9  ;;  %v1700_v17 = vshrl.u32 %v8071_v62, %v1688_v36  ;;  %v1703_v42 = vshrl.u32 %v8072_v10, %v1688_v36  ;;  %v10868_v23 = vshll.u32 %v1681_v61, 8 }
 0x345   :  { %v3499_v34 = vshll.u32 %v10859_v26, 30  ;;  %v3589_v2 = vmul.f32 100.0, %v3588_v30  ;;  %v1689_v50 = vshrl.u32 %v8067_v54, %v1688_v36  ;;  %v5358_v22 = vmul.f32 %v10871_v29, %v10853_v5 }
 0x346   :  { %v1653_v14 = vxor.u32 2147483648, %v1652_v11  ;;  %v1701_v41 = vor.u32 %v1700_v17, %v1699_v4  ;;  %v1692_v43 = vor.u32 %v1691_v16, %v1690_v49  ;;  %v1695_v8 = vor.u32 %v1694_v27, %v1693_v59 }
 0x347   :  { %v10875_v0 = vsub.s32 %v3496_v55, %v3499_v34  ;;  %v1698_v12 = vor.u32 %v1697_v18, %v1696_v35  ;;  %v1704_v46 = vor.u32 %v1703_v42, %v1702_v51  ;;  %vm1705_vm9 = vcmp.lt.s32.totalorder %v1686_v1, 1  ;;  %v7937_v35 = vld [vmem:[#allocation7] sm:$0xff] }
 0x348   :  { %v1654_v21 = vsel %vm1571_vm11, %v1653_v14, %v1652_v11  ;;  %vm1708_vm12 = vcmp.lt.s32.totalorder %v1686_v1, 4  ;;  %vm1706_vm10 = vcmp.lt.s32.totalorder %v1686_v1, 2  ;;  %vm1707_vm14 = vcmp.lt.s32.totalorder %v1686_v1, 3 }
 0x349   :  { %v1657_v47 = vsel %vm10838_vm7, %v10599_v48, %v1654_v21  ;;  %v3502_v24 = vsub.s32 0, %v10875_v0  ;;  %v1709_v32 = vsel %vm1705_vm9, %v1689_v50, %v1692_v43  ;;  %v1710_v57 = vsel %vm1708_vm12, %v1698_v12, 2102212464 }
 0x34a   :  { %7772 = vcosq.f32 %v1657_v47  ;;  %v1714_v15 = vsel %vm1708_vm12, %v1701_v41, 920167782  ;;  %v1711_v20 = vsel %vm1707_vm14, %v1695_v8, %v1710_v57  ;;  %v1713_v55 = vsel %vm1705_vm9, %v1692_v43, %v1695_v8 }
 0x34b   :  { %7774 = vsinq.f32 %v1657_v47  ;;  %v7257_v33 = vmin.u32 %v3502_v24, %v10875_v0  ;;  %v1663_v6 = vand.u32 3, %v1662_v19  ;;  %v1715_v28 = vsel %vm1707_vm14, %v1698_v12, %v1714_v15 }
 0x34c   :  { %v1717_v53 = vsel %vm1705_vm9, %v1695_v8, %v1698_v12  ;;  %v1718_v7 = vsel %vm1708_vm12, %v1704_v46, 1326507024  ;;  %vm10894_vm11 = vcmp.le.f32.partialorder %v3436_v38, 0.7853982  ;;  %vm3438_vm13 = vcmp.lt.s32.totalorder %v10703_v52, 0 }
 0x34d   :  { %v3504_v44 = vclz %v7257_v33  ;;  %v3522_v36 = vsub.s32 4, %v10859_v26  ;;  %v1712_v49 = vsel %vm1706_vm10, %v1709_v32, %v1711_v20  ;;  %v1716_v9 = vsel %vm1706_vm10, %v1713_v55, %v1715_v28 }
 0x34e   :  { %v1719_v59 = vsel %vm1707_vm14, %v1701_v41, %v1718_v7  ;;  %v10903_v4 = vadd.f32 %v7937_v35, %v5358_v22  ;;  %vm1661_vm15 = vweird.f32 %v10599_v48  ;;  %vm1664_vm0 = vcmp.lt.s32.totalorder %v1663_v6, 2 }
 0x34f   :  { %v7258_v38 = vadd.s32 4294967294, %v3504_v44  ;;  %v1720_v30 = vsel %vm1706_vm10, %v1717_v53, %v1719_v59  ;;  %v10908_v16 = vmul.u32.u64.low %v10868_v23, %v1716_v9  ;;  %v10909_v27 = vmul.u32.u64.high %v10868_v23, %v1716_v9, %v10908_v16 }
 0x350   :  { %v10912_v51 = vmul.u32.u64.low %v10868_v23, %v1720_v30  ;;  %v10913_v11 = vmul.u32.u64.high %v10868_v23, %v1720_v30, %v10912_v51  ;;  %v10915_v18 = vadd.f32 1.0, %v3589_v2  ;;  %vm1665_vm1 = vcmp.eq.s32.totalorder %v1663_v6, 0 }
 0x351   :  { %v3492_v17 = vadd.s32 %v10814_v40, %v10820_v45  ;;  %vm7259_vm2 = vcmp.lt.s32.totalorder %v7258_v38, 0  ;;  %v5369_v42 = vand.u32 2139095040, %v10903_v4  ;;  %v3523_v19 = vsel %vm3438_vm13, %v3522_v36, %v10859_v26 }
 0x352   :  { %v3507_v1 = vsel %vm7259_vm2, 0, %v7258_v38  ;;  %v1728_v34 = vmul.u32 %v10868_v23, %v1712_v49  ;;  %v5366_v14 = vand.u32 2147483647, %v10903_v4  ;;  %v1731_v22 = vadd.s32 1, %v10909_v27 }
 0x353   :  { %v3508_v50 = vsub.s32 32, %v3507_v1  ;;  %v3509_v2 = vshll.u32 %v10875_v0, %v3507_v1  ;;  %v3512_v41 = vsub.s32 4294967266, %v3507_v1  ;;  %vm1668_vm3 = vcmp.eq.s32.totalorder %v1663_v6, 2 }
 0x354   :  { %v7773_v43 = vpop.eup %7772  ;;  %vm1730_vm4 = vc.u32 %v10913_v11, %v10908_v16  ;;  %v5370_v40 = vshrl.u32 %v5369_v42, 23  ;;  %v10930_v45 = vrot.slane %v10915_v18, %v8139_v3  ;;  %v3525_v0 = vsel %vm10894_vm11, 0, %v3523_v19 }
 0x355   :  { %v7775_v26 = vpop.eup %7774  ;;  %v1669_v8 = vxor.u32 2147483648, %v7773_v43  ;;  %v3510_v23 = vshrl.u32 %v3492_v17, %v3508_v50  ;;  %v3513_v12 = vadd.s32 127, %v3512_v41  ;;  %v1732_v21 = vsel %vm1730_vm4, %v1731_v22, %v10909_v27 }
 0x356   :  { %v1666_v46 = vxor.u32 2147483648, %v7775_v26  ;;  %v1733_v47 = vadd.s32 %v1732_v21, %v1728_v34  ;;  %v7324_v24 = vadd.s32 4294967169, %v5370_v40  ;;  %v5373_v33 = vand.u32 8388607, %v5366_v14 }
 0x357   :  { %v1670_v32 = vsel %vm1668_vm3, %v1669_v8, %v7775_v26  ;;  %v3511_v57 = vor.u32 %v3510_v23, %v3509_v2  ;;  %v3514_v15 = vshll.u32 %v3513_v12, 23  ;;  %v3595_v28 = vmul.f32 %v10871_v29, %v10930_v45 }
 0x358   :  { %v1667_v3 = vsel %vm1665_vm1, %v7773_v43, %v1666_v46  ;;  %v1734_v20 = vadd.s32 536870912, %v1733_v47  ;;  %v5376_v55 = vadd.s32 1, %v7324_v24  ;;  %v3529_v49 = vadd.s32 3, %v3525_v0 }
 0x359   :  { %v1671_v53 = vsel %vm1664_vm0, %v1667_v3, %v1670_v32  ;;  %v3515_v7 = vor.u32 4788187, %v3514_v15  ;;  %v3518_v44 = vcvt.s32.f32 %v3511_v57  ;;  %v5374_v38 = vor.u32 8388608, %v5373_v33 }
 0x35a   :  { %v1672_v36 = vsel %vm1661_vm15, nan, %v1671_v53  ;;  %v10943_v9 = vshrl.u32 %v1734_v20, 30  ;;  %vm5377_vm6 = vcmp.gt.s32.totalorder %v5376_v55, 0  ;;  %v10946_v17 = vadd.f32 %v7937_v35, %v3595_v28 }
 0x35b   :  { %1791 = vxpose.xlu0.b32.cont [15/16] %v1672_v36, 128  ;;  %v3516_v59 = vand.u32 2147483647, %v3515_v7  ;;  %v5378_v30 = vsel %vm5377_vm6, %v5376_v55, 0  ;;  %v10948_v6 = vand.u32 3, %v3529_v49  ;;  %v1729_v42 = vadd.s32 %v10908_v16, %v10913_v11 }
 0x35c   :  { %v1736_v27 = vshll.u32 %v10943_v9, 30  ;;  %v5380_v51 = vand.u32 31, %v5378_v30  ;;  %v10955_v2 = vshll.u32 %v5374_v38, 8  ;;  %v3606_v43 = vand.u32 2139095040, %v10946_v17 }
 0x35d   :  { %v3519_v29 = vmul.f32 %v3518_v44, %v3516_v59  ;;  %vm1675_vm5 = vcmp.lt.s32.totalorder %v10756_v25, 0  ;;  %v5379_v12 = vshrl.u32 %v5378_v30, 5  ;;  %v1759_v32 = vsub.s32 4, %v10943_v9 }
 0x35e   :  { %v10951_v48 = vsub.s32 %v1733_v47, %v1736_v27  ;;  %v5381_v1 = vsub.s32 32, %v5380_v51  ;;  %v5383_v34 = vshll.u32 %v8067_v54, %v5380_v51  ;;  %v5386_v50 = vshll.u32 %v8068_v56, %v5380_v51 }
 0x35f   :  { %v3520_v19 = vxor.u32 2147483648, %v3519_v29  ;;  %v5389_v22 = vshll.u32 %v8069_v58, %v5380_v51  ;;  %v5392_v26 = vshll.u32 %v8070_v60, %v5380_v51  ;;  %v5395_v61 = vshll.u32 %v8071_v62, %v5380_v51 }
 0x360   :  { %v1739_v41 = vsub.s32 0, %v10951_v48  ;;  %v5384_v35 = vshrl.u32 %v8068_v56, %v5381_v1  ;;  %v5387_v11 = vshrl.u32 %v8069_v58, %v5381_v1  ;;  %v5390_v40 = vshrl.u32 %v8070_v60, %v5381_v1 }
 0x361   :  { %v3521_v16 = vsel %vm3438_vm13, %v3520_v19, %v3519_v29  ;;  %v5382_v21 = vshrl.u32 %v8067_v54, %v5381_v1  ;;  %v5393_v47 = vshrl.u32 %v8071_v62, %v5381_v1  ;;  %v5396_v33 = vshrl.u32 %v8072_v10, %v5381_v1 }
 0x362   :  { %v3524_v8 = vsel %vm10894_vm11, %v10703_v52, %v3521_v16  ;;  %v7193_v23 = vmin.u32 %v1739_v41, %v10951_v48  ;;  %v5385_v46 = vor.u32 %v5384_v35, %v5383_v34  ;;  %v5388_v0 = vor.u32 %v5387_v11, %v5386_v50 }
 0x363   :  { %7776 = vcosq.f32 %v3524_v8  ;;  %v5391_v57 = vor.u32 %v5390_v40, %v5389_v22  ;;  %v5394_v15 = vor.u32 %v5393_v47, %v5392_v26  ;;  %v3607_v3 = vshrl.u32 %v3606_v43, 23  ;;  %v11007_v47 = vld [vmem:[#allocation5 + $0x8] sm:$0xff] }
 0x364   :  { %7778 = vsinq.f32 %v3524_v8  ;;  %v1741_v24 = vclz %v7193_v23  ;;  %vm3532_vm7 = vcmp.eq.s32.totalorder %v10948_v6, 0  ;;  %vm5398_vm8 = vcmp.lt.s32.totalorder %v5379_v12, 1 }
 0x365   :  { %vm5399_vm9 = vcmp.lt.s32.totalorder %v5379_v12, 2  ;;  %vm5400_vm12 = vcmp.lt.s32.totalorder %v5379_v12, 3  ;;  %vm3531_vm10 = vcmp.lt.s32.totalorder %v10948_v6, 2  ;;  %v5397_v55 = vor.u32 %v5396_v33, %v5395_v61 }
 0x366   :  { %v7194_v20 = vadd.s32 4294967294, %v1741_v24  ;;  %vm5401_vm14 = vcmp.lt.s32.totalorder %v5379_v12, 4  ;;  %v5402_v28 = vsel %vm5398_vm8, %v5382_v21, %v5385_v46  ;;  %v5406_v53 = vsel %vm5398_vm8, %v5385_v46, %v5388_v0 }
 0x367   :  { %vm3528_vm11 = vweird.f32 %v10703_v52  ;;  %vm10981_vm13 = vcmp.le.f32.partialorder %v1673_v31, 0.7853982  ;;  %v5403_v44 = vsel %vm5401_vm14, %v5391_v57, 2102212464  ;;  %v5407_v36 = vsel %vm5401_vm14, %v5394_v15, 920167782 }
 0x368   :  { %vm7195_vm15 = vcmp.lt.s32.totalorder %v7194_v20, 0  ;;  %v5410_v49 = vsel %vm5398_vm8, %v5388_v0, %v5391_v57  ;;  %v5404_v38 = vsel %vm5400_vm12, %v5388_v0, %v5403_v44  ;;  %v5408_v30 = vsel %vm5400_vm12, %v5391_v57, %v5407_v36  ;;  %v11025_v36 = vld [vmem:[#allocation7 + $0x8] sm:$0xff] }
 0x369   :  { %v1744_v59 = vsel %vm7195_vm15, 0, %v7194_v20  ;;  %v5411_v27 = vsel %vm5401_vm14, %v5397_v55, 1326507024  ;;  %vm3535_vm0 = vcmp.eq.s32.totalorder %v10948_v6, 2  ;;  %v1760_v31 = vsel %vm1675_vm5, %v1759_v32, %v10943_v9 }
 0x36a   :  { %v1745_v51 = vsub.s32 32, %v1744_v59  ;;  %v1746_v29 = vshll.u32 %v10951_v48, %v1744_v59  ;;  %v1749_v1 = vsub.s32 4294967266, %v1744_v59  ;;  %v5409_v19 = vsel %vm5399_vm9, %v5406_v53, %v5408_v30 }
 0x36b   :  { %v5412_v34 = vsel %vm5400_vm12, %v5394_v15, %v5411_v27  ;;  %v7260_v50 = vadd.s32 4294967169, %v3607_v3  ;;  %v5405_v22 = vsel %vm5399_vm9, %v5402_v28, %v5404_v38  ;;  %v3603_v12 = vand.u32 2147483647, %v10946_v17 }
 0x36c   :  { %v1747_v41 = vshrl.u32 %v1729_v42, %v1745_v51  ;;  %v1750_v35 = vadd.s32 127, %v1749_v1  ;;  %v5413_v43 = vsel %vm5399_vm9, %v5410_v49, %v5412_v34  ;;  %v5421_v0 = vmul.u32 %v10955_v2, %v5405_v22 }
 0x36d   :  { %v7777_v16 = vpop.eup %7776  ;;  %v10997_v11 = vmul.u32.u64.low %v10955_v2, %v5413_v43  ;;  %v10998_v48 = vmul.u32.u64.high %v10955_v2, %v5413_v43, %v10997_v11  ;;  %v11001_v40 = vmul.u32.u64.low %v10955_v2, %v5409_v19  ;;  %v11002_v26 = vmul.u32.u64.high %v10955_v2, %v5409_v19, %v11001_v40 }
 0x36e   :  { %v7779_v9 = vpop.eup %7778  ;;  %v3536_v8 = vxor.u32 2147483648, %v7777_v16  ;;  %v1748_v23 = vor.u32 %v1747_v41, %v1746_v29  ;;  %v1751_v21 = vshll.u32 %v1750_v35, 23  ;;  %v3613_v42 = vadd.s32 1, %v7260_v50 }
 0x36f   :  { %v3533_v46 = vxor.u32 2147483648, %v7779_v9  ;;  %v5359_v24 = vmul.f32 %v11007_v47, %v10853_v5  ;;  %v1762_v33 = vsel %vm10981_vm13, 0, %v1760_v31  ;;  %vm5423_vm2 = vc.u32 %v10998_v48, %v11001_v40 }
 0x370   :  { %v3537_v32 = vsel %vm3535_vm0, %v3536_v8, %v7779_v9  ;;  %v1752_v57 = vor.u32 4788187, %v1751_v21  ;;  %v1755_v15 = vcvt.s32.f32 %v1748_v23  ;;  %vm3614_vm1 = vcmp.gt.s32.totalorder %v3613_v42, 0 }
 0x371   :  { %v3534_v61 = vsel %vm3532_vm7, %v7777_v16, %v3533_v46  ;;  %v5424_v2 = vadd.s32 1, %v11002_v26  ;;  %v3615_v55 = vsel %vm3614_vm1, %v3613_v42, 0  ;;  %v11028_v49 = vadd.f32 %v11025_v36, %v5359_v24 }
 0x372   :  { %v3538_v3 = vsel %vm3531_vm10, %v3534_v61, %v3537_v32  ;;  %v1753_v20 = vand.u32 2147483647, %v1752_v57  ;;  %v3617_v44 = vand.u32 31, %v3615_v55  ;;  %v1766_v38 = vadd.s32 3, %v1762_v33 }
 0x373   :  { %v3539_v28 = vsel %vm3528_vm11, nan, %v3538_v3  ;;  %v5425_v53 = vsel %vm5423_vm2, %v5424_v2, %v11002_v26  ;;  %v3610_v6 = vand.u32 8388607, %v3603_v12  ;;  %v3616_v27 = vshrl.u32 %v3615_v55, 5 }
 0x374   :  { %3555 = vxpose.xlu1.b32.end [16/16] %v3539_v28, 128  ;;  %v1756_v59 = vmul.f32 %v1755_v15, %v1753_v20  ;;  %v5426_v30 = vadd.s32 %v5425_v53, %v5421_v0  ;;  %v3618_v51 = vsub.s32 32, %v3617_v44  ;;  %v3620_v52 = vshll.u32 %v8067_v54, %v3617_v44 }
 0x375   :  { %v3623_v29 = vshll.u32 %v8068_v56, %v3617_v44  ;;  %v3626_v19 = vshll.u32 %v8069_v58, %v3617_v44  ;;  %v3629_v34 = vshll.u32 %v8070_v60, %v3617_v44  ;;  %v3632_v22 = vshll.u32 %v8071_v62, %v3617_v44 }
 0x376   :  { %v1757_v1 = vxor.u32 2147483648, %v1756_v59  ;;  %v5427_v31 = vadd.s32 536870912, %v5426_v30  ;;  %v3621_v50 = vshrl.u32 %v8068_v56, %v3618_v51  ;;  %v3624_v41 = vshrl.u32 %v8069_v58, %v3618_v51 }
 0x377   :  { %v3627_v35 = vshrl.u32 %v8070_v60, %v3618_v51  ;;  %v3630_v11 = vshrl.u32 %v8071_v62, %v3618_v51  ;;  %v3633_v26 = vshrl.u32 %v8072_v10, %v3618_v51  ;;  %v3611_v8 = vor.u32 8388608, %v3610_v6 }
 0x378   :  { %v1758_v43 = vsel %vm1675_vm5, %v1757_v1, %v1756_v59  ;;  %v5428_v16 = vshrl.u32 %v5427_v31, 30  ;;  %v3622_v23 = vor.u32 %v3621_v50, %v3620_v52  ;;  %v3625_v21 = vor.u32 %v3624_v41, %v3623_v29 }
 0x379   :  { %v1761_v9 = vsel %vm10981_vm13, %v10756_v25, %v1758_v43  ;;  %v3619_v46 = vshrl.u32 %v8067_v54, %v3618_v51  ;;  %v3631_v0 = vor.u32 %v3630_v11, %v3629_v34  ;;  %v3628_v24 = vor.u32 %v3627_v35, %v3626_v19 }
 0x37a   :  { %7780 = vcosq.f32 %v1761_v9  ;;  %v5429_v42 = vshll.u32 %v5428_v16, 30  ;;  %v3634_v32 = vor.u32 %v3633_v26, %v3632_v22  ;;  %vm3635_vm3 = vcmp.lt.s32.totalorder %v3616_v27, 1 }
 0x37b   :  { %7782 = vsinq.f32 %v1761_v9  ;;  %v1767_v57 = vand.u32 3, %v1766_v38  ;;  %vm3637_vm4 = vcmp.lt.s32.totalorder %v3616_v27, 3  ;;  %vm3638_vm6 = vcmp.lt.s32.totalorder %v3616_v27, 4 }
 0x37c   :  { %v11048_v15 = vsub.s32 %v5426_v30, %v5429_v42  ;;  %vm3636_vm5 = vcmp.lt.s32.totalorder %v3616_v27, 2  ;;  %v3640_v7 = vsel %vm3638_vm6, %v3628_v24, 2102212464  ;;  %v3643_v61 = vsel %vm3635_vm3, %v3622_v23, %v3625_v21 }
 0x37d   :  { %v3651_v33 = vshll.u32 %v3611_v8, 8  ;;  %v5452_v3 = vsub.s32 4, %v5428_v16  ;;  %v3644_v20 = vsel %vm3638_vm6, %v3631_v0, 920167782  ;;  %v5473_v55 = vand.u32 2139095040, %v11028_v49 }
 0x37e   :  { %v5432_v2 = vsub.s32 0, %v11048_v15  ;;  %v3639_v28 = vsel %vm3635_vm3, %v3619_v46, %v3622_v23  ;;  %v3645_v53 = vsel %vm3637_vm4, %v3628_v24, %v3644_v20  ;;  %v3647_v44 = vsel %vm3635_vm3, %v3625_v21, %v3628_v24 }
 0x37f   :  { %v3648_v59 = vsel %vm3638_vm6, %v3634_v32, 1326507024  ;;  %v3641_v30 = vsel %vm3637_vm4, %v3625_v21, %v3640_v7  ;;  %v3646_v6 = vsel %vm3636_vm5, %v3643_v61, %v3645_v53  ;;  %vm5368_vm7 = vcmp.lt.s32.totalorder %v10903_v4, 0 }
 0x380   :  { %v7325_v38 = vmin.u32 %v5432_v2, %v11048_v15  ;;  %v3649_v51 = vsel %vm3637_vm4, %v3631_v0, %v3648_v59  ;;  %v11059_v29 = vmul.u32.u64.low %v3651_v33, %v3646_v6  ;;  %v11060_v1 = vmul.u32.u64.high %v3651_v33, %v3646_v6, %v11059_v29 }
 0x381   :  { %v3650_v52 = vsel %vm3636_vm5, %v3647_v44, %v3649_v51  ;;  %vm1765_vm8 = vweird.f32 %v10756_v25  ;;  %vm11066_vm9 = vcmp.le.f32.partialorder %v5366_v14, 0.7853982  ;;  %v5453_v34 = vsel %vm5368_vm7, %v5452_v3, %v5428_v16 }
 0x382   :  { %v5434_v19 = vclz %v7325_v38  ;;  %v3642_v50 = vsel %vm3636_vm5, %v3639_v28, %v3641_v30  ;;  %v11073_v41 = vmul.u32.u64.low %v3651_v33, %v3650_v52  ;;  %v11074_v35 = vmul.u32.u64.high %v3651_v33, %v3650_v52, %v11073_v41 }
 0x383   :  { %v5474_v22 = vshrl.u32 %v5473_v55, 23  ;;  %vm1768_vm12 = vcmp.lt.s32.totalorder %v1767_v57, 2  ;;  %vm1769_vm10 = vcmp.eq.s32.totalorder %v1767_v57, 0  ;;  %vm1772_vm14 = vcmp.eq.s32.totalorder %v1767_v57, 2 }
 0x384   :  { %v7781_v43 = vpop.eup %7780  ;;  %v7326_v11 = vadd.s32 4294967294, %v5434_v19  ;;  %v5422_v9 = vadd.s32 %v11001_v40, %v10998_v48  ;;  %v3661_v8 = vadd.s32 1, %v11060_v1  ;;  %v5455_v27 = vsel %vm11066_vm9, 0, %v5453_v34 }
 0x385   :  { %v7783_v26 = vpop.eup %7782  ;;  %v1773_v14 = vxor.u32 2147483648, %v7781_v43  ;;  %v7328_v23 = vadd.s32 4294967169, %v5474_v22  ;;  %v3658_v21 = vmul.u32 %v3651_v33, %v3642_v50  ;;  %vm3660_vm13 = vc.u32 %v11074_v35, %v11059_v29 }
 0x386   :  { %v1770_v16 = vxor.u32 2147483648, %v7783_v26  ;;  %vm7327_vm11 = vcmp.lt.s32.totalorder %v7326_v11, 0  ;;  %v5470_v0 = vand.u32 2147483647, %v11028_v49  ;;  %v5459_v61 = vadd.s32 3, %v5455_v27 }
 0x387   :  { %v1774_v42 = vsel %vm1772_vm14, %v1773_v14, %v7783_v26  ;;  %v5437_v46 = vsel %vm7327_vm11, 0, %v7326_v11  ;;  %v3662_v2 = vsel %vm3660_vm13, %v3661_v8, %v11060_v1  ;;  %v5480_v3 = vadd.s32 1, %v7328_v23 }
 0x388   :  { %v1771_v24 = vsel %vm1769_vm10, %v7781_v43, %v1770_v16  ;;  %v5438_v32 = vsub.s32 32, %v5437_v46  ;;  %v5439_v48 = vshll.u32 %v11048_v15, %v5437_v46  ;;  %v5442_v40 = vsub.s32 4294967266, %v5437_v46 }
 0x389   :  { %v1775_v7 = vsel %vm1768_vm12, %v1771_v24, %v1774_v42  ;;  %v3663_v28 = vadd.s32 %v3662_v2, %v3658_v21  ;;  %v5477_v53 = vand.u32 8388607, %v5470_v0  ;;  %vm5481_vm15 = vcmp.gt.s32.totalorder %v5480_v3, 0 }
 0x38a   :  { %v1776_v33 = vsel %vm1765_vm8, nan, %v1775_v7  ;;  %v5440_v20 = vshrl.u32 %v5422_v9, %v5438_v32  ;;  %v5443_v55 = vadd.s32 127, %v5442_v40  ;;  %v3596_v15 = vmul.f32 %v11007_v47, %v10930_v45 }
 0x38b   :  { %1792 = vxpose.xlu0.b32.end [16/16] %v1776_v33, 128  ;;  %v3664_v59 = vadd.s32 536870912, %v3663_v28  ;;  %v5482_v38 = vsel %vm5481_vm15, %v5480_v3, 0  ;;  %v11094_v25 = vand.u32 3, %v5459_v61  ;;  %v5478_v1 = vor.u32 8388608, %v5477_v53 }
 0x38c   :  { %v5441_v57 = vor.u32 %v5440_v20, %v5439_v48  ;;  %v5444_v44 = vshll.u32 %v5443_v55, 23  ;;  %v5484_v30 = vand.u32 31, %v5482_v38  ;;  %v11096_v19 = vshrl.u32 %v5482_v38, 5 }
 0x38d   :  { %v3665_v52 = vshrl.u32 %v3664_v59, 30  ;;  %v11099_v50 = vadd.f32 %v11025_v36, %v3596_v15  ;;  %vm3605_vm0 = vcmp.lt.s32.totalorder %v10946_v17, 0  ;;  %v3659_v27 = vadd.s32 %v11059_v29, %v11074_v35 }
 0x38e   :  { %v5445_v6 = vor.u32 4788187, %v5444_v44  ;;  %v5448_v51 = vcvt.s32.f32 %v5441_v57  ;;  %v5485_v34 = vsub.s32 32, %v5484_v30  ;;  %v5487_v47 = vshll.u32 %v8067_v54, %v5484_v30 }
 0x38f   :  { %v3666_v22 = vshll.u32 %v3665_v52, 30  ;;  %v5490_v43 = vshll.u32 %v8068_v56, %v5484_v30  ;;  %v5493_v14 = vshll.u32 %v8069_v58, %v5484_v30  ;;  %v5496_v36 = vshll.u32 %v8070_v60, %v5484_v30 }
 0x390   :  { %v5446_v41 = vand.u32 2147483647, %v5445_v6  ;;  %v5488_v11 = vshrl.u32 %v8068_v56, %v5485_v34  ;;  %v5491_v26 = vshrl.u32 %v8069_v58, %v5485_v34  ;;  %v5494_v9 = vshrl.u32 %v8070_v60, %v5485_v34 }
 0x391   :  { %v11107_v23 = vsub.s32 %v3663_v28, %v3666_v22  ;;  %v5497_v16 = vshrl.u32 %v8071_v62, %v5485_v34  ;;  %v11114_v21 = vshll.u32 %v5478_v1, 8  ;;  %v3707_v42 = vand.u32 2147483647, %v11099_v50 }
 0x392   :  { %v5449_v8 = vmul.f32 %v5448_v51, %v5446_v41  ;;  %v3710_v46 = vand.u32 2139095040, %v11099_v50  ;;  %v5486_v48 = vshrl.u32 %v8067_v54, %v5485_v34  ;;  %v5489_v40 = vor.u32 %v5488_v11, %v5487_v47 }
 0x393   :  { %v3669_v32 = vsub.s32 0, %v11107_v23  ;;  %v5492_v7 = vor.u32 %v5491_v26, %v5490_v43  ;;  %v5495_v61 = vor.u32 %v5494_v9, %v5493_v14  ;;  %v5499_v2 = vshll.u32 %v8071_v62, %v5484_v30 }
 0x394   :  { %v5450_v24 = vxor.u32 2147483648, %v5449_v8  ;;  %v5500_v3 = vshrl.u32 %v8072_v10, %v5485_v34  ;;  %vm11126_vm1 = vcmp.le.f32.partialorder %v3603_v12, 0.7853982  ;;  %v5498_v20 = vor.u32 %v5497_v16, %v5496_v36 }
 0x395   :  { %v7261_v33 = vmin.u32 %v3669_v32, %v11107_v23  ;;  %vm5502_vm2 = vcmp.lt.s32.totalorder %v11096_v19, 1  ;;  %vm5505_vm3 = vcmp.lt.s32.totalorder %v11096_v19, 4  ;;  %v3711_v53 = vshrl.u32 %v3710_v46, 23 }
 0x396   :  { %v5451_v29 = vsel %vm5368_vm7, %v5450_v24, %v5449_v8  ;;  %v5501_v28 = vor.u32 %v5500_v3, %v5499_v2  ;;  %v3689_v57 = vsub.s32 4, %v3665_v52  ;;  %vm5504_vm4 = vcmp.lt.s32.totalorder %v11096_v19, 3 }
 0x397   :  { %v5454_v55 = vsel %vm11066_vm9, %v10903_v4, %v5451_v29  ;;  %v3671_v15 = vclz %v7261_v33  ;;  %vm5503_vm6 = vcmp.lt.s32.totalorder %v11096_v19, 2  ;;  %v5507_v12 = vsel %vm5505_vm3, %v5495_v61, 2102212464  ;;  %v11181_v19 = vld [vmem:[#allocation5 + $0x10] sm:$0xff] }
 0x398   :  { %7784 = vcosq.f32 %v5454_v55  ;;  %v5510_v44 = vsel %vm5502_vm2, %v5489_v40, %v5492_v7  ;;  %v5506_v59 = vsel %vm5502_vm2, %v5486_v48, %v5489_v40  ;;  %v5511_v38 = vsel %vm5505_vm3, %v5498_v20, 920167782 }
 0x399   :  { %7786 = vsinq.f32 %v5454_v55  ;;  %v7262_v31 = vadd.s32 4294967294, %v3671_v15  ;;  %v5514_v30 = vsel %vm5502_vm2, %v5492_v7, %v5495_v61  ;;  %v5508_v6 = vsel %vm5504_vm4, %v5492_v7, %v5507_v12 }
 0x39a   :  { %v5512_v51 = vsel %vm5504_vm4, %v5495_v61, %v5511_v38  ;;  %v5515_v1 = vsel %vm5505_vm3, %v5501_v28, 1326507024  ;;  %v7264_v34 = vadd.s32 4294967169, %v3711_v53  ;;  %v3690_v41 = vsel %vm3605_vm0, %v3689_v57, %v3665_v52 }
 0x39b   :  { %vm7263_vm5 = vcmp.lt.s32.totalorder %v7262_v31, 0  ;;  %v5513_v22 = vsel %vm5503_vm6, %v5510_v44, %v5512_v51  ;;  %v5516_v47 = vsel %vm5504_vm4, %v5498_v20, %v5515_v1  ;;  %vm5458_vm7 = vweird.f32 %v10903_v4 }
 0x39c   :  { %v3674_v43 = vsel %vm7263_vm5, 0, %v7262_v31  ;;  %v5517_v11 = vsel %vm5503_vm6, %v5514_v30, %v5516_v47  ;;  %v11164_v26 = vmul.u32.u64.low %v11114_v21, %v5513_v22  ;;  %v11165_v14 = vmul.u32.u64.high %v11114_v21, %v5513_v22, %v11164_v26 }
 0x39d   :  { %v3675_v9 = vsub.s32 32, %v3674_v43  ;;  %v3676_v52 = vshll.u32 %v11107_v23, %v3674_v43  ;;  %v3679_v8 = vsub.s32 4294967266, %v3674_v43  ;;  %v5509_v36 = vsel %vm5503_vm6, %v5506_v59, %v5508_v6  ;;  %v11193_v59 = vld [vmem:[#allocation7 + $0x10] sm:$0xff] }
 0x39e   :  { %v3692_v16 = vsel %vm11126_vm1, 0, %v3690_v41  ;;  %v11174_v46 = vmul.u32.u64.low %v11114_v21, %v5517_v11  ;;  %v11175_v24 = vmul.u32.u64.high %v11114_v21, %v5517_v11, %v11174_v46  ;;  %v3717_v32 = vadd.s32 1, %v7264_v34 }
 0x39f   :  { %vm5461_vm8 = vcmp.lt.s32.totalorder %v11094_v25, 2  ;;  %vm5465_vm9 = vcmp.eq.s32.totalorder %v11094_v25, 2  ;;  %v3677_v48 = vshrl.u32 %v3659_v27, %v3675_v9  ;;  %v3680_v40 = vadd.s32 127, %v3679_v8 }
 0x3a0   :  { %v5525_v23 = vmul.u32 %v11114_v21, %v5509_v36  ;;  %v5528_v7 = vadd.s32 1, %v11165_v14  ;;  %vm3718_vm12 = vcmp.gt.s32.totalorder %v3717_v32, 0  ;;  %v5360_v61 = vmul.f32 %v11181_v19, %v10853_v5 }
 0x3a1   :  { %v3678_v3 = vor.u32 %v3677_v48, %v3676_v52  ;;  %v3681_v29 = vshll.u32 %v3680_v40, 23  ;;  %v3696_v33 = vadd.s32 3, %v3692_v16  ;;  %v3719_v20 = vsel %vm3718_vm12, %v3717_v32, 0 }
 0x3a2   :  { %v7785_v2 = vpop.eup %7784  ;;  %vm5462_vm10 = vcmp.eq.s32.totalorder %v11094_v25, 0  ;;  %vm5527_vm14 = vc.u32 %v11175_v24, %v11164_v26  ;;  %v3714_v21 = vand.u32 8388607, %v3707_v42  ;;  %v3721_v31 = vand.u32 31, %v3719_v20 }
 0x3a3   :  { %v7787_v55 = vpop.eup %7786  ;;  %v5466_v27 = vxor.u32 2147483648, %v7785_v2  ;;  %v3682_v53 = vor.u32 4788187, %v3681_v29  ;;  %v3685_v15 = vcvt.s32.f32 %v3678_v3  ;;  %v5529_v57 = vsel %vm5527_vm14, %v5528_v7, %v11165_v14 }
 0x3a4   :  { %v5463_v28 = vxor.u32 2147483648, %v7787_v55  ;;  %v5530_v44 = vadd.s32 %v5529_v57, %v5525_v23  ;;  %v11196_v38 = vadd.f32 %v11193_v59, %v5360_v61  ;;  %v11198_v51 = vand.u32 3, %v3696_v33 }
 0x3a5   :  { %v5467_v12 = vsel %vm5465_vm9, %v5466_v27, %v7787_v55  ;;  %v3683_v6 = vand.u32 2147483647, %v3682_v53  ;;  %v3720_v1 = vshrl.u32 %v3719_v20, 5  ;;  %v3722_v22 = vsub.s32 32, %v3721_v31 }
 0x3a6   :  { %v5464_v30 = vsel %vm5462_vm10, %v7785_v2, %v5463_v28  ;;  %v5531_v41 = vadd.s32 536870912, %v5530_v44  ;;  %v3724_v47 = vshll.u32 %v8067_v54, %v3721_v31  ;;  %v3715_v14 = vor.u32 8388608, %v3714_v21 }
 0x3a7   :  { %v5468_v34 = vsel %vm5461_vm8, %v5464_v30, %v5467_v12  ;;  %v3686_v11 = vmul.f32 %v3685_v15, %v3683_v6  ;;  %v3727_v9 = vshll.u32 %v8068_v56, %v3721_v31  ;;  %v3725_v8 = vshrl.u32 %v8068_v56, %v3722_v22 }
 0x3a8   :  { %v5469_v43 = vsel %vm5458_vm7, nan, %v5468_v34  ;;  %v11206_v52 = vshrl.u32 %v5531_v41, 30  ;;  %v3728_v36 = vshrl.u32 %v8069_v58, %v3722_v22  ;;  %v3730_v25 = vshll.u32 %v8069_v58, %v3721_v31 }
 0x3a9   :  { %7066 = vxpose.xlu1.b32.start [1/16] %v5469_v43, 128  ;;  %v3687_v16 = vxor.u32 2147483648, %v3686_v11  ;;  %v3731_v46 = vshrl.u32 %v8070_v60, %v3722_v22  ;;  %v3733_v32 = vshll.u32 %v8070_v60, %v3721_v31  ;;  %v3734_v4 = vshrl.u32 %v8071_v62, %v3722_v22 }
 0x3aa   :  { %v5533_v48 = vshll.u32 %v11206_v52, 30  ;;  %v3723_v40 = vshrl.u32 %v8067_v54, %v3722_v22  ;;  %v3726_v23 = vor.u32 %v3725_v8, %v3724_v47  ;;  %vm3739_vm11 = vcmp.lt.s32.totalorder %v3720_v1, 1 }
 0x3ab   :  { %v3688_v7 = vsel %vm3605_vm0, %v3687_v16, %v3686_v11  ;;  %v3729_v61 = vor.u32 %v3728_v36, %v3727_v9  ;;  %v3735_v2 = vor.u32 %v3734_v4, %v3733_v32  ;;  %v3736_v3 = vshll.u32 %v8071_v62, %v3721_v31 }
 0x3ac   :  { %v3691_v29 = vsel %vm11126_vm1, %v10946_v17, %v3688_v7  ;;  %v11222_v33 = vsub.s32 %v5530_v44, %v5533_v48  ;;  %v3732_v20 = vor.u32 %v3731_v46, %v3730_v25  ;;  %v3737_v55 = vshrl.u32 %v8072_v10, %v3722_v22 }
 0x3ad   :  { %7788 = vcosq.f32 %v3691_v29  ;;  %vm3741_vm13 = vcmp.lt.s32.totalorder %v3720_v1, 3  ;;  %vm3742_vm15 = vcmp.lt.s32.totalorder %v3720_v1, 4  ;;  %v5577_v27 = vand.u32 2139095040, %v11196_v38 }
 0x3ae   :  { %7790 = vsinq.f32 %v3691_v29  ;;  %v5536_v21 = vsub.s32 0, %v11222_v33  ;;  %v3738_v28 = vor.u32 %v3737_v55, %v3736_v3  ;;  %vm3740_vm0 = vcmp.lt.s32.totalorder %v3720_v1, 2 }
 0x3af   :  { %v3744_v53 = vsel %vm3742_vm15, %v3732_v20, 2102212464  ;;  %v3747_v35 = vsel %vm3739_vm11, %v3726_v23, %v3729_v61  ;;  %v3748_v15 = vsel %vm3742_vm15, %v3735_v2, 920167782  ;;  %v3755_v57 = vshll.u32 %v3715_v14, 8 }
 0x3b0   :  { %v7329_v12 = vmin.u32 %v5536_v21, %v11222_v33  ;;  %v3743_v44 = vsel %vm3739_vm11, %v3723_v40, %v3726_v23  ;;  %v3749_v31 = vsel %vm3741_vm13, %v3732_v20, %v3748_v15  ;;  %v3751_v30 = vsel %vm3739_vm11, %v3729_v61, %v3732_v20 }
 0x3b1   :  { %v3745_v6 = vsel %vm3741_vm13, %v3729_v61, %v3744_v53  ;;  %v3750_v34 = vsel %vm3740_vm0, %v3747_v35, %v3749_v31  ;;  %v3752_v41 = vsel %vm3742_vm15, %v3738_v28, 1326507024  ;;  %v5578_v22 = vshrl.u32 %v5577_v27, 23 }
 0x3b2   :  { %vm3695_vm1 = vweird.f32 %v10946_v17  ;;  %vm3698_vm2 = vcmp.lt.s32.totalorder %v11198_v51, 2  ;;  %vm11241_vm3 = vcmp.le.f32.partialorder %v5470_v0, 0.7853982  ;;  %vm5472_vm4 = vcmp.lt.s32.totalorder %v11028_v49, 0 }
 0x3b3   :  { %v5538_v43 = vclz %v7329_v12  ;;  %v5556_v11 = vsub.s32 4, %v11206_v52  ;;  %v3753_v14 = vsel %vm3741_vm13, %v3735_v2, %v3752_v41  ;;  %v3746_v25 = vsel %vm3740_vm0, %v3743_v44, %v3745_v6 }
 0x3b4   :  { %v11248_v9 = vmul.u32.u64.low %v3755_v57, %v3750_v34  ;;  %v11249_v8 = vmul.u32.u64.high %v3755_v57, %v3750_v34, %v11248_v9  ;;  %v3754_v16 = vsel %vm3740_vm0, %v3751_v30, %v3753_v14  ;;  %v7332_v0 = vadd.s32 4294967169, %v5578_v22 }
 0x3b5   :  { %v7330_v36 = vadd.s32 4294967294, %v5538_v43  ;;  %vm3699_vm6 = vcmp.eq.s32.totalorder %v11198_v51, 0  ;;  %v11255_v46 = vmul.u32.u64.low %v3755_v57, %v3754_v16  ;;  %v11256_v32 = vmul.u32.u64.high %v3755_v57, %v3754_v16, %v11255_v46 }
 0x3b6   :  { %v5574_v4 = vand.u32 2147483647, %v11196_v38  ;;  %vm3702_vm5 = vcmp.eq.s32.totalorder %v11198_v51, 2  ;;  %v5526_v48 = vadd.s32 %v11164_v26, %v11175_v24  ;;  %v5584_v40 = vadd.s32 1, %v7332_v0 }
 0x3b7   :  { %vm7331_vm7 = vcmp.lt.s32.totalorder %v7330_v36, 0  ;;  %v7789_v23 = vpop.eup %7788  ;;  %v5557_v1 = vsel %vm5472_vm4, %v5556_v11, %v11206_v52  ;;  %v3762_v61 = vmul.u32 %v3755_v57, %v3746_v25  ;;  %v3765_v2 = vadd.s32 1, %v11249_v8 }
 0x3b8   :  { %v5541_v7 = vsel %vm7331_vm7, 0, %v7330_v36  ;;  %v7791_v3 = vpop.eup %7790  ;;  %v3703_v29 = vxor.u32 2147483648, %v7789_v23  ;;  %vm3764_vm8 = vc.u32 %v11256_v32, %v11248_v9  ;;  %v5581_v26 = vand.u32 8388607, %v5574_v4 }
 0x3b9   :  { %v5542_v20 = vsub.s32 32, %v5541_v7  ;;  %v5543_v55 = vshll.u32 %v11222_v33, %v5541_v7  ;;  %v5546_v27 = vsub.s32 4294967266, %v5541_v7  ;;  %v3700_v21 = vxor.u32 2147483648, %v7791_v3 }
 0x3ba   :  { %vm5585_vm9 = vcmp.gt.s32.totalorder %v5584_v40, 0  ;;  %v3704_v24 = vsel %vm3702_vm5, %v3703_v29, %v7791_v3  ;;  %v3766_v53 = vsel %vm3764_vm8, %v3765_v2, %v11249_v8  ;;  %v5559_v33 = vsel %vm11241_vm3, 0, %v5557_v1 }
 0x3bb   :  { %v5544_v52 = vshrl.u32 %v5526_v48, %v5542_v20  ;;  %v5547_v28 = vadd.s32 127, %v5546_v27  ;;  %v3701_v35 = vsel %vm3699_vm6, %v7789_v23, %v3700_v21  ;;  %v3767_v15 = vadd.s32 %v3766_v53, %v3762_v61 }
 0x3bc   :  { %v5586_v57 = vsel %vm5585_vm9, %v5584_v40, 0  ;;  %v3705_v12 = vsel %vm3698_vm2, %v3701_v35, %v3704_v24  ;;  %v5563_v43 = vadd.s32 3, %v5559_v33  ;;  %v5582_v14 = vor.u32 8388608, %v5581_v26 }
 0x3bd   :  { %v5545_v44 = vor.u32 %v5544_v52, %v5543_v55  ;;  %v5548_v31 = vshll.u32 %v5547_v28, 23  ;;  %v3706_v30 = vsel %vm3695_vm1, nan, %v3705_v12  ;;  %v3768_v6 = vadd.s32 536870912, %v3767_v15 }
 0x3be   :  { %v5588_v34 = vand.u32 31, %v5586_v57  ;;  %5303 = vxpose.xlu0.b32.start [1/16] %v3706_v30, 128  ;;  %v5587_v8 = vshrl.u32 %v5586_v57, 5  ;;  %v11291_v2 = vand.u32 3, %v5563_v43  ;;  %v3597_v20 = vmul.f32 %v11181_v19, %v10930_v45 }
 0x3bf   :  { %v5549_v41 = vor.u32 4788187, %v5548_v31  ;;  %v5552_v22 = vcvt.s32.f32 %v5545_v44  ;;  %v3769_v11 = vshrl.u32 %v3768_v6, 30  ;;  %v11298_v26 = vshll.u32 %v5582_v14, 8 }
 0x3c0   :  { %v5589_v36 = vsub.s32 32, %v5588_v34  ;;  %v5591_v16 = vshll.u32 %v8067_v54, %v5588_v34  ;;  %v5594_v51 = vshll.u32 %v8068_v56, %v5588_v34  ;;  %v5597_v0 = vshll.u32 %v8069_v58, %v5588_v34 }
 0x3c1   :  { %v5550_v25 = vand.u32 2147483647, %v5549_v41  ;;  %v3770_v46 = vshll.u32 %v3769_v11, 30  ;;  %v5600_v48 = vshll.u32 %v8070_v60, %v5588_v34  ;;  %v5603_v40 = vshll.u32 %v8071_v62, %v5588_v34 }
 0x3c2   :  { %v5592_v17 = vshrl.u32 %v8068_v56, %v5589_v36  ;;  %v5595_v7 = vshrl.u32 %v8069_v58, %v5589_v36  ;;  %v5598_v1 = vshrl.u32 %v8070_v60, %v5589_v36  ;;  %v5601_v61 = vshrl.u32 %v8071_v62, %v5589_v36 }
 0x3c3   :  { %v5553_v23 = vmul.f32 %v5552_v22, %v5550_v25  ;;  %v11293_v3 = vsub.s32 %v3767_v15, %v3770_v46  ;;  %v5604_v29 = vshrl.u32 %v8072_v10, %v5589_v36  ;;  %vm3709_vm12 = vcmp.lt.s32.totalorder %v11099_v50, 0 }
 0x3c4   :  { %v5593_v27 = vor.u32 %v5592_v17, %v5591_v16  ;;  %v5596_v21 = vor.u32 %v5595_v7, %v5594_v51  ;;  %v5599_v52 = vor.u32 %v5598_v1, %v5597_v0  ;;  %v5602_v28 = vor.u32 %v5601_v61, %v5600_v48 }
 0x3c5   :  { %v5554_v55 = vxor.u32 2147483648, %v5553_v23  ;;  %v3773_v24 = vsub.s32 0, %v11293_v3  ;;  %vm5606_vm10 = vcmp.lt.s32.totalorder %v5587_v8, 1  ;;  %v5590_v35 = vshrl.u32 %v8067_v54, %v5589_v36 }
 0x3c6   :  { %v5605_v33 = vor.u32 %v5604_v29, %v5603_v40  ;;  %vm5609_vm14 = vcmp.lt.s32.totalorder %v5587_v8, 4  ;;  %vm5608_vm11 = vcmp.lt.s32.totalorder %v5587_v8, 3  ;;  %vm5607_vm13 = vcmp.lt.s32.totalorder %v5587_v8, 2 }
 0x3c7   :  { %v5555_v53 = vsel %vm5472_vm4, %v5554_v55, %v5553_v23  ;;  %v7265_v15 = vmin.u32 %v3773_v24, %v11293_v3  ;;  %v5611_v57 = vsel %vm5609_vm14, %v5599_v52, 2102212464  ;;  %v5614_v12 = vsel %vm5606_vm10, %v5593_v27, %v5596_v21 }
 0x3c8   :  { %v5558_v19 = vsel %vm11241_vm3, %v11028_v49, %v5555_v53  ;;  %v5615_v44 = vsel %vm5609_vm14, %v5602_v28, 920167782  ;;  %v3793_v30 = vsub.s32 4, %v3769_v11  ;;  %v11313_v6 = vadd.f32 %v11193_v59, %v3597_v20 }
 0x3c9   :  { %7792 = vcosq.f32 %v5558_v19  ;;  %v3775_v31 = vclz %v7265_v15  ;;  %v5610_v47 = vsel %vm5606_vm10, %v5590_v35, %v5593_v27  ;;  %v5612_v34 = vsel %vm5608_vm11, %v5596_v21, %v5611_v57 }
 0x3ca   :  { %7794 = vsinq.f32 %v5558_v19  ;;  %v5616_v41 = vsel %vm5608_vm11, %v5599_v52, %v5615_v44  ;;  %v5618_v22 = vsel %vm5606_vm10, %v5596_v21, %v5599_v52  ;;  %v3763_v43 = vadd.s32 %v11248_v9, %v11256_v32 }
 0x3cb   :  { %v7266_v14 = vadd.s32 4294967294, %v3775_v31  ;;  %v5617_v36 = vsel %vm5607_vm13, %v5614_v12, %v5616_v41  ;;  %v5619_v25 = vsel %vm5609_vm14, %v5605_v33, 1326507024  ;;  %v3811_v0 = vand.u32 2147483647, %v11313_v6 }
 0x3cc   :  { %v5620_v16 = vsel %vm5608_vm11, %v5602_v28, %v5619_v25  ;;  %v11325_v59 = vmul.u32.u64.low %v11298_v26, %v5617_v36  ;;  %v11326_v51 = vmul.u32.u64.high %v11298_v26, %v5617_v36, %v11325_v59  ;;  %v5613_v46 = vsel %vm5607_vm13, %v5610_v47, %v5612_v34  ;;  %v7942_v34 = vld [vmem:[#allocation5 + $0x18] sm:$0xff] }
 0x3cd   :  { %vm7267_vm15 = vcmp.lt.s32.totalorder %v7266_v14, 0  ;;  %v5621_v17 = vsel %vm5607_vm13, %v5618_v22, %v5620_v16  ;;  %v3814_v9 = vand.u32 2139095040, %v11313_v6  ;;  %v3794_v48 = vsel %vm3709_vm12, %v3793_v30, %v3769_v11 }
 0x3ce   :  { %v3778_v32 = vsel %vm7267_vm15, 0, %v7266_v14  ;;  %v11335_v40 = vmul.u32.u64.low %v11298_v26, %v5621_v17  ;;  %v11336_v23 = vmul.u32.u64.high %v11298_v26, %v5621_v17, %v11335_v40  ;;  %vm5562_vm0 = vweird.f32 %v11028_v49 }
 0x3cf   :  { %v3779_v7 = vsub.s32 32, %v3778_v32  ;;  %v3780_v1 = vshll.u32 %v11293_v3, %v3778_v32  ;;  %v3783_v61 = vsub.s32 4294967266, %v3778_v32  ;;  %v3815_v29 = vshrl.u32 %v3814_v9, 23 }
 0x3d0   :  { %vm11342_vm1 = vcmp.le.f32.partialorder %v3707_v42, 0.7853982  ;;  %v5629_v20 = vmul.u32 %v11298_v26, %v5613_v46  ;;  %v5632_v11 = vadd.s32 1, %v11326_v51  ;;  %vm5566_vm2 = vcmp.eq.s32.totalorder %v11291_v2, 0 }
 0x3d1   :  { %v3781_v55 = vshrl.u32 %v3763_v43, %v3779_v7  ;;  %v3784_v27 = vadd.s32 127, %v3783_v61  ;;  %v7268_v21 = vadd.s32 4294967169, %v3815_v29  ;;  %vm5569_vm3 = vcmp.eq.s32.totalorder %v11291_v2, 2 }
 0x3d2   :  { %v3796_v24 = vsel %vm11342_vm1, 0, %v3794_v48  ;;  %vm5631_vm4 = vc.u32 %v11336_v23, %v11325_v59  ;;  %v3818_v42 = vand.u32 8388607, %v3811_v0  ;;  %vm5565_vm6 = vcmp.lt.s32.totalorder %v11291_v2, 2  ;;  %v11370_v48 = vld [vmem:[#allocation7 + $0x18] sm:$0xff] }
 0x3d3   :  { %v7793_v3 = vpop.eup %7792  ;;  %v3782_v28 = vor.u32 %v3781_v55, %v3780_v1  ;;  %v3785_v53 = vshll.u32 %v3784_v27, 23  ;;  %v5633_v35 = vsel %vm5631_vm4, %v5632_v11, %v11326_v51  ;;  %v3821_v15 = vadd.s32 1, %v7268_v21 }
 0x3d4   :  { %v7795_v52 = vpop.eup %7794  ;;  %v5570_v26 = vxor.u32 2147483648, %v7793_v3  ;;  %v5634_v19 = vadd.s32 %v5633_v35, %v5629_v20  ;;  %v3800_v31 = vadd.s32 3, %v3796_v24  ;;  %v5361_v41 = vmul.f32 %v7942_v34, %v10853_v5 }
 0x3d5   :  { %v5567_v33 = vxor.u32 2147483648, %v7795_v52  ;;  %v3786_v12 = vor.u32 4788187, %v3785_v53  ;;  %v3789_v44 = vcvt.s32.f32 %v3782_v28  ;;  %vm3822_vm5 = vcmp.gt.s32.totalorder %v3821_v15, 0 }
 0x3d6   :  { %v5571_v57 = vsel %vm5569_vm3, %v5570_v26, %v7795_v52  ;;  %v5635_v47 = vadd.s32 536870912, %v5634_v19  ;;  %v3819_v14 = vor.u32 8388608, %v3818_v42  ;;  %v3823_v36 = vsel %vm3822_vm5, %v3821_v15, 0 }
 0x3d7   :  { %v5568_v30 = vsel %vm5566_vm2, %v7793_v3, %v5567_v33  ;;  %v3787_v43 = vand.u32 2147483647, %v3786_v12  ;;  %v3825_v51 = vand.u32 31, %v3823_v36  ;;  %v11362_v17 = vand.u32 3, %v3800_v31 }
 0x3d8   :  { %v5572_v22 = vsel %vm5565_vm6, %v5568_v30, %v5571_v57  ;;  %v5636_v16 = vshrl.u32 %v5635_v47, 30  ;;  %v11365_v2 = vmul.f32 %v7942_v34, %v10930_v45  ;;  %v11368_v9 = vadd.s32 %v11325_v59, %v11336_v23 }
 0x3d9   :  { %v5573_v25 = vsel %vm5562_vm0, nan, %v5572_v22  ;;  %v3790_v46 = vmul.f32 %v3789_v44, %v3787_v43  ;;  %v3826_v32 = vsub.s32 32, %v3825_v51  ;;  %v11373_v40 = vadd.f32 %v11370_v48, %v5361_v41 }
 0x3da   :  { %7067 = vxpose.xlu1.b32.cont [2/16] %v5573_v25, 128  ;;  %v5637_v5 = vshll.u32 %v5636_v16, 30  ;;  %v3824_v7 = vshrl.u32 %v3823_v36, 5  ;;  %v3828_v1 = vshll.u32 %v8067_v54, %v3825_v51  ;;  %v11376_v61 = vshll.u32 %v3819_v14, 8 }
 0x3db   :  { %v3791_v49 = vxor.u32 2147483648, %v3790_v46  ;;  %v3829_v45 = vshrl.u32 %v8068_v56, %v3826_v32  ;;  %v3831_v59 = vshll.u32 %v8068_v56, %v3825_v51  ;;  %v3834_v23 = vshll.u32 %v8069_v58, %v3825_v51 }
 0x3dc   :  { %v11378_v29 = vsub.s32 %v5634_v19, %v5637_v5  ;;  %vm5576_vm7 = vcmp.lt.s32.totalorder %v11196_v38, 0  ;;  %v3832_v11 = vshrl.u32 %v8069_v58, %v3826_v32  ;;  %v3835_v55 = vshrl.u32 %v8070_v60, %v3826_v32 }
 0x3dd   :  { %v3792_v20 = vsel %vm3709_vm12, %v3791_v49, %v3790_v46  ;;  %v3837_v27 = vshll.u32 %v8070_v60, %v3825_v51  ;;  %v5678_v24 = vand.u32 2147483647, %v11373_v40  ;;  %v5681_v42 = vand.u32 2139095040, %v11373_v40 }
 0x3de   :  { %v3795_v21 = vsel %vm11342_vm1, %v11099_v50, %v3792_v20  ;;  %v5640_v3 = vsub.s32 0, %v11378_v29  ;;  %v3827_v52 = vshrl.u32 %v8067_v54, %v3826_v32  ;;  %v3830_v26 = vor.u32 %v3829_v45, %v3828_v1 }
 0x3df   :  { %7796 = vcosq.f32 %v3795_v21  ;;  %v3838_v28 = vshrl.u32 %v8071_v62, %v3826_v32  ;;  %v3833_v35 = vor.u32 %v3832_v11, %v3831_v59  ;;  %v3840_v33 = vshll.u32 %v8071_v62, %v3825_v51 }
 0x3e0   :  { %7798 = vsinq.f32 %v3795_v21  ;;  %v7333_v53 = vmin.u32 %v5640_v3, %v11378_v29  ;;  %vm11401_vm8 = vcmp.le.f32.partialorder %v5574_v4, 0.7853982  ;;  %v3836_v19 = vor.u32 %v3835_v55, %v3834_v23 }
 0x3e1   :  { %v3839_v15 = vor.u32 %v3838_v28, %v3837_v27  ;;  %v3841_v57 = vshrl.u32 %v8072_v10, %v3826_v32  ;;  %vm3843_vm9 = vcmp.lt.s32.totalorder %v3824_v7, 1  ;;  %vm3803_vm12 = vcmp.eq.s32.totalorder %v11362_v17, 0 }
 0x3e2   :  { %v5642_v12 = vclz %v7333_v53  ;;  %v5660_v44 = vsub.s32 4, %v5636_v16  ;;  %vm3844_vm10 = vcmp.lt.s32.totalorder %v3824_v7, 2  ;;  %v5682_v31 = vshrl.u32 %v5681_v42, 23 }
 0x3e3   :  { %vm3802_vm14 = vcmp.lt.s32.totalorder %v11362_v17, 2  ;;  %v3842_v30 = vor.u32 %v3841_v57, %v3840_v33  ;;  %vm3845_vm11 = vcmp.lt.s32.totalorder %v3824_v7, 3  ;;  %vm3846_vm13 = vcmp.lt.s32.totalorder %v3824_v7, 4 }
 0x3e4   :  { %v3847_v4 = vsel %vm3843_vm9, %v3827_v52, %v3830_v26  ;;  %vm3799_vm15 = vweird.f32 %v11099_v50  ;;  %v7334_v47 = vadd.s32 4294967294, %v5642_v12  ;;  %v3848_v34 = vsel %vm3846_vm13, %v3836_v19, 2102212464 }
 0x3e5   :  { %v3851_v41 = vsel %vm3843_vm9, %v3830_v26, %v3833_v35  ;;  %v3852_v22 = vsel %vm3846_vm13, %v3839_v15, 920167782  ;;  %v3849_v43 = vsel %vm3845_vm11, %v3833_v35, %v3848_v34  ;;  %v3855_v36 = vsel %vm3843_vm9, %v3833_v35, %v3836_v19 }
 0x3e6   :  { %v3853_v14 = vsel %vm3845_vm11, %v3836_v19, %v3852_v22  ;;  %v3856_v25 = vsel %vm3846_vm13, %v3842_v30, 1326507024  ;;  %vm7335_vm0 = vcmp.lt.s32.totalorder %v7334_v47, 0  ;;  %v5661_v51 = vsel %vm5576_vm7, %v5660_v44, %v5636_v16 }
 0x3e7   :  { %v3854_v46 = vsel %vm3844_vm10, %v3851_v41, %v3853_v14  ;;  %v3857_v5 = vsel %vm3845_vm11, %v3839_v15, %v3856_v25  ;;  %v5645_v32 = vsel %vm7335_vm0, 0, %v7334_v47  ;;  %v3850_v11 = vsel %vm3844_vm10, %v3847_v4, %v3849_v43 }
 0x3e8   :  { %v3858_v49 = vsel %vm3844_vm10, %v3855_v36, %v3857_v5  ;;  %v11417_v1 = vmul.u32.u64.low %v11376_v61, %v3854_v46  ;;  %v11418_v45 = vmul.u32.u64.high %v11376_v61, %v3854_v46, %v11417_v1  ;;  %v5646_v59 = vsub.s32 32, %v5645_v32 }
 0x3e9   :  { %v5647_v23 = vshll.u32 %v11378_v29, %v5645_v32  ;;  %v5650_v20 = vsub.s32 4294967266, %v5645_v32  ;;  %v7797_v55 = vpop.eup %7796  ;;  %vm3806_vm1 = vcmp.eq.s32.totalorder %v11362_v17, 2  ;;  %v7336_v21 = vadd.s32 4294967169, %v5682_v31 }
 0x3ea   :  { %v11425_v16 = vmul.u32.u64.low %v11376_v61, %v3858_v49  ;;  %v11426_v27 = vmul.u32.u64.high %v11376_v61, %v3858_v49, %v11425_v16  ;;  %v7799_v3 = vpop.eup %7798  ;;  %v3807_v42 = vxor.u32 2147483648, %v7797_v55  ;;  %v5648_v52 = vshrl.u32 %v11368_v9, %v5646_v59 }
 0x3eb   :  { %v5651_v26 = vadd.s32 127, %v5650_v20  ;;  %v5663_v28 = vsel %vm11401_vm8, 0, %v5661_v51  ;;  %v3804_v29 = vxor.u32 2147483648, %v7799_v3  ;;  %v3866_v7 = vmul.u32 %v11376_v61, %v3850_v11 }
 0x3ec   :  { %v3869_v53 = vadd.s32 1, %v11418_v45  ;;  %v5688_v35 = vadd.s32 1, %v7336_v21  ;;  %v3808_v33 = vsel %vm3806_vm1, %v3807_v42, %v7799_v3  ;;  %v5649_v19 = vor.u32 %v5648_v52, %v5647_v23 }
 0x3ed   :  { %v5652_v15 = vshll.u32 %v5651_v26, 23  ;;  %v5685_v57 = vand.u32 8388607, %v5678_v24  ;;  %v3805_v12 = vsel %vm3803_vm12, %v7797_v55, %v3804_v29  ;;  %v5667_v9 = vadd.s32 3, %v5663_v28 }
 0x3ee   :  { %vm3868_vm2 = vc.u32 %v11426_v27, %v11417_v1  ;;  %vm5689_vm3 = vcmp.gt.s32.totalorder %v5688_v35, 0  ;;  %v3809_v61 = vsel %vm3802_vm14, %v3805_v12, %v3808_v33  ;;  %v5656_v31 = vcvt.s32.f32 %v5649_v19 }
 0x3ef   :  { %v5653_v44 = vor.u32 4788187, %v5652_v15  ;;  %v3870_v30 = vsel %vm3868_vm2, %v3869_v53, %v11418_v45  ;;  %v3810_v4 = vsel %vm3799_vm15, nan, %v3809_v61  ;;  %v5690_v34 = vsel %vm5689_vm3, %v5688_v35, 0 }
 0x3f0   :  { %v3871_v47 = vadd.s32 %v3870_v30, %v3866_v7  ;;  %5304 = vxpose.xlu0.b32.cont [2/16] %v3810_v4, 128  ;;  %v5692_v22 = vand.u32 31, %v5690_v34  ;;  %v5686_v14 = vor.u32 8388608, %v5685_v57  ;;  %v11446_v36 = vadd.f32 %v11370_v48, %v11365_v2 }
 0x3f1   :  { %v5654_v41 = vand.u32 2147483647, %v5653_v44  ;;  %v11448_v25 = vand.u32 3, %v5667_v9  ;;  %v5691_v20 = vshrl.u32 %v5690_v34, 5  ;;  %vm3813_vm4 = vcmp.lt.s32.totalorder %v11313_v6, 0 }
 0x3f2   :  { %v3872_v43 = vadd.s32 536870912, %v3871_v47  ;;  %v5693_v51 = vsub.s32 32, %v5692_v22  ;;  %v5695_v46 = vshll.u32 %v8067_v54, %v5692_v22  ;;  %v5698_v50 = vshll.u32 %v8068_v56, %v5692_v22 }
 0x3f3   :  { %v5657_v17 = vmul.f32 %v5656_v31, %v5654_v41  ;;  %v5701_v32 = vshll.u32 %v8069_v58, %v5692_v22  ;;  %v5704_v49 = vshll.u32 %v8070_v60, %v5692_v22  ;;  %v5707_v48 = vshll.u32 %v8071_v62, %v5692_v22 }
 0x3f4   :  { %v11451_v5 = vshrl.u32 %v3872_v43, 30  ;;  %v5696_v59 = vshrl.u32 %v8068_v56, %v5693_v51  ;;  %v5699_v2 = vshrl.u32 %v8069_v58, %v5693_v51  ;;  %v5702_v11 = vshrl.u32 %v8070_v60, %v5693_v51 }
 0x3f5   :  { %v5658_v45 = vxor.u32 2147483648, %v5657_v17  ;;  %v5705_v55 = vshrl.u32 %v8071_v62, %v5693_v51  ;;  %v5694_v21 = vshrl.u32 %v8067_v54, %v5693_v51  ;;  %v5708_v3 = vshrl.u32 %v8072_v10, %v5693_v51 }
 0x3f6   :  { %v3874_v23 = vshll.u32 %v11451_v5, 30  ;;  %v3918_v42 = vand.u32 2139095040, %v11446_v36  ;;  %v5697_v28 = vor.u32 %v5696_v59, %v5695_v46  ;;  %v5700_v29 = vor.u32 %v5699_v2, %v5698_v50 }
 0x3f7   :  { %v5659_v16 = vsel %vm5576_vm7, %v5658_v45, %v5657_v17  ;;  %v5703_v7 = vor.u32 %v5702_v11, %v5701_v32  ;;  %v5706_v53 = vor.u32 %v5705_v55, %v5704_v49  ;;  %v5709_v35 = vor.u32 %v5708_v3, %v5707_v48 }
 0x3f8   :  { %v5662_v52 = vsel %vm11401_vm8, %v11196_v38, %v5659_v16  ;;  %v11470_v26 = vsub.s32 %v3871_v47, %v3874_v23  ;;  %vm5710_vm6 = vcmp.lt.s32.totalorder %v5691_v20, 1  ;;  %v5726_v19 = vshll.u32 %v5686_v14, 8 }
 0x3f9   :  { %7800 = vcosq.f32 %v5662_v52  ;;  %vm5711_vm5 = vcmp.lt.s32.totalorder %v5691_v20, 2  ;;  %vm5712_vm7 = vcmp.lt.s32.totalorder %v5691_v20, 3  ;;  %vm5713_vm9 = vcmp.lt.s32.totalorder %v5691_v20, 4 }
 0x3fa   :  { %7802 = vsinq.f32 %v5662_v52  ;;  %v3877_v33 = vsub.s32 0, %v11470_v26  ;;  %v3919_v8 = vshrl.u32 %v3918_v42, 23  ;;  %v5714_v57 = vsel %vm5710_vm6, %v5694_v21, %v5697_v28 }
 0x3fb   :  { %v5715_v12 = vsel %vm5713_vm9, %v5703_v7, 2102212464  ;;  %v5718_v9 = vsel %vm5710_vm6, %v5697_v28, %v5700_v29  ;;  %v5719_v44 = vsel %vm5713_vm9, %v5706_v53, 920167782  ;;  %v5722_v31 = vsel %vm5710_vm6, %v5700_v29, %v5703_v7 }
 0x3fc   :  { %v7269_v15 = vmin.u32 %v3877_v33, %v11470_v26  ;;  %v5716_v61 = vsel %vm5712_vm7, %v5700_v29, %v5715_v12  ;;  %v5723_v30 = vsel %vm5713_vm9, %v5709_v35, 1326507024  ;;  %vm5666_vm8 = vweird.f32 %v11196_v38 }
 0x3fd   :  { %vm5669_vm12 = vcmp.lt.s32.totalorder %v11448_v25, 2  ;;  %vm11480_vm10 = vcmp.le.f32.partialorder %v3811_v0, 0.7853982  ;;  %v3915_v34 = vand.u32 2147483647, %v11446_v36  ;;  %v11487_v41 = vrot.slane %v10832_v39, %v8732_v37 }
 0x3fe   :  { %v3879_v47 = vclz %v7269_v15  ;;  %v3897_v22 = vsub.s32 4, %v11451_v5  ;;  %v5720_v43 = vsel %vm5712_vm7, %v5703_v7, %v5719_v44  ;;  %v5724_v14 = vsel %vm5712_vm7, %v5706_v53, %v5723_v30 }
 0x3ff   :  { %v7272_v17 = vadd.s32 4294967169, %v3919_v8  ;;  %v5717_v0 = vsel %vm5711_vm5, %v5714_v57, %v5716_v61  ;;  %v5721_v46 = vsel %vm5711_vm5, %v5718_v9, %v5720_v43  ;;  %v5725_v50 = vsel %vm5711_vm5, %v5722_v31, %v5724_v14  ;;  %v11524_v61 = vld [vmem:[#allocation5] sm:$0xff] }
 0x400   :  { %v7270_v51 = vadd.s32 4294967294, %v3879_v47  ;;  %v11495_v32 = vmul.u32.u64.low %v5726_v19, %v5725_v50  ;;  %v11496_v49 = vmul.u32.u64.high %v5726_v19, %v5725_v50, %v11495_v32  ;;  %vm5670_vm14 = vcmp.eq.s32.totalorder %v11448_v25, 0 }
 0x401   :  { %v11498_v45 = vmul.u32.u64.low %v5726_v19, %v5721_v46  ;;  %v11499_v59 = vmul.u32.u64.high %v5726_v19, %v5721_v46, %v11498_v45  ;;  %v3867_v2 = vadd.s32 %v11417_v1, %v11426_v27  ;;  %v3925_v48 = vadd.s32 1, %v7272_v17 }
 0x402   :  { %vm7271_vm11 = vcmp.lt.s32.totalorder %v7270_v51, 0  ;;  %vm5673_vm13 = vcmp.eq.s32.totalorder %v11448_v25, 2  ;;  %v3898_v20 = vsel %vm3813_vm4, %v3897_v22, %v11451_v5  ;;  %v5733_v55 = vmul.u32 %v5726_v19, %v5717_v0 }
 0x403   :  { %v7801_v23 = vpop.eup %7800  ;;  %v3882_v11 = vsel %vm7271_vm11, 0, %v7270_v51  ;;  %vm5735_vm15 = vc.u32 %v11496_v49, %v11498_v45  ;;  %v5736_v1 = vadd.s32 1, %v11499_v59  ;;  %v3922_v27 = vand.u32 8388607, %v3915_v34 }
 0x404   :  { %v7803_v16 = vpop.eup %7802  ;;  %v5674_v21 = vxor.u32 2147483648, %v7801_v23  ;;  %v3883_v3 = vsub.s32 32, %v3882_v11  ;;  %v3884_v42 = vshll.u32 %v11470_v26, %v3882_v11  ;;  %v3887_v52 = vsub.s32 4294967266, %v3882_v11 }
 0x405   :  { %v5671_v28 = vxor.u32 2147483648, %v7803_v16  ;;  %vm3926_vm0 = vcmp.gt.s32.totalorder %v3925_v48, 0  ;;  %v3900_v26 = vsel %vm11480_vm10, 0, %v3898_v20  ;;  %v5737_v35 = vsel %vm5735_vm15, %v5736_v1, %v11499_v59 }
 0x406   :  { %v5675_v29 = vsel %vm5673_vm13, %v5674_v21, %v7803_v16  ;;  %v3885_v7 = vshrl.u32 %v3867_v2, %v3883_v3  ;;  %v3888_v53 = vadd.s32 127, %v3887_v52  ;;  %v3927_v33 = vsel %vm3926_vm0, %v3925_v48, 0  ;;  %v11540_v21 = vld [vmem:[#allocation7] sm:$0xff] }
 0x407   :  { %v5672_v5 = vsel %vm5670_vm14, %v7801_v23, %v5671_v28  ;;  %v5738_v57 = vadd.s32 %v5737_v35, %v5733_v55  ;;  %v3929_v9 = vand.u32 31, %v3927_v33  ;;  %v5786_v44 = vmul.f32 %v11524_v61, %v11487_v41 }
 0x408   :  { %v5676_v19 = vsel %vm5669_vm12, %v5672_v5, %v5675_v29  ;;  %v3886_v8 = vor.u32 %v3885_v7, %v3884_v42  ;;  %v3889_v15 = vshll.u32 %v3888_v53, 23  ;;  %v3904_v47 = vadd.s32 3, %v3900_v26 }
 0x409   :  { %v5677_v12 = vsel %vm5666_vm8, nan, %v5676_v19  ;;  %v5739_v22 = vadd.s32 536870912, %v5738_v57  ;;  %v3923_v43 = vor.u32 8388608, %v3922_v27  ;;  %v3928_v25 = vshrl.u32 %v3927_v33, 5 }
 0x40a   :  { %7068 = vxpose.xlu1.b32.cont [3/16] %v5677_v12, 128  ;;  %v3890_v31 = vor.u32 4788187, %v3889_v15  ;;  %v3893_v30 = vcvt.s32.f32 %v3886_v8  ;;  %v3930_v14 = vsub.s32 32, %v3929_v9  ;;  %v3932_v17 = vshll.u32 %v8067_v54, %v3929_v9 }
 0x40b   :  { %v5740_v0 = vshrl.u32 %v5739_v22, 30  ;;  %v3935_v38 = vshll.u32 %v8068_v56, %v3929_v9  ;;  %v3938_v46 = vshll.u32 %v8069_v58, %v3929_v9  ;;  %v3941_v2 = vshll.u32 %v8070_v60, %v3929_v9 }
 0x40c   :  { %v3891_v51 = vand.u32 2147483647, %v3890_v31  ;;  %v3933_v50 = vshrl.u32 %v8068_v56, %v3930_v14  ;;  %v3936_v32 = vshrl.u32 %v8069_v58, %v3930_v14  ;;  %v3939_v59 = vshrl.u32 %v8070_v60, %v3930_v14 }
 0x40d   :  { %v5741_v23 = vshll.u32 %v5740_v0, 30  ;;  %v3942_v11 = vshrl.u32 %v8071_v62, %v3930_v14  ;;  %v3944_v20 = vshll.u32 %v8071_v62, %v3929_v9  ;;  %v11537_v55 = vand.u32 3, %v3904_v47 }
 0x40e   :  { %v3894_v48 = vmul.f32 %v3893_v30, %v3891_v51  ;;  %v3945_v16 = vshrl.u32 %v8072_v10, %v3930_v14  ;;  %v11543_v3 = vadd.f32 %v11540_v21, %v5786_v44  ;;  %v3931_v28 = vshrl.u32 %v8067_v54, %v3930_v14 }
 0x40f   :  { %v11545_v52 = vsub.s32 %v5738_v57, %v5741_v23  ;;  %v11548_v1 = vshll.u32 %v3923_v43, 8  ;;  %v3934_v27 = vor.u32 %v3933_v50, %v3932_v17  ;;  %v3937_v29 = vor.u32 %v3936_v32, %v3935_v38 }
 0x410   :  { %v3895_v42 = vxor.u32 2147483648, %v3894_v48  ;;  %v3940_v7 = vor.u32 %v3939_v59, %v3938_v46  ;;  %v3943_v53 = vor.u32 %v3942_v11, %v3941_v2  ;;  %v3946_v35 = vor.u32 %v3945_v16, %v3944_v20 }
 0x411   :  { %v5744_v26 = vsub.s32 0, %v11545_v52  ;;  %vm3947_vm1 = vcmp.lt.s32.totalorder %v3928_v25, 1  ;;  %vm3948_vm2 = vcmp.lt.s32.totalorder %v3928_v25, 2  ;;  %vm3949_vm3 = vcmp.lt.s32.totalorder %v3928_v25, 3 }
 0x412   :  { %v3896_v5 = vsel %vm3813_vm4, %v3895_v42, %v3894_v48  ;;  %vm3950_vm6 = vcmp.lt.s32.totalorder %v3928_v25, 4  ;;  %v3951_v8 = vsel %vm3947_vm1, %v3931_v28, %v3934_v27  ;;  %v3955_v12 = vsel %vm3947_vm1, %v3934_v27, %v3937_v29 }
 0x413   :  { %v3899_v33 = vsel %vm11480_vm10, %v11313_v6, %v3896_v5  ;;  %v7337_v19 = vmin.u32 %v5744_v26, %v11545_v52  ;;  %v3952_v15 = vsel %vm3950_vm6, %v3940_v7, 2102212464  ;;  %v3956_v9 = vsel %vm3950_vm6, %v3943_v53, 920167782 }
 0x414   :  { %7804 = vcosq.f32 %v3899_v33  ;;  %v3953_v57 = vsel %vm3949_vm3, %v3937_v29, %v3952_v15  ;;  %vm11560_vm4 = vcmp.le.f32.partialorder %v5678_v24, 0.7853982  ;;  %v3959_v31 = vsel %vm3947_vm1, %v3937_v29, %v3940_v7 }
 0x415   :  { %7806 = vsinq.f32 %v3899_v33  ;;  %v5746_v4 = vclz %v7337_v19  ;;  %vm5680_vm5 = vcmp.lt.s32.totalorder %v11373_v40, 0  ;;  %v5764_v30 = vsub.s32 4, %v5740_v0 }
 0x416   :  { %v3957_v47 = vsel %vm3949_vm3, %v3940_v7, %v3956_v9  ;;  %v3960_v22 = vsel %vm3950_vm6, %v3946_v35, 1326507024  ;;  %vm3906_vm7 = vcmp.lt.s32.totalorder %v11537_v55, 2  ;;  %v3954_v14 = vsel %vm3948_vm2, %v3951_v8, %v3953_v57 }
 0x417   :  { %v7338_v43 = vadd.s32 4294967294, %v5746_v4  ;;  %v3958_v17 = vsel %vm3948_vm2, %v3955_v12, %v3957_v47  ;;  %v3961_v24 = vsel %vm3949_vm3, %v3943_v53, %v3960_v22  ;;  %v5797_v50 = vand.u32 2139095040, %v11543_v3 }
 0x418   :  { %v3962_v51 = vsel %vm3948_vm2, %v3959_v31, %v3961_v24  ;;  %v11572_v38 = vmul.u32.u64.low %v11548_v1, %v3958_v17  ;;  %v11573_v46 = vmul.u32.u64.high %v11548_v1, %v3958_v17, %v11572_v38  ;;  %v5734_v32 = vadd.s32 %v11498_v45, %v11496_v49 }
 0x419   :  { %vm7339_vm9 = vcmp.lt.s32.totalorder %v7338_v43, 0  ;;  %v11580_v59 = vmul.u32.u64.low %v11548_v1, %v3962_v51  ;;  %v11581_v2 = vmul.u32.u64.high %v11548_v1, %v3962_v51, %v11580_v59  ;;  %vm3907_vm8 = vcmp.eq.s32.totalorder %v11537_v55, 0 }
 0x41a   :  { %v5749_v48 = vsel %vm7339_vm9, 0, %v7338_v43  ;;  %v5765_v25 = vsel %vm5680_vm5, %v5764_v30, %v5740_v0  ;;  %v5798_v23 = vshrl.u32 %v5797_v50, 23  ;;  %v3970_v42 = vmul.u32 %v11548_v1, %v3954_v14 }
 0x41b   :  { %v5750_v11 = vsub.s32 32, %v5749_v48  ;;  %v5751_v20 = vshll.u32 %v11545_v52, %v5749_v48  ;;  %v5754_v16 = vsub.s32 4294967266, %v5749_v48  ;;  %vm3910_vm12 = vcmp.eq.s32.totalorder %v11537_v55, 2  ;;  %v11617_v55 = vld [vmem:[#allocation5 + $0x8] sm:$0xff] }
 0x41c   :  { %v3973_v49 = vadd.s32 1, %v11573_v46  ;;  %v7340_v45 = vadd.s32 4294967169, %v5798_v23  ;;  %v11592_v28 = vrot.slane %v10915_v18, %v8732_v37  ;;  %vm3972_vm10 = vc.u32 %v11581_v2, %v11572_v38 }
 0x41d   :  { %v5752_v29 = vshrl.u32 %v5734_v32, %v5750_v11  ;;  %v5755_v7 = vadd.s32 127, %v5754_v16  ;;  %v5794_v0 = vand.u32 2147483647, %v11543_v3  ;;  %v5767_v1 = vsel %vm11560_vm4, 0, %v5765_v25 }
 0x41e   :  { %v7805_v27 = vpop.eup %7804  ;;  %v3974_v5 = vsel %vm3972_vm10, %v3973_v49, %v11573_v46  ;;  %v5804_v26 = vadd.s32 1, %v7340_v45  ;;  %vm3903_vm14 = vweird.f32 %v11313_v6  ;;  %v4023_v15 = vmul.f32 %v11524_v61, %v11592_v28 }
 0x41f   :  { %v7807_v52 = vpop.eup %7806  ;;  %v3911_v53 = vxor.u32 2147483648, %v7805_v27  ;;  %v5753_v33 = vor.u32 %v5752_v29, %v5751_v20  ;;  %v5756_v37 = vshll.u32 %v5755_v7, 23  ;;  %v3975_v19 = vadd.s32 %v3974_v5, %v3970_v42 }
 0x420   :  { %v3908_v35 = vxor.u32 2147483648, %v7807_v52  ;;  %vm5805_vm11 = vcmp.gt.s32.totalorder %v5804_v26, 0  ;;  %v5771_v30 = vadd.s32 3, %v5767_v1  ;;  %v5801_v6 = vand.u32 8388607, %v5794_v0 }
 0x421   :  { %v3912_v8 = vsel %vm3910_vm12, %v3911_v53, %v7807_v52  ;;  %v5757_v12 = vor.u32 4788187, %v5756_v37  ;;  %v5760_v9 = vcvt.s32.f32 %v5753_v33  ;;  %v3976_v4 = vadd.s32 536870912, %v3975_v19 }
 0x422   :  { %v3909_v57 = vsel %vm3907_vm8, %v7805_v27, %v3908_v35  ;;  %v5806_v47 = vsel %vm5805_vm11, %v5804_v26, 0  ;;  %v11614_v17 = vadd.f32 %v11540_v21, %v4023_v15  ;;  %v11621_v50 = vmul.f32 %v11617_v55, %v11487_v41 }
 0x423   :  { %v3913_v31 = vsel %vm3906_vm7, %v3909_v57, %v3912_v8  ;;  %v5758_v43 = vand.u32 2147483647, %v5757_v12  ;;  %v11611_v14 = vshrl.u32 %v3976_v4, 30  ;;  %v5808_v61 = vand.u32 31, %v5806_v47 }
 0x424   :  { %v3914_v22 = vsel %vm3903_vm14, nan, %v3913_v31  ;;  %v5807_v46 = vshrl.u32 %v5806_v47, 5  ;;  %v11623_v32 = vand.u32 3, %v5771_v30  ;;  %v5802_v59 = vor.u32 8388608, %v5801_v6 }
 0x425   :  { %5305 = vxpose.xlu0.b32.cont [3/16] %v3914_v22, 128  ;;  %v5761_v24 = vmul.f32 %v5760_v9, %v5758_v43  ;;  %v3978_v51 = vshll.u32 %v11611_v14, 30  ;;  %v5809_v48 = vsub.s32 32, %v5808_v61  ;;  %v5811_v25 = vshll.u32 %v8067_v54, %v5808_v61 }
 0x426   :  { %v5814_v21 = vshll.u32 %v8068_v56, %v5808_v61  ;;  %v5817_v20 = vshll.u32 %v8069_v58, %v5808_v61  ;;  %v5820_v49 = vshll.u32 %v8070_v60, %v5808_v61  ;;  %v4034_v45 = vand.u32 2139095040, %v11614_v17 }
 0x427   :  { %v5762_v23 = vxor.u32 2147483648, %v5761_v24  ;;  %v11626_v11 = vsub.s32 %v3975_v19, %v3978_v51  ;;  %v5812_v16 = vshrl.u32 %v8068_v56, %v5809_v48  ;;  %v5815_v42 = vshrl.u32 %v8069_v58, %v5809_v48 }
 0x428   :  { %v5818_v7 = vshrl.u32 %v8070_v60, %v5809_v48  ;;  %vm5826_vm13 = vcmp.lt.s32.totalorder %v5807_v46, 1  ;;  %v5810_v53 = vshrl.u32 %v8067_v54, %v5809_v48  ;;  %v5821_v5 = vshrl.u32 %v8071_v62, %v5809_v48 }
 0x429   :  { %v5763_v27 = vsel %vm5680_vm5, %v5762_v23, %v5761_v24  ;;  %v3981_v29 = vsub.s32 0, %v11626_v11  ;;  %v5813_v1 = vor.u32 %v5812_v16, %v5811_v25  ;;  %v5816_v35 = vor.u32 %v5815_v42, %v5814_v21 }
 0x42a   :  { %v5766_v52 = vsel %vm11560_vm4, %v11373_v40, %v5763_v27  ;;  %v5819_v33 = vor.u32 %v5818_v7, %v5817_v20  ;;  %vm3917_vm15 = vcmp.lt.s32.totalorder %v11446_v36, 0  ;;  %v5822_v37 = vor.u32 %v5821_v5, %v5820_v49 }
 0x42b   :  { %7808 = vcosq.f32 %v5766_v52  ;;  %v7273_v26 = vmin.u32 %v3981_v29, %v11626_v11  ;;  %v5823_v19 = vshll.u32 %v8071_v62, %v5808_v61  ;;  %v5824_v8 = vshrl.u32 %v8072_v10, %v5809_v48 }
 0x42c   :  { %7810 = vsinq.f32 %v5766_v52  ;;  %vm5777_vm0 = vcmp.eq.s32.totalorder %v11623_v32, 2  ;;  %v3971_v44 = vadd.s32 %v11572_v38, %v11581_v2  ;;  %v11650_v57 = vshll.u32 %v5802_v59, 8 }
 0x42d   :  { %v3983_v15 = vclz %v7273_v26  ;;  %v4035_v12 = vshrl.u32 %v4034_v45, 23  ;;  %v5825_v9 = vor.u32 %v5824_v8, %v5823_v19  ;;  %vm5827_vm1 = vcmp.lt.s32.totalorder %v5807_v46, 2 }
 0x42e   :  { %vm5828_vm2 = vcmp.lt.s32.totalorder %v5807_v46, 3  ;;  %vm5829_vm3 = vcmp.lt.s32.totalorder %v5807_v46, 4  ;;  %vm5773_vm6 = vcmp.lt.s32.totalorder %v11623_v32, 2  ;;  %vm11655_vm4 = vcmp.le.f32.partialorder %v3915_v34, 0.7853982 }
 0x42f   :  { %v7274_v31 = vadd.s32 4294967294, %v3983_v15  ;;  %v5830_v30 = vsel %vm5826_vm13, %v5810_v53, %v5813_v1  ;;  %v5831_v38 = vsel %vm5829_vm3, %v5819_v33, 2102212464  ;;  %v5834_v2 = vsel %vm5826_vm13, %v5813_v1, %v5816_v35 }
 0x430   :  { %vm5770_vm5 = vweird.f32 %v11373_v40  ;;  %v5832_v6 = vsel %vm5828_vm2, %v5816_v35, %v5831_v38  ;;  %v5835_v47 = vsel %vm5829_vm3, %v5822_v37, 920167782  ;;  %v5838_v22 = vsel %vm5826_vm13, %v5816_v35, %v5819_v33 }
 0x431   :  { %v5839_v43 = vsel %vm5829_vm3, %v5825_v9, 1326507024  ;;  %vm7275_vm7 = vcmp.lt.s32.totalorder %v7274_v31, 0  ;;  %v4001_v34 = vsub.s32 4, %v11611_v14  ;;  %v5836_v61 = vsel %vm5828_vm2, %v5819_v33, %v5835_v47 }
 0x432   :  { %v5840_v24 = vsel %vm5828_vm2, %v5822_v37, %v5839_v43  ;;  %v3986_v51 = vsel %vm7275_vm7, 0, %v7274_v31  ;;  %v5833_v59 = vsel %vm5827_vm1, %v5830_v30, %v5832_v6  ;;  %v5837_v48 = vsel %vm5827_vm1, %v5834_v2, %v5836_v61 }
 0x433   :  { %v5841_v25 = vsel %vm5827_vm1, %v5838_v22, %v5840_v24  ;;  %v3987_v23 = vsub.s32 32, %v3986_v51  ;;  %v3988_v21 = vshll.u32 %v11626_v11, %v3986_v51  ;;  %v3991_v20 = vsub.s32 4294967266, %v3986_v51 }
 0x434   :  { %v7276_v16 = vadd.s32 4294967169, %v4035_v12  ;;  %v11672_v42 = vmul.u32.u64.low %v11650_v57, %v5841_v25  ;;  %v11673_v49 = vmul.u32.u64.high %v11650_v57, %v5841_v25, %v11672_v42  ;;  %v4002_v46 = vsel %vm3917_vm15, %v4001_v34, %v11611_v14 }
 0x435   :  { %v11676_v45 = vmul.u32.u64.low %v11650_v57, %v5837_v48  ;;  %v11677_v27 = vmul.u32.u64.high %v11650_v57, %v5837_v48, %v11676_v45  ;;  %v7809_v29 = vpop.eup %7808  ;;  %v3989_v7 = vshrl.u32 %v3971_v44, %v3987_v23  ;;  %v3992_v52 = vadd.s32 127, %v3991_v20 }
 0x436   :  { %v4041_v53 = vadd.s32 1, %v7276_v16  ;;  %v7811_v11 = vpop.eup %7810  ;;  %vm5774_vm9 = vcmp.eq.s32.totalorder %v11623_v32, 0  ;;  %v5778_v1 = vxor.u32 2147483648, %v7809_v29  ;;  %v5849_v5 = vmul.u32 %v11650_v57, %v5833_v59 }
 0x437   :  { %v4031_v26 = vand.u32 2147483647, %v11614_v17  ;;  %v5775_v35 = vxor.u32 2147483648, %v7811_v11  ;;  %v3990_v33 = vor.u32 %v3989_v7, %v3988_v21  ;;  %v3993_v37 = vshll.u32 %v3992_v52, 23  ;;  %v11711_v52 = vld [vmem:[#allocation7 + $0x8] sm:$0xff] }
 0x438   :  { %vm4042_vm8 = vcmp.gt.s32.totalorder %v4041_v53, 0  ;;  %v5779_v19 = vsel %vm5777_vm0, %v5778_v1, %v7811_v11  ;;  %v4004_v8 = vsel %vm11655_vm4, 0, %v4002_v46  ;;  %vm5851_vm12 = vc.u32 %v11673_v49, %v11676_v45 }
 0x439   :  { %v5852_v14 = vadd.s32 1, %v11677_v27  ;;  %v5776_v44 = vsel %vm5774_vm9, %v7809_v29, %v5775_v35  ;;  %v3994_v15 = vor.u32 4788187, %v3993_v37  ;;  %v3997_v57 = vcvt.s32.f32 %v3990_v33 }
 0x43a   :  { %v4043_v12 = vsel %vm4042_vm8, %v4041_v53, 0  ;;  %v5780_v9 = vsel %vm5773_vm6, %v5776_v44, %v5779_v19  ;;  %v4038_v30 = vand.u32 8388607, %v4031_v26  ;;  %v4008_v47 = vadd.s32 3, %v4004_v8 }
 0x43b   :  { %v5853_v31 = vsel %vm5851_vm12, %v5852_v14, %v11677_v27  ;;  %v4045_v38 = vand.u32 31, %v4043_v12  ;;  %v5781_v2 = vsel %vm5770_vm5, nan, %v5780_v9  ;;  %v3995_v6 = vand.u32 2147483647, %v3994_v15 }
 0x43c   :  { %v5854_v22 = vadd.s32 %v5853_v31, %v5849_v5  ;;  %7069 = vxpose.xlu1.b32.cont [4/16] %v5781_v2, 128  ;;  %v4044_v43 = vshrl.u32 %v4043_v12, 5  ;;  %vm5796_vm10 = vcmp.lt.s32.totalorder %v11543_v3, 0  ;;  %v4039_v29 = vor.u32 8388608, %v4038_v30 }
 0x43d   :  { %v4046_v34 = vsub.s32 32, %v4045_v38  ;;  %v4048_v61 = vshll.u32 %v8067_v54, %v4045_v38  ;;  %v4051_v32 = vshll.u32 %v8068_v56, %v4045_v38  ;;  %v3998_v24 = vmul.f32 %v3997_v57, %v3995_v6 }
 0x43e   :  { %v5855_v51 = vadd.s32 536870912, %v5854_v22  ;;  %v4054_v59 = vshll.u32 %v8069_v58, %v4045_v38  ;;  %v4057_v48 = vshll.u32 %v8070_v60, %v4045_v38  ;;  %v4060_v21 = vshll.u32 %v8071_v62, %v4045_v38 }
 0x43f   :  { %v4049_v25 = vshrl.u32 %v8068_v56, %v4046_v34  ;;  %v4052_v40 = vshrl.u32 %v8069_v58, %v4046_v34  ;;  %v4055_v23 = vshrl.u32 %v8070_v60, %v4046_v34  ;;  %v3999_v20 = vxor.u32 2147483648, %v3998_v24 }
 0x440   :  { %v5856_v16 = vshrl.u32 %v5855_v51, 30  ;;  %v4058_v42 = vshrl.u32 %v8071_v62, %v4046_v34  ;;  %v4061_v27 = vshrl.u32 %v8072_v10, %v4046_v34  ;;  %v11715_v46 = vadd.f32 %v11711_v52, %v11621_v50 }
 0x441   :  { %v4050_v7 = vor.u32 %v4049_v25, %v4048_v61  ;;  %v4000_v53 = vsel %vm3917_vm15, %v3999_v20, %v3998_v24  ;;  %v4053_v1 = vor.u32 %v4052_v40, %v4051_v32  ;;  %v4056_v5 = vor.u32 %v4055_v23, %v4054_v59 }
 0x442   :  { %v5857_v11 = vshll.u32 %v5856_v16, 30  ;;  %v4003_v35 = vsel %vm11655_vm4, %v11446_v36, %v4000_v53  ;;  %v4059_v33 = vor.u32 %v4058_v42, %v4057_v48  ;;  %v4062_v37 = vor.u32 %v4061_v27, %v4060_v21 }
 0x443   :  { %vm4063_vm14 = vcmp.lt.s32.totalorder %v4044_v43, 1  ;;  %7812 = vcosq.f32 %v4003_v35  ;;  %v4009_v19 = vand.u32 3, %v4008_v47  ;;  %vm4066_vm11 = vcmp.lt.s32.totalorder %v4044_v43, 4 }
 0x444   :  { %v11722_v8 = vsub.s32 %v5854_v22, %v5857_v11  ;;  %7814 = vsinq.f32 %v4003_v35  ;;  %v5880_v50 = vsub.s32 4, %v5856_v16  ;;  %v4047_v14 = vshrl.u32 %v8067_v54, %v4046_v34 }
 0x445   :  { %vm4065_vm13 = vcmp.lt.s32.totalorder %v4044_v43, 3  ;;  %vm4064_vm15 = vcmp.lt.s32.totalorder %v4044_v43, 2  ;;  %v4068_v15 = vsel %vm4066_vm11, %v4056_v5, 2102212464  ;;  %v4071_v4 = vsel %vm4063_vm14, %v4050_v7, %v4053_v1 }
 0x446   :  { %v5860_v44 = vsub.s32 0, %v11722_v8  ;;  %v4072_v57 = vsel %vm4066_vm11, %v4059_v33, 920167782  ;;  %v4075_v12 = vsel %vm4063_vm14, %v4053_v1, %v4056_v5  ;;  %v4076_v9 = vsel %vm4066_vm11, %v4062_v37, 1326507024 }
 0x447   :  { %v4079_v31 = vshll.u32 %v4039_v29, 8  ;;  %v4073_v38 = vsel %vm4065_vm13, %v4056_v5, %v4072_v57  ;;  %v4077_v2 = vsel %vm4065_vm13, %v4059_v33, %v4076_v9  ;;  %v5901_v6 = vand.u32 2139095040, %v11715_v46 }
 0x448   :  { %v7341_v30 = vmin.u32 %v5860_v44, %v11722_v8  ;;  %v4067_v47 = vsel %vm4063_vm14, %v4047_v14, %v4050_v7  ;;  %v4069_v22 = vsel %vm4065_vm13, %v4053_v1, %v4068_v15  ;;  %v4074_v34 = vsel %vm4064_vm15, %v4071_v4, %v4073_v38 }
 0x449   :  { %v4078_v61 = vsel %vm4064_vm15, %v4075_v12, %v4077_v2  ;;  %vm4007_vm0 = vweird.f32 %v11446_v36  ;;  %v5881_v24 = vsel %vm5796_vm10, %v5880_v50, %v5856_v16  ;;  %vm11744_vm1 = vcmp.le.f32.partialorder %v5794_v0, 0.7853982 }
 0x44a   :  { %v5862_v32 = vclz %v7341_v30  ;;  %v11736_v51 = vmul.u32.u64.low %v4079_v31, %v4078_v61  ;;  %v11737_v59 = vmul.u32.u64.high %v4079_v31, %v4078_v61, %v11736_v51  ;;  %v4070_v21 = vsel %vm4064_vm15, %v4067_v47, %v4069_v22 }
 0x44b   :  { %v11739_v48 = vmul.u32.u64.low %v4079_v31, %v4074_v34  ;;  %v11740_v25 = vmul.u32.u64.high %v4079_v31, %v4074_v34, %v11739_v48  ;;  %v5902_v20 = vshrl.u32 %v5901_v6, 23  ;;  %vm4010_vm2 = vcmp.lt.s32.totalorder %v4009_v19, 2  ;;  %v11770_v34 = vld [vmem:[#allocation5 + $0x10] sm:$0xff] }
 0x44c   :  { %v7342_v23 = vadd.s32 4294967294, %v5862_v32  ;;  %vm4011_vm3 = vcmp.eq.s32.totalorder %v4009_v19, 0  ;;  %vm4014_vm6 = vcmp.eq.s32.totalorder %v4009_v19, 2  ;;  %v5898_v16 = vand.u32 2147483647, %v11715_v46 }
 0x44d   :  { %v7813_v42 = vpop.eup %7812  ;;  %v5850_v27 = vadd.s32 %v11676_v45, %v11673_v49  ;;  %v5883_v0 = vsel %vm11744_vm1, 0, %v5881_v24  ;;  %v7344_v29 = vadd.s32 4294967169, %v5902_v20  ;;  %v4086_v43 = vmul.u32 %v4079_v31, %v4070_v21 }
 0x44e   :  { %vm7343_vm4 = vcmp.lt.s32.totalorder %v7342_v23, 0  ;;  %v7815_v7 = vpop.eup %7814  ;;  %v4015_v53 = vxor.u32 2147483648, %v7813_v42  ;;  %vm4088_vm5 = vc.u32 %v11737_v59, %v11739_v48  ;;  %v4089_v49 = vadd.s32 1, %v11740_v25 }
 0x44f   :  { %v5865_v11 = vsel %vm7343_vm4, 0, %v7342_v23  ;;  %v4012_v1 = vxor.u32 2147483648, %v7815_v7  ;;  %v5908_v45 = vadd.s32 1, %v7344_v29  ;;  %v4024_v50 = vmul.f32 %v11617_v55, %v11592_v28 }
 0x450   :  { %v5866_v5 = vsub.s32 32, %v5865_v11  ;;  %v5867_v35 = vshll.u32 %v11722_v8, %v5865_v11  ;;  %v5870_v33 = vsub.s32 4294967266, %v5865_v11  ;;  %v4016_v37 = vsel %vm4014_vm6, %v4015_v53, %v7815_v7 }
 0x451   :  { %v4013_v14 = vsel %vm4011_vm3, %v7813_v42, %v4012_v1  ;;  %v5887_v4 = vadd.s32 3, %v5883_v0  ;;  %v4090_v12 = vsel %vm4088_vm5, %v4089_v49, %v11740_v25  ;;  %v5905_v8 = vand.u32 8388607, %v5898_v16 }
 0x452   :  { %v5868_v44 = vshrl.u32 %v5850_v27, %v5866_v5  ;;  %v5871_v15 = vadd.s32 127, %v5870_v33  ;;  %v4017_v57 = vsel %vm4010_vm2, %v4013_v14, %v4016_v37  ;;  %vm5909_vm7 = vcmp.gt.s32.totalorder %v5908_v45, 0 }
 0x453   :  { %v4018_v9 = vsel %vm4007_vm0, nan, %v4017_v57  ;;  %v4091_v38 = vadd.s32 %v4090_v12, %v4086_v43  ;;  %v5910_v55 = vsel %vm5909_vm7, %v5908_v45, 0  ;;  %v11768_v2 = vadd.f32 %v11711_v52, %v4024_v50 }
 0x454   :  { %v5869_v31 = vor.u32 %v5868_v44, %v5867_v35  ;;  %v5872_v30 = vshll.u32 %v5871_v15, 23  ;;  %5306 = vxpose.xlu0.b32.cont [4/16] %v4018_v9, 128  ;;  %v5912_v22 = vand.u32 31, %v5910_v55  ;;  %v11774_v61 = vmul.f32 %v11770_v34, %v11487_v41 }
 0x455   :  { %v4092_v47 = vadd.s32 536870912, %v4091_v38  ;;  %v11776_v32 = vand.u32 3, %v5887_v4  ;;  %v5906_v51 = vor.u32 8388608, %v5905_v8  ;;  %v11781_v25 = vadd.s32 %v11739_v48, %v11737_v59 }
 0x456   :  { %v5873_v6 = vor.u32 4788187, %v5872_v30  ;;  %v5876_v19 = vcvt.s32.f32 %v5869_v31  ;;  %v5913_v52 = vsub.s32 32, %v5912_v22  ;;  %v5915_v23 = vshll.u32 %v8067_v54, %v5912_v22 }
 0x457   :  { %v11778_v24 = vshrl.u32 %v4092_v47, 30  ;;  %v4138_v21 = vand.u32 2139095040, %v11768_v2  ;;  %v5918_v27 = vshll.u32 %v8068_v56, %v5912_v22  ;;  %v5921_v0 = vshll.u32 %v8069_v58, %v5912_v22 }
 0x458   :  { %v5874_v36 = vand.u32 2147483647, %v5873_v6  ;;  %v5916_v29 = vshrl.u32 %v8068_v56, %v5913_v52  ;;  %v5919_v7 = vshrl.u32 %v8069_v58, %v5913_v52  ;;  %v5922_v53 = vshrl.u32 %v8070_v60, %v5913_v52 }
 0x459   :  { %v4094_v42 = vshll.u32 %v11778_v24, 30  ;;  %v5924_v59 = vshll.u32 %v8070_v60, %v5912_v22  ;;  %v5911_v43 = vshrl.u32 %v5910_v55, 5  ;;  %v5925_v1 = vshrl.u32 %v8071_v62, %v5913_v52 }
 0x45a   :  { %v5877_v20 = vmul.f32 %v5876_v19, %v5874_v36  ;;  %v5914_v5 = vshrl.u32 %v8067_v54, %v5913_v52  ;;  %v5917_v35 = vor.u32 %v5916_v29, %v5915_v23  ;;  %v11796_v33 = vshll.u32 %v5906_v51, 8 }
 0x45b   :  { %v11792_v11 = vsub.s32 %v4091_v38, %v4094_v42  ;;  %v4139_v37 = vshrl.u32 %v4138_v21, 23  ;;  %v5920_v50 = vor.u32 %v5919_v7, %v5918_v27  ;;  %v5923_v14 = vor.u32 %v5922_v53, %v5921_v0 }
 0x45c   :  { %v5878_v48 = vxor.u32 2147483648, %v5877_v20  ;;  %v5926_v15 = vor.u32 %v5925_v1, %v5924_v59  ;;  %v5927_v4 = vshll.u32 %v8071_v62, %v5912_v22  ;;  %v5928_v57 = vshrl.u32 %v8072_v10, %v5913_v52 }
 0x45d   :  { %v4097_v45 = vsub.s32 0, %v11792_v11  ;;  %vm4033_vm9 = vcmp.lt.s32.totalorder %v11614_v17, 0  ;;  %vm5930_vm8 = vcmp.lt.s32.totalorder %v5911_v43, 1  ;;  %vm5933_vm12 = vcmp.lt.s32.totalorder %v5911_v43, 4 }
 0x45e   :  { %v5879_v49 = vsel %vm5796_vm10, %v5878_v48, %v5877_v20  ;;  %v5929_v8 = vor.u32 %v5928_v57, %v5927_v4  ;;  %vm5932_vm10 = vcmp.lt.s32.totalorder %v5911_v43, 3  ;;  %v5935_v9 = vsel %vm5933_vm12, %v5923_v14, 2102212464  ;;  %v11849_v4 = vld [vmem:[#allocation7 + $0x10] sm:$0xff] }
 0x45f   :  { %v5882_v44 = vsel %vm11744_vm1, %v11543_v3, %v5879_v49  ;;  %v7277_v12 = vmin.u32 %v4097_v45, %v11792_v11  ;;  %vm5931_vm14 = vcmp.lt.s32.totalorder %v5911_v43, 2  ;;  %v5934_v40 = vsel %vm5930_vm8, %v5914_v5, %v5917_v35 }
 0x460   :  { %7816 = vcosq.f32 %v5882_v44  ;;  %v4135_v30 = vand.u32 2147483647, %v11768_v2  ;;  %v5936_v38 = vsel %vm5932_vm10, %v5920_v50, %v5935_v9  ;;  %v5938_v55 = vsel %vm5930_vm8, %v5917_v35, %v5920_v50 }
 0x461   :  { %7818 = vsinq.f32 %v5882_v44  ;;  %v4099_v31 = vclz %v7277_v12  ;;  %v5939_v6 = vsel %vm5933_vm12, %v5926_v15, 920167782  ;;  %v5942_v19 = vsel %vm5930_vm8, %v5920_v50, %v5923_v14 }
 0x462   :  { %vm5889_vm11 = vcmp.lt.s32.totalorder %v11776_v32, 2  ;;  %vm11815_vm13 = vcmp.le.f32.partialorder %v4031_v26, 0.7853982  ;;  %v4117_v36 = vsub.s32 4, %v11778_v24  ;;  %v5940_v51 = vsel %vm5932_vm10, %v5923_v14, %v5939_v6 }
 0x463   :  { %v7278_v22 = vadd.s32 4294967294, %v4099_v31  ;;  %v5943_v52 = vsel %vm5933_vm12, %v5929_v8, 1326507024  ;;  %vm5886_vm15 = vweird.f32 %v11543_v3  ;;  %v5937_v23 = vsel %vm5931_vm14, %v5934_v40, %v5936_v38 }
 0x464   :  { %v5941_v21 = vsel %vm5931_vm14, %v5938_v55, %v5940_v51  ;;  %v5944_v20 = vsel %vm5932_vm10, %v5926_v15, %v5943_v52  ;;  %v7280_v42 = vadd.s32 4294967169, %v4139_v37  ;;  %vm5890_vm1 = vcmp.eq.s32.totalorder %v11776_v32, 0 }
 0x465   :  { %vm7279_vm0 = vcmp.lt.s32.totalorder %v7278_v22, 0  ;;  %v5945_v26 = vsel %vm5931_vm14, %v5942_v19, %v5944_v20  ;;  %v11828_v27 = vmul.u32.u64.low %v11796_v33, %v5941_v21  ;;  %v11829_v0 = vmul.u32.u64.high %v11796_v33, %v5941_v21, %v11828_v27 }
 0x466   :  { %v4102_v29 = vsel %vm7279_vm0, 0, %v7278_v22  ;;  %v11834_v7 = vmul.u32.u64.low %v11796_v33, %v5945_v26  ;;  %v11835_v53 = vmul.u32.u64.high %v11796_v33, %v5945_v26, %v11834_v7  ;;  %v4145_v5 = vadd.s32 1, %v7280_v42 }
 0x467   :  { %v4103_v59 = vsub.s32 32, %v4102_v29  ;;  %v4104_v48 = vshll.u32 %v11792_v11, %v4102_v29  ;;  %v4107_v1 = vsub.s32 4294967266, %v4102_v29  ;;  %vm5893_vm2 = vcmp.eq.s32.totalorder %v11776_v32, 2 }
 0x468   :  { %v4118_v43 = vsel %vm4033_vm9, %v4117_v36, %v11778_v24  ;;  %v5953_v35 = vmul.u32 %v11796_v33, %v5937_v23  ;;  %v4142_v37 = vand.u32 8388607, %v4135_v30  ;;  %v5956_v14 = vadd.s32 1, %v11829_v0 }
 0x469   :  { %v4105_v45 = vshrl.u32 %v11781_v25, %v4103_v59  ;;  %v4108_v50 = vadd.s32 127, %v4107_v1  ;;  %vm4146_vm3 = vcmp.gt.s32.totalorder %v4145_v5, 0  ;;  %vm5955_vm6 = vc.u32 %v11835_v53, %v11828_v27 }
 0x46a   :  { %v7817_v49 = vpop.eup %7816  ;;  %v4147_v15 = vsel %vm4146_vm3, %v4145_v5, 0  ;;  %v11853_v24 = vadd.f32 %v11849_v4, %v11774_v61  ;;  %v5957_v25 = vsel %vm5955_vm6, %v5956_v14, %v11829_v0  ;;  %v4120_v9 = vsel %vm11815_vm13, 0, %v4118_v43 }
 0x46b   :  { %v7819_v11 = vpop.eup %7818  ;;  %v5894_v44 = vxor.u32 2147483648, %v7817_v49  ;;  %v4106_v57 = vor.u32 %v4105_v45, %v4104_v48  ;;  %v4109_v12 = vshll.u32 %v4108_v50, 23  ;;  %v5958_v31 = vadd.s32 %v5957_v25, %v5953_v35 }
 0x46c   :  { %v5891_v33 = vxor.u32 2147483648, %v7819_v11  ;;  %v4149_v40 = vand.u32 31, %v4147_v15  ;;  %v4143_v61 = vor.u32 8388608, %v4142_v37  ;;  %v4148_v36 = vshrl.u32 %v4147_v15, 5 }
 0x46d   :  { %v5895_v8 = vsel %vm5893_vm2, %v5894_v44, %v7819_v11  ;;  %v4110_v55 = vor.u32 4788187, %v4109_v12  ;;  %v4113_v6 = vcvt.s32.f32 %v4106_v57  ;;  %v5959_v22 = vadd.s32 536870912, %v5958_v31 }
 0x46e   :  { %v5892_v38 = vsel %vm5890_vm1, %v7817_v49, %v5891_v33  ;;  %v4150_v51 = vsub.s32 32, %v4149_v40  ;;  %v4152_v21 = vshll.u32 %v8067_v54, %v4149_v40  ;;  %v4155_v20 = vshll.u32 %v8068_v56, %v4149_v40 }
 0x46f   :  { %v5896_v19 = vsel %vm5889_vm11, %v5892_v38, %v5895_v8  ;;  %v4111_v23 = vand.u32 2147483647, %v4110_v55  ;;  %v11868_v42 = vshrl.u32 %v5959_v22, 30  ;;  %v4158_v32 = vshll.u32 %v8069_v58, %v4149_v40 }
 0x470   :  { %v5897_v52 = vsel %vm5886_vm15, nan, %v5896_v19  ;;  %v4153_v26 = vshrl.u32 %v8068_v56, %v4150_v51  ;;  %v4156_v0 = vshrl.u32 %v8069_v58, %v4150_v51  ;;  %v4159_v7 = vshrl.u32 %v8070_v60, %v4150_v51 }
 0x471   :  { %7070 = vxpose.xlu1.b32.cont [5/16] %v5897_v52, 128  ;;  %v4114_v29 = vmul.f32 %v4113_v6, %v4111_v23  ;;  %v4161_v3 = vshll.u32 %v8070_v60, %v4149_v40  ;;  %v4162_v59 = vshrl.u32 %v8071_v62, %v4150_v51  ;;  %v4124_v48 = vadd.s32 3, %v4120_v9 }
 0x472   :  { %v5961_v1 = vshll.u32 %v11868_v42, 30  ;;  %v11877_v5 = vshll.u32 %v4143_v61, 8  ;;  %v4151_v35 = vshrl.u32 %v8067_v54, %v4150_v51  ;;  %v4164_v37 = vshll.u32 %v8071_v62, %v4149_v40 }
 0x473   :  { %v4115_v43 = vxor.u32 2147483648, %v4114_v29  ;;  %v6005_v49 = vand.u32 2139095040, %v11853_v24  ;;  %v4154_v50 = vor.u32 %v4153_v26, %v4152_v21  ;;  %v4157_v14 = vor.u32 %v4156_v0, %v4155_v20 }
 0x474   :  { %v11882_v45 = vsub.s32 %v5958_v31, %v5961_v1  ;;  %v4165_v11 = vshrl.u32 %v8072_v10, %v4150_v51  ;;  %v4160_v15 = vor.u32 %v4159_v7, %v4158_v32  ;;  %v4163_v33 = vor.u32 %v4162_v59, %v4161_v3 }
 0x475   :  { %v4116_v44 = vsel %vm4033_vm9, %v4115_v43, %v4114_v29  ;;  %vm4167_vm4 = vcmp.lt.s32.totalorder %v4148_v36, 1  ;;  %vm4168_vm5 = vcmp.lt.s32.totalorder %v4148_v36, 2  ;;  %vm4169_vm7 = vcmp.lt.s32.totalorder %v4148_v36, 3 }
 0x476   :  { %v4119_v57 = vsel %vm11815_vm13, %v11614_v17, %v4116_v44  ;;  %v5964_v12 = vsub.s32 0, %v11882_v45  ;;  %v4166_v25 = vor.u32 %v4165_v11, %v4164_v37  ;;  %vm4170_vm8 = vcmp.lt.s32.totalorder %v4148_v36, 4 }
 0x477   :  { %7820 = vcosq.f32 %v4119_v57  ;;  %v4171_v8 = vsel %vm4167_vm4, %v4151_v35, %v4154_v50  ;;  %v4172_v31 = vsel %vm4170_vm8, %v4160_v15, 2102212464  ;;  %v4175_v40 = vsel %vm4167_vm4, %v4154_v50, %v4157_v14 }
 0x478   :  { %7822 = vsinq.f32 %v4119_v57  ;;  %v7345_v9 = vmin.u32 %v5964_v12, %v11882_v45  ;;  %v4173_v38 = vsel %vm4169_vm7, %v4157_v14, %v4172_v31  ;;  %v4176_v55 = vsel %vm4170_vm8, %v4163_v33, 920167782 }
 0x479   :  { %v4179_v6 = vsel %vm4167_vm4, %v4157_v14, %v4160_v15  ;;  %v4180_v61 = vsel %vm4170_vm8, %v4166_v25, 1326507024  ;;  %vm5900_vm9 = vcmp.lt.s32.totalorder %v11715_v46, 0  ;;  %v4125_v19 = vand.u32 3, %v4124_v48 }
 0x47a   :  { %v5966_v47 = vclz %v7345_v9  ;;  %v4177_v22 = vsel %vm4169_vm7, %v4160_v15, %v4176_v55  ;;  %v4181_v51 = vsel %vm4169_vm7, %v4163_v33, %v4180_v61  ;;  %v6006_v52 = vshrl.u32 %v6005_v49, 23 }
 0x47b   :  { %vm4123_vm12 = vweird.f32 %v11614_v17  ;;  %v4174_v21 = vsel %vm4168_vm5, %v4171_v8, %v4173_v38  ;;  %v4178_v20 = vsel %vm4168_vm5, %v4175_v40, %v4177_v22  ;;  %v4182_v26 = vsel %vm4168_vm5, %v4179_v6, %v4181_v51 }
 0x47c   :  { %v7346_v23 = vadd.s32 4294967294, %v5966_v47  ;;  %v11898_v0 = vmul.u32.u64.low %v11877_v5, %v4182_v26  ;;  %v11899_v32 = vmul.u32.u64.high %v11877_v5, %v4182_v26, %v11898_v0  ;;  %v5954_v3 = vadd.s32 %v11828_v27, %v11835_v53 }
 0x47d   :  { %v11902_v29 = vmul.u32.u64.low %v11877_v5, %v4178_v20  ;;  %v11903_v7 = vmul.u32.u64.high %v11877_v5, %v4178_v20, %v11902_v29  ;;  %v5984_v59 = vsub.s32 4, %v11868_v42  ;;  %v7348_v48 = vadd.s32 4294967169, %v6006_v52 }
 0x47e   :  { %vm7347_vm10 = vcmp.lt.s32.totalorder %v7346_v23, 0  ;;  %vm4127_vm14 = vcmp.eq.s32.totalorder %v4125_v19, 0  ;;  %vm11911_vm11 = vcmp.le.f32.partialorder %v5898_v16, 0.7853982  ;;  %v4025_v43 = vmul.f32 %v11770_v34, %v11592_v28 }
 0x47f   :  { %v5969_v1 = vsel %vm7347_vm10, 0, %v7346_v23  ;;  %v4190_v27 = vmul.u32 %v11877_v5, %v4174_v21  ;;  %vm4130_vm13 = vcmp.eq.s32.totalorder %v4125_v19, 2  ;;  %vm4192_vm15 = vc.u32 %v11899_v32, %v11902_v29 }
 0x480   :  { %v5970_v35 = vsub.s32 32, %v5969_v1  ;;  %v5971_v37 = vshll.u32 %v11882_v45, %v5969_v1  ;;  %v5974_v49 = vsub.s32 4294967266, %v5969_v1  ;;  %v4193_v16 = vadd.s32 1, %v11903_v7 }
 0x481   :  { %v7821_v53 = vpop.eup %7820  ;;  %v6012_v50 = vadd.s32 1, %v7348_v48  ;;  %v5985_v34 = vsel %vm5900_vm9, %v5984_v59, %v11868_v42  ;;  %vm4126_vm0 = vcmp.lt.s32.totalorder %v4125_v19, 2  ;;  %v6002_v31 = vand.u32 2147483647, %v11853_v24  ;;  %v11934_v19 = vld [vmem:[#allocation5 + $0x18] sm:$0xff] }
 0x482   :  { %v7823_v14 = vpop.eup %7822  ;;  %v4131_v11 = vxor.u32 2147483648, %v7821_v53  ;;  %v5972_v44 = vshrl.u32 %v5954_v3, %v5970_v35  ;;  %v5975_v15 = vadd.s32 127, %v5974_v49  ;;  %v4194_v5 = vsel %vm4192_vm15, %v4193_v16, %v11903_v7 }
 0x483   :  { %v4128_v45 = vxor.u32 2147483648, %v7823_v14  ;;  %vm6013_vm1 = vcmp.gt.s32.totalorder %v6012_v50, 0  ;;  %v4195_v25 = vadd.s32 %v4194_v5, %v4190_v27  ;;  %v5987_v9 = vsel %vm11911_vm11, 0, %v5985_v34 }
 0x484   :  { %v4132_v33 = vsel %vm4130_vm13, %v4131_v11, %v7823_v14  ;;  %v5973_v57 = vor.u32 %v5972_v44, %v5971_v37  ;;  %v5976_v12 = vshll.u32 %v5975_v15, 23  ;;  %v6014_v40 = vsel %vm6013_vm1, %v6012_v50, 0 }
 0x485   :  { %v4129_v8 = vsel %vm4127_vm14, %v7821_v53, %v4128_v45  ;;  %v4196_v6 = vadd.s32 536870912, %v4195_v25  ;;  %v6016_v47 = vand.u32 31, %v6014_v40  ;;  %v5991_v51 = vadd.s32 3, %v5987_v9 }
 0x486   :  { %v4133_v38 = vsel %vm4126_vm0, %v4129_v8, %v4132_v33  ;;  %v5977_v55 = vor.u32 4788187, %v5976_v12  ;;  %v5980_v42 = vcvt.s32.f32 %v5973_v57  ;;  %v11938_v23 = vmul.f32 %v11934_v19, %v11487_v41 }
 0x487   :  { %v4134_v61 = vsel %vm4123_vm12, nan, %v4133_v38  ;;  %v11932_v52 = vshrl.u32 %v4196_v6, 30  ;;  %v6009_v21 = vand.u32 8388607, %v6002_v31  ;;  %v11942_v20 = vshrl.u32 %v6014_v40, 5 }
 0x488   :  { %5307 = vxpose.xlu0.b32.cont [5/16] %v4134_v61, 128  ;;  %v5978_v22 = vand.u32 2147483647, %v5977_v55  ;;  %v6017_v26 = vsub.s32 32, %v6016_v47  ;;  %v11945_v17 = vadd.f32 %v11849_v4, %v4025_v43  ;;  %v6019_v3 = vshll.u32 %v8067_v54, %v6016_v47 }
 0x489   :  { %v4198_v7 = vshll.u32 %v11932_v52, 30  ;;  %v6022_v59 = vshll.u32 %v8068_v56, %v6016_v47  ;;  %v6025_v1 = vshll.u32 %v8069_v58, %v6016_v47  ;;  %v6028_v35 = vshll.u32 %v8070_v60, %v6016_v47 }
 0x48a   :  { %v5981_v0 = vmul.f32 %v5980_v42, %v5978_v22  ;;  %v6020_v48 = vshrl.u32 %v8068_v56, %v6017_v26  ;;  %v6023_v41 = vshrl.u32 %v8069_v58, %v6017_v26  ;;  %v6026_v4 = vshrl.u32 %v8070_v60, %v6017_v26 }
 0x48b   :  { %v11954_v49 = vsub.s32 %v4195_v25, %v4198_v7  ;;  %v6029_v43 = vshrl.u32 %v8071_v62, %v6017_v26  ;;  %v11958_v27 = vand.u32 3, %v5991_v51  ;;  %v6010_v53 = vor.u32 8388608, %v6009_v21 }
 0x48c   :  { %v5982_v37 = vxor.u32 2147483648, %v5981_v0  ;;  %v6018_v16 = vshrl.u32 %v8067_v54, %v6017_v26  ;;  %v4242_v50 = vand.u32 2139095040, %v11945_v17  ;;  %v6021_v44 = vor.u32 %v6020_v48, %v6019_v3 }
 0x48d   :  { %v4201_v11 = vsub.s32 0, %v11954_v49  ;;  %v6024_v15 = vor.u32 %v6023_v41, %v6022_v59  ;;  %v6030_v45 = vor.u32 %v6029_v43, %v6028_v35  ;;  %v6031_v5 = vshll.u32 %v8071_v62, %v6016_v47 }
 0x48e   :  { %v5983_v14 = vsel %vm5900_vm9, %v5982_v37, %v5981_v0  ;;  %v6032_v33 = vshrl.u32 %v8072_v10, %v6017_v26  ;;  %v6027_v12 = vor.u32 %v6026_v4, %v6025_v1  ;;  %vm6034_vm2 = vcmp.lt.s32.totalorder %v11942_v20, 1 }
 0x48f   :  { %v5986_v34 = vsel %vm11911_vm11, %v11715_v46, %v5983_v14  ;;  %v7281_v57 = vmin.u32 %v4201_v11, %v11954_v49  ;;  %vm4137_vm3 = vcmp.lt.s32.totalorder %v11768_v2, 0  ;;  %vm6036_vm6 = vcmp.lt.s32.totalorder %v11942_v20, 3 }
 0x490   :  { %7824 = vcosq.f32 %v5986_v34  ;;  %v6033_v25 = vor.u32 %v6032_v33, %v6031_v5  ;;  %vm6037_vm4 = vcmp.lt.s32.totalorder %v11942_v20, 4  ;;  %v4191_v36 = vadd.s32 %v11902_v29, %v11899_v32 }
 0x491   :  { %7826 = vsinq.f32 %v5986_v34  ;;  %v4203_v8 = vclz %v7281_v57  ;;  %vm6035_vm5 = vcmp.lt.s32.totalorder %v11942_v20, 2  ;;  %v6050_v9 = vshll.u32 %v6010_v53, 8 }
 0x492   :  { %vm5994_vm7 = vcmp.eq.s32.totalorder %v11958_v27, 0  ;;  %v4221_v40 = vsub.s32 4, %v11932_v52  ;;  %v6039_v38 = vsel %vm6037_vm4, %v6027_v12, 2102212464  ;;  %v6042_v55 = vsel %vm6034_vm2, %v6021_v44, %v6024_v15 }
 0x493   :  { %v6043_v42 = vsel %vm6037_vm4, %v6030_v45, 920167782  ;;  %vm5993_vm8 = vcmp.lt.s32.totalorder %v11958_v27, 2  ;;  %vm11989_vm9 = vcmp.le.f32.partialorder %v4135_v30, 0.7853982  ;;  %v7282_v29 = vadd.s32 4294967294, %v4203_v8 }
 0x494   :  { %v6038_v6 = vsel %vm6034_vm2, %v6018_v16, %v6021_v44  ;;  %v6044_v61 = vsel %vm6036_vm6, %v6027_v12, %v6043_v42  ;;  %v6046_v47 = vsel %vm6034_vm2, %v6024_v15, %v6027_v12  ;;  %vm5990_vm12 = vweird.f32 %v11715_v46 }
 0x495   :  { %v6040_v22 = vsel %vm6036_vm6, %v6024_v15, %v6039_v38  ;;  %v6045_v30 = vsel %vm6035_vm5, %v6042_v55, %v6044_v61  ;;  %v6047_v51 = vsel %vm6037_vm4, %v6033_v25, 1326507024  ;;  %v4243_v21 = vshrl.u32 %v4242_v50, 23 }
 0x496   :  { %vm7283_vm10 = vcmp.lt.s32.totalorder %v7282_v29, 0  ;;  %v6048_v26 = vsel %vm6036_vm6, %v6030_v45, %v6047_v51  ;;  %v12008_v0 = vmul.u32.u64.low %v6050_v9, %v6045_v30  ;;  %v12009_v7 = vmul.u32.u64.high %v6050_v9, %v6045_v30, %v12008_v0 }
 0x497   :  { %v4206_v3 = vsel %vm7283_vm10, 0, %v7282_v29  ;;  %v6049_v59 = vsel %vm6035_vm5, %v6046_v47, %v6048_v26  ;;  %v4239_v48 = vand.u32 2147483647, %v11945_v17  ;;  %v7284_v41 = vadd.s32 4294967169, %v4243_v21 }
 0x498   :  { %v4207_v1 = vsub.s32 32, %v4206_v3  ;;  %v4208_v35 = vshll.u32 %v11954_v49, %v4206_v3  ;;  %v4211_v37 = vsub.s32 4294967266, %v4206_v3  ;;  %v6041_v4 = vsel %vm6035_vm5, %v6038_v6, %v6040_v22  ;;  %v12041_v6 = vld [vmem:[#allocation7 + $0x18] sm:$0xff] }
 0x499   :  { %vm5997_vm14 = vcmp.eq.s32.totalorder %v11958_v27, 2  ;;  %v12019_v43 = vmul.u32.u64.low %v6050_v9, %v6049_v59  ;;  %v12020_v53 = vmul.u32.u64.high %v6050_v9, %v6049_v59, %v12019_v43  ;;  %v4249_v16 = vadd.s32 1, %v7284_v41 }
 0x49a   :  { %v7825_v50 = vpop.eup %7824  ;;  %v4209_v14 = vshrl.u32 %v4191_v36, %v4207_v1  ;;  %v4212_v11 = vadd.s32 127, %v4211_v37  ;;  %v4222_v44 = vsel %vm4137_vm3, %v4221_v40, %v11932_v52  ;;  %v6060_v15 = vadd.s32 1, %v12009_v7 }
 0x49b   :  { %v7827_v49 = vpop.eup %7826  ;;  %v5998_v34 = vxor.u32 2147483648, %v7825_v50  ;;  %v6057_v45 = vmul.u32 %v6050_v9, %v6041_v4  ;;  %v4246_v20 = vand.u32 8388607, %v4239_v48  ;;  %vm4250_vm11 = vcmp.gt.s32.totalorder %v4249_v16, 0 }
 0x49c   :  { %v5995_v5 = vxor.u32 2147483648, %v7827_v49  ;;  %v4210_v33 = vor.u32 %v4209_v14, %v4208_v35  ;;  %v4213_v57 = vshll.u32 %v4212_v11, 23  ;;  %v4251_v12 = vsel %vm4250_vm11, %v4249_v16, 0 }
 0x49d   :  { %v5999_v25 = vsel %vm5997_vm14, %v5998_v34, %v7827_v49  ;;  %v4224_v36 = vsel %vm11989_vm9, 0, %v4222_v44  ;;  %vm6059_vm13 = vc.u32 %v12020_v53, %v12008_v0  ;;  %v12034_v52 = vshrl.u32 %v4251_v12, 5 }
 0x49e   :  { %v5996_v8 = vsel %vm5994_vm7, %v7825_v50, %v5995_v5  ;;  %v4214_v9 = vor.u32 4788187, %v4213_v57  ;;  %v4217_v40 = vcvt.s32.f32 %v4210_v33  ;;  %v6061_v38 = vsel %vm6059_vm13, %v6060_v15, %v12009_v7 }
 0x49f   :  { %v6000_v55 = vsel %vm5993_vm8, %v5996_v8, %v5999_v25  ;;  %v6062_v42 = vadd.s32 %v6061_v38, %v6057_v45  ;;  %v4253_v29 = vand.u32 31, %v4251_v12  ;;  %v12045_v61 = vadd.f32 %v12041_v6, %v11938_v23 }
 0x4a0   :  { %v6001_v47 = vsel %vm5990_vm12, nan, %v6000_v55  ;;  %v4215_v22 = vand.u32 2147483647, %v4214_v9  ;;  %v4228_v30 = vadd.s32 3, %v4224_v36  ;;  %v4247_v51 = vor.u32 8388608, %v4246_v20 }
 0x4a1   :  { %7071 = vxpose.xlu1.b32.cont [6/16] %v6001_v47, 128  ;;  %vm6004_vm15 = vcmp.lt.s32.totalorder %v11853_v24, 0  ;;  %v6063_v21 = vadd.s32 536870912, %v6062_v42  ;;  %v4254_v27 = vsub.s32 32, %v4253_v29  ;;  %v4256_v26 = vshll.u32 %v8067_v54, %v4253_v29 }
 0x4a2   :  { %vm4271_vm0 = vcmp.lt.s32.totalorder %v12034_v52, 1  ;;  %v4218_v7 = vmul.f32 %v4217_v40, %v4215_v22  ;;  %v4259_v3 = vshll.u32 %v8068_v56, %v4253_v29  ;;  %v4262_v23 = vshll.u32 %v8069_v58, %v4253_v29 }
 0x4a3   :  { %v4265_v46 = vshll.u32 %v8070_v60, %v4253_v29  ;;  %v6064_v59 = vshrl.u32 %v6063_v21, 30  ;;  %v4257_v41 = vshrl.u32 %v8068_v56, %v4254_v27  ;;  %v4260_v1 = vshrl.u32 %v8069_v58, %v4254_v27 }
 0x4a4   :  { %v4268_v35 = vshll.u32 %v8071_v62, %v4253_v29  ;;  %v4219_v37 = vxor.u32 2147483648, %v4218_v7  ;;  %vm12060_vm1 = vcmp.le.f32.partialorder %v6002_v31, 0.7853982  ;;  %v4263_v43 = vshrl.u32 %v8070_v60, %v4254_v27 }
 0x4a5   :  { %v4266_v16 = vshrl.u32 %v8071_v62, %v4254_v27  ;;  %v4269_v50 = vshrl.u32 %v8072_v10, %v4254_v27  ;;  %v6065_v14 = vshll.u32 %v6064_v59, 30  ;;  %v6088_v11 = vsub.s32 4, %v6064_v59 }
 0x4a6   :  { %v4255_v44 = vshrl.u32 %v8067_v54, %v4254_v27  ;;  %v4258_v15 = vor.u32 %v4257_v41, %v4256_v26  ;;  %v4220_v49 = vsel %vm4137_vm3, %v4219_v37, %v4218_v7  ;;  %v4261_v34 = vor.u32 %v4260_v1, %v4259_v3 }
 0x4a7   :  { %v4264_v45 = vor.u32 %v4263_v43, %v4262_v23  ;;  %v4267_v31 = vor.u32 %v4266_v16, %v4265_v46  ;;  %v4223_v20 = vsel %vm11989_vm9, %v11768_v2, %v4220_v49  ;;  %v12073_v5 = vsub.s32 %v6062_v42, %v6065_v14 }
 0x4a8   :  { %v4270_v33 = vor.u32 %v4269_v50, %v4268_v35  ;;  %vm4274_vm2 = vcmp.lt.s32.totalorder %v12034_v52, 4  ;;  %7828 = vcosq.f32 %v4223_v20  ;;  %v12076_v57 = vand.u32 3, %v4228_v30 }
 0x4a9   :  { %vm4273_vm6 = vcmp.lt.s32.totalorder %v12034_v52, 3  ;;  %v4287_v12 = vshll.u32 %v4247_v51, 8  ;;  %7830 = vsinq.f32 %v4223_v20  ;;  %v6068_v25 = vsub.s32 0, %v12073_v5 }
 0x4aa   :  { %vm4272_vm3 = vcmp.lt.s32.totalorder %v12034_v52, 2  ;;  %v4276_v32 = vsel %vm4274_vm2, %v4264_v45, 2102212464  ;;  %v6089_v36 = vsel %vm6004_vm15, %v6088_v11, %v6064_v59  ;;  %v4275_v8 = vsel %vm4271_vm0, %v4255_v44, %v4258_v15 }
 0x4ab   :  { %v4279_v9 = vsel %vm4271_vm0, %v4258_v15, %v4261_v34  ;;  %v4280_v40 = vsel %vm4274_vm2, %v4267_v31, 920167782  ;;  %v7349_v38 = vmin.u32 %v6068_v25, %v12073_v5  ;;  %v4283_v42 = vsel %vm4271_vm0, %v4261_v34, %v4264_v45 }
 0x4ac   :  { %v4281_v55 = vsel %vm4273_vm6, %v4264_v45, %v4280_v40  ;;  %v4284_v29 = vsel %vm4274_vm2, %v4270_v33, 1326507024  ;;  %v4277_v47 = vsel %vm4273_vm6, %v4261_v34, %v4276_v32  ;;  %v6109_v51 = vand.u32 2139095040, %v12045_v61 }
 0x4ad   :  { %v4282_v22 = vsel %vm4272_vm3, %v4279_v9, %v4281_v55  ;;  %v4285_v30 = vsel %vm4273_vm6, %v4267_v31, %v4284_v29  ;;  %vm4227_vm4 = vweird.f32 %v11768_v2  ;;  %v6070_v21 = vclz %v7349_v38 }
 0x4ae   :  { %v6091_v27 = vsel %vm12060_vm1, 0, %v6089_v36  ;;  %v4026_v26 = vmul.f32 %v11934_v19, %v11592_v28  ;;  %v4286_v7 = vsel %vm4272_vm3, %v4283_v42, %v4285_v30  ;;  %v6110_v46 = vshrl.u32 %v6109_v51, 23 }
 0x4af   :  { %v12112_v3 = vmul.u32.u64.low %v4287_v12, %v4282_v22  ;;  %v12113_v23 = vmul.u32.u64.high %v4287_v12, %v4282_v22, %v12112_v3  ;;  %v7350_v59 = vadd.s32 4294967294, %v6070_v21  ;;  %v4278_v41 = vsel %vm4272_vm3, %v4275_v8, %v4277_v47 }
 0x4b0   :  { %v12118_v1 = vmul.u32.u64.low %v4287_v12, %v4286_v7  ;;  %v12119_v35 = vmul.u32.u64.high %v4287_v12, %v4286_v7, %v12118_v1  ;;  %vm4230_vm5 = vcmp.lt.s32.totalorder %v12076_v57, 2  ;;  %vm4231_vm7 = vcmp.eq.s32.totalorder %v12076_v57, 0 }
 0x4b1   :  { %v6106_v28 = vand.u32 2147483647, %v12045_v61  ;;  %v7352_v19 = vadd.s32 4294967169, %v6110_v46  ;;  %vm4234_vm8 = vcmp.eq.s32.totalorder %v12076_v57, 2  ;;  %v6058_v37 = vadd.s32 %v12008_v0, %v12020_v53 }
 0x4b2   :  { %vm7351_vm9 = vcmp.lt.s32.totalorder %v7350_v59, 0  ;;  %v6095_v43 = vadd.s32 3, %v6091_v27  ;;  %v7829_v16 = vpop.eup %7828  ;;  %v4294_v50 = vmul.u32 %v4287_v12, %v4278_v41  ;;  %v4297_v14 = vadd.s32 1, %v12113_v23 }
 0x4b3   :  { %v6073_v52 = vsel %vm7351_vm9, 0, %v7350_v59  ;;  %v6116_v11 = vadd.s32 1, %v7352_v19  ;;  %v7831_v44 = vpop.eup %7830  ;;  %v4235_v15 = vxor.u32 2147483648, %v7829_v16  ;;  %vm4296_vm12 = vc.u32 %v12119_v35, %v12112_v3 }
 0x4b4   :  { %v6074_v49 = vsub.s32 32, %v6073_v52  ;;  %v6075_v34 = vshll.u32 %v12073_v5, %v6073_v52  ;;  %v6078_v45 = vsub.s32 4294967266, %v6073_v52  ;;  %v4232_v31 = vxor.u32 2147483648, %v7831_v44 }
 0x4b5   :  { %v6113_v0 = vand.u32 8388607, %v6106_v28  ;;  %vm6117_vm10 = vcmp.gt.s32.totalorder %v6116_v11, 0  ;;  %v4236_v53 = vsel %vm4234_vm8, %v4235_v15, %v7831_v44  ;;  %v4298_v12 = vsel %vm4296_vm12, %v4297_v14, %v12113_v23 }
 0x4b6   :  { %v6076_v20 = vshrl.u32 %v6058_v37, %v6074_v49  ;;  %v6079_v33 = vadd.s32 127, %v6078_v45  ;;  %v4233_v25 = vsel %vm4231_vm7, %v7829_v16, %v4232_v31  ;;  %v4299_v5 = vadd.s32 %v4298_v12, %v4294_v50 }
 0x4b7   :  { %v6118_v32 = vsel %vm6117_vm10, %v6116_v11, 0  ;;  %v12139_v36 = vadd.f32 %v12041_v6, %v4026_v26  ;;  %v4237_v8 = vsel %vm4230_vm5, %v4233_v25, %v4236_v53  ;;  %v12145_v22 = vand.u32 3, %v6095_v43 }
 0x4b8   :  { %v6077_v9 = vor.u32 %v6076_v20, %v6075_v34  ;;  %v6080_v40 = vshll.u32 %v6079_v33, 23  ;;  %v4238_v38 = vsel %vm4227_vm4, nan, %v4237_v8  ;;  %v4300_v55 = vadd.s32 536870912, %v4299_v5 }
 0x4b9   :  { %v6120_v42 = vand.u32 31, %v6118_v32  ;;  %5308 = vxpose.xlu0.b32.cont [6/16] %v4238_v38, 128  ;;  %v6114_v30 = vor.u32 8388608, %v6113_v0  ;;  %v6119_v21 = vshrl.u32 %v6118_v32, 5  ;;  %v4346_v27 = vand.u32 2139095040, %v12139_v36 }
 0x4ba   :  { %v6081_v29 = vor.u32 4788187, %v6080_v40  ;;  %v6084_v47 = vcvt.s32.f32 %v6077_v9  ;;  %v4301_v51 = vshrl.u32 %v4300_v55, 30  ;;  %vm12167_vm11 = vcmp.le.f32.partialorder %v4239_v48, 0.7853982 }
 0x4bb   :  { %v6121_v6 = vsub.s32 32, %v6120_v42  ;;  %v6123_v26 = vshll.u32 %v8067_v54, %v6120_v42  ;;  %v6126_v7 = vshll.u32 %v8068_v56, %v6120_v42  ;;  %v6129_v2 = vshll.u32 %v8069_v58, %v6120_v42 }
 0x4bc   :  { %v6082_v57 = vand.u32 2147483647, %v6081_v29  ;;  %v4302_v23 = vshll.u32 %v4301_v51, 30  ;;  %v6132_v59 = vshll.u32 %v8070_v60, %v6120_v42  ;;  %v6135_v41 = vshll.u32 %v8071_v62, %v6120_v42 }
 0x4bd   :  { %v6124_v46 = vshrl.u32 %v8068_v56, %v6121_v6  ;;  %v6127_v19 = vshrl.u32 %v8069_v58, %v6121_v6  ;;  %v6130_v37 = vshrl.u32 %v8070_v60, %v6121_v6  ;;  %v6133_v43 = vshrl.u32 %v8071_v62, %v6121_v6 }
 0x4be   :  { %v6085_v1 = vmul.f32 %v6084_v47, %v6082_v57  ;;  %v12157_v16 = vsub.s32 %v4299_v5, %v4302_v23  ;;  %v6136_v52 = vshrl.u32 %v8072_v10, %v6121_v6  ;;  %v12160_v50 = vshll.u32 %v6114_v30, 8 }
 0x4bf   :  { %v4347_v14 = vshrl.u32 %v4346_v27, 23  ;;  %v6125_v44 = vor.u32 %v6124_v46, %v6123_v26  ;;  %v6128_v15 = vor.u32 %v6127_v19, %v6126_v7  ;;  %vm6138_vm14 = vcmp.lt.s32.totalorder %v6119_v21, 1 }
 0x4c0   :  { %v6086_v11 = vxor.u32 2147483648, %v6085_v1  ;;  %v4305_v49 = vsub.s32 0, %v12157_v16  ;;  %v4325_v34 = vsub.s32 4, %v4301_v51  ;;  %v6131_v45 = vor.u32 %v6130_v37, %v6129_v2 }
 0x4c1   :  { %v6134_v31 = vor.u32 %v6133_v43, %v6132_v59  ;;  %v6122_v20 = vshrl.u32 %v8067_v54, %v6121_v6  ;;  %v6137_v33 = vor.u32 %v6136_v52, %v6135_v41  ;;  %vm6141_vm13 = vcmp.lt.s32.totalorder %v6119_v21, 4 }
 0x4c2   :  { %v6087_v0 = vsel %vm6004_vm15, %v6086_v11, %v6085_v1  ;;  %v7285_v25 = vmin.u32 %v4305_v49, %v12157_v16  ;;  %vm6140_vm0 = vcmp.lt.s32.totalorder %v6119_v21, 3  ;;  %v6143_v5 = vsel %vm6141_vm13, %v6131_v45, 2102212464 }
 0x4c3   :  { %v6090_v12 = vsel %vm12060_vm1, %v11853_v24, %v6087_v0  ;;  %vm6139_vm15 = vcmp.lt.s32.totalorder %v6119_v21, 2  ;;  %v6146_v48 = vsel %vm6138_vm14, %v6125_v44, %v6128_v15  ;;  %v6147_v32 = vsel %vm6141_vm13, %v6134_v31, 920167782 }
 0x4c4   :  { %7832 = vcosq.f32 %v6090_v12  ;;  %vm4241_vm2 = vcmp.lt.s32.totalorder %v11945_v17, 0  ;;  %v4307_v8 = vclz %v7285_v25  ;;  %v4343_v9 = vand.u32 2147483647, %v12139_v36 }
 0x4c5   :  { %7834 = vsinq.f32 %v6090_v12  ;;  %v6142_v4 = vsel %vm6138_vm14, %v6122_v20, %v6125_v44  ;;  %v6144_v40 = vsel %vm6140_vm0, %v6128_v15, %v6143_v5  ;;  %v6148_v38 = vsel %vm6140_vm0, %v6131_v45, %v6147_v32 }
 0x4c6   :  { %v6150_v55 = vsel %vm6138_vm14, %v6128_v15, %v6131_v45  ;;  %v7286_v42 = vadd.s32 4294967294, %v4307_v8  ;;  %v4326_v29 = vsel %vm4241_vm2, %v4325_v34, %v4301_v51  ;;  %v6149_v47 = vsel %vm6139_vm15, %v6146_v48, %v6148_v38 }
 0x4c7   :  { %v6151_v30 = vsel %vm6141_vm13, %v6137_v33, 1326507024  ;;  %vm6097_vm1 = vcmp.lt.s32.totalorder %v12145_v22, 2  ;;  %v12192_v27 = vmul.u32.u64.low %v12160_v50, %v6149_v47  ;;  %v12193_v57 = vmul.u32.u64.high %v12160_v50, %v6149_v47, %v12192_v27 }
 0x4c8   :  { %v6152_v6 = vsel %vm6140_vm0, %v6134_v31, %v6151_v30  ;;  %v7288_v26 = vadd.s32 4294967169, %v4347_v14  ;;  %vm6094_vm6 = vweird.f32 %v11853_v24  ;;  %v4295_v7 = vadd.s32 %v12112_v3, %v12119_v35  ;;  %v12243_v24 = vld [vmem:[#allocation5] sm:$0xff] }
 0x4c9   :  { %vm7287_vm3 = vcmp.lt.s32.totalorder %v7286_v42, 0  ;;  %v6145_v51 = vsel %vm6139_vm15, %v6142_v4, %v6144_v40  ;;  %v6153_v2 = vsel %vm6139_vm15, %v6150_v55, %v6152_v6  ;;  %v4328_v43 = vsel %vm12167_vm11, 0, %v4326_v29 }
 0x4ca   :  { %v4310_v23 = vsel %vm7287_vm3, 0, %v7286_v42  ;;  %v12202_v46 = vmul.u32.u64.low %v12160_v50, %v6153_v2  ;;  %v12203_v59 = vmul.u32.u64.high %v12160_v50, %v6153_v2, %v12202_v46  ;;  %v4353_v41 = vadd.s32 1, %v7288_v26 }
 0x4cb   :  { %v4311_v1 = vsub.s32 32, %v4310_v23  ;;  %v4312_v19 = vshll.u32 %v12157_v16, %v4310_v23  ;;  %v4315_v37 = vsub.s32 4294967266, %v4310_v23  ;;  %vm6098_vm4 = vcmp.eq.s32.totalorder %v12145_v22, 0 }
 0x4cc   :  { %v6161_v3 = vmul.u32 %v12160_v50, %v6145_v51  ;;  %v6164_v35 = vadd.s32 1, %v12193_v57  ;;  %vm4354_vm5 = vcmp.gt.s32.totalorder %v4353_v41, 0  ;;  %v4350_v14 = vand.u32 8388607, %v4343_v9 }
 0x4cd   :  { %v4313_v21 = vshrl.u32 %v4295_v7, %v4311_v1  ;;  %v4316_v52 = vadd.s32 127, %v4315_v37  ;;  %v4355_v11 = vsel %vm4354_vm5, %v4353_v41, 0  ;;  %vm6101_vm7 = vcmp.eq.s32.totalorder %v12145_v22, 2 }
 0x4ce   :  { %v7833_v44 = vpop.eup %7832  ;;  %v12214_v16 = vadd.s32 3, %v4328_v43  ;;  %vm6163_vm8 = vc.u32 %v12203_v59, %v12192_v27  ;;  %v4357_v15 = vand.u32 31, %v4355_v11  ;;  %v12221_v12 = vrot.slane %v10832_v39, %v9449_v13 }
 0x4cf   :  { %v7835_v49 = vpop.eup %7834  ;;  %v6102_v50 = vxor.u32 2147483648, %v7833_v44  ;;  %v4314_v34 = vor.u32 %v4313_v21, %v4312_v19  ;;  %v4317_v45 = vshll.u32 %v4316_v52, 23  ;;  %v6165_v31 = vsel %vm6163_vm8, %v6164_v35, %v12193_v57 }
 0x4d0   :  { %v6099_v0 = vxor.u32 2147483648, %v7835_v49  ;;  %v6166_v20 = vadd.s32 %v6165_v31, %v6161_v3  ;;  %v4358_v33 = vsub.s32 32, %v4357_v15  ;;  %v4351_v32 = vor.u32 8388608, %v4350_v14 }
 0x4d1   :  { %v6103_v25 = vsel %vm6101_vm7, %v6102_v50, %v7835_v49  ;;  %v4318_v5 = vor.u32 4788187, %v4317_v45  ;;  %v4321_v48 = vcvt.s32.f32 %v4314_v34  ;;  %v4360_v40 = vshll.u32 %v8067_v54, %v4357_v15 }
 0x4d2   :  { %v6100_v8 = vsel %vm6098_vm4, %v7833_v44, %v6099_v0  ;;  %v6167_v4 = vadd.s32 536870912, %v6166_v20  ;;  %v4363_v38 = vshll.u32 %v8068_v56, %v4357_v15  ;;  %v4361_v29 = vshrl.u32 %v8068_v56, %v4358_v33 }
 0x4d3   :  { %v6104_v55 = vsel %vm6097_vm1, %v6100_v8, %v6103_v25  ;;  %v4319_v42 = vand.u32 2147483647, %v4318_v5  ;;  %v4364_v47 = vshrl.u32 %v8069_v58, %v4358_v33  ;;  %v4366_v57 = vshll.u32 %v8069_v58, %v4357_v15 }
 0x4d4   :  { %v6105_v30 = vsel %vm6094_vm6, nan, %v6104_v55  ;;  %v12233_v6 = vshrl.u32 %v6167_v4, 30  ;;  %v4367_v26 = vshrl.u32 %v8070_v60, %v4358_v33  ;;  %v4356_v51 = vshrl.u32 %v4355_v11, 5 }
 0x4d5   :  { %7072 = vxpose.xlu1.b32.cont [7/16] %v6105_v30, 128  ;;  %v4322_v7 = vmul.f32 %v4321_v48, %v4319_v42  ;;  %v4369_v22 = vshll.u32 %v8070_v60, %v4357_v15  ;;  %v4370_v2 = vshrl.u32 %v8071_v62, %v4358_v33  ;;  %v4372_v46 = vshll.u32 %v8071_v62, %v4357_v15 }
 0x4d6   :  { %v6169_v23 = vshll.u32 %v12233_v6, 30  ;;  %v12241_v41 = vshll.u32 %v4351_v32, 8  ;;  %v6214_v1 = vmul.f32 %v12243_v24, %v12221_v12  ;;  %v4359_v37 = vshrl.u32 %v8067_v54, %v4358_v33 }
 0x4d7   :  { %v4323_v19 = vxor.u32 2147483648, %v4322_v7  ;;  %v4371_v43 = vor.u32 %v4370_v2, %v4369_v22  ;;  %v4373_v3 = vshrl.u32 %v8072_v10, %v4358_v33  ;;  %v4362_v21 = vor.u32 %v4361_v29, %v4360_v40 }
 0x4d8   :  { %v12249_v35 = vsub.s32 %v6166_v20, %v6169_v23  ;;  %v4365_v52 = vor.u32 %v4364_v47, %v4363_v38  ;;  %v4368_v14 = vor.u32 %v4367_v26, %v4366_v57  ;;  %vm4375_vm9 = vcmp.lt.s32.totalorder %v4356_v51, 1  ;;  %v7953_v38 = vld [vmem:[#allocation7] sm:$0xff] }
 0x4d9   :  { %v4324_v11 = vsel %vm4241_vm2, %v4323_v19, %v4322_v7  ;;  %v4374_v44 = vor.u32 %v4373_v3, %v4372_v46  ;;  %vm4378_vm12 = vcmp.lt.s32.totalorder %v4356_v51, 4  ;;  %vm4376_vm10 = vcmp.lt.s32.totalorder %v4356_v51, 2 }
 0x4da   :  { %v4327_v15 = vsel %vm12167_vm11, %v11945_v17, %v4324_v11  ;;  %v6172_v49 = vsub.s32 0, %v12249_v35  ;;  %vm4377_vm14 = vcmp.lt.s32.totalorder %v4356_v51, 3  ;;  %v4379_v50 = vsel %vm4375_vm9, %v4359_v37, %v4362_v21 }
 0x4db   :  { %7836 = vcosq.f32 %v4327_v15  ;;  %v4380_v34 = vsel %vm4378_vm12, %v4368_v14, 2102212464  ;;  %v4384_v45 = vsel %vm4378_vm12, %v4371_v43, 920167782  ;;  %v4383_v20 = vsel %vm4375_vm9, %v4362_v21, %v4365_v52 }
 0x4dc   :  { %7838 = vsinq.f32 %v4327_v15  ;;  %v7353_v31 = vmin.u32 %v6172_v49, %v12249_v35  ;;  %v4381_v0 = vsel %vm4377_vm14, %v4365_v52, %v4380_v34  ;;  %v4333_v53 = vand.u32 3, %v12214_v16 }
 0x4dd   :  { %v4385_v33 = vsel %vm4377_vm14, %v4368_v14, %v4384_v45  ;;  %v4387_v25 = vsel %vm4375_vm9, %v4365_v52, %v4368_v14  ;;  %v4388_v5 = vsel %vm4378_vm12, %v4374_v44, 1326507024  ;;  %vm12269_vm11 = vcmp.le.f32.partialorder %v6106_v28, 0.7853982 }
 0x4de   :  { %v6174_v32 = vclz %v7353_v31  ;;  %v6192_v8 = vsub.s32 4, %v12233_v6  ;;  %v4382_v4 = vsel %vm4376_vm10, %v4379_v50, %v4381_v0  ;;  %v4386_v40 = vsel %vm4376_vm10, %v4383_v20, %v4385_v33 }
 0x4df   :  { %v4389_v16 = vsel %vm4377_vm14, %v4371_v43, %v4388_v5  ;;  %v12277_v55 = vadd.f32 %v7953_v38, %v6214_v1  ;;  %vm4331_vm13 = vweird.f32 %v11945_v17  ;;  %vm4334_vm0 = vcmp.lt.s32.totalorder %v4333_v53, 2 }
 0x4e0   :  { %v7354_v42 = vadd.s32 4294967294, %v6174_v32  ;;  %v4390_v28 = vsel %vm4376_vm10, %v4387_v25, %v4389_v16  ;;  %v12282_v29 = vmul.u32.u64.low %v12241_v41, %v4386_v40  ;;  %v12283_v47 = vmul.u32.u64.high %v12241_v41, %v4386_v40, %v12282_v29 }
 0x4e1   :  { %vm6108_vm15 = vcmp.lt.s32.totalorder %v12045_v61, 0  ;;  %v12287_v30 = vmul.u32.u64.low %v12241_v41, %v4390_v28  ;;  %v12288_v57 = vmul.u32.u64.high %v12241_v41, %v4390_v28, %v12287_v30  ;;  %vm4335_vm2 = vcmp.eq.s32.totalorder %v4333_v53, 0 }
 0x4e2   :  { %v6162_v26 = vadd.s32 %v12192_v27, %v12203_v59  ;;  %vm7355_vm1 = vcmp.lt.s32.totalorder %v7354_v42, 0  ;;  %v6225_v7 = vand.u32 2139095040, %v12277_v55  ;;  %v6193_v22 = vsel %vm6108_vm15, %v6192_v8, %v12233_v6 }
 0x4e3   :  { %v6177_v51 = vsel %vm7355_vm1, 0, %v7354_v42  ;;  %v4398_v2 = vmul.u32 %v12241_v41, %v4382_v4  ;;  %v6222_v23 = vand.u32 2147483647, %v12277_v55  ;;  %v4401_v37 = vadd.s32 1, %v12283_v47 }
 0x4e4   :  { %v6178_v46 = vsub.s32 32, %v6177_v51  ;;  %v6179_v1 = vshll.u32 %v12249_v35, %v6177_v51  ;;  %v6182_v19 = vsub.s32 4294967266, %v6177_v51  ;;  %vm4338_vm6 = vcmp.eq.s32.totalorder %v4333_v53, 2 }
 0x4e5   :  { %v7837_v43 = vpop.eup %7836  ;;  %vm4400_vm3 = vc.u32 %v12288_v57, %v12282_v29  ;;  %v6226_v27 = vshrl.u32 %v6225_v7, 23  ;;  %v12303_v59 = vrot.slane %v10915_v18, %v9449_v13  ;;  %v6195_v35 = vsel %vm12269_vm11, 0, %v6193_v22 }
 0x4e6   :  { %v7839_v6 = vpop.eup %7838  ;;  %v4339_v3 = vxor.u32 2147483648, %v7837_v43  ;;  %v6180_v41 = vshrl.u32 %v6162_v26, %v6178_v46  ;;  %v6183_v21 = vadd.s32 127, %v6182_v19  ;;  %v4402_v52 = vsel %vm4400_vm3, %v4401_v37, %v12283_v47 }
 0x4e7   :  { %v4336_v14 = vxor.u32 2147483648, %v7839_v6  ;;  %v4403_v11 = vadd.s32 %v4402_v52, %v4398_v2  ;;  %v7356_v44 = vadd.s32 4294967169, %v6226_v27  ;;  %v6229_v34 = vand.u32 8388607, %v6222_v23 }
 0x4e8   :  { %v4340_v15 = vsel %vm4338_vm6, %v4339_v3, %v7839_v6  ;;  %v6181_v49 = vor.u32 %v6180_v41, %v6179_v1  ;;  %v6184_v50 = vshll.u32 %v6183_v21, 23  ;;  %v4451_v0 = vmul.f32 %v12243_v24, %v12303_v59 }
 0x4e9   :  { %v4337_v13 = vsel %vm4335_vm2, %v7837_v43, %v4336_v14  ;;  %v4404_v45 = vadd.s32 536870912, %v4403_v11  ;;  %v6232_v31 = vadd.s32 1, %v7356_v44  ;;  %v6199_v32 = vadd.s32 3, %v6195_v35 }
 0x4ea   :  { %v4341_v20 = vsel %vm4334_vm0, %v4337_v13, %v4340_v15  ;;  %v6185_v33 = vor.u32 4788187, %v6184_v50  ;;  %v6188_v25 = vcvt.s32.f32 %v6181_v49  ;;  %v6230_v40 = vor.u32 8388608, %v6229_v34 }
 0x4eb   :  { %v4342_v5 = vsel %vm4331_vm13, nan, %v4341_v20  ;;  %v12316_v8 = vshrl.u32 %v4404_v45, 30  ;;  %vm6233_vm4 = vcmp.gt.s32.totalorder %v6232_v31, 0  ;;  %v12319_v47 = vadd.f32 %v7953_v38, %v4451_v0 }
 0x4ec   :  { %5309 = vxpose.xlu0.b32.cont [7/16] %v4342_v5, 128  ;;  %v6186_v4 = vand.u32 2147483647, %v6185_v33  ;;  %v6234_v16 = vsel %vm6233_vm4, %v6232_v31, 0  ;;  %v12321_v53 = vand.u32 3, %v6199_v32  ;;  %v4399_v30 = vadd.s32 %v12282_v29, %v12288_v57 }
 0x4ed   :  { %v4406_v42 = vshll.u32 %v12316_v8, 30  ;;  %v6236_v28 = vand.u32 31, %v6234_v16  ;;  %v12328_v2 = vshll.u32 %v6230_v40, 8  ;;  %v4462_v19 = vand.u32 2139095040, %v12319_v47 }
 0x4ee   :  { %v6189_v24 = vmul.f32 %v6188_v25, %v6186_v4  ;;  %vm4345_vm5 = vcmp.lt.s32.totalorder %v12139_v36, 0  ;;  %v6235_v3 = vshrl.u32 %v6234_v16, 5  ;;  %vm6202_vm7 = vcmp.eq.s32.totalorder %v12321_v53, 0 }
 0x4ef   :  { %v12324_v17 = vsub.s32 %v4403_v11, %v4406_v42  ;;  %v6237_v26 = vsub.s32 32, %v6236_v28  ;;  %v6239_v51 = vshll.u32 %v8067_v54, %v6236_v28  ;;  %v6242_v22 = vshll.u32 %v8068_v56, %v6236_v28 }
 0x4f0   :  { %v6190_v7 = vxor.u32 2147483648, %v6189_v24  ;;  %v6245_v1 = vshll.u32 %v8069_v58, %v6236_v28  ;;  %v6248_v43 = vshll.u32 %v8070_v60, %v6236_v28  ;;  %v4429_v11 = vsub.s32 4, %v12316_v8 }
 0x4f1   :  { %v4409_v46 = vsub.s32 0, %v12324_v17  ;;  %v6240_v38 = vshrl.u32 %v8068_v56, %v6237_v26  ;;  %v6243_v57 = vshrl.u32 %v8069_v58, %v6237_v26  ;;  %v6246_v37 = vshrl.u32 %v8070_v60, %v6237_v26 }
 0x4f2   :  { %v6191_v29 = vsel %vm6108_vm15, %v6190_v7, %v6189_v24  ;;  %v6238_v41 = vshrl.u32 %v8067_v54, %v6237_v26  ;;  %v6249_v14 = vshrl.u32 %v8071_v62, %v6237_v26  ;;  %v6251_v48 = vshll.u32 %v8071_v62, %v6236_v28 }
 0x4f3   :  { %v6194_v27 = vsel %vm12269_vm11, %v12045_v61, %v6191_v29  ;;  %v7289_v6 = vmin.u32 %v4409_v46, %v12324_v17  ;;  %v6241_v21 = vor.u32 %v6240_v38, %v6239_v51  ;;  %v6244_v52 = vor.u32 %v6243_v57, %v6242_v22 }
 0x4f4   :  { %7840 = vcosq.f32 %v6194_v27  ;;  %v6247_v44 = vor.u32 %v6246_v37, %v6245_v1  ;;  %v6250_v15 = vor.u32 %v6249_v14, %v6248_v43  ;;  %v6252_v49 = vshrl.u32 %v8072_v10, %v6237_v26 }
 0x4f5   :  { %7842 = vsinq.f32 %v6194_v27  ;;  %v4411_v35 = vclz %v7289_v6  ;;  %v4463_v50 = vshrl.u32 %v4462_v19, 23  ;;  %vm6254_vm8 = vcmp.lt.s32.totalorder %v6235_v3, 1 }
 0x4f6   :  { %vm6255_vm9 = vcmp.lt.s32.totalorder %v6235_v3, 2  ;;  %vm6256_vm12 = vcmp.lt.s32.totalorder %v6235_v3, 3  ;;  %vm6201_vm10 = vcmp.lt.s32.totalorder %v12321_v53, 2  ;;  %v6253_v13 = vor.u32 %v6252_v49, %v6251_v48 }
 0x4f7   :  { %v7290_v34 = vadd.s32 4294967294, %v4411_v35  ;;  %vm6257_vm14 = vcmp.lt.s32.totalorder %v6235_v3, 4  ;;  %v6258_v45 = vsel %vm6254_vm8, %v6238_v41, %v6241_v21  ;;  %v6262_v31 = vsel %vm6254_vm8, %v6241_v21, %v6244_v52  ;;  %v12380_v21 = vld [vmem:[#allocation5 + $0x8] sm:$0xff] }
 0x4f8   :  { %vm6198_vm11 = vweird.f32 %v12045_v61  ;;  %vm12354_vm13 = vcmp.le.f32.partialorder %v4343_v9, 0.7853982  ;;  %v6259_v20 = vsel %vm6257_vm14, %v6247_v44, 2102212464  ;;  %v6263_v33 = vsel %vm6257_vm14, %v6250_v15, 920167782 }
 0x4f9   :  { %vm7291_vm0 = vcmp.lt.s32.totalorder %v7290_v34, 0  ;;  %v6266_v25 = vsel %vm6254_vm8, %v6244_v52, %v6247_v44  ;;  %v6260_v32 = vsel %vm6256_vm12, %v6244_v52, %v6259_v20  ;;  %v6264_v4 = vsel %vm6256_vm12, %v6247_v44, %v6263_v33 }
 0x4fa   :  { %v4414_v5 = vsel %vm7291_vm0, 0, %v7290_v34  ;;  %v6267_v40 = vsel %vm6257_vm14, %v6253_v13, 1326507024  ;;  %vm6205_vm15 = vcmp.eq.s32.totalorder %v12321_v53, 2  ;;  %v4430_v9 = vsel %vm4345_vm5, %v4429_v11, %v12316_v8 }
 0x4fb   :  { %v4415_v16 = vsub.s32 32, %v4414_v5  ;;  %v4416_v42 = vshll.u32 %v12324_v17, %v4414_v5  ;;  %v4419_v28 = vsub.s32 4294967266, %v4414_v5  ;;  %v6265_v24 = vsel %vm6255_vm9, %v6262_v31, %v6264_v4  ;;  %v12398_v31 = vld [vmem:[#allocation7 + $0x8] sm:$0xff] }
 0x4fc   :  { %v6268_v26 = vsel %vm6256_vm12, %v6250_v15, %v6267_v40  ;;  %v7292_v7 = vadd.s32 4294967169, %v4463_v50  ;;  %v6261_v46 = vsel %vm6255_vm9, %v6258_v45, %v6260_v32  ;;  %v4459_v3 = vand.u32 2147483647, %v12319_v47 }
 0x4fd   :  { %v4417_v51 = vshrl.u32 %v4399_v30, %v4415_v16  ;;  %v4420_v22 = vadd.s32 127, %v4419_v28  ;;  %v6269_v38 = vsel %vm6255_vm9, %v6266_v25, %v6268_v26  ;;  %v6277_v41 = vmul.u32 %v12328_v2, %v6261_v46 }
 0x4fe   :  { %v7841_v1 = vpop.eup %7840  ;;  %v12370_v19 = vmul.u32.u64.low %v12328_v2, %v6269_v38  ;;  %v12371_v17 = vmul.u32.u64.high %v12328_v2, %v6269_v38, %v12370_v19  ;;  %v12374_v29 = vmul.u32.u64.low %v12328_v2, %v6265_v24  ;;  %v12375_v57 = vmul.u32.u64.high %v12328_v2, %v6265_v24, %v12374_v29 }
 0x4ff   :  { %v7843_v8 = vpop.eup %7842  ;;  %v6206_v37 = vxor.u32 2147483648, %v7841_v1  ;;  %v4418_v43 = vor.u32 %v4417_v51, %v4416_v42  ;;  %v4421_v27 = vshll.u32 %v4420_v22, 23  ;;  %v4469_v30 = vadd.s32 1, %v7292_v7 }
 0x500   :  { %v6203_v6 = vxor.u32 2147483648, %v7843_v8  ;;  %v6215_v52 = vmul.f32 %v12380_v21, %v12221_v12  ;;  %v4432_v15 = vsel %vm12354_vm13, 0, %v4430_v9  ;;  %vm6279_vm1 = vc.u32 %v12371_v17, %v12374_v29 }
 0x501   :  { %v6207_v14 = vsel %vm6205_vm15, %v6206_v37, %v7843_v8  ;;  %v4422_v35 = vor.u32 4788187, %v4421_v27  ;;  %v4425_v11 = vcvt.s32.f32 %v4418_v43  ;;  %vm4470_vm2 = vcmp.gt.s32.totalorder %v4469_v30, 0 }
 0x502   :  { %v6204_v44 = vsel %vm6202_vm7, %v7841_v1, %v6203_v6  ;;  %v6280_v2 = vadd.s32 1, %v12375_v57  ;;  %v4471_v50 = vsel %vm4470_vm2, %v4469_v30, 0  ;;  %v12401_v20 = vadd.f32 %v12398_v31, %v6215_v52 }
 0x503   :  { %v6208_v48 = vsel %vm6201_vm10, %v6204_v44, %v6207_v14  ;;  %v4423_v49 = vand.u32 2147483647, %v4422_v35  ;;  %v4473_v45 = vand.u32 31, %v4471_v50  ;;  %v4436_v25 = vadd.s32 3, %v4432_v15 }
 0x504   :  { %v6209_v34 = vsel %vm6198_vm11, nan, %v6208_v48  ;;  %v6281_v13 = vsel %vm6279_vm1, %v6280_v2, %v12375_v57  ;;  %v4466_v53 = vand.u32 8388607, %v4459_v3  ;;  %v4472_v32 = vshrl.u32 %v4471_v50, 5 }
 0x505   :  { %7073 = vxpose.xlu1.b32.cont [8/16] %v6209_v34, 128  ;;  %v4426_v33 = vmul.f32 %v4425_v11, %v4423_v49  ;;  %v6282_v5 = vadd.s32 %v6281_v13, %v6277_v41  ;;  %v4474_v4 = vsub.s32 32, %v4473_v45  ;;  %v4476_v61 = vshll.u32 %v8067_v54, %v4473_v45 }
 0x506   :  { %v4479_v40 = vshll.u32 %v8068_v56, %v4473_v45  ;;  %v4482_v28 = vshll.u32 %v8069_v58, %v4473_v45  ;;  %v4485_v9 = vshll.u32 %v8070_v60, %v4473_v45  ;;  %v4488_v51 = vshll.u32 %v8071_v62, %v4473_v45 }
 0x507   :  { %v4427_v16 = vxor.u32 2147483648, %v4426_v33  ;;  %v6283_v42 = vadd.s32 536870912, %v6282_v5  ;;  %v4477_v24 = vshrl.u32 %v8068_v56, %v4474_v4  ;;  %v4480_v26 = vshrl.u32 %v8069_v58, %v4474_v4 }
 0x508   :  { %v4483_v7 = vshrl.u32 %v8070_v60, %v4474_v4  ;;  %v4486_v38 = vshrl.u32 %v8071_v62, %v4474_v4  ;;  %v4489_v1 = vshrl.u32 %v8072_v10, %v4474_v4  ;;  %v4467_v57 = vor.u32 8388608, %v4466_v53 }
 0x509   :  { %v4428_v22 = vsel %vm4345_vm5, %v4427_v16, %v4426_v33  ;;  %v6284_v46 = vshrl.u32 %v6283_v42, 30  ;;  %v4478_v8 = vor.u32 %v4477_v24, %v4476_v61  ;;  %v4481_v37 = vor.u32 %v4480_v26, %v4479_v40 }
 0x50a   :  { %v4431_v19 = vsel %vm12354_vm13, %v12139_v36, %v4428_v22  ;;  %v4475_v27 = vshrl.u32 %v8067_v54, %v4474_v4  ;;  %v4487_v30 = vor.u32 %v4486_v38, %v4485_v9  ;;  %v4484_v6 = vor.u32 %v4483_v7, %v4482_v28 }
 0x50b   :  { %7844 = vcosq.f32 %v4431_v19  ;;  %v6285_v43 = vshll.u32 %v6284_v46, 30  ;;  %v4490_v41 = vor.u32 %v4489_v1, %v4488_v51  ;;  %vm4491_vm6 = vcmp.lt.s32.totalorder %v4472_v32, 1 }
 0x50c   :  { %7846 = vsinq.f32 %v4431_v19  ;;  %v4437_v52 = vand.u32 3, %v4436_v25  ;;  %vm4493_vm3 = vcmp.lt.s32.totalorder %v4472_v32, 3  ;;  %vm4494_vm4 = vcmp.lt.s32.totalorder %v4472_v32, 4 }
 0x50d   :  { %v12421_v14 = vsub.s32 %v6282_v5, %v6285_v43  ;;  %vm4492_vm5 = vcmp.lt.s32.totalorder %v4472_v32, 2  ;;  %v4496_v0 = vsel %vm4494_vm4, %v4484_v6, 2102212464  ;;  %v4499_v35 = vsel %vm4491_vm6, %v4478_v8, %v4481_v37 }
 0x50e   :  { %v4507_v11 = vshll.u32 %v4467_v57, 8  ;;  %v6308_v15 = vsub.s32 4, %v6284_v46  ;;  %v4500_v2 = vsel %vm4494_vm4, %v4487_v30, 920167782  ;;  %v6329_v48 = vand.u32 2139095040, %v12401_v20 }
 0x50f   :  { %v6288_v44 = vsub.s32 0, %v12421_v14  ;;  %v4495_v49 = vsel %vm4491_vm6, %v4475_v27, %v4478_v8  ;;  %v4501_v50 = vsel %vm4493_vm3, %v4484_v6, %v4500_v2  ;;  %v4503_v34 = vsel %vm4491_vm6, %v4481_v37, %v4484_v6 }
 0x510   :  { %v4504_v13 = vsel %vm4494_vm4, %v4490_v41, 1326507024  ;;  %v4497_v33 = vsel %vm4493_vm3, %v4481_v37, %v4496_v0  ;;  %v4502_v25 = vsel %vm4492_vm5, %v4499_v35, %v4501_v50  ;;  %vm6224_vm7 = vcmp.lt.s32.totalorder %v12277_v55, 0 }
 0x511   :  { %v7357_v45 = vmin.u32 %v6288_v44, %v12421_v14  ;;  %v4505_v5 = vsel %vm4493_vm3, %v4487_v30, %v4504_v13  ;;  %v12432_v4 = vmul.u32.u64.low %v4507_v11, %v4502_v25  ;;  %v12433_v61 = vmul.u32.u64.high %v4507_v11, %v4502_v25, %v12432_v4 }
 0x512   :  { %v4506_v53 = vsel %vm4492_vm5, %v4503_v34, %v4505_v5  ;;  %vm4435_vm8 = vweird.f32 %v12139_v36  ;;  %vm12439_vm9 = vcmp.le.f32.partialorder %v6222_v23, 0.7853982  ;;  %v6309_v42 = vsel %vm6224_vm7, %v6308_v15, %v6284_v46 }
 0x513   :  { %v6290_v16 = vclz %v7357_v45  ;;  %v4498_v28 = vsel %vm4492_vm5, %v4495_v49, %v4497_v33  ;;  %v12446_v9 = vmul.u32.u64.low %v4507_v11, %v4506_v53  ;;  %v12447_v24 = vmul.u32.u64.high %v4507_v11, %v4506_v53, %v12446_v9 }
 0x514   :  { %v6330_v26 = vshrl.u32 %v6329_v48, 23  ;;  %vm4438_vm12 = vcmp.lt.s32.totalorder %v4437_v52, 2  ;;  %vm4439_vm10 = vcmp.eq.s32.totalorder %v4437_v52, 0  ;;  %vm4442_vm14 = vcmp.eq.s32.totalorder %v4437_v52, 2 }
 0x515   :  { %v7845_v7 = vpop.eup %7844  ;;  %v7358_v51 = vadd.s32 4294967294, %v6290_v16  ;;  %v6278_v38 = vadd.s32 %v12374_v29, %v12371_v17  ;;  %v4517_v1 = vadd.s32 1, %v12433_v61  ;;  %v6311_v32 = vsel %vm12439_vm9, 0, %v6309_v42 }
 0x516   :  { %v7847_v22 = vpop.eup %7846  ;;  %v4443_v23 = vxor.u32 2147483648, %v7845_v7  ;;  %v7360_v19 = vadd.s32 4294967169, %v6330_v26  ;;  %v4514_v57 = vmul.u32 %v4507_v11, %v4498_v28  ;;  %vm4516_vm13 = vc.u32 %v12447_v24, %v12432_v4 }
 0x517   :  { %v4440_v46 = vxor.u32 2147483648, %v7847_v22  ;;  %vm7359_vm11 = vcmp.lt.s32.totalorder %v7358_v51, 0  ;;  %v6326_v43 = vand.u32 2147483647, %v12401_v20  ;;  %v6315_v41 = vadd.s32 3, %v6311_v32 }
 0x518   :  { %v4444_v8 = vsel %vm4442_vm14, %v4443_v23, %v7847_v22  ;;  %v6293_v37 = vsel %vm7359_vm11, 0, %v7358_v51  ;;  %v4518_v0 = vsel %vm4516_vm13, %v4517_v1, %v12433_v61  ;;  %v6336_v35 = vadd.s32 1, %v7360_v19 }
 0x519   :  { %v4441_v27 = vsel %vm4439_vm10, %v7845_v7, %v4440_v46  ;;  %v6294_v30 = vsub.s32 32, %v6293_v37  ;;  %v6295_v17 = vshll.u32 %v12421_v14, %v6293_v37  ;;  %v6298_v29 = vsub.s32 4294967266, %v6293_v37 }
 0x51a   :  { %v4445_v6 = vsel %vm4438_vm12, %v4441_v27, %v4444_v8  ;;  %v4519_v2 = vadd.s32 %v4518_v0, %v4514_v57  ;;  %v6333_v48 = vand.u32 8388607, %v6326_v43  ;;  %vm6337_vm0 = vcmp.gt.s32.totalorder %v6336_v35, 0 }
 0x51b   :  { %v4446_v11 = vsel %vm4435_vm8, nan, %v4445_v6  ;;  %v6296_v44 = vshrl.u32 %v6278_v38, %v6294_v30  ;;  %v6299_v15 = vadd.s32 127, %v6298_v29  ;;  %v4452_v14 = vmul.f32 %v12380_v21, %v12303_v59 }
 0x51c   :  { %5310 = vxpose.xlu0.b32.cont [8/16] %v4446_v11, 128  ;;  %v4520_v50 = vadd.s32 536870912, %v4519_v2  ;;  %v6338_v34 = vsel %vm6337_vm0, %v6336_v35, 0  ;;  %v12467_v36 = vand.u32 3, %v6315_v41  ;;  %v6334_v5 = vor.u32 8388608, %v6333_v48 }
 0x51d   :  { %v6297_v52 = vor.u32 %v6296_v44, %v6295_v17  ;;  %v6300_v49 = vshll.u32 %v6299_v15, 23  ;;  %v6340_v13 = vand.u32 31, %v6338_v34  ;;  %v12469_v53 = vshrl.u32 %v6338_v34, 5 }
 0x51e   :  { %v4521_v25 = vshrl.u32 %v4520_v50, 30  ;;  %v12472_v16 = vadd.f32 %v12398_v31, %v4452_v14  ;;  %vm4461_vm15 = vcmp.lt.s32.totalorder %v12319_v47, 0  ;;  %v4515_v19 = vadd.s32 %v12432_v4, %v12447_v24 }
 0x51f   :  { %v6301_v45 = vor.u32 4788187, %v6300_v49  ;;  %v6304_v33 = vcvt.s32.f32 %v6297_v52  ;;  %v6341_v61 = vsub.s32 32, %v6340_v13  ;;  %v6343_v21 = vshll.u32 %v8067_v54, %v6340_v13 }
 0x520   :  { %v4522_v28 = vshll.u32 %v4521_v25, 30  ;;  %v6346_v9 = vshll.u32 %v8068_v56, %v6340_v13  ;;  %v6349_v51 = vshll.u32 %v8069_v58, %v6340_v13  ;;  %v6352_v31 = vshll.u32 %v8070_v60, %v6340_v13 }
 0x521   :  { %v6302_v42 = vand.u32 2147483647, %v6301_v45  ;;  %v6344_v26 = vshrl.u32 %v8068_v56, %v6341_v61  ;;  %v6347_v7 = vshrl.u32 %v8069_v58, %v6341_v61  ;;  %v6350_v22 = vshrl.u32 %v8070_v60, %v6341_v61 }
 0x522   :  { %v12480_v38 = vsub.s32 %v4519_v2, %v4522_v28  ;;  %v6353_v1 = vshrl.u32 %v8071_v62, %v6341_v61  ;;  %v12487_v46 = vshll.u32 %v6334_v5, 8  ;;  %v4563_v32 = vand.u32 2147483647, %v12472_v16 }
 0x523   :  { %v6305_v23 = vmul.f32 %v6304_v33, %v6302_v42  ;;  %v4566_v57 = vand.u32 2139095040, %v12472_v16  ;;  %v6342_v27 = vshrl.u32 %v8067_v54, %v6341_v61  ;;  %v6345_v30 = vor.u32 %v6344_v26, %v6343_v21 }
 0x524   :  { %v4525_v37 = vsub.s32 0, %v12480_v38  ;;  %v6348_v17 = vor.u32 %v6347_v7, %v6346_v9  ;;  %v6351_v29 = vor.u32 %v6350_v22, %v6349_v51  ;;  %v6355_v6 = vshll.u32 %v8071_v62, %v6340_v13 }
 0x525   :  { %v6306_v8 = vxor.u32 2147483648, %v6305_v23  ;;  %v6356_v41 = vshrl.u32 %v8072_v10, %v6341_v61  ;;  %vm12499_vm2 = vcmp.le.f32.partialorder %v4459_v3, 0.7853982  ;;  %v6354_v35 = vor.u32 %v6353_v1, %v6352_v31 }
 0x526   :  { %v7293_v0 = vmin.u32 %v4525_v37, %v12480_v38  ;;  %vm6358_vm1 = vcmp.lt.s32.totalorder %v12469_v53, 1  ;;  %vm6361_vm6 = vcmp.lt.s32.totalorder %v12469_v53, 4  ;;  %v4567_v15 = vshrl.u32 %v4566_v57, 23 }
 0x527   :  { %v6307_v4 = vsel %vm6224_vm7, %v6306_v8, %v6305_v23  ;;  %v6357_v44 = vor.u32 %v6356_v41, %v6355_v6  ;;  %v4545_v48 = vsub.s32 4, %v4521_v25  ;;  %vm6360_vm3 = vcmp.lt.s32.totalorder %v12469_v53, 3 }
 0x528   :  { %v6310_v11 = vsel %vm12439_vm9, %v12277_v55, %v6307_v4  ;;  %v4527_v2 = vclz %v7293_v0  ;;  %vm6359_vm4 = vcmp.lt.s32.totalorder %v12469_v53, 2  ;;  %v6363_v3 = vsel %vm6361_vm6, %v6351_v29, 2102212464  ;;  %v12554_v53 = vld [vmem:[#allocation5 + $0x10] sm:$0xff] }
 0x529   :  { %7848 = vcosq.f32 %v6310_v11  ;;  %v6366_v14 = vsel %vm6358_vm1, %v6345_v30, %v6348_v17  ;;  %v6362_v52 = vsel %vm6358_vm1, %v6342_v27, %v6345_v30  ;;  %v6367_v49 = vsel %vm6361_vm6, %v6354_v35, 920167782 }
 0x52a   :  { %7850 = vsinq.f32 %v6310_v11  ;;  %v7294_v40 = vadd.s32 4294967294, %v4527_v2  ;;  %v6370_v50 = vsel %vm6358_vm1, %v6348_v17, %v6351_v29  ;;  %v6364_v34 = vsel %vm6360_vm3, %v6348_v17, %v6363_v3 }
 0x52b   :  { %v6368_v13 = vsel %vm6360_vm3, %v6351_v29, %v6367_v49  ;;  %v6371_v45 = vsel %vm6361_vm6, %v6357_v44, 1326507024  ;;  %v7296_v33 = vadd.s32 4294967169, %v4567_v15  ;;  %v4546_v5 = vsel %vm4461_vm15, %v4545_v48, %v4521_v25 }
 0x52c   :  { %vm7295_vm5 = vcmp.lt.s32.totalorder %v7294_v40, 0  ;;  %v6369_v61 = vsel %vm6359_vm4, %v6366_v14, %v6368_v13  ;;  %v6372_v42 = vsel %vm6360_vm3, %v6354_v35, %v6371_v45  ;;  %vm6314_vm7 = vweird.f32 %v12277_v55  ;;  %v12566_v14 = vld [vmem:[#allocation7 + $0x10] sm:$0xff] }
 0x52d   :  { %v4530_v28 = vsel %vm7295_vm5, 0, %v7294_v40  ;;  %v6373_v21 = vsel %vm6359_vm4, %v6370_v50, %v6372_v42  ;;  %v12537_v9 = vmul.u32.u64.low %v12487_v46, %v6369_v61  ;;  %v12538_v26 = vmul.u32.u64.high %v12487_v46, %v6369_v61, %v12537_v9 }
 0x52e   :  { %v4531_v7 = vsub.s32 32, %v4530_v28  ;;  %v4532_v25 = vshll.u32 %v12480_v38, %v4530_v28  ;;  %v4535_v51 = vsub.s32 4294967266, %v4530_v28  ;;  %v6365_v22 = vsel %vm6359_vm4, %v6362_v52, %v6364_v34 }
 0x52f   :  { %v4548_v23 = vsel %vm12499_vm2, 0, %v4546_v5  ;;  %v12547_v31 = vmul.u32.u64.low %v12487_v46, %v6373_v21  ;;  %v12548_v1 = vmul.u32.u64.high %v12487_v46, %v6373_v21, %v12547_v31  ;;  %v4573_v57 = vadd.s32 1, %v7296_v33 }
 0x530   :  { %vm6317_vm8 = vcmp.lt.s32.totalorder %v12467_v36, 2  ;;  %vm6321_vm9 = vcmp.eq.s32.totalorder %v12467_v36, 2  ;;  %v4533_v8 = vshrl.u32 %v4515_v19, %v4531_v7  ;;  %v4536_v37 = vadd.s32 127, %v4535_v51 }
 0x531   :  { %v6381_v38 = vmul.u32 %v12487_v46, %v6365_v22  ;;  %v6384_v27 = vadd.s32 1, %v12538_v26  ;;  %vm4574_vm12 = vcmp.gt.s32.totalorder %v4573_v57, 0  ;;  %v6216_v30 = vmul.f32 %v12554_v53, %v12221_v12 }
 0x532   :  { %v4534_v29 = vor.u32 %v4533_v8, %v4532_v25  ;;  %v4537_v6 = vshll.u32 %v4536_v37, 23  ;;  %v4552_v41 = vadd.s32 3, %v4548_v23  ;;  %v4575_v4 = vsel %vm4574_vm12, %v4573_v57, 0 }
 0x533   :  { %v7849_v17 = vpop.eup %7848  ;;  %vm6318_vm10 = vcmp.eq.s32.totalorder %v12467_v36, 0  ;;  %vm6383_vm14 = vc.u32 %v12548_v1, %v12537_v9  ;;  %v4570_v46 = vand.u32 8388607, %v4563_v32  ;;  %v4577_v3 = vand.u32 31, %v4575_v4 }
 0x534   :  { %v7851_v0 = vpop.eup %7850  ;;  %v6322_v19 = vxor.u32 2147483648, %v7849_v17  ;;  %v4538_v11 = vor.u32 4788187, %v4537_v6  ;;  %v4541_v44 = vcvt.s32.f32 %v4534_v29  ;;  %v6385_v15 = vsel %vm6383_vm14, %v6384_v27, %v12538_v26 }
 0x535   :  { %v6319_v35 = vxor.u32 2147483648, %v7851_v0  ;;  %v6386_v48 = vadd.s32 %v6385_v15, %v6381_v38  ;;  %v12569_v40 = vadd.f32 %v12566_v14, %v6216_v30  ;;  %v12571_v50 = vand.u32 3, %v4552_v41 }
 0x536   :  { %v6323_v2 = vsel %vm6321_vm9, %v6322_v19, %v7851_v0  ;;  %v4539_v49 = vand.u32 2147483647, %v4538_v11  ;;  %v4576_v34 = vshrl.u32 %v4575_v4, 5  ;;  %v4578_v33 = vsub.s32 32, %v4577_v3 }
 0x537   :  { %v6320_v52 = vsel %vm6318_vm10, %v7849_v17, %v6319_v35  ;;  %v6387_v45 = vadd.s32 536870912, %v6386_v48  ;;  %v4580_v5 = vshll.u32 %v8067_v54, %v4577_v3  ;;  %v4571_v28 = vor.u32 8388608, %v4570_v46 }
 0x538   :  { %v6324_v13 = vsel %vm6317_vm8, %v6320_v52, %v6323_v2  ;;  %v4542_v42 = vmul.f32 %v4541_v44, %v4539_v49  ;;  %v4583_v21 = vshll.u32 %v8068_v56, %v4577_v3  ;;  %v4581_v7 = vshrl.u32 %v8068_v56, %v4578_v33 }
 0x539   :  { %v6325_v61 = vsel %vm6314_vm7, nan, %v6324_v13  ;;  %v12579_v26 = vshrl.u32 %v6387_v45, 30  ;;  %v4584_v25 = vshrl.u32 %v8069_v58, %v4578_v33  ;;  %v4586_v36 = vshll.u32 %v8069_v58, %v4577_v3 }
 0x53a   :  { %7074 = vxpose.xlu1.b32.cont [9/16] %v6325_v61, 128  ;;  %v4543_v51 = vxor.u32 2147483648, %v4542_v42  ;;  %v4587_v22 = vshrl.u32 %v8070_v60, %v4578_v33  ;;  %v4589_v23 = vshll.u32 %v8070_v60, %v4577_v3  ;;  %v4590_v55 = vshrl.u32 %v8071_v62, %v4578_v33 }
 0x53b   :  { %v6389_v31 = vshll.u32 %v12579_v26, 30  ;;  %v4579_v57 = vshrl.u32 %v8067_v54, %v4578_v33  ;;  %v4582_v8 = vor.u32 %v4581_v7, %v4580_v5  ;;  %vm4595_vm11 = vcmp.lt.s32.totalorder %v4576_v34, 1 }
 0x53c   :  { %v4544_v37 = vsel %vm4461_vm15, %v4543_v51, %v4542_v42  ;;  %v4585_v38 = vor.u32 %v4584_v25, %v4583_v21  ;;  %v4591_v27 = vor.u32 %v4590_v55, %v4589_v23  ;;  %v4592_v30 = vshll.u32 %v8071_v62, %v4577_v3 }
 0x53d   :  { %v4547_v17 = vsel %vm12499_vm2, %v12319_v47, %v4544_v37  ;;  %v12595_v29 = vsub.s32 %v6386_v48, %v6389_v31  ;;  %v4588_v6 = vor.u32 %v4587_v22, %v4586_v36  ;;  %v4593_v41 = vshrl.u32 %v8072_v10, %v4578_v33 }
 0x53e   :  { %7852 = vcosq.f32 %v4547_v17  ;;  %vm4597_vm13 = vcmp.lt.s32.totalorder %v4576_v34, 3  ;;  %vm4598_vm0 = vcmp.lt.s32.totalorder %v4576_v34, 4  ;;  %v6433_v4 = vand.u32 2139095040, %v12569_v40 }
 0x53f   :  { %7854 = vsinq.f32 %v4547_v17  ;;  %v6392_v0 = vsub.s32 0, %v12595_v29  ;;  %v4594_v19 = vor.u32 %v4593_v41, %v4592_v30  ;;  %vm4596_vm15 = vcmp.lt.s32.totalorder %v4576_v34, 2 }
 0x540   :  { %v4600_v46 = vsel %vm4598_vm0, %v4588_v6, 2102212464  ;;  %v4603_v24 = vsel %vm4595_vm11, %v4582_v8, %v4585_v38  ;;  %v4604_v35 = vsel %vm4598_vm0, %v4591_v27, 920167782  ;;  %v4611_v11 = vshll.u32 %v4571_v28, 8 }
 0x541   :  { %v7361_v44 = vmin.u32 %v6392_v0, %v12595_v29  ;;  %v4599_v15 = vsel %vm4595_vm11, %v4579_v57, %v4582_v8  ;;  %v4605_v2 = vsel %vm4597_vm13, %v4588_v6, %v4604_v35  ;;  %v4607_v48 = vsel %vm4595_vm11, %v4585_v38, %v4588_v6 }
 0x542   :  { %v4601_v3 = vsel %vm4597_vm13, %v4585_v38, %v4600_v46  ;;  %v4606_v52 = vsel %vm4596_vm15, %v4603_v24, %v4605_v2  ;;  %v4608_v49 = vsel %vm4598_vm0, %v4594_v19, 1326507024  ;;  %v6434_v13 = vshrl.u32 %v6433_v4, 23 }
 0x543   :  { %vm4551_vm2 = vweird.f32 %v12319_v47  ;;  %vm4554_vm1 = vcmp.lt.s32.totalorder %v12571_v50, 2  ;;  %vm12614_vm6 = vcmp.le.f32.partialorder %v6326_v43, 0.7853982  ;;  %vm6328_vm3 = vcmp.lt.s32.totalorder %v12401_v20, 0 }
 0x544   :  { %v6394_v33 = vclz %v7361_v44  ;;  %v6412_v5 = vsub.s32 4, %v12579_v26  ;;  %v4609_v61 = vsel %vm4597_vm13, %v4591_v27, %v4608_v49  ;;  %v4602_v7 = vsel %vm4596_vm15, %v4599_v15, %v4601_v3 }
 0x545   :  { %v12621_v42 = vmul.u32.u64.low %v4611_v11, %v4606_v52  ;;  %v12622_v28 = vmul.u32.u64.high %v4611_v11, %v4606_v52, %v12621_v42  ;;  %v4610_v25 = vsel %vm4596_vm15, %v4607_v48, %v4609_v61  ;;  %v7364_v43 = vadd.s32 4294967169, %v6434_v13 }
 0x546   :  { %v7362_v21 = vadd.s32 4294967294, %v6394_v33  ;;  %vm4555_vm4 = vcmp.eq.s32.totalorder %v12571_v50, 0  ;;  %v12628_v36 = vmul.u32.u64.low %v4611_v11, %v4610_v25  ;;  %v12629_v51 = vmul.u32.u64.high %v4611_v11, %v4610_v25, %v12628_v36 }
 0x547   :  { %v6430_v22 = vand.u32 2147483647, %v12569_v40  ;;  %vm4558_vm5 = vcmp.eq.s32.totalorder %v12571_v50, 2  ;;  %v6382_v23 = vadd.s32 %v12537_v9, %v12548_v1  ;;  %v6440_v55 = vadd.s32 1, %v7364_v43 }
 0x548   :  { %vm7363_vm7 = vcmp.lt.s32.totalorder %v7362_v21, 0  ;;  %v7853_v31 = vpop.eup %7852  ;;  %v6413_v34 = vsel %vm6328_vm3, %v6412_v5, %v12579_v26  ;;  %v4618_v8 = vmul.u32 %v4611_v11, %v4602_v7  ;;  %v4621_v37 = vadd.s32 1, %v12622_v28 }
 0x549   :  { %v6397_v57 = vsel %vm7363_vm7, 0, %v7362_v21  ;;  %v7855_v38 = vpop.eup %7854  ;;  %v4559_v27 = vxor.u32 2147483648, %v7853_v31  ;;  %vm4620_vm8 = vc.u32 %v12629_v51, %v12621_v42  ;;  %v6437_v9 = vand.u32 8388607, %v6430_v22 }
 0x54a   :  { %v6398_v30 = vsub.s32 32, %v6397_v57  ;;  %v6399_v17 = vshll.u32 %v12595_v29, %v6397_v57  ;;  %v6402_v6 = vsub.s32 4294967266, %v6397_v57  ;;  %v4556_v41 = vxor.u32 2147483648, %v7855_v38 }
 0x54b   :  { %vm6441_vm9 = vcmp.gt.s32.totalorder %v6440_v55, 0  ;;  %v4560_v1 = vsel %vm4558_vm5, %v4559_v27, %v7855_v38  ;;  %v4622_v0 = vsel %vm4620_vm8, %v4621_v37, %v12622_v28  ;;  %v6415_v29 = vsel %vm12614_vm6, 0, %v6413_v34 }
 0x54c   :  { %v6400_v26 = vshrl.u32 %v6382_v23, %v6398_v30  ;;  %v6403_v4 = vadd.s32 127, %v6402_v6  ;;  %v4557_v19 = vsel %vm4555_vm4, %v7853_v31, %v4556_v41  ;;  %v4623_v46 = vadd.s32 %v4622_v0, %v4618_v8 }
 0x54d   :  { %v6442_v24 = vsel %vm6441_vm9, %v6440_v55, 0  ;;  %v4561_v35 = vsel %vm4554_vm1, %v4557_v19, %v4560_v1  ;;  %v6419_v49 = vadd.s32 3, %v6415_v29  ;;  %v6438_v33 = vor.u32 8388608, %v6437_v9 }
 0x54e   :  { %v6401_v11 = vor.u32 %v6400_v26, %v6399_v17  ;;  %v6404_v44 = vshll.u32 %v6403_v4, 23  ;;  %v4562_v15 = vsel %vm4551_vm2, nan, %v4561_v35  ;;  %v4624_v2 = vadd.s32 536870912, %v4623_v46 }
 0x54f   :  { %v6444_v48 = vand.u32 31, %v6442_v24  ;;  %5311 = vxpose.xlu0.b32.cont [9/16] %v4562_v15, 128  ;;  %v6443_v5 = vshrl.u32 %v6442_v24, 5  ;;  %v12664_v34 = vand.u32 3, %v6419_v49  ;;  %v4453_v38 = vmul.f32 %v12554_v53, %v12303_v59 }
 0x550   :  { %v6405_v3 = vor.u32 4788187, %v6404_v44  ;;  %v6408_v52 = vcvt.s32.f32 %v6401_v11  ;;  %v4625_v13 = vshrl.u32 %v4624_v2, 30  ;;  %v12671_v6 = vshll.u32 %v6438_v33, 8 }
 0x551   :  { %v6445_v61 = vsub.s32 32, %v6444_v48  ;;  %v6447_v21 = vshll.u32 %v8067_v54, %v6444_v48  ;;  %v6450_v50 = vshll.u32 %v8068_v56, %v6444_v48  ;;  %v6453_v7 = vshll.u32 %v8069_v58, %v6444_v48 }
 0x552   :  { %v6406_v28 = vand.u32 2147483647, %v6405_v3  ;;  %v4626_v25 = vshll.u32 %v4625_v13, 30  ;;  %v6456_v43 = vshll.u32 %v8070_v60, %v6444_v48  ;;  %v6459_v36 = vshll.u32 %v8071_v62, %v6444_v48 }
 0x553   :  { %v6448_v47 = vshrl.u32 %v8068_v56, %v6445_v61  ;;  %v6451_v55 = vshrl.u32 %v8069_v58, %v6445_v61  ;;  %v6454_v31 = vshrl.u32 %v8070_v60, %v6445_v61  ;;  %v6457_v57 = vshrl.u32 %v8071_v62, %v6445_v61 }
 0x554   :  { %v6409_v23 = vmul.f32 %v6408_v52, %v6406_v28  ;;  %v12666_v8 = vsub.s32 %v4623_v46, %v4626_v25  ;;  %v6460_v37 = vshrl.u32 %v8072_v10, %v6445_v61  ;;  %vm4565_vm12 = vcmp.lt.s32.totalorder %v12472_v16, 0 }
 0x555   :  { %v6449_v30 = vor.u32 %v6448_v47, %v6447_v21  ;;  %v6452_v17 = vor.u32 %v6451_v55, %v6450_v50  ;;  %v6455_v9 = vor.u32 %v6454_v31, %v6453_v7  ;;  %v6458_v1 = vor.u32 %v6457_v57, %v6456_v43 }
 0x556   :  { %v6410_v27 = vxor.u32 2147483648, %v6409_v23  ;;  %v4629_v41 = vsub.s32 0, %v12666_v8  ;;  %vm6462_vm10 = vcmp.lt.s32.totalorder %v6443_v5, 1  ;;  %v6446_v4 = vshrl.u32 %v8067_v54, %v6445_v61 }
 0x557   :  { %v6461_v0 = vor.u32 %v6460_v37, %v6459_v36  ;;  %vm6465_vm14 = vcmp.lt.s32.totalorder %v6443_v5, 4  ;;  %vm6464_vm11 = vcmp.lt.s32.totalorder %v6443_v5, 3  ;;  %vm6463_vm13 = vcmp.lt.s32.totalorder %v6443_v5, 2 }
 0x558   :  { %v6411_v26 = vsel %vm6328_vm3, %v6410_v27, %v6409_v23  ;;  %v7297_v19 = vmin.u32 %v4629_v41, %v12666_v8  ;;  %v6467_v29 = vsel %vm6465_vm14, %v6455_v9, 2102212464  ;;  %v6470_v46 = vsel %vm6462_vm10, %v6449_v30, %v6452_v17 }
 0x559   :  { %v6414_v53 = vsel %vm12614_vm6, %v12401_v20, %v6411_v26  ;;  %v6471_v24 = vsel %vm6465_vm14, %v6458_v1, 920167782  ;;  %v4649_v11 = vsub.s32 4, %v4625_v13  ;;  %v12686_v44 = vadd.f32 %v12566_v14, %v4453_v38 }
 0x55a   :  { %7856 = vcosq.f32 %v6414_v53  ;;  %v4631_v35 = vclz %v7297_v19  ;;  %v6466_v45 = vsel %vm6462_vm10, %v6446_v4, %v6449_v30  ;;  %v6468_v15 = vsel %vm6464_vm11, %v6452_v17, %v6467_v29 }
 0x55b   :  { %7858 = vsinq.f32 %v6414_v53  ;;  %v6472_v2 = vsel %vm6464_vm11, %v6455_v9, %v6471_v24  ;;  %v6474_v48 = vsel %vm6462_vm10, %v6452_v17, %v6455_v9  ;;  %v4619_v3 = vadd.s32 %v12621_v42, %v12629_v51 }
 0x55c   :  { %v7298_v52 = vadd.s32 4294967294, %v4631_v35  ;;  %v6473_v49 = vsel %vm6463_vm13, %v6470_v46, %v6472_v2  ;;  %v6475_v33 = vsel %vm6465_vm14, %v6461_v0, 1326507024  ;;  %v4667_v21 = vand.u32 2147483647, %v12686_v44 }
 0x55d   :  { %v6476_v61 = vsel %vm6464_vm11, %v6458_v1, %v6475_v33  ;;  %v12698_v14 = vmul.u32.u64.low %v12671_v6, %v6473_v49  ;;  %v12699_v28 = vmul.u32.u64.high %v12671_v6, %v6473_v49, %v12698_v14  ;;  %v6469_v50 = vsel %vm6463_vm13, %v6466_v45, %v6468_v15 }
 0x55e   :  { %vm7299_vm0 = vcmp.lt.s32.totalorder %v7298_v52, 0  ;;  %v6477_v7 = vsel %vm6463_vm13, %v6474_v48, %v6476_v61  ;;  %v4670_v42 = vand.u32 2139095040, %v12686_v44  ;;  %v4650_v25 = vsel %vm4565_vm12, %v4649_v11, %v4625_v13  ;;  %v7958_v11 = vld [vmem:[#allocation5 + $0x18] sm:$0xff] }
 0x55f   :  { %v4634_v51 = vsel %vm7299_vm0, 0, %v7298_v52  ;;  %v12708_v47 = vmul.u32.u64.low %v12671_v6, %v6477_v7  ;;  %v12709_v43 = vmul.u32.u64.high %v12671_v6, %v6477_v7, %v12708_v47  ;;  %vm6418_vm15 = vweird.f32 %v12401_v20 }
 0x560   :  { %v4635_v36 = vsub.s32 32, %v4634_v51  ;;  %v4636_v23 = vshll.u32 %v12666_v8, %v4634_v51  ;;  %v4639_v55 = vsub.s32 4294967266, %v4634_v51  ;;  %v4671_v31 = vshrl.u32 %v4670_v42, 23  ;;  %v12743_v42 = vld [vmem:[#allocation7 + $0x18] sm:$0xff] }
 0x561   :  { %vm12715_vm2 = vcmp.le.f32.partialorder %v4563_v32, 0.7853982  ;;  %v6485_v57 = vmul.u32 %v12671_v6, %v6469_v50  ;;  %v6488_v13 = vadd.s32 1, %v12699_v28  ;;  %vm6422_vm1 = vcmp.eq.s32.totalorder %v12664_v34, 0 }
 0x562   :  { %v4637_v37 = vshrl.u32 %v4619_v3, %v4635_v36  ;;  %v4640_v38 = vadd.s32 127, %v4639_v55  ;;  %v7300_v27 = vadd.s32 4294967169, %v4671_v31  ;;  %vm6425_vm6 = vcmp.eq.s32.totalorder %v12664_v34, 2 }
 0x563   :  { %v4652_v30 = vsel %vm12715_vm2, 0, %v4650_v25  ;;  %vm6487_vm3 = vc.u32 %v12709_v43, %v12698_v14  ;;  %v4674_v32 = vand.u32 8388607, %v4667_v21  ;;  %vm6421_vm4 = vcmp.lt.s32.totalorder %v12664_v34, 2 }
 0x564   :  { %v7857_v8 = vpop.eup %7856  ;;  %v4638_v41 = vor.u32 %v4637_v37, %v4636_v23  ;;  %v4641_v9 = vshll.u32 %v4640_v38, 23  ;;  %v6489_v1 = vsel %vm6487_vm3, %v6488_v13, %v12699_v28  ;;  %v4677_v0 = vadd.s32 1, %v7300_v27 }
 0x565   :  { %v7859_v17 = vpop.eup %7858  ;;  %v6426_v6 = vxor.u32 2147483648, %v7857_v8  ;;  %v6490_v4 = vadd.s32 %v6489_v1, %v6485_v57  ;;  %v4656_v46 = vadd.s32 3, %v4652_v30  ;;  %v6217_v45 = vmul.f32 %v7958_v11, %v12221_v12 }
 0x566   :  { %v6423_v26 = vxor.u32 2147483648, %v7859_v17  ;;  %v4642_v19 = vor.u32 4788187, %v4641_v9  ;;  %v4645_v29 = vcvt.s32.f32 %v4638_v41  ;;  %vm4678_vm5 = vcmp.gt.s32.totalorder %v4677_v0, 0 }
 0x567   :  { %v6427_v53 = vsel %vm6425_vm6, %v6426_v6, %v7859_v17  ;;  %v6491_v35 = vadd.s32 536870912, %v6490_v4  ;;  %v4675_v48 = vor.u32 8388608, %v4674_v32  ;;  %v4679_v3 = vsel %vm4678_vm5, %v4677_v0, 0 }
 0x568   :  { %v6424_v24 = vsel %vm6422_vm1, %v7857_v8, %v6423_v26  ;;  %v4643_v2 = vand.u32 2147483647, %v4642_v19  ;;  %v4681_v33 = vand.u32 31, %v4679_v3  ;;  %v12735_v28 = vand.u32 3, %v4656_v46 }
 0x569   :  { %v6428_v15 = vsel %vm6421_vm4, %v6424_v24, %v6427_v53  ;;  %v6492_v49 = vshrl.u32 %v6491_v35, 30  ;;  %v12738_v34 = vmul.f32 %v7958_v11, %v12303_v59  ;;  %v12741_v50 = vadd.s32 %v12698_v14, %v12709_v43 }
 0x56a   :  { %v6429_v52 = vsel %vm6418_vm15, nan, %v6428_v15  ;;  %v4646_v61 = vmul.f32 %v4645_v29, %v4643_v2  ;;  %v4682_v7 = vsub.s32 32, %v4681_v33  ;;  %v12746_v51 = vadd.f32 %v12743_v42, %v6217_v45 }
 0x56b   :  { %7075 = vxpose.xlu1.b32.cont [10/16] %v6429_v52, 128  ;;  %v6493_v12 = vshll.u32 %v6492_v49, 30  ;;  %v4680_v25 = vshrl.u32 %v4679_v3, 5  ;;  %v4684_v47 = vshll.u32 %v8067_v54, %v4681_v33  ;;  %v12749_v36 = vshll.u32 %v4675_v48, 8 }
 0x56c   :  { %v4647_v20 = vxor.u32 2147483648, %v4646_v61  ;;  %v4685_v59 = vshrl.u32 %v8068_v56, %v4682_v7  ;;  %v4687_v14 = vshll.u32 %v8068_v56, %v4681_v33  ;;  %v4690_v43 = vshll.u32 %v8069_v58, %v4681_v33 }
 0x56d   :  { %v12751_v23 = vsub.s32 %v6490_v4, %v6493_v12  ;;  %vm6432_vm7 = vcmp.lt.s32.totalorder %v12569_v40, 0  ;;  %v4688_v31 = vshrl.u32 %v8069_v58, %v4682_v7  ;;  %v4691_v57 = vshrl.u32 %v8070_v60, %v4682_v7 }
 0x56e   :  { %v4648_v55 = vsel %vm4565_vm12, %v4647_v20, %v4646_v61  ;;  %v4693_v13 = vshll.u32 %v8070_v60, %v4681_v33  ;;  %v6534_v27 = vand.u32 2147483647, %v12746_v51  ;;  %v6537_v8 = vand.u32 2139095040, %v12746_v51 }
 0x56f   :  { %v4651_v37 = vsel %vm12715_vm2, %v12472_v16, %v4648_v55  ;;  %v6496_v38 = vsub.s32 0, %v12751_v23  ;;  %v4683_v30 = vshrl.u32 %v8067_v54, %v4682_v7  ;;  %v4686_v32 = vor.u32 %v4685_v59, %v4684_v47 }
 0x570   :  { %7860 = vcosq.f32 %v4651_v37  ;;  %v4694_v17 = vshrl.u32 %v8071_v62, %v4682_v7  ;;  %v4689_v41 = vor.u32 %v4688_v31, %v4687_v14  ;;  %v4696_v9 = vshll.u32 %v8071_v62, %v4681_v33 }
 0x571   :  { %7862 = vsinq.f32 %v4651_v37  ;;  %v7365_v6 = vmin.u32 %v6496_v38, %v12751_v23  ;;  %vm12774_vm8 = vcmp.le.f32.partialorder %v6430_v22, 0.7853982  ;;  %v4692_v1 = vor.u32 %v4691_v57, %v4690_v43 }
 0x572   :  { %v4695_v26 = vor.u32 %v4694_v17, %v4693_v13  ;;  %v4697_v4 = vshrl.u32 %v8072_v10, %v4682_v7  ;;  %vm4699_vm9 = vcmp.lt.s32.totalorder %v4680_v25, 1  ;;  %vm4659_vm12 = vcmp.eq.s32.totalorder %v12735_v28, 0 }
 0x573   :  { %v6498_v0 = vclz %v7365_v6  ;;  %v6516_v53 = vsub.s32 4, %v6492_v49  ;;  %vm4700_vm10 = vcmp.lt.s32.totalorder %v4680_v25, 2  ;;  %v6538_v19 = vshrl.u32 %v6537_v8, 23 }
 0x574   :  { %vm4658_vm14 = vcmp.lt.s32.totalorder %v12735_v28, 2  ;;  %v4698_v29 = vor.u32 %v4697_v4, %v4696_v9  ;;  %vm4701_vm11 = vcmp.lt.s32.totalorder %v4680_v25, 3  ;;  %vm4702_vm13 = vcmp.lt.s32.totalorder %v4680_v25, 4 }
 0x575   :  { %v4703_v22 = vsel %vm4699_vm9, %v4683_v30, %v4686_v32  ;;  %vm4655_vm0 = vweird.f32 %v12472_v16  ;;  %v7366_v46 = vadd.s32 4294967294, %v6498_v0  ;;  %v4704_v24 = vsel %vm4702_vm13, %v4692_v1, 2102212464 }
 0x576   :  { %v4707_v35 = vsel %vm4699_vm9, %v4686_v32, %v4689_v41  ;;  %v4708_v11 = vsel %vm4702_vm13, %v4695_v26, 920167782  ;;  %v4705_v45 = vsel %vm4701_vm11, %v4689_v41, %v4704_v24  ;;  %v4711_v2 = vsel %vm4699_vm9, %v4689_v41, %v4692_v1 }
 0x577   :  { %v4709_v15 = vsel %vm4701_vm11, %v4692_v1, %v4708_v11  ;;  %v4712_v48 = vsel %vm4702_vm13, %v4698_v29, 1326507024  ;;  %vm7367_vm15 = vcmp.lt.s32.totalorder %v7366_v46, 0  ;;  %v6517_v3 = vsel %vm6432_vm7, %v6516_v53, %v6492_v49 }
 0x578   :  { %v4710_v52 = vsel %vm4700_vm10, %v4707_v35, %v4709_v15  ;;  %v4713_v33 = vsel %vm4701_vm11, %v4695_v26, %v4712_v48  ;;  %v6501_v61 = vsel %vm7367_vm15, 0, %v7366_v46  ;;  %v4706_v43 = vsel %vm4700_vm10, %v4703_v22, %v4705_v45 }
 0x579   :  { %v4714_v12 = vsel %vm4700_vm10, %v4711_v2, %v4713_v33  ;;  %v12790_v7 = vmul.u32.u64.low %v12749_v36, %v4710_v52  ;;  %v12791_v20 = vmul.u32.u64.high %v12749_v36, %v4710_v52, %v12790_v7  ;;  %v6502_v47 = vsub.s32 32, %v6501_v61 }
 0x57a   :  { %v6503_v59 = vshll.u32 %v12751_v23, %v6501_v61  ;;  %v6506_v14 = vsub.s32 4294967266, %v6501_v61  ;;  %v7861_v55 = vpop.eup %7860  ;;  %vm4662_vm2 = vcmp.eq.s32.totalorder %v12735_v28, 2  ;;  %v7368_v57 = vadd.s32 4294967169, %v6538_v19 }
 0x57b   :  { %v12798_v49 = vmul.u32.u64.low %v12749_v36, %v4714_v12  ;;  %v12799_v31 = vmul.u32.u64.high %v12749_v36, %v4714_v12, %v12798_v49  ;;  %v7863_v13 = vpop.eup %7862  ;;  %v4663_v37 = vxor.u32 2147483648, %v7861_v55  ;;  %v6504_v38 = vshrl.u32 %v12741_v50, %v6502_v47 }
 0x57c   :  { %v6507_v8 = vadd.s32 127, %v6506_v14  ;;  %v6519_v30 = vsel %vm12774_vm8, 0, %v6517_v3  ;;  %v4660_v23 = vxor.u32 2147483648, %v7863_v13  ;;  %v4722_v25 = vmul.u32 %v12749_v36, %v4706_v43 }
 0x57d   :  { %v4725_v32 = vadd.s32 1, %v12791_v20  ;;  %v6544_v17 = vadd.s32 1, %v7368_v57  ;;  %v4664_v6 = vsel %vm4662_vm2, %v4663_v37, %v7863_v13  ;;  %v6505_v41 = vor.u32 %v6504_v38, %v6503_v59 }
 0x57e   :  { %v6508_v9 = vshll.u32 %v6507_v8, 23  ;;  %v6541_v1 = vand.u32 8388607, %v6534_v27  ;;  %v4661_v26 = vsel %vm4659_vm12, %v7861_v55, %v4660_v23  ;;  %v6523_v50 = vadd.s32 3, %v6519_v30 }
 0x57f   :  { %vm4724_vm1 = vc.u32 %v12799_v31, %v12790_v7  ;;  %vm6545_vm6 = vcmp.gt.s32.totalorder %v6544_v17, 0  ;;  %v4665_v36 = vsel %vm4658_vm14, %v4661_v26, %v4664_v6  ;;  %v6512_v0 = vcvt.s32.f32 %v6505_v41 }
 0x580   :  { %v6509_v4 = vor.u32 4788187, %v6508_v9  ;;  %v4726_v53 = vsel %vm4724_vm1, %v4725_v32, %v12791_v20  ;;  %v4666_v19 = vsel %vm4655_vm0, nan, %v4665_v36  ;;  %v6546_v22 = vsel %vm6545_vm6, %v6544_v17, 0 }
 0x581   :  { %v4727_v29 = vadd.s32 %v4726_v53, %v4722_v25  ;;  %5312 = vxpose.xlu0.b32.cont [10/16] %v4666_v19, 128  ;;  %v6548_v24 = vand.u32 31, %v6546_v22  ;;  %v6542_v11 = vor.u32 8388608, %v6541_v1  ;;  %v12819_v45 = vadd.f32 %v12743_v42, %v12738_v34 }
 0x582   :  { %v6510_v46 = vand.u32 2147483647, %v6509_v4  ;;  %v12821_v15 = vand.u32 3, %v6523_v50  ;;  %v6547_v47 = vshrl.u32 %v6546_v22, 5  ;;  %vm4669_vm3 = vcmp.lt.s32.totalorder %v12686_v44, 0 }
 0x583   :  { %v4728_v35 = vadd.s32 536870912, %v4727_v29  ;;  %v6549_v2 = vsub.s32 32, %v6548_v24  ;;  %v6551_v48 = vshll.u32 %v8067_v54, %v6548_v24  ;;  %v6554_v16 = vshll.u32 %v8068_v56, %v6548_v24 }
 0x584   :  { %v6513_v28 = vmul.f32 %v6512_v0, %v6510_v46  ;;  %v6557_v52 = vshll.u32 %v8069_v58, %v6548_v24  ;;  %v6560_v33 = vshll.u32 %v8070_v60, %v6548_v24  ;;  %v6563_v42 = vshll.u32 %v8071_v62, %v6548_v24 }
 0x585   :  { %v12824_v3 = vshrl.u32 %v4728_v35, 30  ;;  %v6552_v12 = vshrl.u32 %v8068_v56, %v6549_v2  ;;  %v6555_v34 = vshrl.u32 %v8069_v58, %v6549_v2  ;;  %v6558_v59 = vshrl.u32 %v8070_v60, %v6549_v2 }
 0x586   :  { %v6514_v61 = vxor.u32 2147483648, %v6513_v28  ;;  %v6561_v14 = vshrl.u32 %v8071_v62, %v6549_v2  ;;  %v6550_v55 = vshrl.u32 %v8067_v54, %v6549_v2  ;;  %v6564_v49 = vshrl.u32 %v8072_v10, %v6549_v2 }
 0x587   :  { %v4730_v20 = vshll.u32 %v12824_v3, 30  ;;  %v4774_v57 = vand.u32 2139095040, %v12819_v45  ;;  %v6553_v38 = vor.u32 %v6552_v12, %v6551_v48  ;;  %v6556_v8 = vor.u32 %v6555_v34, %v6554_v16 }
 0x588   :  { %v6515_v43 = vsel %vm6432_vm7, %v6514_v61, %v6513_v28  ;;  %v6559_v30 = vor.u32 %v6558_v59, %v6557_v52  ;;  %v6562_v23 = vor.u32 %v6561_v14, %v6560_v33  ;;  %v6565_v25 = vor.u32 %v6564_v49, %v6563_v42 }
 0x589   :  { %v6518_v13 = vsel %vm12774_vm8, %v12569_v40, %v6515_v43  ;;  %v12843_v37 = vsub.s32 %v4727_v29, %v4730_v20  ;;  %vm6566_vm4 = vcmp.lt.s32.totalorder %v6547_v47, 1  ;;  %v6582_v17 = vshll.u32 %v6542_v11, 8 }
 0x58a   :  { %7864 = vcosq.f32 %v6518_v13  ;;  %vm6567_vm5 = vcmp.lt.s32.totalorder %v6547_v47, 2  ;;  %vm6568_vm7 = vcmp.lt.s32.totalorder %v6547_v47, 3  ;;  %vm6569_vm9 = vcmp.lt.s32.totalorder %v6547_v47, 4 }
 0x58b   :  { %7866 = vsinq.f32 %v6518_v13  ;;  %v4733_v32 = vsub.s32 0, %v12843_v37  ;;  %v4775_v5 = vshrl.u32 %v4774_v57, 23  ;;  %v6570_v41 = vsel %vm6566_vm4, %v6550_v55, %v6553_v38 }
 0x58c   :  { %v6571_v9 = vsel %vm6569_vm9, %v6559_v30, 2102212464  ;;  %v6574_v1 = vsel %vm6566_vm4, %v6553_v38, %v6556_v8  ;;  %v6575_v50 = vsel %vm6569_vm9, %v6562_v23, 920167782  ;;  %v6578_v36 = vsel %vm6566_vm4, %v6556_v8, %v6559_v30 }
 0x58d   :  { %v7301_v6 = vmin.u32 %v4733_v32, %v12843_v37  ;;  %v6572_v26 = vsel %vm6568_vm7, %v6556_v8, %v6571_v9  ;;  %v6579_v4 = vsel %vm6569_vm9, %v6565_v25, 1326507024  ;;  %vm6522_vm8 = vweird.f32 %v12569_v40 }
 0x58e   :  { %vm6525_vm12 = vcmp.lt.s32.totalorder %v12821_v15, 2  ;;  %vm12853_vm10 = vcmp.le.f32.partialorder %v4667_v21, 0.7853982  ;;  %v4771_v19 = vand.u32 2147483647, %v12819_v45  ;;  %v12860_v29 = vrot.slane %v10832_v39, %v10137_v63 }
 0x58f   :  { %v4735_v53 = vclz %v7301_v6  ;;  %v4753_v22 = vsub.s32 4, %v12824_v3  ;;  %v6576_v46 = vsel %vm6568_vm7, %v6559_v30, %v6575_v50  ;;  %v6580_v24 = vsel %vm6568_vm7, %v6562_v23, %v6579_v4 }
 0x590   :  { %v7304_v35 = vadd.s32 4294967169, %v4775_v5  ;;  %v6573_v21 = vsel %vm6567_vm5, %v6570_v41, %v6572_v26  ;;  %v6577_v28 = vsel %vm6567_vm5, %v6574_v1, %v6576_v46  ;;  %v6581_v2 = vsel %vm6567_vm5, %v6578_v36, %v6580_v24  ;;  %v12897_v41 = vld [vmem:[#allocation5] sm:$0xff] }
 0x591   :  { %v7302_v11 = vadd.s32 4294967294, %v4735_v53  ;;  %v12868_v48 = vmul.u32.u64.low %v6582_v17, %v6581_v2  ;;  %v12869_v16 = vmul.u32.u64.high %v6582_v17, %v6581_v2, %v12868_v48  ;;  %vm6526_vm14 = vcmp.eq.s32.totalorder %v12821_v15, 0 }
 0x592   :  { %v12871_v52 = vmul.u32.u64.low %v6582_v17, %v6577_v28  ;;  %v12872_v39 = vmul.u32.u64.high %v6582_v17, %v6577_v28, %v12871_v52  ;;  %v4723_v33 = vadd.s32 %v12790_v7, %v12799_v31  ;;  %v4781_v61 = vadd.s32 1, %v7304_v35 }
 0x593   :  { %vm7303_vm11 = vcmp.lt.s32.totalorder %v7302_v11, 0  ;;  %vm6529_vm13 = vcmp.eq.s32.totalorder %v12821_v15, 2  ;;  %v4754_v42 = vsel %vm4669_vm3, %v4753_v22, %v12824_v3  ;;  %v6589_v20 = vmul.u32 %v6582_v17, %v6573_v21 }
 0x594   :  { %v7865_v12 = vpop.eup %7864  ;;  %v4738_v34 = vsel %vm7303_vm11, 0, %v7302_v11  ;;  %vm6591_vm0 = vc.u32 %v12869_v16, %v12871_v52  ;;  %v6592_v7 = vadd.s32 1, %v12872_v39  ;;  %v4778_v31 = vand.u32 8388607, %v4771_v19 }
 0x595   :  { %v7867_v47 = vpop.eup %7866  ;;  %v6530_v59 = vxor.u32 2147483648, %v7865_v12  ;;  %v4739_v14 = vsub.s32 32, %v4738_v34  ;;  %v4740_v43 = vshll.u32 %v12843_v37, %v4738_v34  ;;  %v4743_v55 = vsub.s32 4294967266, %v4738_v34 }
 0x596   :  { %v6527_v49 = vxor.u32 2147483648, %v7867_v47  ;;  %vm4782_vm15 = vcmp.gt.s32.totalorder %v4781_v61, 0  ;;  %v4756_v37 = vsel %vm12853_vm10, 0, %v4754_v42  ;;  %v6593_v8 = vsel %vm6591_vm0, %v6592_v7, %v12872_v39  ;;  %v12913_v42 = vld [vmem:[#allocation7] sm:$0xff] }
 0x597   :  { %v6531_v57 = vsel %vm6529_vm13, %v6530_v59, %v7867_v47  ;;  %v4741_v13 = vshrl.u32 %v4723_v33, %v4739_v14  ;;  %v4744_v38 = vadd.s32 127, %v4743_v55  ;;  %v4783_v30 = vsel %vm4782_vm15, %v4781_v61, 0 }
 0x598   :  { %v6528_v3 = vsel %vm6526_vm14, %v7865_v12, %v6527_v49  ;;  %v6594_v17 = vadd.s32 %v6593_v8, %v6589_v20  ;;  %v4785_v6 = vand.u32 31, %v4783_v30  ;;  %v6642_v9 = vmul.f32 %v12897_v41, %v12860_v29 }
 0x599   :  { %v6532_v23 = vsel %vm6525_vm12, %v6528_v3, %v6531_v57  ;;  %v4742_v25 = vor.u32 %v4741_v13, %v4740_v43  ;;  %v4745_v32 = vshll.u32 %v4744_v38, 23  ;;  %v4760_v50 = vadd.s32 3, %v4756_v37 }
 0x59a   :  { %v6533_v5 = vsel %vm6522_vm8, nan, %v6532_v23  ;;  %v6595_v36 = vadd.s32 536870912, %v6594_v17  ;;  %v4779_v4 = vor.u32 8388608, %v4778_v31  ;;  %v4784_v15 = vshrl.u32 %v4783_v30, 5 }
 0x59b   :  { %7076 = vxpose.xlu1.b32.cont [11/16] %v6533_v5, 128  ;;  %v4746_v1 = vor.u32 4788187, %v4745_v32  ;;  %v4749_v26 = vcvt.s32.f32 %v4742_v25  ;;  %v4786_v53 = vsub.s32 32, %v4785_v6  ;;  %v4788_v22 = vshll.u32 %v8067_v54, %v4785_v6 }
 0x59c   :  { %v6596_v24 = vshrl.u32 %v6595_v36, 30  ;;  %v4791_v40 = vshll.u32 %v8068_v56, %v4785_v6  ;;  %v4794_v35 = vshll.u32 %v8069_v58, %v4785_v6  ;;  %v4797_v2 = vshll.u32 %v8070_v60, %v4785_v6 }
 0x59d   :  { %v4747_v46 = vand.u32 2147483647, %v4746_v1  ;;  %v4789_v11 = vshrl.u32 %v8068_v56, %v4786_v53  ;;  %v4792_v21 = vshrl.u32 %v8069_v58, %v4786_v53  ;;  %v4795_v28 = vshrl.u32 %v8070_v60, %v4786_v53 }
 0x59e   :  { %v6597_v39 = vshll.u32 %v6596_v24, 30  ;;  %v4798_v33 = vshrl.u32 %v8071_v62, %v4786_v53  ;;  %v4800_v61 = vshll.u32 %v8071_v62, %v4785_v6  ;;  %v12910_v12 = vand.u32 3, %v4760_v50 }
 0x59f   :  { %v4750_v48 = vmul.f32 %v4749_v26, %v4747_v46  ;;  %v4801_v34 = vshrl.u32 %v8072_v10, %v4786_v53  ;;  %v12916_v20 = vadd.f32 %v12913_v42, %v6642_v9  ;;  %v4787_v14 = vshrl.u32 %v8067_v54, %v4786_v53 }
 0x5a0   :  { %v12918_v59 = vsub.s32 %v6594_v17, %v6597_v39  ;;  %v12921_v43 = vshll.u32 %v4779_v4, 8  ;;  %v4790_v55 = vor.u32 %v4789_v11, %v4788_v22  ;;  %v4793_v49 = vor.u32 %v4792_v21, %v4791_v40 }
 0x5a1   :  { %v4751_v47 = vxor.u32 2147483648, %v4750_v48  ;;  %v4796_v7 = vor.u32 %v4795_v28, %v4794_v35  ;;  %v4799_v31 = vor.u32 %v4798_v33, %v4797_v2  ;;  %v4802_v38 = vor.u32 %v4801_v34, %v4800_v61 }
 0x5a2   :  { %v6600_v13 = vsub.s32 0, %v12918_v59  ;;  %vm4803_vm2 = vcmp.lt.s32.totalorder %v4784_v15, 1  ;;  %vm4804_vm1 = vcmp.lt.s32.totalorder %v4784_v15, 2  ;;  %vm4805_vm6 = vcmp.lt.s32.totalorder %v4784_v15, 3 }
 0x5a3   :  { %v4752_v57 = vsel %vm4669_vm3, %v4751_v47, %v4750_v48  ;;  %vm4806_vm4 = vcmp.lt.s32.totalorder %v4784_v15, 4  ;;  %v4807_v8 = vsel %vm4803_vm2, %v4787_v14, %v4790_v55  ;;  %v4811_v25 = vsel %vm4803_vm2, %v4790_v55, %v4793_v49 }
 0x5a4   :  { %v4755_v3 = vsel %vm12853_vm10, %v12686_v44, %v4752_v57  ;;  %v7369_v37 = vmin.u32 %v6600_v13, %v12918_v59  ;;  %v4808_v30 = vsel %vm4806_vm4, %v4796_v7, 2102212464  ;;  %v4812_v32 = vsel %vm4806_vm4, %v4799_v31, 920167782 }
 0x5a5   :  { %7868 = vcosq.f32 %v4755_v3  ;;  %v4809_v23 = vsel %vm4805_vm6, %v4793_v49, %v4808_v30  ;;  %vm12933_vm3 = vcmp.le.f32.partialorder %v6534_v27, 0.7853982  ;;  %v4815_v5 = vsel %vm4803_vm2, %v4793_v49, %v4796_v7 }
 0x5a6   :  { %7870 = vsinq.f32 %v4755_v3  ;;  %v6602_v0 = vclz %v7369_v37  ;;  %vm6536_vm5 = vcmp.lt.s32.totalorder %v12746_v51, 0  ;;  %v6620_v6 = vsub.s32 4, %v6596_v24 }
 0x5a7   :  { %v4813_v9 = vsel %vm4805_vm6, %v4796_v7, %v4812_v32  ;;  %v4816_v1 = vsel %vm4806_vm4, %v4802_v38, 1326507024  ;;  %vm4762_vm7 = vcmp.lt.s32.totalorder %v12910_v12, 2  ;;  %v4810_v50 = vsel %vm4804_vm1, %v4807_v8, %v4809_v23 }
 0x5a8   :  { %v7370_v26 = vadd.s32 4294967294, %v6602_v0  ;;  %v4814_v36 = vsel %vm4804_vm1, %v4811_v25, %v4813_v9  ;;  %v4817_v27 = vsel %vm4805_vm6, %v4799_v31, %v4816_v1  ;;  %v6653_v46 = vand.u32 2139095040, %v12916_v20 }
 0x5a9   :  { %v4818_v4 = vsel %vm4804_vm1, %v4815_v5, %v4817_v27  ;;  %v12945_v53 = vmul.u32.u64.low %v12921_v43, %v4814_v36  ;;  %v12946_v22 = vmul.u32.u64.high %v12921_v43, %v4814_v36, %v12945_v53  ;;  %v6590_v40 = vadd.s32 %v12871_v52, %v12869_v16 }
 0x5aa   :  { %vm7371_vm9 = vcmp.lt.s32.totalorder %v7370_v26, 0  ;;  %v12953_v35 = vmul.u32.u64.low %v12921_v43, %v4818_v4  ;;  %v12954_v11 = vmul.u32.u64.high %v12921_v43, %v4818_v4, %v12953_v35  ;;  %vm4763_vm8 = vcmp.eq.s32.totalorder %v12910_v12, 0 }
 0x5ab   :  { %v6605_v21 = vsel %vm7371_vm9, 0, %v7370_v26  ;;  %v6621_v15 = vsel %vm6536_vm5, %v6620_v6, %v6596_v24  ;;  %v6654_v28 = vshrl.u32 %v6653_v46, 23  ;;  %v4826_v33 = vmul.u32 %v12921_v43, %v4810_v50 }
 0x5ac   :  { %v6606_v2 = vsub.s32 32, %v6605_v21  ;;  %v6607_v48 = vshll.u32 %v12918_v59, %v6605_v21  ;;  %v6610_v39 = vsub.s32 4294967266, %v6605_v21  ;;  %vm4766_vm12 = vcmp.eq.s32.totalorder %v12910_v12, 2  ;;  %v12990_v12 = vld [vmem:[#allocation5 + $0x8] sm:$0xff] }
 0x5ad   :  { %v4829_v16 = vadd.s32 1, %v12946_v22  ;;  %v7372_v52 = vadd.s32 4294967169, %v6654_v28  ;;  %v12965_v61 = vrot.slane %v10915_v18, %v10137_v63  ;;  %vm4828_vm10 = vc.u32 %v12954_v11, %v12945_v53 }
 0x5ae   :  { %v6608_v47 = vshrl.u32 %v6590_v40, %v6606_v2  ;;  %v6611_v14 = vadd.s32 127, %v6610_v39  ;;  %v6650_v24 = vand.u32 2147483647, %v12916_v20  ;;  %v6623_v43 = vsel %vm12933_vm3, 0, %v6621_v15 }
 0x5af   :  { %v7869_v34 = vpop.eup %7868  ;;  %v4830_v49 = vsel %vm4828_vm10, %v4829_v16, %v12946_v22  ;;  %v6660_v7 = vadd.s32 1, %v7372_v52  ;;  %vm4759_vm14 = vweird.f32 %v12686_v44  ;;  %v4879_v38 = vmul.f32 %v12897_v41, %v12965_v61 }
 0x5b0   :  { %v7871_v59 = vpop.eup %7870  ;;  %v4767_v55 = vxor.u32 2147483648, %v7869_v34  ;;  %v6609_v57 = vor.u32 %v6608_v47, %v6607_v48  ;;  %v6612_v63 = vshll.u32 %v6611_v14, 23  ;;  %v4831_v18 = vadd.s32 %v4830_v49, %v4826_v33 }
 0x5b1   :  { %v4764_v31 = vxor.u32 2147483648, %v7871_v59  ;;  %vm6661_vm11 = vcmp.gt.s32.totalorder %v6660_v7, 0  ;;  %v6627_v25 = vadd.s32 3, %v6623_v43  ;;  %v6657_v44 = vand.u32 8388607, %v6650_v24 }
 0x5b2   :  { %v4768_v13 = vsel %vm4766_vm12, %v4767_v55, %v7871_v59  ;;  %v6613_v37 = vor.u32 4788187, %v6612_v63  ;;  %v6616_v8 = vcvt.s32.f32 %v6609_v57  ;;  %v4832_v30 = vadd.s32 536870912, %v4831_v18 }
 0x5b3   :  { %v4765_v3 = vsel %vm4763_vm8, %v7869_v34, %v4764_v31  ;;  %v6662_v32 = vsel %vm6661_vm11, %v6660_v7, 0  ;;  %v12987_v9 = vadd.f32 %v12913_v42, %v4879_v38  ;;  %v12994_v36 = vmul.f32 %v12990_v12, %v12860_v29 }
 0x5b4   :  { %v4769_v23 = vsel %vm4762_vm7, %v4765_v3, %v4768_v13  ;;  %v6614_v5 = vand.u32 2147483647, %v6613_v37  ;;  %v12984_v6 = vshrl.u32 %v4832_v30, 30  ;;  %v6664_v41 = vand.u32 31, %v6662_v32 }
 0x5b5   :  { %v4770_v0 = vsel %vm4759_vm14, nan, %v4769_v23  ;;  %v6663_v50 = vshrl.u32 %v6662_v32, 5  ;;  %v12996_v27 = vand.u32 3, %v6627_v25  ;;  %v6658_v4 = vor.u32 8388608, %v6657_v44 }
 0x5b6   :  { %5313 = vxpose.xlu0.b32.cont [11/16] %v4770_v0, 128  ;;  %v6617_v1 = vmul.f32 %v6616_v8, %v6614_v5  ;;  %v4834_v26 = vshll.u32 %v12984_v6, 30  ;;  %v6665_v22 = vsub.s32 32, %v6664_v41  ;;  %v6667_v46 = vshll.u32 %v8067_v54, %v6664_v41 }
 0x5b7   :  { %v6670_v42 = vshll.u32 %v8068_v56, %v6664_v41  ;;  %v6673_v21 = vshll.u32 %v8069_v58, %v6664_v41  ;;  %v6676_v2 = vshll.u32 %v8070_v60, %v6664_v41  ;;  %v4890_v48 = vand.u32 2139095040, %v12987_v9 }
 0x5b8   :  { %v6618_v40 = vxor.u32 2147483648, %v6617_v1  ;;  %v12999_v35 = vsub.s32 %v4831_v18, %v4834_v26  ;;  %v6668_v15 = vshrl.u32 %v8068_v56, %v6665_v22  ;;  %v6671_v28 = vshrl.u32 %v8069_v58, %v6665_v22 }
 0x5b9   :  { %v6674_v16 = vshrl.u32 %v8070_v60, %v6665_v22  ;;  %vm6682_vm13 = vcmp.lt.s32.totalorder %v6663_v50, 1  ;;  %v6666_v34 = vshrl.u32 %v8067_v54, %v6665_v22  ;;  %v6677_v14 = vshrl.u32 %v8071_v62, %v6665_v22 }
 0x5ba   :  { %v6619_v39 = vsel %vm6536_vm5, %v6618_v40, %v6617_v1  ;;  %v4837_v33 = vsub.s32 0, %v12999_v35  ;;  %v6669_v47 = vor.u32 %v6668_v15, %v6667_v46  ;;  %v6672_v55 = vor.u32 %v6671_v28, %v6670_v42 }
 0x5bb   :  { %v6622_v52 = vsel %vm12933_vm3, %v12746_v51, %v6619_v39  ;;  %v6675_v43 = vor.u32 %v6674_v16, %v6673_v21  ;;  %vm4773_vm0 = vcmp.lt.s32.totalorder %v12819_v45, 0  ;;  %v6678_v49 = vor.u32 %v6677_v14, %v6676_v2 }
 0x5bc   :  { %7872 = vcosq.f32 %v6622_v52  ;;  %v7305_v59 = vmin.u32 %v4837_v33, %v12999_v35  ;;  %v6679_v7 = vshll.u32 %v8071_v62, %v6664_v41  ;;  %v6680_v31 = vshrl.u32 %v8072_v10, %v6665_v22 }
 0x5bd   :  { %7874 = vsinq.f32 %v6622_v52  ;;  %vm6633_vm15 = vcmp.eq.s32.totalorder %v12996_v27, 2  ;;  %v4827_v17 = vadd.s32 %v12945_v53, %v12954_v11  ;;  %v13023_v63 = vshll.u32 %v6658_v4, 8 }
 0x5be   :  { %v4839_v57 = vclz %v7305_v59  ;;  %v4891_v18 = vshrl.u32 %v4890_v48, 23  ;;  %v6681_v13 = vor.u32 %v6680_v31, %v6679_v7  ;;  %vm6683_vm2 = vcmp.lt.s32.totalorder %v6663_v50, 2 }
 0x5bf   :  { %vm6684_vm1 = vcmp.lt.s32.totalorder %v6663_v50, 3  ;;  %vm6685_vm6 = vcmp.lt.s32.totalorder %v6663_v50, 4  ;;  %vm6629_vm4 = vcmp.lt.s32.totalorder %v12996_v27, 2  ;;  %vm13028_vm3 = vcmp.le.f32.partialorder %v4771_v19, 0.7853982 }
 0x5c0   :  { %v7306_v3 = vadd.s32 4294967294, %v4839_v57  ;;  %v6686_v37 = vsel %vm6682_vm13, %v6666_v34, %v6669_v47  ;;  %v6687_v53 = vsel %vm6685_vm6, %v6675_v43, 2102212464  ;;  %v6690_v11 = vsel %vm6682_vm13, %v6669_v47, %v6672_v55 }
 0x5c1   :  { %vm6626_vm5 = vweird.f32 %v12746_v51  ;;  %v6688_v8 = vsel %vm6684_vm1, %v6672_v55, %v6687_v53  ;;  %v6691_v30 = vsel %vm6685_vm6, %v6678_v49, 920167782  ;;  %v6694_v23 = vsel %vm6682_vm13, %v6672_v55, %v6675_v43 }
 0x5c2   :  { %v6695_v25 = vsel %vm6685_vm6, %v6681_v13, 1326507024  ;;  %vm7307_vm7 = vcmp.lt.s32.totalorder %v7306_v3, 0  ;;  %v4857_v19 = vsub.s32 4, %v12984_v6  ;;  %v6692_v44 = vsel %vm6684_vm1, %v6675_v43, %v6691_v30 }
 0x5c3   :  { %v6696_v32 = vsel %vm6684_vm1, %v6678_v49, %v6695_v25  ;;  %v4842_v0 = vsel %vm7307_vm7, 0, %v7306_v3  ;;  %v6689_v5 = vsel %vm6683_vm2, %v6686_v37, %v6688_v8  ;;  %v6693_v41 = vsel %vm6683_vm2, %v6690_v11, %v6692_v44 }
 0x5c4   :  { %v6697_v1 = vsel %vm6683_vm2, %v6694_v23, %v6696_v32  ;;  %v4843_v26 = vsub.s32 32, %v4842_v0  ;;  %v4844_v4 = vshll.u32 %v12999_v35, %v4842_v0  ;;  %v4847_v22 = vsub.s32 4294967266, %v4842_v0 }
 0x5c5   :  { %v7308_v46 = vadd.s32 4294967169, %v4891_v18  ;;  %v13045_v40 = vmul.u32.u64.low %v13023_v63, %v6697_v1  ;;  %v13046_v42 = vmul.u32.u64.high %v13023_v63, %v6697_v1, %v13045_v40  ;;  %v4858_v50 = vsel %vm4773_vm0, %v4857_v19, %v12984_v6 }
 0x5c6   :  { %v13049_v21 = vmul.u32.u64.low %v13023_v63, %v6693_v41  ;;  %v13050_v15 = vmul.u32.u64.high %v13023_v63, %v6693_v41, %v13049_v21  ;;  %v7873_v28 = vpop.eup %7872  ;;  %v4845_v2 = vshrl.u32 %v4827_v17, %v4843_v26  ;;  %v4848_v48 = vadd.s32 127, %v4847_v22  ;;  %v13084_v40 = vld [vmem:[#allocation7 + $0x8] sm:$0xff] }
 0x5c7   :  { %v4897_v39 = vadd.s32 1, %v7308_v46  ;;  %v7875_v35 = vpop.eup %7874  ;;  %vm6630_vm9 = vcmp.eq.s32.totalorder %v12996_v27, 0  ;;  %v6634_v33 = vxor.u32 2147483648, %v7873_v28  ;;  %v6705_v16 = vmul.u32 %v13023_v63, %v6689_v5 }
 0x5c8   :  { %v4887_v52 = vand.u32 2147483647, %v12987_v9  ;;  %v6631_v34 = vxor.u32 2147483648, %v7875_v35  ;;  %v4846_v47 = vor.u32 %v4845_v2, %v4844_v4  ;;  %v4849_v14 = vshll.u32 %v4848_v48, 23 }
 0x5c9   :  { %vm4898_vm8 = vcmp.gt.s32.totalorder %v4897_v39, 0  ;;  %v6635_v59 = vsel %vm6633_vm15, %v6634_v33, %v7875_v35  ;;  %v4860_v55 = vsel %vm13028_vm3, 0, %v4858_v50  ;;  %vm6707_vm12 = vc.u32 %v13046_v42, %v13049_v21 }
 0x5ca   :  { %v6708_v6 = vadd.s32 1, %v13050_v15  ;;  %v6632_v43 = vsel %vm6630_vm9, %v7873_v28, %v6631_v34  ;;  %v4850_v49 = vor.u32 4788187, %v4849_v14  ;;  %v4853_v7 = vcvt.s32.f32 %v4846_v47 }
 0x5cb   :  { %v4899_v31 = vsel %vm4898_vm8, %v4897_v39, 0  ;;  %v6636_v17 = vsel %vm6629_vm4, %v6632_v43, %v6635_v59  ;;  %v4894_v63 = vand.u32 8388607, %v4887_v52  ;;  %v4864_v37 = vadd.s32 3, %v4860_v55 }
 0x5cc   :  { %v6709_v57 = vsel %vm6707_vm12, %v6708_v6, %v13050_v15  ;;  %v4901_v18 = vand.u32 31, %v4899_v31  ;;  %v6637_v13 = vsel %vm6626_vm5, nan, %v6636_v17  ;;  %v4851_v3 = vand.u32 2147483647, %v4850_v49 }
 0x5cd   :  { %v6710_v53 = vadd.s32 %v6709_v57, %v6705_v16  ;;  %7077 = vxpose.xlu1.b32.cont [12/16] %v6637_v13, 128  ;;  %v4900_v11 = vshrl.u32 %v4899_v31, 5  ;;  %vm6652_vm10 = vcmp.lt.s32.totalorder %v12916_v20, 0  ;;  %v4895_v22 = vor.u32 8388608, %v4894_v63 }
 0x5ce   :  { %v4902_v8 = vsub.s32 32, %v4901_v18  ;;  %v4904_v30 = vshll.u32 %v8067_v54, %v4901_v18  ;;  %v4907_v27 = vshll.u32 %v8068_v56, %v4901_v18  ;;  %v4854_v23 = vmul.f32 %v4853_v7, %v4851_v3 }
 0x5cf   :  { %v6711_v25 = vadd.s32 536870912, %v6710_v53  ;;  %v4910_v19 = vshll.u32 %v8069_v58, %v4901_v18  ;;  %v4913_v44 = vshll.u32 %v8070_v60, %v4901_v18  ;;  %v4916_v5 = vshll.u32 %v8071_v62, %v4901_v18 }
 0x5d0   :  { %v4905_v32 = vshrl.u32 %v8068_v56, %v4902_v8  ;;  %v4908_v51 = vshrl.u32 %v8069_v58, %v4902_v8  ;;  %v4911_v0 = vshrl.u32 %v8070_v60, %v4902_v8  ;;  %v4855_v41 = vxor.u32 2147483648, %v4854_v23 }
 0x5d1   :  { %v6712_v1 = vshrl.u32 %v6711_v25, 30  ;;  %v4914_v26 = vshrl.u32 %v8071_v62, %v4902_v8  ;;  %v4917_v4 = vshrl.u32 %v8072_v10, %v4902_v8  ;;  %v13088_v15 = vadd.f32 %v13084_v40, %v12994_v36 }
 0x5d2   :  { %v4906_v46 = vor.u32 %v4905_v32, %v4904_v30  ;;  %v4856_v28 = vsel %vm4773_vm0, %v4855_v41, %v4854_v23  ;;  %v4909_v48 = vor.u32 %v4908_v51, %v4907_v27  ;;  %v4912_v50 = vor.u32 %v4911_v0, %v4910_v19 }
 0x5d3   :  { %v6713_v2 = vshll.u32 %v6712_v1, 30  ;;  %v4859_v39 = vsel %vm13028_vm3, %v12819_v45, %v4856_v28  ;;  %v4915_v35 = vor.u32 %v4914_v26, %v4913_v44  ;;  %v4918_v33 = vor.u32 %v4917_v4, %v4916_v5 }
 0x5d4   :  { %vm4919_vm14 = vcmp.lt.s32.totalorder %v4900_v11, 1  ;;  %7876 = vcosq.f32 %v4859_v39  ;;  %v4865_v16 = vand.u32 3, %v4864_v37  ;;  %vm4922_vm11 = vcmp.lt.s32.totalorder %v4900_v11, 4 }
 0x5d5   :  { %v13095_v34 = vsub.s32 %v6710_v53, %v6713_v2  ;;  %7878 = vsinq.f32 %v4859_v39  ;;  %v6736_v36 = vsub.s32 4, %v6712_v1  ;;  %v4903_v47 = vshrl.u32 %v8067_v54, %v4902_v8 }
 0x5d6   :  { %vm4921_vm13 = vcmp.lt.s32.totalorder %v4900_v11, 3  ;;  %vm4920_vm0 = vcmp.lt.s32.totalorder %v4900_v11, 2  ;;  %v4924_v59 = vsel %vm4922_vm11, %v4912_v50, 2102212464  ;;  %v4927_v38 = vsel %vm4919_vm14, %v4906_v46, %v4909_v48 }
 0x5d7   :  { %v6716_v14 = vsub.s32 0, %v13095_v34  ;;  %v4928_v55 = vsel %vm4922_vm11, %v4915_v35, 920167782  ;;  %v4931_v6 = vsel %vm4919_vm14, %v4909_v48, %v4912_v50  ;;  %v4932_v43 = vsel %vm4922_vm11, %v4918_v33, 1326507024 }
 0x5d8   :  { %v4935_v49 = vshll.u32 %v4895_v22, 8  ;;  %v4929_v31 = vsel %vm4921_vm13, %v4912_v50, %v4928_v55  ;;  %v4933_v17 = vsel %vm4921_vm13, %v4915_v35, %v4932_v43  ;;  %v6757_v57 = vand.u32 2139095040, %v13088_v15 }
 0x5d9   :  { %v7373_v7 = vmin.u32 %v6716_v14, %v13095_v34  ;;  %v4923_v63 = vsel %vm4919_vm14, %v4903_v47, %v4906_v46  ;;  %v4925_v18 = vsel %vm4921_vm13, %v4909_v48, %v4924_v59  ;;  %v4930_v13 = vsel %vm4920_vm0, %v4927_v38, %v4929_v31 }
 0x5da   :  { %v4934_v3 = vsel %vm4920_vm0, %v4931_v6, %v4933_v17  ;;  %vm4863_vm15 = vweird.f32 %v12819_v45  ;;  %v6737_v53 = vsel %vm6652_vm10, %v6736_v36, %v6712_v1  ;;  %vm13117_vm2 = vcmp.le.f32.partialorder %v6650_v24, 0.7853982  ;;  %v13143_v17 = vld [vmem:[#allocation5 + $0x10] sm:$0xff] }
 0x5db   :  { %v6718_v37 = vclz %v7373_v7  ;;  %v13109_v8 = vmul.u32.u64.low %v4935_v49, %v4934_v3  ;;  %v13110_v30 = vmul.u32.u64.high %v4935_v49, %v4934_v3, %v13109_v8  ;;  %v4926_v44 = vsel %vm4920_vm0, %v4923_v63, %v4925_v18 }
 0x5dc   :  { %v13112_v27 = vmul.u32.u64.low %v4935_v49, %v4930_v13  ;;  %v13113_v23 = vmul.u32.u64.high %v4935_v49, %v4930_v13, %v13112_v27  ;;  %v6758_v32 = vshrl.u32 %v6757_v57, 23  ;;  %vm4866_vm1 = vcmp.lt.s32.totalorder %v4865_v16, 2 }
 0x5dd   :  { %v7374_v19 = vadd.s32 4294967294, %v6718_v37  ;;  %vm4867_vm6 = vcmp.eq.s32.totalorder %v4865_v16, 0  ;;  %vm4870_vm4 = vcmp.eq.s32.totalorder %v4865_v16, 2  ;;  %v6754_v51 = vand.u32 2147483647, %v13088_v15 }
 0x5de   :  { %v7877_v0 = vpop.eup %7876  ;;  %v6706_v5 = vadd.s32 %v13049_v21, %v13046_v42  ;;  %v6739_v24 = vsel %vm13117_vm2, 0, %v6737_v53  ;;  %v7376_v41 = vadd.s32 4294967169, %v6758_v32  ;;  %v4942_v11 = vmul.u32 %v4935_v49, %v4926_v44 }
 0x5df   :  { %vm7375_vm3 = vcmp.lt.s32.totalorder %v7374_v19, 0  ;;  %v7879_v1 = vpop.eup %7878  ;;  %v4871_v26 = vxor.u32 2147483648, %v7877_v0  ;;  %vm4944_vm5 = vc.u32 %v13110_v30, %v13112_v27  ;;  %v4945_v42 = vadd.s32 1, %v13113_v23 }
 0x5e0   :  { %v6721_v4 = vsel %vm7375_vm3, 0, %v7374_v19  ;;  %v4868_v22 = vxor.u32 2147483648, %v7879_v1  ;;  %v6764_v21 = vadd.s32 1, %v7376_v41  ;;  %v4880_v50 = vmul.f32 %v12990_v12, %v12965_v61 }
 0x5e1   :  { %v6722_v46 = vsub.s32 32, %v6721_v4  ;;  %v6723_v28 = vshll.u32 %v13095_v34, %v6721_v4  ;;  %v6726_v2 = vsub.s32 4294967266, %v6721_v4  ;;  %v4872_v48 = vsel %vm4870_vm4, %v4871_v26, %v7879_v1 }
 0x5e2   :  { %v4869_v39 = vsel %vm4867_vm6, %v7877_v0, %v4868_v22  ;;  %v6743_v36 = vadd.s32 3, %v6739_v24  ;;  %v4946_v14 = vsel %vm4944_vm5, %v4945_v42, %v13113_v23  ;;  %v6761_v34 = vand.u32 8388607, %v6754_v51 }
 0x5e3   :  { %v6724_v35 = vshrl.u32 %v6706_v5, %v6722_v46  ;;  %v6727_v33 = vadd.s32 127, %v6726_v2  ;;  %v4873_v47 = vsel %vm4866_vm1, %v4869_v39, %v4872_v48  ;;  %vm6765_vm7 = vcmp.gt.s32.totalorder %v6764_v21, 0 }
 0x5e4   :  { %v4874_v59 = vsel %vm4863_vm15, nan, %v4873_v47  ;;  %v4947_v6 = vadd.s32 %v4946_v14, %v4942_v11  ;;  %v6766_v12 = vsel %vm6765_vm7, %v6764_v21, 0  ;;  %v13141_v43 = vadd.f32 %v13084_v40, %v4880_v50 }
 0x5e5   :  { %v6725_v38 = vor.u32 %v6724_v35, %v6723_v28  ;;  %v6728_v55 = vshll.u32 %v6727_v33, 23  ;;  %5314 = vxpose.xlu0.b32.cont [12/16] %v4874_v59, 128  ;;  %v6768_v31 = vand.u32 31, %v6766_v12  ;;  %v13147_v57 = vmul.f32 %v13143_v17, %v12860_v29 }
 0x5e6   :  { %v4948_v7 = vadd.s32 536870912, %v4947_v6  ;;  %v13149_v63 = vand.u32 3, %v6743_v36  ;;  %v6762_v13 = vor.u32 8388608, %v6761_v34  ;;  %v13154_v3 = vadd.s32 %v13112_v27, %v13110_v30 }
 0x5e7   :  { %v6729_v49 = vor.u32 4788187, %v6728_v55  ;;  %v6732_v16 = vcvt.s32.f32 %v6725_v38  ;;  %v6769_v40 = vsub.s32 32, %v6768_v31  ;;  %v6771_v37 = vshll.u32 %v8067_v54, %v6768_v31 }
 0x5e8   :  { %v13151_v18 = vshrl.u32 %v4948_v7, 30  ;;  %v4994_v53 = vand.u32 2139095040, %v13141_v43  ;;  %v6774_v19 = vshll.u32 %v8068_v56, %v6768_v31  ;;  %v6777_v44 = vshll.u32 %v8069_v58, %v6768_v31 }
 0x5e9   :  { %v6730_v45 = vand.u32 2147483647, %v6729_v49  ;;  %v6772_v32 = vshrl.u32 %v8068_v56, %v6769_v40  ;;  %v6775_v0 = vshrl.u32 %v8069_v58, %v6769_v40  ;;  %v6778_v5 = vshrl.u32 %v8070_v60, %v6769_v40 }
 0x5ea   :  { %v4950_v23 = vshll.u32 %v13151_v18, 30  ;;  %v6780_v30 = vshll.u32 %v8070_v60, %v6768_v31  ;;  %v6767_v41 = vshrl.u32 %v6766_v12, 5  ;;  %v6781_v1 = vshrl.u32 %v8071_v62, %v6769_v40 }
 0x5eb   :  { %v6733_v8 = vmul.f32 %v6732_v16, %v6730_v45  ;;  %v6770_v26 = vshrl.u32 %v8067_v54, %v6769_v40  ;;  %v6773_v4 = vor.u32 %v6772_v32, %v6771_v37  ;;  %v13169_v11 = vshll.u32 %v6762_v13, 8 }
 0x5ec   :  { %v13165_v24 = vsub.s32 %v4947_v6, %v4950_v23  ;;  %v4995_v22 = vshrl.u32 %v4994_v53, 23  ;;  %v6776_v2 = vor.u32 %v6775_v0, %v6774_v19  ;;  %v6779_v48 = vor.u32 %v6778_v5, %v6777_v44 }
 0x5ed   :  { %v6734_v27 = vxor.u32 2147483648, %v6733_v8  ;;  %v6782_v21 = vor.u32 %v6781_v1, %v6780_v30  ;;  %v6783_v50 = vshll.u32 %v8071_v62, %v6768_v31  ;;  %v6784_v39 = vshrl.u32 %v8072_v10, %v6769_v40 }
 0x5ee   :  { %v4953_v28 = vsub.s32 0, %v13165_v24  ;;  %vm4889_vm9 = vcmp.lt.s32.totalorder %v12987_v9, 0  ;;  %vm6786_vm8 = vcmp.lt.s32.totalorder %v6767_v41, 1  ;;  %vm6789_vm12 = vcmp.lt.s32.totalorder %v6767_v41, 4 }
 0x5ef   :  { %v6735_v46 = vsel %vm6652_vm10, %v6734_v27, %v6733_v8  ;;  %v6785_v33 = vor.u32 %v6784_v39, %v6783_v50  ;;  %vm6788_vm10 = vcmp.lt.s32.totalorder %v6767_v41, 3  ;;  %v6791_v36 = vsel %vm6789_vm12, %v6779_v48, 2102212464 }
 0x5f0   :  { %v6738_v42 = vsel %vm13117_vm2, %v12916_v20, %v6735_v46  ;;  %v7309_v35 = vmin.u32 %v4953_v28, %v13165_v24  ;;  %vm6787_vm14 = vcmp.lt.s32.totalorder %v6767_v41, 2  ;;  %v6790_v25 = vsel %vm6786_vm8, %v6770_v26, %v6773_v4 }
 0x5f1   :  { %7880 = vcosq.f32 %v6738_v42  ;;  %v4991_v14 = vand.u32 2147483647, %v13141_v43  ;;  %v6792_v34 = vsel %vm6788_vm10, %v6776_v2, %v6791_v36  ;;  %v6794_v59 = vsel %vm6786_vm8, %v6773_v4, %v6776_v2 }
 0x5f2   :  { %7882 = vsinq.f32 %v6738_v42  ;;  %v4955_v47 = vclz %v7309_v35  ;;  %v6795_v38 = vsel %vm6789_vm12, %v6782_v21, 920167782  ;;  %v6798_v55 = vsel %vm6786_vm8, %v6776_v2, %v6779_v48  ;;  %v13222_v2 = vld [vmem:[#allocation7 + $0x10] sm:$0xff] }
 0x5f3   :  { %vm6745_vm11 = vcmp.lt.s32.totalorder %v13149_v63, 2  ;;  %vm13188_vm13 = vcmp.le.f32.partialorder %v4887_v52, 0.7853982  ;;  %v4973_v49 = vsub.s32 4, %v13151_v18  ;;  %v6796_v16 = vsel %vm6788_vm10, %v6779_v48, %v6795_v38 }
 0x5f4   :  { %v7310_v12 = vadd.s32 4294967294, %v4955_v47  ;;  %v6799_v7 = vsel %vm6789_vm12, %v6785_v33, 1326507024  ;;  %vm6742_vm0 = vweird.f32 %v12916_v20  ;;  %v6793_v31 = vsel %vm6787_vm14, %v6790_v25, %v6792_v34 }
 0x5f5   :  { %v6797_v45 = vsel %vm6787_vm14, %v6794_v59, %v6796_v16  ;;  %v6800_v13 = vsel %vm6788_vm10, %v6782_v21, %v6799_v7  ;;  %v7312_v40 = vadd.s32 4294967169, %v4995_v22  ;;  %vm6746_vm2 = vcmp.eq.s32.totalorder %v13149_v63, 0 }
 0x5f6   :  { %vm7311_vm15 = vcmp.lt.s32.totalorder %v7310_v12, 0  ;;  %v6801_v52 = vsel %vm6787_vm14, %v6798_v55, %v6800_v13  ;;  %v13201_v37 = vmul.u32.u64.low %v13169_v11, %v6797_v45  ;;  %v13202_v53 = vmul.u32.u64.high %v13169_v11, %v6797_v45, %v13201_v37 }
 0x5f7   :  { %v4958_v8 = vsel %vm7311_vm15, 0, %v7310_v12  ;;  %v13207_v23 = vmul.u32.u64.low %v13169_v11, %v6801_v52  ;;  %v13208_v19 = vmul.u32.u64.high %v13169_v11, %v6801_v52, %v13207_v23  ;;  %v5001_v5 = vadd.s32 1, %v7312_v40 }
 0x5f8   :  { %v4959_v44 = vsub.s32 32, %v4958_v8  ;;  %v4960_v32 = vshll.u32 %v13165_v24, %v4958_v8  ;;  %v4963_v0 = vsub.s32 4294967266, %v4958_v8  ;;  %vm6749_vm1 = vcmp.eq.s32.totalorder %v13149_v63, 2 }
 0x5f9   :  { %v4974_v30 = vsel %vm4889_vm9, %v4973_v49, %v13151_v18  ;;  %v6809_v27 = vmul.u32 %v13169_v11, %v6793_v31  ;;  %v4998_v41 = vand.u32 8388607, %v4991_v14  ;;  %v6812_v22 = vadd.s32 1, %v13202_v53 }
 0x5fa   :  { %v4961_v26 = vshrl.u32 %v13154_v3, %v4959_v44  ;;  %v4964_v4 = vadd.s32 127, %v4963_v0  ;;  %vm5002_vm6 = vcmp.gt.s32.totalorder %v5001_v5, 0  ;;  %vm6811_vm4 = vc.u32 %v13208_v19, %v13201_v37 }
 0x5fb   :  { %v7881_v1 = vpop.eup %7880  ;;  %v5003_v28 = vsel %vm5002_vm6, %v5001_v5, 0  ;;  %v13226_v18 = vadd.f32 %v13222_v2, %v13147_v57  ;;  %v6813_v3 = vsel %vm6811_vm4, %v6812_v22, %v13202_v53  ;;  %v4976_v50 = vsel %vm13188_vm13, 0, %v4974_v30 }
 0x5fc   :  { %v7883_v24 = vpop.eup %7882  ;;  %v6750_v46 = vxor.u32 2147483648, %v7881_v1  ;;  %v4962_v48 = vor.u32 %v4961_v26, %v4960_v32  ;;  %v4965_v42 = vshll.u32 %v4964_v4, 23  ;;  %v6814_v39 = vadd.s32 %v6813_v3, %v6809_v27 }
 0x5fd   :  { %v6747_v11 = vxor.u32 2147483648, %v7883_v24  ;;  %v5005_v35 = vand.u32 31, %v5003_v28  ;;  %v4999_v57 = vor.u32 8388608, %v4998_v41  ;;  %v5004_v59 = vshrl.u32 %v5003_v28, 5 }
 0x5fe   :  { %v6751_v21 = vsel %vm6749_vm1, %v6750_v46, %v7883_v24  ;;  %v4966_v36 = vor.u32 4788187, %v4965_v42  ;;  %v4969_v47 = vcvt.s32.f32 %v4962_v48  ;;  %v6815_v34 = vadd.s32 536870912, %v6814_v39 }
 0x5ff   :  { %v6748_v33 = vsel %vm6746_vm2, %v7881_v1, %v6747_v11  ;;  %v5006_v38 = vsub.s32 32, %v5005_v35  ;;  %v5008_v49 = vshll.u32 %v8067_v54, %v5005_v35  ;;  %v5011_v16 = vshll.u32 %v8068_v56, %v5005_v35 }
 0x600   :  { %v6752_v25 = vsel %vm6745_vm11, %v6748_v33, %v6751_v21  ;;  %v4967_v12 = vand.u32 2147483647, %v4966_v36  ;;  %v13241_v7 = vshrl.u32 %v6815_v34, 30  ;;  %v5014_v63 = vshll.u32 %v8069_v58, %v5005_v35 }
 0x601   :  { %v6753_v55 = vsel %vm6742_vm0, nan, %v6752_v25  ;;  %v5009_v31 = vshrl.u32 %v8068_v56, %v5006_v38  ;;  %v5012_v45 = vshrl.u32 %v8069_v58, %v5006_v38  ;;  %v5015_v40 = vshrl.u32 %v8070_v60, %v5006_v38 }
 0x602   :  { %7078 = vxpose.xlu1.b32.cont [13/16] %v6753_v55, 128  ;;  %v4970_v13 = vmul.f32 %v4969_v47, %v4967_v12  ;;  %v5017_v20 = vshll.u32 %v8070_v60, %v5005_v35  ;;  %v5018_v52 = vshrl.u32 %v8071_v62, %v5006_v38  ;;  %v4980_v53 = vadd.s32 3, %v4976_v50 }
 0x603   :  { %v6817_v8 = vshll.u32 %v13241_v7, 30  ;;  %v13250_v23 = vshll.u32 %v4999_v57, 8  ;;  %v5007_v32 = vshrl.u32 %v8067_v54, %v5006_v38  ;;  %v5020_v0 = vshll.u32 %v8071_v62, %v5005_v35 }
 0x604   :  { %v4971_v44 = vxor.u32 2147483648, %v4970_v13  ;;  %v6861_v5 = vand.u32 2139095040, %v13226_v18  ;;  %v5010_v27 = vor.u32 %v5009_v31, %v5008_v49  ;;  %v5013_v41 = vor.u32 %v5012_v45, %v5011_v16 }
 0x605   :  { %v13255_v30 = vsub.s32 %v6814_v39, %v6817_v8  ;;  %v5021_v1 = vshrl.u32 %v8072_v10, %v5006_v38  ;;  %v5016_v4 = vor.u32 %v5015_v40, %v5014_v63  ;;  %v5019_v22 = vor.u32 %v5018_v52, %v5017_v20 }
 0x606   :  { %v4972_v26 = vsel %vm4889_vm9, %v4971_v44, %v4970_v13  ;;  %vm5023_vm3 = vcmp.lt.s32.totalorder %v5004_v59, 1  ;;  %vm5024_vm5 = vcmp.lt.s32.totalorder %v5004_v59, 2  ;;  %vm5025_vm7 = vcmp.lt.s32.totalorder %v5004_v59, 3 }
 0x607   :  { %v4975_v24 = vsel %vm13188_vm13, %v12987_v9, %v4972_v26  ;;  %v6820_v46 = vsub.s32 0, %v13255_v30  ;;  %v5022_v28 = vor.u32 %v5021_v1, %v5020_v0  ;;  %vm5026_vm8 = vcmp.lt.s32.totalorder %v5004_v59, 4 }
 0x608   :  { %7884 = vcosq.f32 %v4975_v24  ;;  %v5027_v11 = vsel %vm5023_vm3, %v5007_v32, %v5010_v27  ;;  %v5028_v42 = vsel %vm5026_vm8, %v5016_v4, 2102212464  ;;  %v5031_v3 = vsel %vm5023_vm3, %v5010_v27, %v5013_v41 }
 0x609   :  { %7886 = vsinq.f32 %v4975_v24  ;;  %v7377_v48 = vmin.u32 %v6820_v46, %v13255_v30  ;;  %v5029_v21 = vsel %vm5025_vm7, %v5013_v41, %v5028_v42  ;;  %v5032_v50 = vsel %vm5026_vm8, %v5019_v22, 920167782 }
 0x60a   :  { %v5035_v39 = vsel %vm5023_vm3, %v5013_v41, %v5016_v4  ;;  %v5036_v35 = vsel %vm5026_vm8, %v5022_v28, 1326507024  ;;  %vm6756_vm9 = vcmp.lt.s32.totalorder %v13088_v15, 0  ;;  %v4981_v33 = vand.u32 3, %v4980_v53 }
 0x60b   :  { %v6822_v6 = vclz %v7377_v48  ;;  %v5033_v36 = vsel %vm5025_vm7, %v5016_v4, %v5032_v50  ;;  %v5037_v47 = vsel %vm5025_vm7, %v5019_v22, %v5036_v35  ;;  %v6862_v57 = vshrl.u32 %v6861_v5, 23 }
 0x60c   :  { %vm4979_vm12 = vweird.f32 %v12987_v9  ;;  %v5030_v34 = vsel %vm5024_vm5, %v5027_v11, %v5029_v21  ;;  %v5034_v38 = vsel %vm5024_vm5, %v5031_v3, %v5033_v36  ;;  %v5038_v55 = vsel %vm5024_vm5, %v5035_v39, %v5037_v47 }
 0x60d   :  { %v7378_v25 = vadd.s32 4294967294, %v6822_v6  ;;  %v13271_v12 = vmul.u32.u64.low %v13250_v23, %v5038_v55  ;;  %v13272_v49 = vmul.u32.u64.high %v13250_v23, %v5038_v55, %v13271_v12  ;;  %v6810_v45 = vadd.s32 %v13201_v37, %v13208_v19 }
 0x60e   :  { %v13275_v16 = vmul.u32.u64.low %v13250_v23, %v5034_v38  ;;  %v13276_v31 = vmul.u32.u64.high %v13250_v23, %v5034_v38, %v13275_v16  ;;  %v6840_v63 = vsub.s32 4, %v13241_v7  ;;  %v7380_v13 = vadd.s32 4294967169, %v6862_v57 }
 0x60f   :  { %vm7379_vm10 = vcmp.lt.s32.totalorder %v7378_v25, 0  ;;  %vm4983_vm14 = vcmp.eq.s32.totalorder %v4981_v33, 0  ;;  %vm13284_vm11 = vcmp.le.f32.partialorder %v6754_v51, 0.7853982  ;;  %v4881_v20 = vmul.f32 %v13143_v17, %v12965_v61 }
 0x610   :  { %v6825_v40 = vsel %vm7379_vm10, 0, %v7378_v25  ;;  %v5046_v37 = vmul.u32 %v13250_v23, %v5030_v34  ;;  %vm4986_vm13 = vcmp.eq.s32.totalorder %v4981_v33, 2  ;;  %vm5048_vm0 = vc.u32 %v13272_v49, %v13275_v16 }
 0x611   :  { %v6826_v52 = vsub.s32 32, %v6825_v40  ;;  %v6827_v53 = vshll.u32 %v13255_v30, %v6825_v40  ;;  %v6830_v8 = vsub.s32 4294967266, %v6825_v40  ;;  %v5049_v51 = vadd.s32 1, %v13276_v31 }
 0x612   :  { %v7885_v19 = vpop.eup %7884  ;;  %v6868_v44 = vadd.s32 1, %v7380_v13  ;;  %v6841_v17 = vsel %vm6756_vm9, %v6840_v63, %v13241_v7  ;;  %vm4982_vm15 = vcmp.lt.s32.totalorder %v4981_v33, 2  ;;  %v6858_v46 = vand.u32 2147483647, %v13226_v18 }
 0x613   :  { %v7887_v32 = vpop.eup %7886  ;;  %v4987_v0 = vxor.u32 2147483648, %v7885_v19  ;;  %v6828_v5 = vshrl.u32 %v6810_v45, %v6826_v52  ;;  %v6831_v27 = vadd.s32 127, %v6830_v8  ;;  %v5050_v23 = vsel %vm5048_vm0, %v5049_v51, %v13276_v31 }
 0x614   :  { %v4984_v30 = vxor.u32 2147483648, %v7887_v32  ;;  %vm6869_vm2 = vcmp.gt.s32.totalorder %v6868_v44, 0  ;;  %v5051_v4 = vadd.s32 %v5050_v23, %v5046_v37  ;;  %v6843_v24 = vsel %vm13284_vm11, 0, %v6841_v17 }
 0x615   :  { %v4988_v41 = vsel %vm4986_vm13, %v4987_v0, %v7887_v32  ;;  %v6829_v1 = vor.u32 %v6828_v5, %v6827_v53  ;;  %v6832_v26 = vshll.u32 %v6831_v27, 23  ;;  %v6870_v28 = vsel %vm6869_vm2, %v6868_v44, 0 }
 0x616   :  { %v4985_v22 = vsel %vm4983_vm14, %v7885_v19, %v4984_v30  ;;  %v5052_v42 = vadd.s32 536870912, %v5051_v4  ;;  %v6872_v21 = vand.u32 31, %v6870_v28  ;;  %v6847_v39 = vadd.s32 3, %v6843_v24 }
 0x617   :  { %v4989_v11 = vsel %vm4982_vm15, %v4985_v22, %v4988_v41  ;;  %v6833_v48 = vor.u32 4788187, %v6832_v26  ;;  %v6836_v7 = vcvt.s32.f32 %v6829_v1  ;;  %v6865_v6 = vand.u32 8388607, %v6858_v46 }
 0x618   :  { %v4990_v3 = vsel %vm4979_vm12, nan, %v4989_v11  ;;  %v13305_v35 = vshrl.u32 %v5052_v42, 30  ;;  %v13309_v33 = vshrl.u32 %v6870_v28, 5  ;;  %v6873_v36 = vsub.s32 32, %v6872_v21 }
 0x619   :  { %5315 = vxpose.xlu0.b32.cont [13/16] %v4990_v3, 128  ;;  %v6834_v50 = vand.u32 2147483647, %v6833_v48  ;;  %v13312_v47 = vadd.f32 %v13222_v2, %v4881_v20  ;;  %v6875_v9 = vshll.u32 %v8067_v54, %v6872_v21  ;;  %v6878_v34 = vshll.u32 %v8068_v56, %v6872_v21 }
 0x61a   :  { %v5054_v25 = vshll.u32 %v13305_v35, 30  ;;  %v6876_v38 = vshrl.u32 %v8068_v56, %v6873_v36  ;;  %v6879_v55 = vshrl.u32 %v8069_v58, %v6873_v36  ;;  %v6881_v12 = vshll.u32 %v8069_v58, %v6872_v21 }
 0x61b   :  { %v6837_v57 = vmul.f32 %v6836_v7, %v6834_v50  ;;  %v6884_v31 = vshll.u32 %v8070_v60, %v6872_v21  ;;  %v6882_v2 = vshrl.u32 %v8070_v60, %v6873_v36  ;;  %v6885_v13 = vshrl.u32 %v8071_v62, %v6873_v36 }
 0x61c   :  { %v13321_v63 = vsub.s32 %v5051_v4, %v5054_v25  ;;  %v13325_v40 = vand.u32 3, %v6847_v39  ;;  %v6866_v20 = vor.u32 8388608, %v6865_v6  ;;  %v6874_v52 = vshrl.u32 %v8067_v54, %v6873_v36 }
 0x61d   :  { %v6838_v45 = vxor.u32 2147483648, %v6837_v57  ;;  %v5098_v53 = vand.u32 2139095040, %v13312_v47  ;;  %v6877_v19 = vor.u32 %v6876_v38, %v6875_v9  ;;  %v6880_v51 = vor.u32 %v6879_v55, %v6878_v34 }
 0x61e   :  { %v5057_v37 = vsub.s32 0, %v13321_v63  ;;  %v6886_v32 = vor.u32 %v6885_v13, %v6884_v31  ;;  %v6887_v0 = vshll.u32 %v8071_v62, %v6872_v21  ;;  %v6888_v5 = vshrl.u32 %v8072_v10, %v6873_v36 }
 0x61f   :  { %v6839_v8 = vsel %vm6756_vm9, %v6838_v45, %v6837_v57  ;;  %v6883_v17 = vor.u32 %v6882_v2, %v6881_v12  ;;  %vm6890_vm1 = vcmp.lt.s32.totalorder %v13309_v33, 1  ;;  %vm4993_vm6 = vcmp.lt.s32.totalorder %v13141_v43, 0 }
 0x620   :  { %v6842_v44 = vsel %vm13284_vm11, %v13088_v15, %v6839_v8  ;;  %v7313_v27 = vmin.u32 %v5057_v37, %v13321_v63  ;;  %v6889_v30 = vor.u32 %v6888_v5, %v6887_v0  ;;  %vm6892_vm4 = vcmp.lt.s32.totalorder %v13309_v33, 3  ;;  %v3556_v37 = vpop.trf.xlu1 }
 0x621   :  { %7888 = vcosq.f32 %v6842_v44  ;;  %vm6893_vm3 = vcmp.lt.s32.totalorder %v13309_v33, 4  ;;  %v5047_v59 = vadd.s32 %v13275_v16, %v13272_v49  ;;  %vm6891_vm5 = vcmp.lt.s32.totalorder %v13309_v33, 2  ;;  %3572 = vst [vmem:[#allocation8 + $0x80] sm:$0xff] %v3556_v37 }
 0x622   :  { %7890 = vsinq.f32 %v6842_v44  ;;  %v5059_v23 = vclz %v7313_v27  ;;  %v6906_v41 = vshll.u32 %v6866_v20, 8  ;;  %vm6850_vm7 = vcmp.eq.s32.totalorder %v13325_v40, 0  ;;  %v7966_v27 = vld [vmem:[#allocation5 + $0x18] sm:$0xff] }
 0x623   :  { %v5077_v1 = vsub.s32 4, %v13305_v35  ;;  %v6895_v26 = vsel %vm6893_vm3, %v6883_v17, 2102212464  ;;  %v6898_v4 = vsel %vm6890_vm1, %v6877_v19, %v6880_v51  ;;  %v6899_v22 = vsel %vm6893_vm3, %v6886_v32, 920167782 }
 0x624   :  { %vm6849_vm8 = vcmp.lt.s32.totalorder %v13325_v40, 2  ;;  %vm13356_vm9 = vcmp.le.f32.partialorder %v4991_v14, 0.7853982  ;;  %v7314_v16 = vadd.s32 4294967294, %v5059_v23  ;;  %v6894_v24 = vsel %vm6890_vm1, %v6874_v52, %v6877_v19  ;;  %v1793_v19 = vpop.trf.xlu0 }
 0x625   :  { %v6900_v28 = vsel %vm6892_vm4, %v6883_v17, %v6899_v22  ;;  %v6902_v11 = vsel %vm6890_vm1, %v6880_v51, %v6883_v17  ;;  %vm6846_vm12 = vweird.f32 %v13088_v15  ;;  %v6896_v48 = vsel %vm6892_vm4, %v6880_v51, %v6895_v26  ;;  %1809 = vst [vmem:[#allocation8] sm:$0xff] %v1793_v19 }
 0x626   :  { %v6901_v14 = vsel %vm6891_vm5, %v6898_v4, %v6900_v28  ;;  %v6903_v7 = vsel %vm6893_vm3, %v6889_v30, 1326507024  ;;  %v5099_v42 = vshrl.u32 %v5098_v53, 23  ;;  %vm7315_vm10 = vcmp.lt.s32.totalorder %v7314_v16, 0 }
 0x627   :  { %v6904_v3 = vsel %vm6892_vm4, %v6886_v32, %v6903_v7  ;;  %v13375_v21 = vmul.u32.u64.low %v6906_v41, %v6901_v14  ;;  %v13376_v50 = vmul.u32.u64.high %v6906_v41, %v6901_v14, %v13375_v21  ;;  %v5062_v39 = vsel %vm7315_vm10, 0, %v7314_v16  ;;  %v3557_v16 = vpop.trf.xlu1 }
 0x628   :  { %v6905_v6 = vsel %vm6891_vm5, %v6902_v11, %v6904_v3  ;;  %v5095_v36 = vand.u32 2147483647, %v13312_v47  ;;  %v7316_v57 = vadd.s32 4294967169, %v5099_v42  ;;  %v5063_v25 = vsub.s32 32, %v5062_v39  ;;  %3573 = vst [vmem:[#allocation8 + $0x88] sm:$0xff] %v3557_v16 }
 0x629   :  { %v5064_v9 = vshll.u32 %v13321_v63, %v5062_v39  ;;  %v5067_v34 = vsub.s32 4294967266, %v5062_v39  ;;  %v6897_v38 = vsel %vm6891_vm5, %v6894_v24, %v6896_v48  ;;  %vm6853_vm14 = vcmp.eq.s32.totalorder %v13325_v40, 2  ;;  %v1794_v24 = vpop.trf.xlu0 }
 0x62a   :  { %v13386_v55 = vmul.u32.u64.low %v6906_v41, %v6905_v6  ;;  %v13387_v12 = vmul.u32.u64.high %v6906_v41, %v6905_v6, %v13386_v55  ;;  %v5105_v31 = vadd.s32 1, %v7316_v57  ;;  %v5065_v2 = vshrl.u32 %v5047_v59, %v5063_v25  ;;  %1810 = vst [vmem:[#allocation8 + $0x8] sm:$0xff] %v1794_v24 }
 0x62b   :  { %v7889_v45 = vpop.eup %7888  ;;  %v5068_v13 = vadd.s32 127, %v5067_v34  ;;  %v5078_v20 = vsel %vm4993_vm6, %v5077_v1, %v13305_v35  ;;  %v6916_v52 = vadd.s32 1, %v13376_v50  ;;  %v6913_v8 = vmul.u32 %v6906_v41, %v6897_v38 }
 0x62c   :  { %v7891_v63 = vpop.eup %7890  ;;  %v6854_v53 = vxor.u32 2147483648, %v7889_v45  ;;  %v13395_v33 = vand.u32 8388607, %v5095_v36  ;;  %vm5106_vm11 = vcmp.gt.s32.totalorder %v5105_v31, 0  ;;  %v5066_v44 = vor.u32 %v5065_v2, %v5064_v9  ;;  %v3558_v9 = vpop.trf.xlu1 }
 0x62d   :  { %v6851_v51 = vxor.u32 2147483648, %v7891_v63  ;;  %v5069_v32 = vshll.u32 %v5068_v13, 23  ;;  %v5107_v0 = vsel %vm5106_vm11, %v5105_v31, 0  ;;  %v5080_v5 = vsel %vm13356_vm9, 0, %v5078_v20  ;;  %v1795_v34 = vpop.trf.xlu0  ;;  %3574 = vst [vmem:[#allocation8 + $0x90] sm:$0xff] %v3558_v9 }
 0x62e   :  { %v6855_v35 = vsel %vm6853_vm14, %v6854_v53, %v7891_v63  ;;  %vm6915_vm13 = vc.u32 %v13387_v12, %v13375_v21  ;;  %v6645_v17 = vmul.f32 %v7966_v27, %v12860_v29  ;;  %v5073_v23 = vcvt.s32.f32 %v5066_v44  ;;  %1811 = vst [vmem:[#allocation8 + $0x10] sm:$0xff] %v1795_v34 }
 0x62f   :  { %v6852_v30 = vsel %vm6850_vm7, %v7889_v45, %v6851_v51  ;;  %v5070_v59 = vor.u32 4788187, %v5069_v32  ;;  %v6917_v41 = vsel %vm6915_vm13, %v6916_v52, %v13376_v50  ;;  %v5109_v4 = vand.u32 31, %v5107_v0 }
 0x630   :  { %v6856_v1 = vsel %vm6849_vm8, %v6852_v30, %v6855_v35  ;;  %v6918_v26 = vadd.s32 %v6917_v41, %v6913_v8  ;;  %v13410_v22 = vmul.f32 %v7966_v27, %v12965_v61  ;;  %v5084_v11 = vadd.s32 3, %v5080_v5  ;;  %v3559_v51 = vpop.trf.xlu1 }
 0x631   :  { %v6857_v29 = vsel %vm6846_vm12, nan, %v6856_v1  ;;  %v5071_v28 = vand.u32 2147483647, %v5070_v59  ;;  %v5103_v48 = vor.u32 8388608, %v13395_v33  ;;  %v13415_v40 = vshrl.u32 %v5107_v0, 5  ;;  %v1796_v44 = vpop.trf.xlu0  ;;  %v7967_v0 = vld [vmem:[#allocation7 + $0x18] sm:$0xff] }
 0x632   :  { %7079 = vxpose.xlu1.b32.cont [14/16] %v6857_v29, 128  ;;  %v6919_v14 = vadd.s32 536870912, %v6918_v26  ;;  %v5110_v7 = vsub.s32 32, %v5109_v4  ;;  %v5112_v42 = vshll.u32 %v8067_v54, %v5109_v4  ;;  %v5115_v3 = vshll.u32 %v8068_v56, %v5109_v4  ;;  %3575 = vst [vmem:[#allocation8 + $0x98] sm:$0xff] %v3559_v51  ;;  %1812 = vst [vmem:[#allocation8 + $0x18] sm:$0xff] %v1796_v44 }
 0x633   :  { %v5074_v61 = vmul.f32 %v5073_v23, %v5071_v28  ;;  %v5118_v50 = vshll.u32 %v8069_v58, %v5109_v4  ;;  %v5121_v15 = vshll.u32 %v8070_v60, %v5109_v4  ;;  %v5124_v25 = vshll.u32 %v8071_v62, %v5109_v4 }
 0x634   :  { %v13421_v39 = vshrl.u32 %v6919_v14, 30  ;;  %v5113_v6 = vshrl.u32 %v8068_v56, %v5110_v7  ;;  %v5116_v57 = vshrl.u32 %v8069_v58, %v5110_v7  ;;  %v5119_v55 = vshrl.u32 %v8070_v60, %v5110_v7  ;;  %v3560_v4 = vpop.trf.xlu1 }
 0x635   :  { %v5075_v38 = vxor.u32 2147483648, %v5074_v61  ;;  %v5122_v31 = vshrl.u32 %v8071_v62, %v5110_v7  ;;  %v5125_v45 = vshrl.u32 %v8072_v10, %v5110_v7  ;;  %v5111_v13 = vshrl.u32 %v8067_v54, %v5110_v7  ;;  %v1797_v16 = vpop.trf.xlu0  ;;  %3576 = vst [vmem:[#allocation8 + $0xa0] sm:$0xff] %v3560_v4 }
 0x636   :  { %v6921_v2 = vshll.u32 %v13421_v39, 30  ;;  %v5114_v20 = vor.u32 %v5113_v6, %v5112_v42  ;;  %vm5127_vm0 = vcmp.lt.s32.totalorder %v13415_v40, 1  ;;  %v5117_v63 = vor.u32 %v5116_v57, %v5115_v3  ;;  %1813 = vst [vmem:[#allocation8 + $0x20] sm:$0xff] %v1797_v16 }
 0x637   :  { %v5076_v52 = vsel %vm4993_vm6, %v5075_v38, %v5074_v61  ;;  %v5120_v53 = vor.u32 %v5119_v55, %v5118_v50  ;;  %v5123_v8 = vor.u32 %v5122_v31, %v5121_v15  ;;  %v5126_v19 = vor.u32 %v5125_v45, %v5124_v25 }
 0x638   :  { %v5079_v33 = vsel %vm13356_vm9, %v13141_v43, %v5076_v52  ;;  %v13437_v37 = vsub.s32 %v6918_v26, %v6921_v2  ;;  %vm5130_vm15 = vcmp.lt.s32.totalorder %v13415_v40, 4  ;;  %v13440_v32 = vand.u32 3, %v5084_v11  ;;  %v3561_v25 = vpop.trf.xlu1 }
 0x639   :  { %7892 = vcosq.f32 %v5079_v33  ;;  %vm5129_vm2 = vcmp.lt.s32.totalorder %v13415_v40, 3  ;;  %v13443_v35 = vadd.f32 %v7967_v0, %v6645_v17  ;;  %vm5128_vm1 = vcmp.lt.s32.totalorder %v13415_v40, 2  ;;  %v1798_v9 = vpop.trf.xlu0  ;;  %3577 = vst [vmem:[#allocation8 + $0xa8] sm:$0xff] %v3561_v25 }
 0x63a   :  { %7894 = vsinq.f32 %v5079_v33  ;;  %v6924_v49 = vsub.s32 0, %v13437_v37  ;;  %v5132_v5 = vsel %vm5130_vm15, %v5120_v53, 2102212464  ;;  %v5131_v27 = vsel %vm5127_vm0, %v5111_v13, %v5114_v20  ;;  %1814 = vst [vmem:[#allocation8 + $0x28] sm:$0xff] %v1798_v9 }
 0x63b   :  { %v5135_v30 = vsel %vm5127_vm0, %v5114_v20, %v5117_v63  ;;  %v5136_v17 = vsel %vm5130_vm15, %v5123_v8, 920167782  ;;  %v5143_v59 = vshll.u32 %v5103_v48, 8  ;;  %v5139_v1 = vsel %vm5127_vm0, %v5117_v63, %v5120_v53 }
 0x63c   :  { %v7381_v23 = vmin.u32 %v6924_v49, %v13437_v37  ;;  %v5137_v41 = vsel %vm5129_vm2, %v5120_v53, %v5136_v17  ;;  %v5140_v26 = vsel %vm5130_vm15, %v5126_v19, 1326507024  ;;  %v5133_v24 = vsel %vm5129_vm2, %v5117_v63, %v5132_v5  ;;  %v3562_v33 = vpop.trf.xlu1 }
 0x63d   :  { %v5138_v29 = vsel %vm5128_vm1, %v5135_v30, %v5137_v41  ;;  %v5141_v28 = vsel %vm5129_vm2, %v5123_v8, %v5140_v26  ;;  %v6965_v11 = vand.u32 2139095040, %v13443_v35  ;;  %vm5083_vm6 = vweird.f32 %v13141_v43  ;;  %v1799_v19 = vpop.trf.xlu0  ;;  %3578 = vst [vmem:[#allocation8 + $0xb0] sm:$0xff] %v3562_v33 }
 0x63e   :  { %vm6860_vm4 = vcmp.lt.s32.totalorder %v13226_v18, 0  ;;  %v6926_v48 = vclz %v7381_v23  ;;  %v13472_v14 = vadd.f32 %v7967_v0, %v13410_v22  ;;  %v5142_v7 = vsel %vm5128_vm1, %v5139_v1, %v5141_v28  ;;  %1815 = vst [vmem:[#allocation8 + $0x30] sm:$0xff] %v1799_v19 }
 0x63f   :  { %v13476_v42 = vmul.u32.u64.low %v5143_v59, %v5138_v29  ;;  %v13477_v61 = vmul.u32.u64.high %v5143_v59, %v5138_v29, %v13476_v42  ;;  %v6966_v3 = vshrl.u32 %v6965_v11, 23  ;;  %v5134_v15 = vsel %vm5128_vm1, %v5131_v27, %v5133_v24 }
 0x640   :  { %v7382_v50 = vadd.s32 4294967294, %v6926_v48  ;;  %v13482_v6 = vmul.u32.u64.low %v5143_v59, %v5142_v7  ;;  %v13483_v57 = vmul.u32.u64.high %v5143_v59, %v5142_v7, %v13482_v6  ;;  %vm5086_vm3 = vcmp.lt.s32.totalorder %v13440_v32, 2  ;;  %v3563_v41 = vpop.trf.xlu1 }
 0x641   :  { %vm5087_vm5 = vcmp.eq.s32.totalorder %v13440_v32, 0  ;;  %v6962_v22 = vand.u32 2147483647, %v13443_v35  ;;  %v7384_v34 = vadd.s32 4294967169, %v6966_v3  ;;  %vm5090_vm7 = vcmp.eq.s32.totalorder %v13440_v32, 2  ;;  %v1800_v1 = vpop.trf.xlu0  ;;  %3579 = vst [vmem:[#allocation8 + $0xb8] sm:$0xff] %v3563_v41 }
 0x642   :  { %v6914_v40 = vadd.s32 %v13375_v21, %v13387_v12  ;;  %vm7383_vm8 = vcmp.lt.s32.totalorder %v7382_v50, 0  ;;  %v6944_v38 = vsub.s32 4, %v13421_v39  ;;  %v5150_v45 = vmul.u32 %v5143_v59, %v5134_v15  ;;  %1816 = vst [vmem:[#allocation8 + $0x38] sm:$0xff] %v1800_v1 }
 0x643   :  { %v7893_v55 = vpop.eup %7892  ;;  %v6929_v31 = vsel %vm7383_vm8, 0, %v7382_v50  ;;  %v5153_v2 = vadd.s32 1, %v13477_v61  ;;  %v6972_v13 = vadd.s32 1, %v7384_v34  ;;  %vm5152_vm9 = vc.u32 %v13483_v57, %v13476_v42 }
 0x644   :  { %v7895_v20 = vpop.eup %7894  ;;  %v5091_v52 = vxor.u32 2147483648, %v7893_v55  ;;  %v6930_v63 = vsub.s32 32, %v6929_v31  ;;  %v6931_v53 = vshll.u32 %v13437_v37, %v6929_v31  ;;  %v6934_v8 = vsub.s32 4294967266, %v6929_v31  ;;  %v3564_v15 = vpop.trf.xlu1 }
 0x645   :  { %v5088_v51 = vxor.u32 2147483648, %v7895_v20  ;;  %v6969_v21 = vand.u32 8388607, %v6962_v22  ;;  %vm6973_vm12 = vcmp.gt.s32.totalorder %v6972_v13, 0  ;;  %v5154_v37 = vsel %vm5152_vm9, %v5153_v2, %v13477_v61  ;;  %v1801_v6 = vpop.trf.xlu0  ;;  %3580 = vst [vmem:[#allocation8 + $0xc0] sm:$0xff] %v3564_v15 }
 0x646   :  { %v5092_v12 = vsel %vm5090_vm7, %v5091_v52, %v7895_v20  ;;  %v6932_v44 = vshrl.u32 %v6914_v40, %v6930_v63  ;;  %v6935_v0 = vadd.s32 127, %v6934_v8  ;;  %v6945_v5 = vsel %vm6860_vm4, %v6944_v38, %v13421_v39  ;;  %1817 = vst [vmem:[#allocation8 + $0x40] sm:$0xff] %v1801_v6 }
 0x647   :  { %v5089_v49 = vsel %vm5087_vm5, %v7893_v55, %v5088_v51  ;;  %v5155_v27 = vadd.s32 %v5154_v37, %v5150_v45  ;;  %v6974_v30 = vsel %vm6973_vm12, %v6972_v13, 0  ;;  %vm13512_vm10 = vcmp.le.f32.partialorder %v6858_v46, 0.7853982 }
 0x648   :  { %v5093_v17 = vsel %vm5086_vm3, %v5089_v49, %v5092_v12  ;;  %v6933_v59 = vor.u32 %v6932_v44, %v6931_v53  ;;  %v6936_v23 = vshll.u32 %v6935_v0, 23  ;;  %v6976_v39 = vand.u32 31, %v6974_v30  ;;  %v3565_v19 = vpop.trf.xlu1 }
 0x649   :  { %v5094_v26 = vsel %vm5083_vm6, nan, %v5093_v17  ;;  %v5156_v16 = vadd.s32 536870912, %v5155_v27  ;;  %v6947_v29 = vsel %vm13512_vm10, 0, %v6945_v5  ;;  %v6970_v28 = vor.u32 8388608, %v6969_v21  ;;  %v1802_v51 = vpop.trf.xlu0  ;;  %3581 = vst [vmem:[#allocation8 + $0xc8] sm:$0xff] %v3565_v19 }
 0x64a   :  { %5316 = vxpose.xlu0.b32.cont [14/16] %v5094_v26, 128  ;;  %v6937_v32 = vor.u32 4788187, %v6936_v23  ;;  %v6940_v24 = vcvt.s32.f32 %v6933_v59  ;;  %v13520_v43 = vshrl.u32 %v6974_v30, 5  ;;  %v6977_v48 = vsub.s32 32, %v6976_v39  ;;  %1818 = vst [vmem:[#allocation8 + $0x48] sm:$0xff] %v1802_v51 }
 0x64b   :  { %v13518_v11 = vshrl.u32 %v5156_v16, 30  ;;  %v5202_v46 = vand.u32 2139095040, %v13472_v14  ;;  %v6979_v61 = vshll.u32 %v8067_v54, %v6976_v39  ;;  %v6982_v3 = vshll.u32 %v8068_v56, %v6976_v39 }
 0x64c   :  { %v6938_v7 = vand.u32 2147483647, %v6937_v32  ;;  %v6985_v50 = vshll.u32 %v8069_v58, %v6976_v39  ;;  %v6980_v9 = vshrl.u32 %v8068_v56, %v6977_v48  ;;  %v6988_v34 = vshll.u32 %v8070_v60, %v6976_v39  ;;  %v3566_v23 = vpop.trf.xlu1 }
 0x64d   :  { %v5158_v25 = vshll.u32 %v13518_v11, 30  ;;  %v6991_v40 = vshll.u32 %v8071_v62, %v6976_v39  ;;  %v6983_v55 = vshrl.u32 %v8069_v58, %v6977_v48  ;;  %v6986_v31 = vshrl.u32 %v8070_v60, %v6977_v48  ;;  %v1803_v41 = vpop.trf.xlu0  ;;  %3582 = vst [vmem:[#allocation8 + $0xd0] sm:$0xff] %v3566_v23 }
 0x64e   :  { %v6941_v38 = vmul.f32 %v6940_v24, %v6938_v7  ;;  %v6989_v45 = vshrl.u32 %v8071_v62, %v6977_v48  ;;  %v6951_v2 = vadd.s32 3, %v6947_v29  ;;  %v6992_v20 = vshrl.u32 %v8072_v10, %v6977_v48  ;;  %1819 = vst [vmem:[#allocation8 + $0x50] sm:$0xff] %v1803_v41 }
 0x64f   :  { %v13533_v13 = vsub.s32 %v5155_v27, %v5158_v25  ;;  %v13536_v52 = vshll.u32 %v6970_v28, 8  ;;  %v6981_v53 = vor.u32 %v6980_v9, %v6979_v61  ;;  %v6984_v8 = vor.u32 %v6983_v55, %v6982_v3 }
 0x650   :  { %v6942_v63 = vxor.u32 2147483648, %v6941_v38  ;;  %v5203_v33 = vshrl.u32 %v5202_v46, 23  ;;  %v6987_v12 = vor.u32 %v6986_v31, %v6985_v50  ;;  %v6990_v44 = vor.u32 %v6989_v45, %v6988_v34  ;;  %v3567_v50 = vpop.trf.xlu1 }
 0x651   :  { %v5161_v21 = vsub.s32 0, %v13533_v13  ;;  %vm6994_vm14 = vcmp.lt.s32.totalorder %v13520_v43, 1  ;;  %v6978_v37 = vshrl.u32 %v8067_v54, %v6977_v48  ;;  %v6993_v49 = vor.u32 %v6992_v20, %v6991_v40  ;;  %v1804_v15 = vpop.trf.xlu0  ;;  %3583 = vst [vmem:[#allocation8 + $0xd8] sm:$0xff] %v3567_v50 }
 0x652   :  { %v6943_v0 = vsel %vm6860_vm4, %v6942_v63, %v6941_v38  ;;  %vm6997_vm11 = vcmp.lt.s32.totalorder %v13520_v43, 4  ;;  %vm6996_vm13 = vcmp.lt.s32.totalorder %v13520_v43, 3  ;;  %vm6995_vm0 = vcmp.lt.s32.totalorder %v13520_v43, 2  ;;  %1820 = vst [vmem:[#allocation8 + $0x58] sm:$0xff] %v1804_v15 }
 0x653   :  { %v6946_v5 = vsel %vm13512_vm10, %v13226_v18, %v6943_v0  ;;  %v7317_v27 = vmin.u32 %v5161_v21, %v13533_v13  ;;  %v6999_v30 = vsel %vm6997_vm11, %v6987_v12, 2102212464  ;;  %v7002_v17 = vsel %vm6994_vm14, %v6981_v53, %v6984_v8 }
 0x654   :  { %7896 = vcosq.f32 %v6946_v5  ;;  %v7003_v59 = vsel %vm6997_vm11, %v6990_v44, 920167782  ;;  %v13556_v1 = vand.u32 3, %v6951_v2  ;;  %v6998_v4 = vsel %vm6994_vm14, %v6978_v37, %v6981_v53  ;;  %v3568_v20 = vpop.trf.xlu1 }
 0x655   :  { %7898 = vsinq.f32 %v6946_v5  ;;  %v5163_v26 = vclz %v7317_v27  ;;  %v7000_v16 = vsel %vm6996_vm13, %v6984_v8, %v6999_v30  ;;  %v7004_v39 = vsel %vm6996_vm13, %v6987_v12, %v7003_v59  ;;  %v1805_v63 = vpop.trf.xlu0  ;;  %3584 = vst [vmem:[#allocation8 + $0xe0] sm:$0xff] %v3568_v20 }
 0x656   :  { %v7006_v32 = vsel %vm6994_vm14, %v6984_v8, %v6987_v12  ;;  %vm5097_vm15 = vcmp.lt.s32.totalorder %v13312_v47, 0  ;;  %v7005_v29 = vsel %vm6995_vm0, %v7002_v17, %v7004_v39  ;;  %v7007_v28 = vsel %vm6997_vm11, %v6993_v49, 1326507024  ;;  %1821 = vst [vmem:[#allocation8 + $0x60] sm:$0xff] %v1805_v63 }
 0x657   :  { %v7318_v24 = vadd.s32 4294967294, %v5163_v26  ;;  %v5199_v48 = vand.u32 2147483647, %v13472_v14  ;;  %v7008_v46 = vsel %vm6996_vm13, %v6990_v44, %v7007_v28  ;;  %v7320_v3 = vadd.s32 4294967169, %v5203_v33 }
 0x658   :  { %v13575_v7 = vmul.u32.u64.low %v13536_v52, %v7005_v29  ;;  %v13576_v61 = vmul.u32.u64.high %v13536_v52, %v7005_v29, %v13575_v7  ;;  %vm6950_vm2 = vweird.f32 %v13226_v18  ;;  %v5151_v6 = vadd.s32 %v13476_v42, %v13483_v57  ;;  %v3569_v30 = vpop.trf.xlu1 }
 0x659   :  { %vm7319_vm1 = vcmp.lt.s32.totalorder %v7318_v24, 0  ;;  %v7001_v25 = vsel %vm6995_vm0, %v6998_v4, %v7000_v16  ;;  %v7009_v9 = vsel %vm6995_vm0, %v7006_v32, %v7008_v46  ;;  %v5209_v55 = vadd.s32 1, %v7320_v3  ;;  %v1806_v17 = vpop.trf.xlu0  ;;  %3585 = vst [vmem:[#allocation8 + $0xe8] sm:$0xff] %v3569_v30 }
 0x65a   :  { %v5166_v34 = vsel %vm7319_vm1, 0, %v7318_v24  ;;  %v13587_v40 = vmul.u32.u64.low %v13536_v52, %v7009_v9  ;;  %v13588_v38 = vmul.u32.u64.high %v13536_v52, %v7009_v9, %v13587_v40  ;;  %vm6953_vm6 = vcmp.lt.s32.totalorder %v13556_v1, 2  ;;  %1822 = vst [vmem:[#allocation8 + $0x68] sm:$0xff] %v1806_v17 }
 0x65b   :  { %v5167_v31 = vsub.s32 32, %v5166_v34  ;;  %v5168_v42 = vshll.u32 %v13533_v13, %v5166_v34  ;;  %v5171_v57 = vsub.s32 4294967266, %v5166_v34  ;;  %v5181_v45 = vsub.s32 4, %v13518_v11 }
 0x65c   :  { %v7017_v2 = vmul.u32 %v13536_v52, %v7001_v25  ;;  %v7020_v43 = vadd.s32 1, %v13576_v61  ;;  %vm5210_vm4 = vcmp.gt.s32.totalorder %v5209_v55, 0  ;;  %vm13597_vm3 = vcmp.le.f32.partialorder %v5095_v36, 0.7853982  ;;  %v3570_v15 = vpop.trf.xlu1 }
 0x65d   :  { %v5169_v8 = vshrl.u32 %v5151_v6, %v5167_v31  ;;  %v5172_v33 = vadd.s32 127, %v5171_v57  ;;  %v5206_v13 = vand.u32 8388607, %v5199_v48  ;;  %v5211_v19 = vsel %vm5210_vm4, %v5209_v55, 0  ;;  %v1807_v6 = vpop.trf.xlu0  ;;  %3586 = vst [vmem:[#allocation8 + $0xf0] sm:$0xff] %v3570_v15 }
 0x65e   :  { %v7897_v52 = vpop.eup %7896  ;;  %vm6954_vm5 = vcmp.eq.s32.totalorder %v13556_v1, 0  ;;  %vm6957_vm7 = vcmp.eq.s32.totalorder %v13556_v1, 2  ;;  %vm7019_vm8 = vc.u32 %v13588_v38, %v13575_v7  ;;  %v5213_v36 = vand.u32 31, %v5211_v19  ;;  %1823 = vst [vmem:[#allocation8 + $0x70] sm:$0xff] %v1807_v6 }
 0x65f   :  { %v7899_v51 = vpop.eup %7898  ;;  %v6958_v21 = vxor.u32 2147483648, %v7897_v52  ;;  %v5170_v12 = vor.u32 %v5169_v8, %v5168_v42  ;;  %v5173_v44 = vshll.u32 %v5172_v33, 23  ;;  %v7021_v0 = vsel %vm7019_vm8, %v7020_v43, %v13576_v61 }
 0x660   :  { %v6955_v37 = vxor.u32 2147483648, %v7899_v51  ;;  %v13611_v49 = vsel %vm5097_vm15, %v5181_v45, %v13518_v11  ;;  %v7022_v5 = vadd.s32 %v7021_v0, %v7017_v2  ;;  %v5214_v27 = vsub.s32 32, %v5213_v36  ;;  %v3571_v20 = vpop.trf.xlu1 }
 0x661   :  { %v6959_v59 = vsel %vm6957_vm7, %v6958_v21, %v7899_v51  ;;  %v5174_v23 = vor.u32 4788187, %v5173_v44  ;;  %v5177_v41 = vcvt.s32.f32 %v5170_v12  ;;  %v5207_v26 = vor.u32 8388608, %v5206_v13  ;;  %v1808_v63 = vpop.trf.xlu0  ;;  %3587 = vst [vmem:[#allocation8 + $0xf8] sm:$0xff] %v3571_v20 }
 0x662   :  { %v6956_v4 = vsel %vm6954_vm5, %v7897_v52, %v6955_v37  ;;  %v7023_v16 = vadd.s32 536870912, %v7022_v5  ;;  %v5216_v39 = vshll.u32 %v8067_v54, %v5213_v36  ;;  %v5219_v32 = vshll.u32 %v8068_v56, %v5213_v36  ;;  %1824 = vst [vmem:[#allocation8 + $0x78] sm:$0xff] %v1808_v63 }
 0x663   :  { %v6960_v11 = vsel %vm6953_vm6, %v6956_v4, %v6959_v59  ;;  %v5175_v24 = vand.u32 2147483647, %v5174_v23  ;;  %v5217_v29 = vshrl.u32 %v8068_v56, %v5214_v27  ;;  %v5220_v28 = vshrl.u32 %v8069_v58, %v5214_v27 }
 0x664   :  { %v6961_v46 = vsel %vm6950_vm2, nan, %v6960_v11  ;;  %v13623_v61 = vshrl.u32 %v7023_v16, 30  ;;  %v5222_v3 = vshll.u32 %v8069_v58, %v5213_v36  ;;  %v5223_v50 = vshrl.u32 %v8070_v60, %v5214_v27 }
 0x665   :  { %7080 = vxpose.xlu1.b32.cont [15/16] %v6961_v46, 128  ;;  %v5178_v25 = vmul.f32 %v5177_v41, %v5175_v24  ;;  %v5212_v1 = vshrl.u32 %v5211_v19, 5  ;;  %v5225_v9 = vshll.u32 %v8070_v60, %v5213_v36  ;;  %v5226_v56 = vshrl.u32 %v8071_v62, %v5214_v27 }
 0x666   :  { %v5184_v18 = vsel %vm13597_vm3, 0, %v13611_v49  ;;  %v7025_v34 = vshll.u32 %v13623_v61, 30  ;;  %v5228_v58 = vshll.u32 %v8071_v62, %v5213_v36  ;;  %v13634_v40 = vshll.u32 %v5207_v26, 8 }
 0x667   :  { %v5179_v55 = vxor.u32 2147483648, %v5178_v25  ;;  %v5215_v31 = vshrl.u32 %v8067_v54, %v5214_v27  ;;  %v5227_v42 = vor.u32 %v5226_v56, %v5225_v9  ;;  %v5229_v60 = vshrl.u32 %v8072_v10, %v5214_v27 }
 0x668   :  { %v7026_v57 = vsub.s32 %v7022_v5, %v7025_v34  ;;  %v5218_v45 = vor.u32 %v5217_v29, %v5216_v39  ;;  %v5221_v2 = vor.u32 %v5220_v28, %v5219_v32  ;;  %v5224_v43 = vor.u32 %v5223_v50, %v5222_v3 }
 0x669   :  { %v5180_v8 = vsel %vm5097_vm15, %v5179_v55, %v5178_v25  ;;  %v5230_v33 = vor.u32 %v5229_v60, %v5228_v58  ;;  %vm5231_vm9 = vcmp.lt.s32.totalorder %v5212_v1, 1  ;;  %vm5234_vm12 = vcmp.lt.s32.totalorder %v5212_v1, 4 }
 0x66a   :  { %v5183_v54 = vsel %vm13597_vm3, %v13312_v47, %v5180_v8  ;;  %v7028_v62 = vsub.s32 0, %v7026_v57  ;;  %vm5232_vm10 = vcmp.lt.s32.totalorder %v5212_v1, 2  ;;  %vm5233_vm14 = vcmp.lt.s32.totalorder %v5212_v1, 3 }
 0x66b   :  { %7900 = vcosq.f32 %v5183_v54  ;;  %v5235_v10 = vsel %vm5231_vm9, %v5215_v31, %v5218_v45  ;;  %v5236_v13 = vsel %vm5234_vm12, %v5224_v43, 2102212464  ;;  %v5240_v19 = vsel %vm5234_vm12, %v5227_v42, 920167782 }
 0x66c   :  { %7902 = vsinq.f32 %v5183_v54  ;;  %v7385_v52 = vmin.u32 %v7028_v62, %v7026_v57  ;;  %v5237_v36 = vsel %vm5233_vm14, %v5221_v2, %v5236_v13  ;;  %v5239_v51 = vsel %vm5231_vm9, %v5218_v45, %v5221_v2 }
 0x66d   :  { %v5188_v21 = vadd.s32 3, %v5184_v18  ;;  %v5241_v53 = vsel %vm5233_vm14, %v5224_v43, %v5240_v19  ;;  %v5243_v12 = vsel %vm5231_vm9, %v5221_v2, %v5224_v43  ;;  %v5244_v44 = vsel %vm5234_vm12, %v5230_v33, 1326507024 }
 0x66e   :  { %v7030_v0 = vclz %v7385_v52  ;;  %v5238_v37 = vsel %vm5232_vm10, %v5235_v10, %v5237_v36  ;;  %v5242_v49 = vsel %vm5232_vm10, %v5239_v51, %v5241_v53  ;;  %v5245_v5 = vsel %vm5233_vm14, %v5227_v42, %v5244_v44 }
 0x66f   :  { %v5246_v30 = vsel %vm5232_vm10, %v5243_v12, %v5245_v5  ;;  %v13656_v17 = vmul.u32.u64.low %v13634_v40, %v5242_v49  ;;  %v13657_v59 = vmul.u32.u64.high %v13634_v40, %v5242_v49, %v13656_v17  ;;  %v5189_v23 = vand.u32 3, %v5188_v21 }
 0x670   :  { %v7386_v27 = vadd.s32 4294967294, %v7030_v0  ;;  %v13660_v41 = vmul.u32.u64.low %v13634_v40, %v5246_v30  ;;  %v13661_v26 = vmul.u32.u64.high %v13634_v40, %v5246_v30, %v13660_v41  ;;  %v7018_v4 = vadd.s32 %v13575_v7, %v13588_v38 }
 0x671   :  { %v5254_v39 = vmul.u32 %v13634_v40, %v5238_v37  ;;  %v5257_v29 = vadd.s32 1, %v13657_v59  ;;  %vm5191_vm13 = vcmp.eq.s32.totalorder %v5189_v23, 0  ;;  %vm5194_vm0 = vcmp.eq.s32.totalorder %v5189_v23, 2 }
 0x672   :  { %vm7387_vm11 = vcmp.lt.s32.totalorder %v7386_v27, 0  ;;  %vm5256_vm15 = vc.u32 %v13661_v26, %v13656_v17  ;;  %vm5190_vm2 = vcmp.lt.s32.totalorder %v5189_v23, 2  ;;  %vm5187_vm1 = vweird.f32 %v13312_v47 }
 0x673   :  { %v7033_v16 = vsel %vm7387_vm11, 0, %v7386_v27  ;;  %v5258_v7 = vsel %vm5256_vm15, %v5257_v29, %v13657_v59  ;;  %v7048_v60 = vsub.s32 4, %v13623_v61  ;;  %vm6964_vm6 = vcmp.lt.s32.totalorder %v13443_v35, 0 }
 0x674   :  { %v7034_v32 = vsub.s32 32, %v7033_v16  ;;  %v7035_v11 = vshll.u32 %v7026_v57, %v7033_v16  ;;  %v7038_v24 = vsub.s32 4294967266, %v7033_v16  ;;  %v5259_v6 = vadd.s32 %v5258_v7, %v5254_v39 }
 0x675   :  { %v7901_v28 = vpop.eup %7900  ;;  %vm6963_vm4 = vcmp.le.f32.partialorder %v6962_v22, 0.7853982  ;;  %v7049_v43 = vsel %vm6964_vm6, %v7048_v60, %v13623_v61  ;;  %v5255_v19 = vadd.s32 %v13656_v17, %v13661_v26  ;;  %vm7054_vm9 = vweird.f32 %v13443_v35 }
 0x676   :  { %v7903_v46 = vpop.eup %7902  ;;  %v5195_v3 = vxor.u32 2147483648, %v7901_v28  ;;  %v7036_v50 = vshrl.u32 %v7018_v4, %v7034_v32  ;;  %v7039_v15 = vadd.s32 127, %v7038_v24  ;;  %v5260_v18 = vadd.s32 536870912, %v5259_v6 }
 0x677   :  { %v5192_v38 = vxor.u32 2147483648, %v7903_v46  ;;  %v7051_v33 = vsel %vm6963_vm4, 0, %v7049_v43  ;;  %vm5201_vm12 = vcmp.lt.s32.totalorder %v13472_v14, 0  ;;  %vm5200_vm10 = vcmp.le.f32.partialorder %v5199_v48, 0.7853982 }
 0x678   :  { %v5196_v25 = vsel %vm5194_vm0, %v5195_v3, %v7903_v46  ;;  %v7037_v1 = vor.u32 %v7036_v50, %v7035_v11  ;;  %v7040_v9 = vshll.u32 %v7039_v15, 23  ;;  %v5261_v31 = vshrl.u32 %v5260_v18, 30 }
 0x679   :  { %v5193_v56 = vsel %vm5191_vm13, %v7901_v28, %v5192_v38  ;;  %v7055_v10 = vadd.s32 3, %v7051_v33  ;;  %vm5291_vm0 = vweird.f32 %v13472_v14 }
 0x67a   :  { %v5197_v34 = vsel %vm5190_vm2, %v5193_v56, %v5196_v25  ;;  %v7041_v58 = vor.u32 4788187, %v7040_v9  ;;  %v7044_v40 = vcvt.s32.f32 %v7037_v1  ;;  %v5262_v57 = vshll.u32 %v5261_v31, 30 }
 0x67b   :  { %v5198_v55 = vsel %vm5187_vm1, nan, %v5197_v34  ;;  %v7056_v52 = vand.u32 3, %v7055_v10  ;;  %v5285_v26 = vsub.s32 4, %v5261_v31 }
 0x67c   :  { %5317 = vxpose.xlu0.b32.cont [15/16] %v5198_v55, 128  ;;  %v7042_v42 = vand.u32 2147483647, %v7041_v58  ;;  %v5263_v2 = vsub.s32 %v5259_v6, %v5262_v57 }
 0x67d   :  { %vm7061_vm5 = vcmp.eq.s32.totalorder %v7056_v52, 2  ;;  %vm7058_vm7 = vcmp.eq.s32.totalorder %v7056_v52, 0  ;;  %vm7057_vm8 = vcmp.lt.s32.totalorder %v7056_v52, 2  ;;  %v5286_v32 = vsel %vm5201_vm12, %v5285_v26, %v5261_v31 }
 0x67e   :  { %v7045_v45 = vmul.f32 %v7044_v40, %v7042_v42  ;;  %v5265_v20 = vsub.s32 0, %v5263_v2  ;;  %v5288_v24 = vsel %vm5200_vm10, 0, %v5286_v32 }
 0x67f   :  { %v5292_v29 = vadd.s32 3, %v5288_v24 }
 0x680   :  { %v7046_v47 = vxor.u32 2147483648, %v7045_v45  ;;  %v7321_v54 = vmin.u32 %v5265_v20, %v5263_v2 }
 0x681   :  { %v5293_v28 = vand.u32 3, %v5292_v29 }
 0x682   :  { %v7047_v63 = vsel %vm6964_vm6, %v7046_v47, %v7045_v45  ;;  %v5267_v62 = vclz %v7321_v54 }
 0x683   :  { %v7050_v8 = vsel %vm6963_vm4, %v13443_v35, %v7047_v63  ;;  %vm5298_vm14 = vcmp.eq.s32.totalorder %v5293_v28, 2  ;;  %vm5295_vm11 = vcmp.eq.s32.totalorder %v5293_v28, 0  ;;  %vm5294_vm13 = vcmp.lt.s32.totalorder %v5293_v28, 2 }
 0x684   :  { %7904 = vcosq.f32 %v7050_v8  ;;  %v7322_v13 = vadd.s32 4294967294, %v5267_v62 }
 0x685   :  { %7906 = vsinq.f32 %v7050_v8 }
 0x686   :  { %vm7323_vm3 = vcmp.lt.s32.totalorder %v7322_v13, 0 }
 0x687   :  { %v5270_v36 = vsel %vm7323_vm3, 0, %v7322_v13 }
 0x688   :  { %v5271_v22 = vsub.s32 32, %v5270_v36  ;;  %v5272_v51 = vshll.u32 %v5263_v2, %v5270_v36  ;;  %v5275_v21 = vsub.s32 4294967266, %v5270_v36 }
 0x68a   :  { %v5273_v61 = vshrl.u32 %v5255_v19, %v5271_v22  ;;  %v5276_v53 = vadd.s32 127, %v5275_v21 }
 0x68c   :  { %v5274_v37 = vor.u32 %v5273_v61, %v5272_v51  ;;  %v5277_v49 = vshll.u32 %v5276_v53, 23 }
 0x68e   :  { %v7905_v12 = vpop.eup %7904  ;;  %v5278_v30 = vor.u32 4788187, %v5277_v49  ;;  %v5281_v17 = vcvt.s32.f32 %v5274_v37 }
 0x68f   :  { %v7907_v44 = vpop.eup %7906  ;;  %v7062_v0 = vxor.u32 2147483648, %v7905_v12 }
 0x690   :  { %v7059_v5 = vxor.u32 2147483648, %v7907_v44  ;;  %v5279_v41 = vand.u32 2147483647, %v5278_v30 }
 0x691   :  { %v7063_v27 = vsel %vm7061_vm5, %v7062_v0, %v7907_v44 }
 0x692   :  { %v7060_v59 = vsel %vm7058_vm7, %v7905_v12, %v7059_v5  ;;  %v5282_v16 = vmul.f32 %v5281_v17, %v5279_v41 }
 0x693   :  { %v7064_v23 = vsel %vm7057_vm8, %v7060_v59, %v7063_v27 }
 0x694   :  { %v7065_v4 = vsel %vm7054_vm9, nan, %v7064_v23  ;;  %v5283_v39 = vxor.u32 2147483648, %v5282_v16 }
 0x695   :  { %7081 = vxpose.xlu1.b32.end [16/16] %v7065_v4, 128 }
 0x696   :  { %v5284_v11 = vsel %vm5201_vm12, %v5283_v39, %v5282_v16 }
 0x697   :  { %v5287_v35 = vsel %vm5200_vm10, %v13472_v14, %v5284_v11 }
 0x698   :  { %7908 = vcosq.f32 %v5287_v35 }
 0x699   :  { %7910 = vsinq.f32 %v5287_v35 }
 0x6a2   :  { %v7909_v46 = vpop.eup %7908 }
 0x6a3   :  { %v7911_v3 = vpop.eup %7910  ;;  %v5299_v50 = vxor.u32 2147483648, %v7909_v46 }
 0x6a4   :  { %v5296_v15 = vxor.u32 2147483648, %v7911_v3 }
 0x6a5   :  { %v5300_v48 = vsel %vm5298_vm14, %v5299_v50, %v7911_v3 }
 0x6a6   :  { %v5297_v7 = vsel %vm5295_vm11, %v7909_v46, %v5296_v15 }
 0x6a7   :  { %v5301_v38 = vsel %vm5294_vm13, %v5297_v7, %v5300_v48 }
 0x6a8   :  { %v5302_v6 = vsel %vm5291_vm0, nan, %v5301_v38 }
 0x6a9   :  { %5318 = vxpose.xlu0.b32.end [16/16] %v5302_v6, 128 }
 0x6d9   :  { %v7082_v25 = vpop.trf.xlu1 }
 0x6da   :  { %7098 = vst [vmem:[#allocation8 + $0x180] sm:$0xff] %v7082_v25 }
 0x6dd   :  { %v7083_v1 = vpop.trf.xlu1 }
 0x6de   :  { %7099 = vst [vmem:[#allocation8 + $0x188] sm:$0xff] %v7083_v1 }
 0x6e1   :  { %v7084_v9 = vpop.trf.xlu1 }
 0x6e2   :  { %7100 = vst [vmem:[#allocation8 + $0x190] sm:$0xff] %v7084_v9 }
 0x6e5   :  { %v7085_v56 = vpop.trf.xlu1 }
 0x6e6   :  { %7101 = vst [vmem:[#allocation8 + $0x198] sm:$0xff] %v7085_v56 }
 0x6e9   :  { %v7086_v18 = vpop.trf.xlu1 }
 0x6ea   :  { %7102 = vst [vmem:[#allocation8 + $0x1a0] sm:$0xff] %v7086_v18 }
 0x6ed   :  { %v7087_v34 = vpop.trf.xlu1  ;;  %v5319_v58 = vpop.trf.xlu0 }
 0x6ee   :  { %7103 = vst [vmem:[#allocation8 + $0x1a8] sm:$0xff] %v7087_v34  ;;  %5335 = vst [vmem:[#allocation8 + $0x100] sm:$0xff] %v5319_v58 }
 0x6f1   :  { %v7088_v14 = vpop.trf.xlu1  ;;  %v5320_v40 = vpop.trf.xlu0 }
 0x6f2   :  { %7104 = vst [vmem:[#allocation8 + $0x1b0] sm:$0xff] %v7088_v14  ;;  %5336 = vst [vmem:[#allocation8 + $0x108] sm:$0xff] %v5320_v40 }
 0x6f5   :  { %v7089_v55 = vpop.trf.xlu1  ;;  %v5321_v31 = vpop.trf.xlu0 }
 0x6f6   :  { %7105 = vst [vmem:[#allocation8 + $0x1b8] sm:$0xff] %v7089_v55  ;;  %5337 = vst [vmem:[#allocation8 + $0x110] sm:$0xff] %v5321_v31 }
 0x6f9   :  { %v7090_v42 = vpop.trf.xlu1  ;;  %v5322_v60 = vpop.trf.xlu0 }
 0x6fa   :  { %7106 = vst [vmem:[#allocation8 + $0x1c0] sm:$0xff] %v7090_v42  ;;  %5338 = vst [vmem:[#allocation8 + $0x118] sm:$0xff] %v5322_v60 }
 0x6fd   :  { %v7091_v57 = vpop.trf.xlu1  ;;  %v5323_v45 = vpop.trf.xlu0 }
 0x6fe   :  { %7107 = vst [vmem:[#allocation8 + $0x1c8] sm:$0xff] %v7091_v57  ;;  %5339 = vst [vmem:[#allocation8 + $0x120] sm:$0xff] %v5323_v45 }
 0x701   :  { %v7092_v2 = vpop.trf.xlu1  ;;  %v5324_v47 = vpop.trf.xlu0 }
 0x702   :  { %7108 = vst [vmem:[#allocation8 + $0x1d0] sm:$0xff] %v7092_v2  ;;  %5340 = vst [vmem:[#allocation8 + $0x128] sm:$0xff] %v5324_v47 }
 0x705   :  { %v7093_v43 = vpop.trf.xlu1  ;;  %v5325_v20 = vpop.trf.xlu0 }
 0x706   :  { %7109 = vst [vmem:[#allocation8 + $0x1d8] sm:$0xff] %v7093_v43  ;;  %5341 = vst [vmem:[#allocation8 + $0x130] sm:$0xff] %v5325_v20 }
 0x709   :  { %v7094_v63 = vpop.trf.xlu1  ;;  %v5326_v8 = vpop.trf.xlu0 }
 0x70a   :  { %7110 = vst [vmem:[#allocation8 + $0x1e0] sm:$0xff] %v7094_v63  ;;  %5342 = vst [vmem:[#allocation8 + $0x138] sm:$0xff] %v5326_v8 }
 0x70d   :  { %v7095_v33 = vpop.trf.xlu1  ;;  %v5327_v54 = vpop.trf.xlu0 }
 0x70e   :  { %7111 = vst [vmem:[#allocation8 + $0x1e8] sm:$0xff] %v7095_v33  ;;  %5343 = vst [vmem:[#allocation8 + $0x140] sm:$0xff] %v5327_v54 }
 0x711   :  { %v7096_v62 = vpop.trf.xlu1  ;;  %v5328_v10 = vpop.trf.xlu0 }
 0x712   :  { %7112 = vst [vmem:[#allocation8 + $0x1f0] sm:$0xff] %v7096_v62  ;;  %5344 = vst [vmem:[#allocation8 + $0x148] sm:$0xff] %v5328_v10 }
 0x715   :  { %v7097_v13 = vpop.trf.xlu1  ;;  %v5329_v19 = vpop.trf.xlu0 }
 0x716   :  { %7113 = vst [vmem:[#allocation8 + $0x1f8] sm:$0xff] %v7097_v13  ;;  %5345 = vst [vmem:[#allocation8 + $0x150] sm:$0xff] %v5329_v19 }
 0x719   :  { %v5330_v52 = vpop.trf.xlu0 }
 0x71a   :  { %5346 = vst [vmem:[#allocation8 + $0x158] sm:$0xff] %v5330_v52 }
 0x71d   :  { %v5331_v36 = vpop.trf.xlu0 }
 0x71e   :  { %5347 = vst [vmem:[#allocation8 + $0x160] sm:$0xff] %v5331_v36 }
 0x721   :  { %v5332_v22 = vpop.trf.xlu0 }
 0x722   :  { %5348 = vst [vmem:[#allocation8 + $0x168] sm:$0xff] %v5332_v22 }
 0x725   :  { %v5333_v51 = vpop.trf.xlu0 }
 0x726   :  { %5349 = vst [vmem:[#allocation8 + $0x170] sm:$0xff] %v5333_v51 }
 0x729   :  { %v5334_v21 = vpop.trf.xlu0 }
 0x72a   :  { %5350 = vst [vmem:[#allocation8 + $0x178] sm:$0xff] %v5334_v21 }
 0x72b   :  { %8045 = shalt.err (!%p8042_p0)
}
 0x72c   :  { %s8046_s27 = scalar_lea.hbm %s13701_s3, 8192 }
 0x72d   :  { %p8047_p1 = scmp.ne.s32.totalorder %s13701_s3, %s8046_s27  ;;  %p8050_p2 = scmp.lt.u32.totalorder %s8046_s27, %s13701_s3 }
 0x72f   :  { %p8052_p3 = pnand %p8050_p2, %p8047_p1 }
 0x731   :  { %8055 = shalt.err (!%p8052_p3)
}
 0x732   :  { %7125 = dma.vmem_to_hbm [thread:$0]  %s7120_s21, 8192, %s13701_s3, [#allocation4], %s8063_s22, %s8063_s22, %s8064_s23  }
 0x733   :  { %8060 = dma.done.wait [#allocation4], 8192  }
 0x734   :  { %8061 = vsyncadd [#allocation4], 4294959104 }
 0x735   :  { %7129 = vsyncpa [#allocation3], 1 }
 0x736   :  { %7130 = vsyncpa [#allocation6], 1 }
 0x737   :  { %7131 = vsyncpa [#allocation4], 1 }

</bundles_post_ra>
